<compile_context>
chip_gen: v6e
topology: v6e:2x2x1
jax: 0.10.0
libtpu: 0.0.40
codegen_flags: <defaults>
</compile_context>

<pallas_src>
import functools

import jax
import jax.numpy as jnp
from jax import lax
from jax.experimental import pallas as pl
from jax.experimental.pallas import tpu as pltpu

K = 7
PAD = K // 2


def cbam_kernel(x_ref, w1_ref, w2_ref, wconv_ref, mask_ref, y_ref, *, H, W):
    """Per grid step:
      x_ref    : (Bblk, C, H*W)  VMEM  activations, channels on sublanes, HW on lanes
      w1_ref   : (Cr, C)         VMEM  first 1x1 conv weight (PyTorch layout)
      w2_ref   : (C, Cr)         VMEM  second 1x1 conv weight (PyTorch layout)
      wconv_ref: (2*K*K,)        SMEM  flattened 7x7 spatial-attention conv weight
      mask_ref : (K, H*W)        VMEM  per-dx column-validity masks (0/1 floats)
      y_ref    : (Bblk, C, H*W)  VMEM  output
    """
    Bblk, C, HW = x_ref.shape
    OFF = PAD * W + PAD                  # flat offset of (0,0) in the padded map
    L = 2 * PAD + (H + 2 * PAD) * W      # padded flat length

    x = x_ref[...]                       # (Bblk, C, HW) float32

    # ---- channel attention: AdaptiveAvg/MaxPool(1) + shared MLP + sigmoid ----
    # Per-channel reductions are lane reductions (HW on lanes).  Stack all pooled
    # column-vectors so the MLP is one small matmul over the whole batch block.
    cols = [jnp.mean(x[b], axis=-1, keepdims=True) for b in range(Bblk)]   # (C,1) each
    cols += [jnp.max(x[b], axis=-1, keepdims=True) for b in range(Bblk)]
    pooled = jnp.concatenate(cols, axis=1)                                 # (C, 2*Bblk)

    h = jnp.maximum(
        jnp.dot(w1_ref[...], pooled, preferred_element_type=jnp.float32), 0.0)
    fc = jnp.dot(w2_ref[...], h, preferred_element_type=jnp.float32)       # (C, 2*Bblk)
    ca = jax.nn.sigmoid(fc[:, :Bblk] + fc[:, Bblk:])                       # (C, Bblk)

    # ---- hoisted spatial-conv weights (98 scalar SMEM reads, once) ----
    wv = [wconv_ref[i] for i in range(2 * K * K)]
    wa = wv[:K * K]          # taps for the channel-mean map
    wm = wv[K * K:]          # taps for the channel-max map
    masks = mask_ref[...]    # (K, HW) 0/1 floats

    zpad = jnp.zeros((1, OFF), jnp.float32)          # L - OFF - HW == OFF

    for b in range(Bblk):
        # channel-attended activations (lane-dense elementwise multiply)
        x1 = x[b] * ca[:, b:b + 1]                                   # (C, HW)

        # ---- spatial attention: channel mean/max -> 7x7 conv -> sigmoid ----
        avg_c = jnp.mean(x1, axis=0, keepdims=True)                  # (1, HW)
        max_c = jnp.max(x1, axis=0, keepdims=True)                   # (1, HW)

        # Flat zero-padded maps: padded[OFF + y*W + x] = map[y, x].
        pad_a = jnp.concatenate([zpad, avg_c, zpad], axis=1)         # (1, L)
        pad_m = jnp.concatenate([zpad, max_c, zpad], axis=1)         # (1, L)

        # 49-tap cross-correlation, grouped by column offset dx so each group of 7
        # row-taps shares a single column-validity mask (handles the fact that a
        # flat lane shift wraps across image rows).
        acc = jnp.zeros((1, HW), jnp.float32)
        for dx in range(K):
            partial = jnp.zeros((1, HW), jnp.float32)
            for dy in range(K):
                s = dy * W + dx                                       # window start
                idx = dy * K + dx
                partial = partial + wa[idx] * pad_a[:, s:s + HW] \
                                  + wm[idx] * pad_m[:, s:s + HW]
            if dx != PAD:                                             # dx==PAD: all valid
                partial = partial * masks[dx:dx + 1, :]
            acc = acc + partial

        sa = jax.nn.sigmoid(acc)                                      # (1, HW)
        y_ref[b] = (x1 * sa).astype(y_ref.dtype)                      # lane-dense store


def cbam_pallas(x_nchw, w1, w2, wconv, *, block_b=None):
    """x_nchw: (B, C, H, W) float32.  w1: (Cr, C), w2: (C, Cr), wconv: (2, K, K)
    (all in native PyTorch weight layouts).  Returns (B, C, H, W)."""
    B, C, H, W = x_nchw.shape
    Cr = w1.shape[0]
    HW = H * W

    if block_b is None:
        # Amortize per-grid-step overhead, but keep >=2 grid steps for v7x's 2 TCs.
        block_b = 2 if (B % 2 == 0 and B >= 4) else 1
    assert B % block_b == 0

    # Free HBM reshape: NCHW is already contiguous as (B, C, H*W).
    x = x_nchw.reshape(B, C, HW).astype(jnp.float32)
    wconv_flat = wconv.reshape(-1).astype(jnp.float32)                 # (2*K*K,)

    # Column-validity masks for each dx tap (static, built once in plain JAX).
    col = jnp.tile(jnp.arange(W, dtype=jnp.int32), H)                  # (HW,)
    masks = jnp.stack(
        [((col + (dx - PAD) >= 0) & (col + (dx - PAD) <= W - 1)) for dx in range(K)],
        axis=0).astype(jnp.float32)                                    # (K, HW)

    kernel = functools.partial(cbam_kernel, H=H, W=W)

    y = pl.pallas_call(
        kernel,
        out_shape=jax.ShapeDtypeStruct((B, C, HW), jnp.float32),
        grid=(B // block_b,),
        in_specs=[
            pl.BlockSpec((block_b, C, HW), lambda b: (b, 0, 0)),
            pl.BlockSpec((Cr, C), lambda b: (0, 0)),
            pl.BlockSpec((C, Cr), lambda b: (0, 0)),
            pl.BlockSpec(memory_space=pltpu.MemorySpace.SMEM),
            pl.BlockSpec((K, HW), lambda b: (0, 0)),
        ],
        out_specs=pl.BlockSpec((block_b, C, HW), lambda b: (b, 0, 0)),
        compiler_params=pltpu.CompilerParams(
            dimension_semantics=("parallel",)),
    )(x, w1.astype(jnp.float32), w2.astype(jnp.float32), wconv_flat, masks)

    return y.reshape(B, C, H, W)


def cbam_ref(x_nchw, w1, w2, wconv):
    """Pure-JAX reference matching the PyTorch forward (NCHW, PyTorch weight layouts)."""
    avg = jnp.mean(x_nchw, axis=(2, 3))
    mx = jnp.max(x_nchw, axis=(2, 3))

    def fc(v):
        return jnp.maximum(v @ w1.T, 0.0) @ w2.T

    ca = jax.nn.sigmoid(fc(avg) + fc(mx))                 # (B, C)
    x1 = x_nchw * ca[:, :, None, None]
    avg_c = jnp.mean(x1, axis=1, keepdims=True)
    max_c = jnp.max(x1, axis=1, keepdims=True)
    maps = jnp.concatenate([avg_c, max_c], axis=1)        # (B, 2, H, W)
    conv = lax.conv_general_dilated(
        maps, wconv[None].astype(maps.dtype), (1, 1),
        [(PAD, PAD), (PAD, PAD)],
        dimension_numbers=("NCHW", "OIHW", "NCHW"))
    sa = jax.nn.sigmoid(conv)
    return sa * x1


if __name__ == "__main__":
    B, C, H, W = 4, 16, 16, 16          # B=4 exercises batch blocking (2 per step)
    reduction = 4                       # CBAM default in this module
    Cr = C // reduction

    key = jax.random.PRNGKey(0)
    k1, k2, k3, k4 = jax.random.split(key, 4)
    x = jax.random.normal(k1, (B, C, H, W), jnp.float32)
    # PyTorch Conv2d(C, Cr, 1, bias=False).weight -> (Cr, C); Conv2d(Cr, C, 1) -> (C, Cr)
    w1 = jax.random.normal(k2, (Cr, C), jnp.float32) * 0.2
    w2 = jax.random.normal(k3, (C, Cr), jnp.float32) * 0.2
    # SpatialAttention Conv2d(2, 1, 7, padding=3, bias=False).weight -> (2, 7, 7)
    wconv = jax.random.normal(k4, (2, K, K), jnp.float32) * 0.1

    y = cbam_pallas(x, w1, w2, wconv)
    jax.block_until_ready(y)

    y_ref = cbam_ref(x, w1, w2, wconv)
    err = float(jnp.max(jnp.abs(y - y_ref)))
    assert jnp.allclose(y, y_ref, atol=1e-4, rtol=1e-4), err

    print("KERNEL_OK")
</pallas_src>

<mosaic_0001>
module attributes {stable_mosaic.version = 11 : i64} {
  func.func @cbam_kernel(%arg0: i32, %arg1: memref<2x16x256xf32, #tpu.memory_space<vmem>>, %arg2: memref<4x16xf32, #tpu.memory_space<vmem>>, %arg3: memref<16x4xf32, #tpu.memory_space<vmem>>, %arg4: memref<98xf32, #tpu.memory_space<smem>>, %arg5: memref<7x256xf32, #tpu.memory_space<vmem>>, %arg6: memref<2x16x256xf32, #tpu.memory_space<vmem>>) attributes {dimension_semantics = [#tpu.dimension_semantics<parallel>], iteration_bounds = array<i64: 2>, scalar_prefetch = 0 : i64, scratch_operands = 0 : i64, tpu.core_type = #tpu.core_type<tc>, window_params = [{transform_indices = @transform_0, window_bounds = array<i64: 2, 16, 256>}, {pipeline_mode = #tpu.pipeline_mode<synchronous>, transform_indices = @transform_1, window_bounds = array<i64: 4, 16>}, {pipeline_mode = #tpu.pipeline_mode<synchronous>, transform_indices = @transform_2, window_bounds = array<i64: 16, 4>}, {transform_indices = @transform_3, window_bounds = array<i64: 98>}, {pipeline_mode = #tpu.pipeline_mode<synchronous>, transform_indices = @transform_4, window_bounds = array<i64: 7, 256>}, {transform_indices = @transform_5, window_bounds = array<i64: 2, 16, 256>}]} {
    %c0 = arith.constant 0 : index
    %c0_0 = arith.constant 0 : index
    %c0_1 = arith.constant 0 : index
    %0 = vector.load %arg1[%c0, %c0_0, %c0_1] : memref<2x16x256xf32, #tpu.memory_space<vmem>>, vector<2x16x256xf32>
    %1 = vector.extract_strided_slice %0 {offsets = [0, 0, 0], sizes = [1, 16, 256], strides = [1, 1, 1]} : vector<2x16x256xf32> to vector<1x16x256xf32>
    %2 = vector.shape_cast %1 : vector<1x16x256xf32> to vector<16x256xf32>
    %cst = arith.constant dense<0.000000e+00> : vector<16xf32>
    %3 = vector.multi_reduction <add>, %2, %cst [1] : vector<16x256xf32> to vector<16xf32>
    %4 = vector.shape_cast %3 : vector<16xf32> to vector<16x1xf32>
    %cst_2 = arith.constant 2.560000e+02 : f32
    %5 = vector.broadcast %cst_2 : f32 to vector<16x1xf32>
    %6 = arith.divf %4, %5 : vector<16x1xf32>
    %7 = vector.extract_strided_slice %0 {offsets = [1, 0, 0], sizes = [1, 16, 256], strides = [1, 1, 1]} : vector<2x16x256xf32> to vector<1x16x256xf32>
    %8 = vector.shape_cast %7 : vector<1x16x256xf32> to vector<16x256xf32>
    %cst_3 = arith.constant dense<0.000000e+00> : vector<16xf32>
    %9 = vector.multi_reduction <add>, %8, %cst_3 [1] : vector<16x256xf32> to vector<16xf32>
    %10 = vector.shape_cast %9 : vector<16xf32> to vector<16x1xf32>
    %cst_4 = arith.constant 2.560000e+02 : f32
    %11 = vector.broadcast %cst_4 : f32 to vector<16x1xf32>
    %12 = arith.divf %10, %11 : vector<16x1xf32>
    %13 = vector.extract_strided_slice %0 {offsets = [0, 0, 0], sizes = [1, 16, 256], strides = [1, 1, 1]} : vector<2x16x256xf32> to vector<1x16x256xf32>
    %14 = vector.shape_cast %13 : vector<1x16x256xf32> to vector<16x256xf32>
    %cst_5 = arith.constant dense<0xFF800000> : vector<16xf32>
    %15 = vector.multi_reduction <maximumf>, %14, %cst_5 [1] : vector<16x256xf32> to vector<16xf32>
    %16 = vector.shape_cast %15 : vector<16xf32> to vector<16x1xf32>
    %17 = vector.extract_strided_slice %0 {offsets = [1, 0, 0], sizes = [1, 16, 256], strides = [1, 1, 1]} : vector<2x16x256xf32> to vector<1x16x256xf32>
    %18 = vector.shape_cast %17 : vector<1x16x256xf32> to vector<16x256xf32>
    %cst_6 = arith.constant dense<0xFF800000> : vector<16xf32>
    %19 = vector.multi_reduction <maximumf>, %18, %cst_6 [1] : vector<16x256xf32> to vector<16xf32>
    %20 = vector.shape_cast %19 : vector<16xf32> to vector<16x1xf32>
    %21 = tpu.concatenate %6, %12, %16, %20 in 1 : vector<16x1xf32>, vector<16x1xf32>, vector<16x1xf32>, vector<16x1xf32> -> vector<16x4xf32>
    %c0_7 = arith.constant 0 : index
    %c0_8 = arith.constant 0 : index
    %22 = vector.load %arg2[%c0_7, %c0_8] : memref<4x16xf32, #tpu.memory_space<vmem>>, vector<4x16xf32>
    %cst_9 = arith.constant dense<0.000000e+00> : vector<4x4xf32>
    %23 = tpu.matmul %22, %21, %cst_9 {dimension_numbers = #tpu.dot_dimension_numbers<[1], [0], [0], [1], [0, 0, 1, 1], [], []>} : vector<4x16xf32>, vector<16x4xf32>, vector<4x4xf32> -> vector<4x4xf32>
    %cst_10 = arith.constant 0.000000e+00 : f32
    %24 = vector.broadcast %cst_10 : f32 to vector<4x4xf32>
    %25 = arith.maximumf %23, %24 : vector<4x4xf32>
    %c0_11 = arith.constant 0 : index
    %c0_12 = arith.constant 0 : index
    %26 = vector.load %arg3[%c0_11, %c0_12] : memref<16x4xf32, #tpu.memory_space<vmem>>, vector<16x4xf32>
    %cst_13 = arith.constant dense<0.000000e+00> : vector<16x4xf32>
    %27 = tpu.matmul %26, %25, %cst_13 {dimension_numbers = #tpu.dot_dimension_numbers<[1], [0], [0], [1], [0, 0, 1, 1], [], []>} : vector<16x4xf32>, vector<4x4xf32>, vector<16x4xf32> -> vector<16x4xf32>
    %28 = vector.extract_strided_slice %27 {offsets = [0, 0], sizes = [16, 2], strides = [1, 1]} : vector<16x4xf32> to vector<16x2xf32>
    %29 = vector.extract_strided_slice %27 {offsets = [0, 2], sizes = [16, 2], strides = [1, 1]} : vector<16x4xf32> to vector<16x2xf32>
    %30 = arith.addf %28, %29 : vector<16x2xf32>
    %31 = arith.negf %30 : vector<16x2xf32>
    %32 = math.exp %31 : vector<16x2xf32>
    %cst_14 = arith.constant 1.000000e+00 : f32
    %33 = vector.broadcast %cst_14 : f32 to vector<16x2xf32>
    %34 = arith.addf %33, %32 : vector<16x2xf32>
    %35 = arith.divf %33, %34 : vector<16x2xf32>
    %c0_15 = arith.constant 0 : index
    %36 = memref.load %arg4[%c0_15] : memref<98xf32, #tpu.memory_space<smem>>
    %c1 = arith.constant 1 : index
    %37 = memref.load %arg4[%c1] : memref<98xf32, #tpu.memory_space<smem>>
    %c2 = arith.constant 2 : index
    %38 = memref.load %arg4[%c2] : memref<98xf32, #tpu.memory_space<smem>>
    %c3 = arith.constant 3 : index
    %39 = memref.load %arg4[%c3] : memref<98xf32, #tpu.memory_space<smem>>
    %c4 = arith.constant 4 : index
    %40 = memref.load %arg4[%c4] : memref<98xf32, #tpu.memory_space<smem>>
    %c5 = arith.constant 5 : index
    %41 = memref.load %arg4[%c5] : memref<98xf32, #tpu.memory_space<smem>>
    %c6 = arith.constant 6 : index
    %42 = memref.load %arg4[%c6] : memref<98xf32, #tpu.memory_space<smem>>
    %c7 = arith.constant 7 : index
    %43 = memref.load %arg4[%c7] : memref<98xf32, #tpu.memory_space<smem>>
    %c8 = arith.constant 8 : index
    %44 = memref.load %arg4[%c8] : memref<98xf32, #tpu.memory_space<smem>>
    %c9 = arith.constant 9 : index
    %45 = memref.load %arg4[%c9] : memref<98xf32, #tpu.memory_space<smem>>
    %c10 = arith.constant 10 : index
    %46 = memref.load %arg4[%c10] : memref<98xf32, #tpu.memory_space<smem>>
    %c11 = arith.constant 11 : index
    %47 = memref.load %arg4[%c11] : memref<98xf32, #tpu.memory_space<smem>>
    %c12 = arith.constant 12 : index
    %48 = memref.load %arg4[%c12] : memref<98xf32, #tpu.memory_space<smem>>
    %c13 = arith.constant 13 : index
    %49 = memref.load %arg4[%c13] : memref<98xf32, #tpu.memory_space<smem>>
    %c14 = arith.constant 14 : index
    %50 = memref.load %arg4[%c14] : memref<98xf32, #tpu.memory_space<smem>>
    %c15 = arith.constant 15 : index
    %51 = memref.load %arg4[%c15] : memref<98xf32, #tpu.memory_space<smem>>
    %c16 = arith.constant 16 : index
    %52 = memref.load %arg4[%c16] : memref<98xf32, #tpu.memory_space<smem>>
    %c17 = arith.constant 17 : index
    %53 = memref.load %arg4[%c17] : memref<98xf32, #tpu.memory_space<smem>>
    %c18 = arith.constant 18 : index
    %54 = memref.load %arg4[%c18] : memref<98xf32, #tpu.memory_space<smem>>
    %c19 = arith.constant 19 : index
    %55 = memref.load %arg4[%c19] : memref<98xf32, #tpu.memory_space<smem>>
    %c20 = arith.constant 20 : index
    %56 = memref.load %arg4[%c20] : memref<98xf32, #tpu.memory_space<smem>>
    %c21 = arith.constant 21 : index
    %57 = memref.load %arg4[%c21] : memref<98xf32, #tpu.memory_space<smem>>
    %c22 = arith.constant 22 : index
    %58 = memref.load %arg4[%c22] : memref<98xf32, #tpu.memory_space<smem>>
    %c23 = arith.constant 23 : index
    %59 = memref.load %arg4[%c23] : memref<98xf32, #tpu.memory_space<smem>>
    %c24 = arith.constant 24 : index
    %60 = memref.load %arg4[%c24] : memref<98xf32, #tpu.memory_space<smem>>
    %c25 = arith.constant 25 : index
    %61 = memref.load %arg4[%c25] : memref<98xf32, #tpu.memory_space<smem>>
    %c26 = arith.constant 26 : index
    %62 = memref.load %arg4[%c26] : memref<98xf32, #tpu.memory_space<smem>>
    %c27 = arith.constant 27 : index
    %63 = memref.load %arg4[%c27] : memref<98xf32, #tpu.memory_space<smem>>
    %c28 = arith.constant 28 : index
    %64 = memref.load %arg4[%c28] : memref<98xf32, #tpu.memory_space<smem>>
    %c29 = arith.constant 29 : index
    %65 = memref.load %arg4[%c29] : memref<98xf32, #tpu.memory_space<smem>>
    %c30 = arith.constant 30 : index
    %66 = memref.load %arg4[%c30] : memref<98xf32, #tpu.memory_space<smem>>
    %c31 = arith.constant 31 : index
    %67 = memref.load %arg4[%c31] : memref<98xf32, #tpu.memory_space<smem>>
    %c32 = arith.constant 32 : index
    %68 = memref.load %arg4[%c32] : memref<98xf32, #tpu.memory_space<smem>>
    %c33 = arith.constant 33 : index
    %69 = memref.load %arg4[%c33] : memref<98xf32, #tpu.memory_space<smem>>
    %c34 = arith.constant 34 : index
    %70 = memref.load %arg4[%c34] : memref<98xf32, #tpu.memory_space<smem>>
    %c35 = arith.constant 35 : index
    %71 = memref.load %arg4[%c35] : memref<98xf32, #tpu.memory_space<smem>>
    %c36 = arith.constant 36 : index
    %72 = memref.load %arg4[%c36] : memref<98xf32, #tpu.memory_space<smem>>
    %c37 = arith.constant 37 : index
    %73 = memref.load %arg4[%c37] : memref<98xf32, #tpu.memory_space<smem>>
    %c38 = arith.constant 38 : index
    %74 = memref.load %arg4[%c38] : memref<98xf32, #tpu.memory_space<smem>>
    %c39 = arith.constant 39 : index
    %75 = memref.load %arg4[%c39] : memref<98xf32, #tpu.memory_space<smem>>
    %c40 = arith.constant 40 : index
    %76 = memref.load %arg4[%c40] : memref<98xf32, #tpu.memory_space<smem>>
    %c41 = arith.constant 41 : index
    %77 = memref.load %arg4[%c41] : memref<98xf32, #tpu.memory_space<smem>>
    %c42 = arith.constant 42 : index
    %78 = memref.load %arg4[%c42] : memref<98xf32, #tpu.memory_space<smem>>
    %c43 = arith.constant 43 : index
    %79 = memref.load %arg4[%c43] : memref<98xf32, #tpu.memory_space<smem>>
    %c44 = arith.constant 44 : index
    %80 = memref.load %arg4[%c44] : memref<98xf32, #tpu.memory_space<smem>>
    %c45 = arith.constant 45 : index
    %81 = memref.load %arg4[%c45] : memref<98xf32, #tpu.memory_space<smem>>
    %c46 = arith.constant 46 : index
    %82 = memref.load %arg4[%c46] : memref<98xf32, #tpu.memory_space<smem>>
    %c47 = arith.constant 47 : index
    %83 = memref.load %arg4[%c47] : memref<98xf32, #tpu.memory_space<smem>>
    %c48 = arith.constant 48 : index
    %84 = memref.load %arg4[%c48] : memref<98xf32, #tpu.memory_space<smem>>
    %c49 = arith.constant 49 : index
    %85 = memref.load %arg4[%c49] : memref<98xf32, #tpu.memory_space<smem>>
    %c50 = arith.constant 50 : index
    %86 = memref.load %arg4[%c50] : memref<98xf32, #tpu.memory_space<smem>>
    %c51 = arith.constant 51 : index
    %87 = memref.load %arg4[%c51] : memref<98xf32, #tpu.memory_space<smem>>
    %c52 = arith.constant 52 : index
    %88 = memref.load %arg4[%c52] : memref<98xf32, #tpu.memory_space<smem>>
    %c53 = arith.constant 53 : index
    %89 = memref.load %arg4[%c53] : memref<98xf32, #tpu.memory_space<smem>>
    %c54 = arith.constant 54 : index
    %90 = memref.load %arg4[%c54] : memref<98xf32, #tpu.memory_space<smem>>
    %c55 = arith.constant 55 : index
    %91 = memref.load %arg4[%c55] : memref<98xf32, #tpu.memory_space<smem>>
    %c56 = arith.constant 56 : index
    %92 = memref.load %arg4[%c56] : memref<98xf32, #tpu.memory_space<smem>>
    %c57 = arith.constant 57 : index
    %93 = memref.load %arg4[%c57] : memref<98xf32, #tpu.memory_space<smem>>
    %c58 = arith.constant 58 : index
    %94 = memref.load %arg4[%c58] : memref<98xf32, #tpu.memory_space<smem>>
    %c59 = arith.constant 59 : index
    %95 = memref.load %arg4[%c59] : memref<98xf32, #tpu.memory_space<smem>>
    %c60 = arith.constant 60 : index
    %96 = memref.load %arg4[%c60] : memref<98xf32, #tpu.memory_space<smem>>
    %c61 = arith.constant 61 : index
    %97 = memref.load %arg4[%c61] : memref<98xf32, #tpu.memory_space<smem>>
    %c62 = arith.constant 62 : index
    %98 = memref.load %arg4[%c62] : memref<98xf32, #tpu.memory_space<smem>>
    %c63 = arith.constant 63 : index
    %99 = memref.load %arg4[%c63] : memref<98xf32, #tpu.memory_space<smem>>
    %c64 = arith.constant 64 : index
    %100 = memref.load %arg4[%c64] : memref<98xf32, #tpu.memory_space<smem>>
    %c65 = arith.constant 65 : index
    %101 = memref.load %arg4[%c65] : memref<98xf32, #tpu.memory_space<smem>>
    %c66 = arith.constant 66 : index
    %102 = memref.load %arg4[%c66] : memref<98xf32, #tpu.memory_space<smem>>
    %c67 = arith.constant 67 : index
    %103 = memref.load %arg4[%c67] : memref<98xf32, #tpu.memory_space<smem>>
    %c68 = arith.constant 68 : index
    %104 = memref.load %arg4[%c68] : memref<98xf32, #tpu.memory_space<smem>>
    %c69 = arith.constant 69 : index
    %105 = memref.load %arg4[%c69] : memref<98xf32, #tpu.memory_space<smem>>
    %c70 = arith.constant 70 : index
    %106 = memref.load %arg4[%c70] : memref<98xf32, #tpu.memory_space<smem>>
    %c71 = arith.constant 71 : index
    %107 = memref.load %arg4[%c71] : memref<98xf32, #tpu.memory_space<smem>>
    %c72 = arith.constant 72 : index
    %108 = memref.load %arg4[%c72] : memref<98xf32, #tpu.memory_space<smem>>
    %c73 = arith.constant 73 : index
    %109 = memref.load %arg4[%c73] : memref<98xf32, #tpu.memory_space<smem>>
    %c74 = arith.constant 74 : index
    %110 = memref.load %arg4[%c74] : memref<98xf32, #tpu.memory_space<smem>>
    %c75 = arith.constant 75 : index
    %111 = memref.load %arg4[%c75] : memref<98xf32, #tpu.memory_space<smem>>
    %c76 = arith.constant 76 : index
    %112 = memref.load %arg4[%c76] : memref<98xf32, #tpu.memory_space<smem>>
    %c77 = arith.constant 77 : index
    %113 = memref.load %arg4[%c77] : memref<98xf32, #tpu.memory_space<smem>>
    %c78 = arith.constant 78 : index
    %114 = memref.load %arg4[%c78] : memref<98xf32, #tpu.memory_space<smem>>
    %c79 = arith.constant 79 : index
    %115 = memref.load %arg4[%c79] : memref<98xf32, #tpu.memory_space<smem>>
    %c80 = arith.constant 80 : index
    %116 = memref.load %arg4[%c80] : memref<98xf32, #tpu.memory_space<smem>>
    %c81 = arith.constant 81 : index
    %117 = memref.load %arg4[%c81] : memref<98xf32, #tpu.memory_space<smem>>
    %c82 = arith.constant 82 : index
    %118 = memref.load %arg4[%c82] : memref<98xf32, #tpu.memory_space<smem>>
    %c83 = arith.constant 83 : index
    %119 = memref.load %arg4[%c83] : memref<98xf32, #tpu.memory_space<smem>>
    %c84 = arith.constant 84 : index
    %120 = memref.load %arg4[%c84] : memref<98xf32, #tpu.memory_space<smem>>
    %c85 = arith.constant 85 : index
    %121 = memref.load %arg4[%c85] : memref<98xf32, #tpu.memory_space<smem>>
    %c86 = arith.constant 86 : index
    %122 = memref.load %arg4[%c86] : memref<98xf32, #tpu.memory_space<smem>>
    %c87 = arith.constant 87 : index
    %123 = memref.load %arg4[%c87] : memref<98xf32, #tpu.memory_space<smem>>
    %c88 = arith.constant 88 : index
    %124 = memref.load %arg4[%c88] : memref<98xf32, #tpu.memory_space<smem>>
    %c89 = arith.constant 89 : index
    %125 = memref.load %arg4[%c89] : memref<98xf32, #tpu.memory_space<smem>>
    %c90 = arith.constant 90 : index
    %126 = memref.load %arg4[%c90] : memref<98xf32, #tpu.memory_space<smem>>
    %c91 = arith.constant 91 : index
    %127 = memref.load %arg4[%c91] : memref<98xf32, #tpu.memory_space<smem>>
    %c92 = arith.constant 92 : index
    %128 = memref.load %arg4[%c92] : memref<98xf32, #tpu.memory_space<smem>>
    %c93 = arith.constant 93 : index
    %129 = memref.load %arg4[%c93] : memref<98xf32, #tpu.memory_space<smem>>
    %c94 = arith.constant 94 : index
    %130 = memref.load %arg4[%c94] : memref<98xf32, #tpu.memory_space<smem>>
    %c95 = arith.constant 95 : index
    %131 = memref.load %arg4[%c95] : memref<98xf32, #tpu.memory_space<smem>>
    %c96 = arith.constant 96 : index
    %132 = memref.load %arg4[%c96] : memref<98xf32, #tpu.memory_space<smem>>
    %c97 = arith.constant 97 : index
    %133 = memref.load %arg4[%c97] : memref<98xf32, #tpu.memory_space<smem>>
    %c0_16 = arith.constant 0 : index
    %c0_17 = arith.constant 0 : index
    %134 = vector.load %arg5[%c0_16, %c0_17] : memref<7x256xf32, #tpu.memory_space<vmem>>, vector<7x256xf32>
    %cst_18 = arith.constant 0.000000e+00 : f32
    %135 = vector.broadcast %cst_18 : f32 to vector<1x51xf32>
    %136 = vector.extract_strided_slice %0 {offsets = [0, 0, 0], sizes = [1, 16, 256], strides = [1, 1, 1]} : vector<2x16x256xf32> to vector<1x16x256xf32>
    %137 = vector.shape_cast %136 : vector<1x16x256xf32> to vector<16x256xf32>
    %138 = vector.extract_strided_slice %35 {offsets = [0, 0], sizes = [16, 1], strides = [1, 1]} : vector<16x2xf32> to vector<16x1xf32>
    %139 = vector.broadcast %138 : vector<16x1xf32> to vector<16x256xf32>
    %140 = arith.mulf %137, %139 : vector<16x256xf32>
    %cst_19 = arith.constant dense<0.000000e+00> : vector<256xf32>
    %141 = vector.multi_reduction <add>, %140, %cst_19 [0] : vector<16x256xf32> to vector<256xf32>
    %142 = vector.shape_cast %141 : vector<256xf32> to vector<1x256xf32>
    %cst_20 = arith.constant 1.600000e+01 : f32
    %143 = vector.broadcast %cst_20 : f32 to vector<1x256xf32>
    %144 = arith.divf %142, %143 : vector<1x256xf32>
    %cst_21 = arith.constant dense<0xFF800000> : vector<256xf32>
    %145 = vector.multi_reduction <maximumf>, %140, %cst_21 [0] : vector<16x256xf32> to vector<256xf32>
    %146 = vector.shape_cast %145 : vector<256xf32> to vector<1x256xf32>
    %147 = tpu.concatenate %135, %144, %135 in 1 : vector<1x51xf32>, vector<1x256xf32>, vector<1x51xf32> -> vector<1x358xf32>
    %148 = tpu.concatenate %135, %146, %135 in 1 : vector<1x51xf32>, vector<1x256xf32>, vector<1x51xf32> -> vector<1x358xf32>
    %cst_22 = arith.constant 0.000000e+00 : f32
    %149 = vector.broadcast %cst_22 : f32 to vector<1x256xf32>
    %cst_23 = arith.constant 0.000000e+00 : f32
    %150 = vector.broadcast %cst_23 : f32 to vector<1x256xf32>
    %151 = vector.extract_strided_slice %147 {offsets = [0, 0], sizes = [1, 256], strides = [1, 1]} : vector<1x358xf32> to vector<1x256xf32>
    %152 = vector.broadcast %36 : f32 to vector<1x256xf32>
    %153 = arith.mulf %152, %151 : vector<1x256xf32>
    %154 = arith.addf %150, %153 : vector<1x256xf32>
    %155 = vector.extract_strided_slice %148 {offsets = [0, 0], sizes = [1, 256], strides = [1, 1]} : vector<1x358xf32> to vector<1x256xf32>
    %156 = vector.broadcast %85 : f32 to vector<1x256xf32>
    %157 = arith.mulf %156, %155 : vector<1x256xf32>
    %158 = arith.addf %154, %157 : vector<1x256xf32>
    %159 = vector.extract_strided_slice %147 {offsets = [0, 16], sizes = [1, 256], strides = [1, 1]} : vector<1x358xf32> to vector<1x256xf32>
    %160 = vector.broadcast %43 : f32 to vector<1x256xf32>
    %161 = arith.mulf %160, %159 : vector<1x256xf32>
    %162 = arith.addf %158, %161 : vector<1x256xf32>
    %163 = vector.extract_strided_slice %148 {offsets = [0, 16], sizes = [1, 256], strides = [1, 1]} : vector<1x358xf32> to vector<1x256xf32>
    %164 = vector.broadcast %92 : f32 to vector<1x256xf32>
    %165 = arith.mulf %164, %163 : vector<1x256xf32>
    %166 = arith.addf %162, %165 : vector<1x256xf32>
    %167 = vector.extract_strided_slice %147 {offsets = [0, 32], sizes = [1, 256], strides = [1, 1]} : vector<1x358xf32> to vector<1x256xf32>
    %168 = vector.broadcast %50 : f32 to vector<1x256xf32>
    %169 = arith.mulf %168, %167 : vector<1x256xf32>
    %170 = arith.addf %166, %169 : vector<1x256xf32>
    %171 = vector.extract_strided_slice %148 {offsets = [0, 32], sizes = [1, 256], strides = [1, 1]} : vector<1x358xf32> to vector<1x256xf32>
    %172 = vector.broadcast %99 : f32 to vector<1x256xf32>
    %173 = arith.mulf %172, %171 : vector<1x256xf32>
    %174 = arith.addf %170, %173 : vector<1x256xf32>
    %175 = vector.extract_strided_slice %147 {offsets = [0, 48], sizes = [1, 256], strides = [1, 1]} : vector<1x358xf32> to vector<1x256xf32>
    %176 = vector.broadcast %57 : f32 to vector<1x256xf32>
    %177 = arith.mulf %176, %175 : vector<1x256xf32>
    %178 = arith.addf %174, %177 : vector<1x256xf32>
    %179 = vector.extract_strided_slice %148 {offsets = [0, 48], sizes = [1, 256], strides = [1, 1]} : vector<1x358xf32> to vector<1x256xf32>
    %180 = vector.broadcast %106 : f32 to vector<1x256xf32>
    %181 = arith.mulf %180, %179 : vector<1x256xf32>
    %182 = arith.addf %178, %181 : vector<1x256xf32>
    %183 = vector.extract_strided_slice %147 {offsets = [0, 64], sizes = [1, 256], strides = [1, 1]} : vector<1x358xf32> to vector<1x256xf32>
    %184 = vector.broadcast %64 : f32 to vector<1x256xf32>
    %185 = arith.mulf %184, %183 : vector<1x256xf32>
    %186 = arith.addf %182, %185 : vector<1x256xf32>
    %187 = vector.extract_strided_slice %148 {offsets = [0, 64], sizes = [1, 256], strides = [1, 1]} : vector<1x358xf32> to vector<1x256xf32>
    %188 = vector.broadcast %113 : f32 to vector<1x256xf32>
    %189 = arith.mulf %188, %187 : vector<1x256xf32>
    %190 = arith.addf %186, %189 : vector<1x256xf32>
    %191 = vector.extract_strided_slice %147 {offsets = [0, 80], sizes = [1, 256], strides = [1, 1]} : vector<1x358xf32> to vector<1x256xf32>
    %192 = vector.broadcast %71 : f32 to vector<1x256xf32>
    %193 = arith.mulf %192, %191 : vector<1x256xf32>
    %194 = arith.addf %190, %193 : vector<1x256xf32>
    %195 = vector.extract_strided_slice %148 {offsets = [0, 80], sizes = [1, 256], strides = [1, 1]} : vector<1x358xf32> to vector<1x256xf32>
    %196 = vector.broadcast %120 : f32 to vector<1x256xf32>
    %197 = arith.mulf %196, %195 : vector<1x256xf32>
    %198 = arith.addf %194, %197 : vector<1x256xf32>
    %199 = vector.extract_strided_slice %147 {offsets = [0, 96], sizes = [1, 256], strides = [1, 1]} : vector<1x358xf32> to vector<1x256xf32>
    %200 = vector.broadcast %78 : f32 to vector<1x256xf32>
    %201 = arith.mulf %200, %199 : vector<1x256xf32>
    %202 = arith.addf %198, %201 : vector<1x256xf32>
    %203 = vector.extract_strided_slice %148 {offsets = [0, 96], sizes = [1, 256], strides = [1, 1]} : vector<1x358xf32> to vector<1x256xf32>
    %204 = vector.broadcast %127 : f32 to vector<1x256xf32>
    %205 = arith.mulf %204, %203 : vector<1x256xf32>
    %206 = arith.addf %202, %205 : vector<1x256xf32>
    %207 = vector.extract_strided_slice %134 {offsets = [0, 0], sizes = [1, 256], strides = [1, 1]} : vector<7x256xf32> to vector<1x256xf32>
    %208 = arith.mulf %206, %207 : vector<1x256xf32>
    %209 = arith.addf %149, %208 : vector<1x256xf32>
    %cst_24 = arith.constant 0.000000e+00 : f32
    %210 = vector.broadcast %cst_24 : f32 to vector<1x256xf32>
    %211 = vector.extract_strided_slice %147 {offsets = [0, 1], sizes = [1, 256], strides = [1, 1]} : vector<1x358xf32> to vector<1x256xf32>
    %212 = vector.broadcast %37 : f32 to vector<1x256xf32>
    %213 = arith.mulf %212, %211 : vector<1x256xf32>
    %214 = arith.addf %210, %213 : vector<1x256xf32>
    %215 = vector.extract_strided_slice %148 {offsets = [0, 1], sizes = [1, 256], strides = [1, 1]} : vector<1x358xf32> to vector<1x256xf32>
    %216 = vector.broadcast %86 : f32 to vector<1x256xf32>
    %217 = arith.mulf %216, %215 : vector<1x256xf32>
    %218 = arith.addf %214, %217 : vector<1x256xf32>
    %219 = vector.extract_strided_slice %147 {offsets = [0, 17], sizes = [1, 256], strides = [1, 1]} : vector<1x358xf32> to vector<1x256xf32>
    %220 = vector.broadcast %44 : f32 to vector<1x256xf32>
    %221 = arith.mulf %220, %219 : vector<1x256xf32>
    %222 = arith.addf %218, %221 : vector<1x256xf32>
    %223 = vector.extract_strided_slice %148 {offsets = [0, 17], sizes = [1, 256], strides = [1, 1]} : vector<1x358xf32> to vector<1x256xf32>
    %224 = vector.broadcast %93 : f32 to vector<1x256xf32>
    %225 = arith.mulf %224, %223 : vector<1x256xf32>
    %226 = arith.addf %222, %225 : vector<1x256xf32>
    %227 = vector.extract_strided_slice %147 {offsets = [0, 33], sizes = [1, 256], strides = [1, 1]} : vector<1x358xf32> to vector<1x256xf32>
    %228 = vector.broadcast %51 : f32 to vector<1x256xf32>
    %229 = arith.mulf %228, %227 : vector<1x256xf32>
    %230 = arith.addf %226, %229 : vector<1x256xf32>
    %231 = vector.extract_strided_slice %148 {offsets = [0, 33], sizes = [1, 256], strides = [1, 1]} : vector<1x358xf32> to vector<1x256xf32>
    %232 = vector.broadcast %100 : f32 to vector<1x256xf32>
    %233 = arith.mulf %232, %231 : vector<1x256xf32>
    %234 = arith.addf %230, %233 : vector<1x256xf32>
    %235 = vector.extract_strided_slice %147 {offsets = [0, 49], sizes = [1, 256], strides = [1, 1]} : vector<1x358xf32> to vector<1x256xf32>
    %236 = vector.broadcast %58 : f32 to vector<1x256xf32>
    %237 = arith.mulf %236, %235 : vector<1x256xf32>
    %238 = arith.addf %234, %237 : vector<1x256xf32>
    %239 = vector.extract_strided_slice %148 {offsets = [0, 49], sizes = [1, 256], strides = [1, 1]} : vector<1x358xf32> to vector<1x256xf32>
    %240 = vector.broadcast %107 : f32 to vector<1x256xf32>
    %241 = arith.mulf %240, %239 : vector<1x256xf32>
    %242 = arith.addf %238, %241 : vector<1x256xf32>
    %243 = vector.extract_strided_slice %147 {offsets = [0, 65], sizes = [1, 256], strides = [1, 1]} : vector<1x358xf32> to vector<1x256xf32>
    %244 = vector.broadcast %65 : f32 to vector<1x256xf32>
    %245 = arith.mulf %244, %243 : vector<1x256xf32>
    %246 = arith.addf %242, %245 : vector<1x256xf32>
    %247 = vector.extract_strided_slice %148 {offsets = [0, 65], sizes = [1, 256], strides = [1, 1]} : vector<1x358xf32> to vector<1x256xf32>
    %248 = vector.broadcast %114 : f32 to vector<1x256xf32>
    %249 = arith.mulf %248, %247 : vector<1x256xf32>
    %250 = arith.addf %246, %249 : vector<1x256xf32>
    %251 = vector.extract_strided_slice %147 {offsets = [0, 81], sizes = [1, 256], strides = [1, 1]} : vector<1x358xf32> to vector<1x256xf32>
    %252 = vector.broadcast %72 : f32 to vector<1x256xf32>
    %253 = arith.mulf %252, %251 : vector<1x256xf32>
    %254 = arith.addf %250, %253 : vector<1x256xf32>
    %255 = vector.extract_strided_slice %148 {offsets = [0, 81], sizes = [1, 256], strides = [1, 1]} : vector<1x358xf32> to vector<1x256xf32>
    %256 = vector.broadcast %121 : f32 to vector<1x256xf32>
    %257 = arith.mulf %256, %255 : vector<1x256xf32>
    %258 = arith.addf %254, %257 : vector<1x256xf32>
    %259 = vector.extract_strided_slice %147 {offsets = [0, 97], sizes = [1, 256], strides = [1, 1]} : vector<1x358xf32> to vector<1x256xf32>
    %260 = vector.broadcast %79 : f32 to vector<1x256xf32>
    %261 = arith.mulf %260, %259 : vector<1x256xf32>
    %262 = arith.addf %258, %261 : vector<1x256xf32>
    %263 = vector.extract_strided_slice %148 {offsets = [0, 97], sizes = [1, 256], strides = [1, 1]} : vector<1x358xf32> to vector<1x256xf32>
    %264 = vector.broadcast %128 : f32 to vector<1x256xf32>
    %265 = arith.mulf %264, %263 : vector<1x256xf32>
    %266 = arith.addf %262, %265 : vector<1x256xf32>
    %267 = vector.extract_strided_slice %134 {offsets = [1, 0], sizes = [1, 256], strides = [1, 1]} : vector<7x256xf32> to vector<1x256xf32>
    %268 = arith.mulf %266, %267 : vector<1x256xf32>
    %269 = arith.addf %209, %268 : vector<1x256xf32>
    %cst_25 = arith.constant 0.000000e+00 : f32
    %270 = vector.broadcast %cst_25 : f32 to vector<1x256xf32>
    %271 = vector.extract_strided_slice %147 {offsets = [0, 2], sizes = [1, 256], strides = [1, 1]} : vector<1x358xf32> to vector<1x256xf32>
    %272 = vector.broadcast %38 : f32 to vector<1x256xf32>
    %273 = arith.mulf %272, %271 : vector<1x256xf32>
    %274 = arith.addf %270, %273 : vector<1x256xf32>
    %275 = vector.extract_strided_slice %148 {offsets = [0, 2], sizes = [1, 256], strides = [1, 1]} : vector<1x358xf32> to vector<1x256xf32>
    %276 = vector.broadcast %87 : f32 to vector<1x256xf32>
    %277 = arith.mulf %276, %275 : vector<1x256xf32>
    %278 = arith.addf %274, %277 : vector<1x256xf32>
    %279 = vector.extract_strided_slice %147 {offsets = [0, 18], sizes = [1, 256], strides = [1, 1]} : vector<1x358xf32> to vector<1x256xf32>
    %280 = vector.broadcast %45 : f32 to vector<1x256xf32>
    %281 = arith.mulf %280, %279 : vector<1x256xf32>
    %282 = arith.addf %278, %281 : vector<1x256xf32>
    %283 = vector.extract_strided_slice %148 {offsets = [0, 18], sizes = [1, 256], strides = [1, 1]} : vector<1x358xf32> to vector<1x256xf32>
    %284 = vector.broadcast %94 : f32 to vector<1x256xf32>
    %285 = arith.mulf %284, %283 : vector<1x256xf32>
    %286 = arith.addf %282, %285 : vector<1x256xf32>
    %287 = vector.extract_strided_slice %147 {offsets = [0, 34], sizes = [1, 256], strides = [1, 1]} : vector<1x358xf32> to vector<1x256xf32>
    %288 = vector.broadcast %52 : f32 to vector<1x256xf32>
    %289 = arith.mulf %288, %287 : vector<1x256xf32>
    %290 = arith.addf %286, %289 : vector<1x256xf32>
    %291 = vector.extract_strided_slice %148 {offsets = [0, 34], sizes = [1, 256], strides = [1, 1]} : vector<1x358xf32> to vector<1x256xf32>
    %292 = vector.broadcast %101 : f32 to vector<1x256xf32>
    %293 = arith.mulf %292, %291 : vector<1x256xf32>
    %294 = arith.addf %290, %293 : vector<1x256xf32>
    %295 = vector.extract_strided_slice %147 {offsets = [0, 50], sizes = [1, 256], strides = [1, 1]} : vector<1x358xf32> to vector<1x256xf32>
    %296 = vector.broadcast %59 : f32 to vector<1x256xf32>
    %297 = arith.mulf %296, %295 : vector<1x256xf32>
    %298 = arith.addf %294, %297 : vector<1x256xf32>
    %299 = vector.extract_strided_slice %148 {offsets = [0, 50], sizes = [1, 256], strides = [1, 1]} : vector<1x358xf32> to vector<1x256xf32>
    %300 = vector.broadcast %108 : f32 to vector<1x256xf32>
    %301 = arith.mulf %300, %299 : vector<1x256xf32>
    %302 = arith.addf %298, %301 : vector<1x256xf32>
    %303 = vector.extract_strided_slice %147 {offsets = [0, 66], sizes = [1, 256], strides = [1, 1]} : vector<1x358xf32> to vector<1x256xf32>
    %304 = vector.broadcast %66 : f32 to vector<1x256xf32>
    %305 = arith.mulf %304, %303 : vector<1x256xf32>
    %306 = arith.addf %302, %305 : vector<1x256xf32>
    %307 = vector.extract_strided_slice %148 {offsets = [0, 66], sizes = [1, 256], strides = [1, 1]} : vector<1x358xf32> to vector<1x256xf32>
    %308 = vector.broadcast %115 : f32 to vector<1x256xf32>
    %309 = arith.mulf %308, %307 : vector<1x256xf32>
    %310 = arith.addf %306, %309 : vector<1x256xf32>
    %311 = vector.extract_strided_slice %147 {offsets = [0, 82], sizes = [1, 256], strides = [1, 1]} : vector<1x358xf32> to vector<1x256xf32>
    %312 = vector.broadcast %73 : f32 to vector<1x256xf32>
    %313 = arith.mulf %312, %311 : vector<1x256xf32>
    %314 = arith.addf %310, %313 : vector<1x256xf32>
    %315 = vector.extract_strided_slice %148 {offsets = [0, 82], sizes = [1, 256], strides = [1, 1]} : vector<1x358xf32> to vector<1x256xf32>
    %316 = vector.broadcast %122 : f32 to vector<1x256xf32>
    %317 = arith.mulf %316, %315 : vector<1x256xf32>
    %318 = arith.addf %314, %317 : vector<1x256xf32>
    %319 = vector.extract_strided_slice %147 {offsets = [0, 98], sizes = [1, 256], strides = [1, 1]} : vector<1x358xf32> to vector<1x256xf32>
    %320 = vector.broadcast %80 : f32 to vector<1x256xf32>
    %321 = arith.mulf %320, %319 : vector<1x256xf32>
    %322 = arith.addf %318, %321 : vector<1x256xf32>
    %323 = vector.extract_strided_slice %148 {offsets = [0, 98], sizes = [1, 256], strides = [1, 1]} : vector<1x358xf32> to vector<1x256xf32>
    %324 = vector.broadcast %129 : f32 to vector<1x256xf32>
    %325 = arith.mulf %324, %323 : vector<1x256xf32>
    %326 = arith.addf %322, %325 : vector<1x256xf32>
    %327 = vector.extract_strided_slice %134 {offsets = [2, 0], sizes = [1, 256], strides = [1, 1]} : vector<7x256xf32> to vector<1x256xf32>
    %328 = arith.mulf %326, %327 : vector<1x256xf32>
    %329 = arith.addf %269, %328 : vector<1x256xf32>
    %cst_26 = arith.constant 0.000000e+00 : f32
    %330 = vector.broadcast %cst_26 : f32 to vector<1x256xf32>
    %331 = vector.extract_strided_slice %147 {offsets = [0, 3], sizes = [1, 256], strides = [1, 1]} : vector<1x358xf32> to vector<1x256xf32>
    %332 = vector.broadcast %39 : f32 to vector<1x256xf32>
    %333 = arith.mulf %332, %331 : vector<1x256xf32>
    %334 = arith.addf %330, %333 : vector<1x256xf32>
    %335 = vector.extract_strided_slice %148 {offsets = [0, 3], sizes = [1, 256], strides = [1, 1]} : vector<1x358xf32> to vector<1x256xf32>
    %336 = vector.broadcast %88 : f32 to vector<1x256xf32>
    %337 = arith.mulf %336, %335 : vector<1x256xf32>
    %338 = arith.addf %334, %337 : vector<1x256xf32>
    %339 = vector.extract_strided_slice %147 {offsets = [0, 19], sizes = [1, 256], strides = [1, 1]} : vector<1x358xf32> to vector<1x256xf32>
    %340 = vector.broadcast %46 : f32 to vector<1x256xf32>
    %341 = arith.mulf %340, %339 : vector<1x256xf32>
    %342 = arith.addf %338, %341 : vector<1x256xf32>
    %343 = vector.extract_strided_slice %148 {offsets = [0, 19], sizes = [1, 256], strides = [1, 1]} : vector<1x358xf32> to vector<1x256xf32>
    %344 = vector.broadcast %95 : f32 to vector<1x256xf32>
    %345 = arith.mulf %344, %343 : vector<1x256xf32>
    %346 = arith.addf %342, %345 : vector<1x256xf32>
    %347 = vector.extract_strided_slice %147 {offsets = [0, 35], sizes = [1, 256], strides = [1, 1]} : vector<1x358xf32> to vector<1x256xf32>
    %348 = vector.broadcast %53 : f32 to vector<1x256xf32>
    %349 = arith.mulf %348, %347 : vector<1x256xf32>
    %350 = arith.addf %346, %349 : vector<1x256xf32>
    %351 = vector.extract_strided_slice %148 {offsets = [0, 35], sizes = [1, 256], strides = [1, 1]} : vector<1x358xf32> to vector<1x256xf32>
    %352 = vector.broadcast %102 : f32 to vector<1x256xf32>
    %353 = arith.mulf %352, %351 : vector<1x256xf32>
    %354 = arith.addf %350, %353 : vector<1x256xf32>
    %355 = vector.extract_strided_slice %147 {offsets = [0, 51], sizes = [1, 256], strides = [1, 1]} : vector<1x358xf32> to vector<1x256xf32>
    %356 = vector.broadcast %60 : f32 to vector<1x256xf32>
    %357 = arith.mulf %356, %355 : vector<1x256xf32>
    %358 = arith.addf %354, %357 : vector<1x256xf32>
    %359 = vector.extract_strided_slice %148 {offsets = [0, 51], sizes = [1, 256], strides = [1, 1]} : vector<1x358xf32> to vector<1x256xf32>
    %360 = vector.broadcast %109 : f32 to vector<1x256xf32>
    %361 = arith.mulf %360, %359 : vector<1x256xf32>
    %362 = arith.addf %358, %361 : vector<1x256xf32>
    %363 = vector.extract_strided_slice %147 {offsets = [0, 67], sizes = [1, 256], strides = [1, 1]} : vector<1x358xf32> to vector<1x256xf32>
    %364 = vector.broadcast %67 : f32 to vector<1x256xf32>
    %365 = arith.mulf %364, %363 : vector<1x256xf32>
    %366 = arith.addf %362, %365 : vector<1x256xf32>
    %367 = vector.extract_strided_slice %148 {offsets = [0, 67], sizes = [1, 256], strides = [1, 1]} : vector<1x358xf32> to vector<1x256xf32>
    %368 = vector.broadcast %116 : f32 to vector<1x256xf32>
    %369 = arith.mulf %368, %367 : vector<1x256xf32>
    %370 = arith.addf %366, %369 : vector<1x256xf32>
    %371 = vector.extract_strided_slice %147 {offsets = [0, 83], sizes = [1, 256], strides = [1, 1]} : vector<1x358xf32> to vector<1x256xf32>
    %372 = vector.broadcast %74 : f32 to vector<1x256xf32>
    %373 = arith.mulf %372, %371 : vector<1x256xf32>
    %374 = arith.addf %370, %373 : vector<1x256xf32>
    %375 = vector.extract_strided_slice %148 {offsets = [0, 83], sizes = [1, 256], strides = [1, 1]} : vector<1x358xf32> to vector<1x256xf32>
    %376 = vector.broadcast %123 : f32 to vector<1x256xf32>
    %377 = arith.mulf %376, %375 : vector<1x256xf32>
    %378 = arith.addf %374, %377 : vector<1x256xf32>
    %379 = vector.extract_strided_slice %147 {offsets = [0, 99], sizes = [1, 256], strides = [1, 1]} : vector<1x358xf32> to vector<1x256xf32>
    %380 = vector.broadcast %81 : f32 to vector<1x256xf32>
    %381 = arith.mulf %380, %379 : vector<1x256xf32>
    %382 = arith.addf %378, %381 : vector<1x256xf32>
    %383 = vector.extract_strided_slice %148 {offsets = [0, 99], sizes = [1, 256], strides = [1, 1]} : vector<1x358xf32> to vector<1x256xf32>
    %384 = vector.broadcast %130 : f32 to vector<1x256xf32>
    %385 = arith.mulf %384, %383 : vector<1x256xf32>
    %386 = arith.addf %382, %385 : vector<1x256xf32>
    %387 = arith.addf %329, %386 : vector<1x256xf32>
    %cst_27 = arith.constant 0.000000e+00 : f32
    %388 = vector.broadcast %cst_27 : f32 to vector<1x256xf32>
    %389 = vector.extract_strided_slice %147 {offsets = [0, 4], sizes = [1, 256], strides = [1, 1]} : vector<1x358xf32> to vector<1x256xf32>
    %390 = vector.broadcast %40 : f32 to vector<1x256xf32>
    %391 = arith.mulf %390, %389 : vector<1x256xf32>
    %392 = arith.addf %388, %391 : vector<1x256xf32>
    %393 = vector.extract_strided_slice %148 {offsets = [0, 4], sizes = [1, 256], strides = [1, 1]} : vector<1x358xf32> to vector<1x256xf32>
    %394 = vector.broadcast %89 : f32 to vector<1x256xf32>
    %395 = arith.mulf %394, %393 : vector<1x256xf32>
    %396 = arith.addf %392, %395 : vector<1x256xf32>
    %397 = vector.extract_strided_slice %147 {offsets = [0, 20], sizes = [1, 256], strides = [1, 1]} : vector<1x358xf32> to vector<1x256xf32>
    %398 = vector.broadcast %47 : f32 to vector<1x256xf32>
    %399 = arith.mulf %398, %397 : vector<1x256xf32>
    %400 = arith.addf %396, %399 : vector<1x256xf32>
    %401 = vector.extract_strided_slice %148 {offsets = [0, 20], sizes = [1, 256], strides = [1, 1]} : vector<1x358xf32> to vector<1x256xf32>
    %402 = vector.broadcast %96 : f32 to vector<1x256xf32>
    %403 = arith.mulf %402, %401 : vector<1x256xf32>
    %404 = arith.addf %400, %403 : vector<1x256xf32>
    %405 = vector.extract_strided_slice %147 {offsets = [0, 36], sizes = [1, 256], strides = [1, 1]} : vector<1x358xf32> to vector<1x256xf32>
    %406 = vector.broadcast %54 : f32 to vector<1x256xf32>
    %407 = arith.mulf %406, %405 : vector<1x256xf32>
    %408 = arith.addf %404, %407 : vector<1x256xf32>
    %409 = vector.extract_strided_slice %148 {offsets = [0, 36], sizes = [1, 256], strides = [1, 1]} : vector<1x358xf32> to vector<1x256xf32>
    %410 = vector.broadcast %103 : f32 to vector<1x256xf32>
    %411 = arith.mulf %410, %409 : vector<1x256xf32>
    %412 = arith.addf %408, %411 : vector<1x256xf32>
    %413 = vector.extract_strided_slice %147 {offsets = [0, 52], sizes = [1, 256], strides = [1, 1]} : vector<1x358xf32> to vector<1x256xf32>
    %414 = vector.broadcast %61 : f32 to vector<1x256xf32>
    %415 = arith.mulf %414, %413 : vector<1x256xf32>
    %416 = arith.addf %412, %415 : vector<1x256xf32>
    %417 = vector.extract_strided_slice %148 {offsets = [0, 52], sizes = [1, 256], strides = [1, 1]} : vector<1x358xf32> to vector<1x256xf32>
    %418 = vector.broadcast %110 : f32 to vector<1x256xf32>
    %419 = arith.mulf %418, %417 : vector<1x256xf32>
    %420 = arith.addf %416, %419 : vector<1x256xf32>
    %421 = vector.extract_strided_slice %147 {offsets = [0, 68], sizes = [1, 256], strides = [1, 1]} : vector<1x358xf32> to vector<1x256xf32>
    %422 = vector.broadcast %68 : f32 to vector<1x256xf32>
    %423 = arith.mulf %422, %421 : vector<1x256xf32>
    %424 = arith.addf %420, %423 : vector<1x256xf32>
    %425 = vector.extract_strided_slice %148 {offsets = [0, 68], sizes = [1, 256], strides = [1, 1]} : vector<1x358xf32> to vector<1x256xf32>
    %426 = vector.broadcast %117 : f32 to vector<1x256xf32>
    %427 = arith.mulf %426, %425 : vector<1x256xf32>
    %428 = arith.addf %424, %427 : vector<1x256xf32>
    %429 = vector.extract_strided_slice %147 {offsets = [0, 84], sizes = [1, 256], strides = [1, 1]} : vector<1x358xf32> to vector<1x256xf32>
    %430 = vector.broadcast %75 : f32 to vector<1x256xf32>
    %431 = arith.mulf %430, %429 : vector<1x256xf32>
    %432 = arith.addf %428, %431 : vector<1x256xf32>
    %433 = vector.extract_strided_slice %148 {offsets = [0, 84], sizes = [1, 256], strides = [1, 1]} : vector<1x358xf32> to vector<1x256xf32>
    %434 = vector.broadcast %124 : f32 to vector<1x256xf32>
    %435 = arith.mulf %434, %433 : vector<1x256xf32>
    %436 = arith.addf %432, %435 : vector<1x256xf32>
    %437 = vector.extract_strided_slice %147 {offsets = [0, 100], sizes = [1, 256], strides = [1, 1]} : vector<1x358xf32> to vector<1x256xf32>
    %438 = vector.broadcast %82 : f32 to vector<1x256xf32>
    %439 = arith.mulf %438, %437 : vector<1x256xf32>
    %440 = arith.addf %436, %439 : vector<1x256xf32>
    %441 = vector.extract_strided_slice %148 {offsets = [0, 100], sizes = [1, 256], strides = [1, 1]} : vector<1x358xf32> to vector<1x256xf32>
    %442 = vector.broadcast %131 : f32 to vector<1x256xf32>
    %443 = arith.mulf %442, %441 : vector<1x256xf32>
    %444 = arith.addf %440, %443 : vector<1x256xf32>
    %445 = vector.extract_strided_slice %134 {offsets = [4, 0], sizes = [1, 256], strides = [1, 1]} : vector<7x256xf32> to vector<1x256xf32>
    %446 = arith.mulf %444, %445 : vector<1x256xf32>
    %447 = arith.addf %387, %446 : vector<1x256xf32>
    %cst_28 = arith.constant 0.000000e+00 : f32
    %448 = vector.broadcast %cst_28 : f32 to vector<1x256xf32>
    %449 = vector.extract_strided_slice %147 {offsets = [0, 5], sizes = [1, 256], strides = [1, 1]} : vector<1x358xf32> to vector<1x256xf32>
    %450 = vector.broadcast %41 : f32 to vector<1x256xf32>
    %451 = arith.mulf %450, %449 : vector<1x256xf32>
    %452 = arith.addf %448, %451 : vector<1x256xf32>
    %453 = vector.extract_strided_slice %148 {offsets = [0, 5], sizes = [1, 256], strides = [1, 1]} : vector<1x358xf32> to vector<1x256xf32>
    %454 = vector.broadcast %90 : f32 to vector<1x256xf32>
    %455 = arith.mulf %454, %453 : vector<1x256xf32>
    %456 = arith.addf %452, %455 : vector<1x256xf32>
    %457 = vector.extract_strided_slice %147 {offsets = [0, 21], sizes = [1, 256], strides = [1, 1]} : vector<1x358xf32> to vector<1x256xf32>
    %458 = vector.broadcast %48 : f32 to vector<1x256xf32>
    %459 = arith.mulf %458, %457 : vector<1x256xf32>
    %460 = arith.addf %456, %459 : vector<1x256xf32>
    %461 = vector.extract_strided_slice %148 {offsets = [0, 21], sizes = [1, 256], strides = [1, 1]} : vector<1x358xf32> to vector<1x256xf32>
    %462 = vector.broadcast %97 : f32 to vector<1x256xf32>
    %463 = arith.mulf %462, %461 : vector<1x256xf32>
    %464 = arith.addf %460, %463 : vector<1x256xf32>
    %465 = vector.extract_strided_slice %147 {offsets = [0, 37], sizes = [1, 256], strides = [1, 1]} : vector<1x358xf32> to vector<1x256xf32>
    %466 = vector.broadcast %55 : f32 to vector<1x256xf32>
    %467 = arith.mulf %466, %465 : vector<1x256xf32>
    %468 = arith.addf %464, %467 : vector<1x256xf32>
    %469 = vector.extract_strided_slice %148 {offsets = [0, 37], sizes = [1, 256], strides = [1, 1]} : vector<1x358xf32> to vector<1x256xf32>
    %470 = vector.broadcast %104 : f32 to vector<1x256xf32>
    %471 = arith.mulf %470, %469 : vector<1x256xf32>
    %472 = arith.addf %468, %471 : vector<1x256xf32>
    %473 = vector.extract_strided_slice %147 {offsets = [0, 53], sizes = [1, 256], strides = [1, 1]} : vector<1x358xf32> to vector<1x256xf32>
    %474 = vector.broadcast %62 : f32 to vector<1x256xf32>
    %475 = arith.mulf %474, %473 : vector<1x256xf32>
    %476 = arith.addf %472, %475 : vector<1x256xf32>
    %477 = vector.extract_strided_slice %148 {offsets = [0, 53], sizes = [1, 256], strides = [1, 1]} : vector<1x358xf32> to vector<1x256xf32>
    %478 = vector.broadcast %111 : f32 to vector<1x256xf32>
    %479 = arith.mulf %478, %477 : vector<1x256xf32>
    %480 = arith.addf %476, %479 : vector<1x256xf32>
    %481 = vector.extract_strided_slice %147 {offsets = [0, 69], sizes = [1, 256], strides = [1, 1]} : vector<1x358xf32> to vector<1x256xf32>
    %482 = vector.broadcast %69 : f32 to vector<1x256xf32>
    %483 = arith.mulf %482, %481 : vector<1x256xf32>
    %484 = arith.addf %480, %483 : vector<1x256xf32>
    %485 = vector.extract_strided_slice %148 {offsets = [0, 69], sizes = [1, 256], strides = [1, 1]} : vector<1x358xf32> to vector<1x256xf32>
    %486 = vector.broadcast %118 : f32 to vector<1x256xf32>
    %487 = arith.mulf %486, %485 : vector<1x256xf32>
    %488 = arith.addf %484, %487 : vector<1x256xf32>
    %489 = vector.extract_strided_slice %147 {offsets = [0, 85], sizes = [1, 256], strides = [1, 1]} : vector<1x358xf32> to vector<1x256xf32>
    %490 = vector.broadcast %76 : f32 to vector<1x256xf32>
    %491 = arith.mulf %490, %489 : vector<1x256xf32>
    %492 = arith.addf %488, %491 : vector<1x256xf32>
    %493 = vector.extract_strided_slice %148 {offsets = [0, 85], sizes = [1, 256], strides = [1, 1]} : vector<1x358xf32> to vector<1x256xf32>
    %494 = vector.broadcast %125 : f32 to vector<1x256xf32>
    %495 = arith.mulf %494, %493 : vector<1x256xf32>
    %496 = arith.addf %492, %495 : vector<1x256xf32>
    %497 = vector.extract_strided_slice %147 {offsets = [0, 101], sizes = [1, 256], strides = [1, 1]} : vector<1x358xf32> to vector<1x256xf32>
    %498 = vector.broadcast %83 : f32 to vector<1x256xf32>
    %499 = arith.mulf %498, %497 : vector<1x256xf32>
    %500 = arith.addf %496, %499 : vector<1x256xf32>
    %501 = vector.extract_strided_slice %148 {offsets = [0, 101], sizes = [1, 256], strides = [1, 1]} : vector<1x358xf32> to vector<1x256xf32>
    %502 = vector.broadcast %132 : f32 to vector<1x256xf32>
    %503 = arith.mulf %502, %501 : vector<1x256xf32>
    %504 = arith.addf %500, %503 : vector<1x256xf32>
    %505 = vector.extract_strided_slice %134 {offsets = [5, 0], sizes = [1, 256], strides = [1, 1]} : vector<7x256xf32> to vector<1x256xf32>
    %506 = arith.mulf %504, %505 : vector<1x256xf32>
    %507 = arith.addf %447, %506 : vector<1x256xf32>
    %cst_29 = arith.constant 0.000000e+00 : f32
    %508 = vector.broadcast %cst_29 : f32 to vector<1x256xf32>
    %509 = vector.extract_strided_slice %147 {offsets = [0, 6], sizes = [1, 256], strides = [1, 1]} : vector<1x358xf32> to vector<1x256xf32>
    %510 = vector.broadcast %42 : f32 to vector<1x256xf32>
    %511 = arith.mulf %510, %509 : vector<1x256xf32>
    %512 = arith.addf %508, %511 : vector<1x256xf32>
    %513 = vector.extract_strided_slice %148 {offsets = [0, 6], sizes = [1, 256], strides = [1, 1]} : vector<1x358xf32> to vector<1x256xf32>
    %514 = vector.broadcast %91 : f32 to vector<1x256xf32>
    %515 = arith.mulf %514, %513 : vector<1x256xf32>
    %516 = arith.addf %512, %515 : vector<1x256xf32>
    %517 = vector.extract_strided_slice %147 {offsets = [0, 22], sizes = [1, 256], strides = [1, 1]} : vector<1x358xf32> to vector<1x256xf32>
    %518 = vector.broadcast %49 : f32 to vector<1x256xf32>
    %519 = arith.mulf %518, %517 : vector<1x256xf32>
    %520 = arith.addf %516, %519 : vector<1x256xf32>
    %521 = vector.extract_strided_slice %148 {offsets = [0, 22], sizes = [1, 256], strides = [1, 1]} : vector<1x358xf32> to vector<1x256xf32>
    %522 = vector.broadcast %98 : f32 to vector<1x256xf32>
    %523 = arith.mulf %522, %521 : vector<1x256xf32>
    %524 = arith.addf %520, %523 : vector<1x256xf32>
    %525 = vector.extract_strided_slice %147 {offsets = [0, 38], sizes = [1, 256], strides = [1, 1]} : vector<1x358xf32> to vector<1x256xf32>
    %526 = vector.broadcast %56 : f32 to vector<1x256xf32>
    %527 = arith.mulf %526, %525 : vector<1x256xf32>
    %528 = arith.addf %524, %527 : vector<1x256xf32>
    %529 = vector.extract_strided_slice %148 {offsets = [0, 38], sizes = [1, 256], strides = [1, 1]} : vector<1x358xf32> to vector<1x256xf32>
    %530 = vector.broadcast %105 : f32 to vector<1x256xf32>
    %531 = arith.mulf %530, %529 : vector<1x256xf32>
    %532 = arith.addf %528, %531 : vector<1x256xf32>
    %533 = vector.extract_strided_slice %147 {offsets = [0, 54], sizes = [1, 256], strides = [1, 1]} : vector<1x358xf32> to vector<1x256xf32>
    %534 = vector.broadcast %63 : f32 to vector<1x256xf32>
    %535 = arith.mulf %534, %533 : vector<1x256xf32>
    %536 = arith.addf %532, %535 : vector<1x256xf32>
    %537 = vector.extract_strided_slice %148 {offsets = [0, 54], sizes = [1, 256], strides = [1, 1]} : vector<1x358xf32> to vector<1x256xf32>
    %538 = vector.broadcast %112 : f32 to vector<1x256xf32>
    %539 = arith.mulf %538, %537 : vector<1x256xf32>
    %540 = arith.addf %536, %539 : vector<1x256xf32>
    %541 = vector.extract_strided_slice %147 {offsets = [0, 70], sizes = [1, 256], strides = [1, 1]} : vector<1x358xf32> to vector<1x256xf32>
    %542 = vector.broadcast %70 : f32 to vector<1x256xf32>
    %543 = arith.mulf %542, %541 : vector<1x256xf32>
    %544 = arith.addf %540, %543 : vector<1x256xf32>
    %545 = vector.extract_strided_slice %148 {offsets = [0, 70], sizes = [1, 256], strides = [1, 1]} : vector<1x358xf32> to vector<1x256xf32>
    %546 = vector.broadcast %119 : f32 to vector<1x256xf32>
    %547 = arith.mulf %546, %545 : vector<1x256xf32>
    %548 = arith.addf %544, %547 : vector<1x256xf32>
    %549 = vector.extract_strided_slice %147 {offsets = [0, 86], sizes = [1, 256], strides = [1, 1]} : vector<1x358xf32> to vector<1x256xf32>
    %550 = vector.broadcast %77 : f32 to vector<1x256xf32>
    %551 = arith.mulf %550, %549 : vector<1x256xf32>
    %552 = arith.addf %548, %551 : vector<1x256xf32>
    %553 = vector.extract_strided_slice %148 {offsets = [0, 86], sizes = [1, 256], strides = [1, 1]} : vector<1x358xf32> to vector<1x256xf32>
    %554 = vector.broadcast %126 : f32 to vector<1x256xf32>
    %555 = arith.mulf %554, %553 : vector<1x256xf32>
    %556 = arith.addf %552, %555 : vector<1x256xf32>
    %557 = vector.extract_strided_slice %147 {offsets = [0, 102], sizes = [1, 256], strides = [1, 1]} : vector<1x358xf32> to vector<1x256xf32>
    %558 = vector.broadcast %84 : f32 to vector<1x256xf32>
    %559 = arith.mulf %558, %557 : vector<1x256xf32>
    %560 = arith.addf %556, %559 : vector<1x256xf32>
    %561 = vector.extract_strided_slice %148 {offsets = [0, 102], sizes = [1, 256], strides = [1, 1]} : vector<1x358xf32> to vector<1x256xf32>
    %562 = vector.broadcast %133 : f32 to vector<1x256xf32>
    %563 = arith.mulf %562, %561 : vector<1x256xf32>
    %564 = arith.addf %560, %563 : vector<1x256xf32>
    %565 = vector.extract_strided_slice %134 {offsets = [6, 0], sizes = [1, 256], strides = [1, 1]} : vector<7x256xf32> to vector<1x256xf32>
    %566 = arith.mulf %564, %565 : vector<1x256xf32>
    %567 = arith.addf %507, %566 : vector<1x256xf32>
    %568 = arith.negf %567 : vector<1x256xf32>
    %569 = math.exp %568 : vector<1x256xf32>
    %cst_30 = arith.constant 1.000000e+00 : f32
    %570 = vector.broadcast %cst_30 : f32 to vector<1x256xf32>
    %571 = arith.addf %570, %569 : vector<1x256xf32>
    %572 = arith.divf %570, %571 : vector<1x256xf32>
    %573 = vector.broadcast %572 : vector<1x256xf32> to vector<16x256xf32>
    %574 = arith.mulf %140, %573 : vector<16x256xf32>
    %c0_31 = arith.constant 0 : index
    %c0_32 = arith.constant 0 : index
    %c0_33 = arith.constant 0 : index
    %575 = vector.load %arg6[%c0_31, %c0_32, %c0_33] : memref<2x16x256xf32, #tpu.memory_space<vmem>>, vector<1x16x256xf32>
    %576 = vector.shape_cast %575 : vector<1x16x256xf32> to vector<16x256xf32>
    %577 = vector.shape_cast %574 : vector<16x256xf32> to vector<1x16x256xf32>
    tpu.vector_store %arg6[%c0_31, %c0_32, %c0_33], %577 {strides = array<i32>} : memref<2x16x256xf32, #tpu.memory_space<vmem>>, vector<1x16x256xf32>,
    %578 = vector.extract_strided_slice %0 {offsets = [1, 0, 0], sizes = [1, 16, 256], strides = [1, 1, 1]} : vector<2x16x256xf32> to vector<1x16x256xf32>
    %579 = vector.shape_cast %578 : vector<1x16x256xf32> to vector<16x256xf32>
    %580 = vector.extract_strided_slice %35 {offsets = [0, 1], sizes = [16, 1], strides = [1, 1]} : vector<16x2xf32> to vector<16x1xf32>
    %581 = vector.broadcast %580 : vector<16x1xf32> to vector<16x256xf32>
    %582 = arith.mulf %579, %581 : vector<16x256xf32>
    %cst_34 = arith.constant dense<0.000000e+00> : vector<256xf32>
    %583 = vector.multi_reduction <add>, %582, %cst_34 [0] : vector<16x256xf32> to vector<256xf32>
    %584 = vector.shape_cast %583 : vector<256xf32> to vector<1x256xf32>
    %cst_35 = arith.constant 1.600000e+01 : f32
    %585 = vector.broadcast %cst_35 : f32 to vector<1x256xf32>
    %586 = arith.divf %584, %585 : vector<1x256xf32>
    %cst_36 = arith.constant dense<0xFF800000> : vector<256xf32>
    %587 = vector.multi_reduction <maximumf>, %582, %cst_36 [0] : vector<16x256xf32> to vector<256xf32>
    %588 = vector.shape_cast %587 : vector<256xf32> to vector<1x256xf32>
    %589 = tpu.concatenate %135, %586, %135 in 1 : vector<1x51xf32>, vector<1x256xf32>, vector<1x51xf32> -> vector<1x358xf32>
    %590 = tpu.concatenate %135, %588, %135 in 1 : vector<1x51xf32>, vector<1x256xf32>, vector<1x51xf32> -> vector<1x358xf32>
    %cst_37 = arith.constant 0.000000e+00 : f32
    %591 = vector.broadcast %cst_37 : f32 to vector<1x256xf32>
    %cst_38 = arith.constant 0.000000e+00 : f32
    %592 = vector.broadcast %cst_38 : f32 to vector<1x256xf32>
    %593 = vector.extract_strided_slice %589 {offsets = [0, 0], sizes = [1, 256], strides = [1, 1]} : vector<1x358xf32> to vector<1x256xf32>
    %594 = vector.broadcast %36 : f32 to vector<1x256xf32>
    %595 = arith.mulf %594, %593 : vector<1x256xf32>
    %596 = arith.addf %592, %595 : vector<1x256xf32>
    %597 = vector.extract_strided_slice %590 {offsets = [0, 0], sizes = [1, 256], strides = [1, 1]} : vector<1x358xf32> to vector<1x256xf32>
    %598 = vector.broadcast %85 : f32 to vector<1x256xf32>
    %599 = arith.mulf %598, %597 : vector<1x256xf32>
    %600 = arith.addf %596, %599 : vector<1x256xf32>
    %601 = vector.extract_strided_slice %589 {offsets = [0, 16], sizes = [1, 256], strides = [1, 1]} : vector<1x358xf32> to vector<1x256xf32>
    %602 = vector.broadcast %43 : f32 to vector<1x256xf32>
    %603 = arith.mulf %602, %601 : vector<1x256xf32>
    %604 = arith.addf %600, %603 : vector<1x256xf32>
    %605 = vector.extract_strided_slice %590 {offsets = [0, 16], sizes = [1, 256], strides = [1, 1]} : vector<1x358xf32> to vector<1x256xf32>
    %606 = vector.broadcast %92 : f32 to vector<1x256xf32>
    %607 = arith.mulf %606, %605 : vector<1x256xf32>
    %608 = arith.addf %604, %607 : vector<1x256xf32>
    %609 = vector.extract_strided_slice %589 {offsets = [0, 32], sizes = [1, 256], strides = [1, 1]} : vector<1x358xf32> to vector<1x256xf32>
    %610 = vector.broadcast %50 : f32 to vector<1x256xf32>
    %611 = arith.mulf %610, %609 : vector<1x256xf32>
    %612 = arith.addf %608, %611 : vector<1x256xf32>
    %613 = vector.extract_strided_slice %590 {offsets = [0, 32], sizes = [1, 256], strides = [1, 1]} : vector<1x358xf32> to vector<1x256xf32>
    %614 = vector.broadcast %99 : f32 to vector<1x256xf32>
    %615 = arith.mulf %614, %613 : vector<1x256xf32>
    %616 = arith.addf %612, %615 : vector<1x256xf32>
    %617 = vector.extract_strided_slice %589 {offsets = [0, 48], sizes = [1, 256], strides = [1, 1]} : vector<1x358xf32> to vector<1x256xf32>
    %618 = vector.broadcast %57 : f32 to vector<1x256xf32>
    %619 = arith.mulf %618, %617 : vector<1x256xf32>
    %620 = arith.addf %616, %619 : vector<1x256xf32>
    %621 = vector.extract_strided_slice %590 {offsets = [0, 48], sizes = [1, 256], strides = [1, 1]} : vector<1x358xf32> to vector<1x256xf32>
    %622 = vector.broadcast %106 : f32 to vector<1x256xf32>
    %623 = arith.mulf %622, %621 : vector<1x256xf32>
    %624 = arith.addf %620, %623 : vector<1x256xf32>
    %625 = vector.extract_strided_slice %589 {offsets = [0, 64], sizes = [1, 256], strides = [1, 1]} : vector<1x358xf32> to vector<1x256xf32>
    %626 = vector.broadcast %64 : f32 to vector<1x256xf32>
    %627 = arith.mulf %626, %625 : vector<1x256xf32>
    %628 = arith.addf %624, %627 : vector<1x256xf32>
    %629 = vector.extract_strided_slice %590 {offsets = [0, 64], sizes = [1, 256], strides = [1, 1]} : vector<1x358xf32> to vector<1x256xf32>
    %630 = vector.broadcast %113 : f32 to vector<1x256xf32>
    %631 = arith.mulf %630, %629 : vector<1x256xf32>
    %632 = arith.addf %628, %631 : vector<1x256xf32>
    %633 = vector.extract_strided_slice %589 {offsets = [0, 80], sizes = [1, 256], strides = [1, 1]} : vector<1x358xf32> to vector<1x256xf32>
    %634 = vector.broadcast %71 : f32 to vector<1x256xf32>
    %635 = arith.mulf %634, %633 : vector<1x256xf32>
    %636 = arith.addf %632, %635 : vector<1x256xf32>
    %637 = vector.extract_strided_slice %590 {offsets = [0, 80], sizes = [1, 256], strides = [1, 1]} : vector<1x358xf32> to vector<1x256xf32>
    %638 = vector.broadcast %120 : f32 to vector<1x256xf32>
    %639 = arith.mulf %638, %637 : vector<1x256xf32>
    %640 = arith.addf %636, %639 : vector<1x256xf32>
    %641 = vector.extract_strided_slice %589 {offsets = [0, 96], sizes = [1, 256], strides = [1, 1]} : vector<1x358xf32> to vector<1x256xf32>
    %642 = vector.broadcast %78 : f32 to vector<1x256xf32>
    %643 = arith.mulf %642, %641 : vector<1x256xf32>
    %644 = arith.addf %640, %643 : vector<1x256xf32>
    %645 = vector.extract_strided_slice %590 {offsets = [0, 96], sizes = [1, 256], strides = [1, 1]} : vector<1x358xf32> to vector<1x256xf32>
    %646 = vector.broadcast %127 : f32 to vector<1x256xf32>
    %647 = arith.mulf %646, %645 : vector<1x256xf32>
    %648 = arith.addf %644, %647 : vector<1x256xf32>
    %649 = vector.extract_strided_slice %134 {offsets = [0, 0], sizes = [1, 256], strides = [1, 1]} : vector<7x256xf32> to vector<1x256xf32>
    %650 = arith.mulf %648, %649 : vector<1x256xf32>
    %651 = arith.addf %591, %650 : vector<1x256xf32>
    %cst_39 = arith.constant 0.000000e+00 : f32
    %652 = vector.broadcast %cst_39 : f32 to vector<1x256xf32>
    %653 = vector.extract_strided_slice %589 {offsets = [0, 1], sizes = [1, 256], strides = [1, 1]} : vector<1x358xf32> to vector<1x256xf32>
    %654 = vector.broadcast %37 : f32 to vector<1x256xf32>
    %655 = arith.mulf %654, %653 : vector<1x256xf32>
    %656 = arith.addf %652, %655 : vector<1x256xf32>
    %657 = vector.extract_strided_slice %590 {offsets = [0, 1], sizes = [1, 256], strides = [1, 1]} : vector<1x358xf32> to vector<1x256xf32>
    %658 = vector.broadcast %86 : f32 to vector<1x256xf32>
    %659 = arith.mulf %658, %657 : vector<1x256xf32>
    %660 = arith.addf %656, %659 : vector<1x256xf32>
    %661 = vector.extract_strided_slice %589 {offsets = [0, 17], sizes = [1, 256], strides = [1, 1]} : vector<1x358xf32> to vector<1x256xf32>
    %662 = vector.broadcast %44 : f32 to vector<1x256xf32>
    %663 = arith.mulf %662, %661 : vector<1x256xf32>
    %664 = arith.addf %660, %663 : vector<1x256xf32>
    %665 = vector.extract_strided_slice %590 {offsets = [0, 17], sizes = [1, 256], strides = [1, 1]} : vector<1x358xf32> to vector<1x256xf32>
    %666 = vector.broadcast %93 : f32 to vector<1x256xf32>
    %667 = arith.mulf %666, %665 : vector<1x256xf32>
    %668 = arith.addf %664, %667 : vector<1x256xf32>
    %669 = vector.extract_strided_slice %589 {offsets = [0, 33], sizes = [1, 256], strides = [1, 1]} : vector<1x358xf32> to vector<1x256xf32>
    %670 = vector.broadcast %51 : f32 to vector<1x256xf32>
    %671 = arith.mulf %670, %669 : vector<1x256xf32>
    %672 = arith.addf %668, %671 : vector<1x256xf32>
    %673 = vector.extract_strided_slice %590 {offsets = [0, 33], sizes = [1, 256], strides = [1, 1]} : vector<1x358xf32> to vector<1x256xf32>
    %674 = vector.broadcast %100 : f32 to vector<1x256xf32>
    %675 = arith.mulf %674, %673 : vector<1x256xf32>
    %676 = arith.addf %672, %675 : vector<1x256xf32>
    %677 = vector.extract_strided_slice %589 {offsets = [0, 49], sizes = [1, 256], strides = [1, 1]} : vector<1x358xf32> to vector<1x256xf32>
    %678 = vector.broadcast %58 : f32 to vector<1x256xf32>
    %679 = arith.mulf %678, %677 : vector<1x256xf32>
    %680 = arith.addf %676, %679 : vector<1x256xf32>
    %681 = vector.extract_strided_slice %590 {offsets = [0, 49], sizes = [1, 256], strides = [1, 1]} : vector<1x358xf32> to vector<1x256xf32>
    %682 = vector.broadcast %107 : f32 to vector<1x256xf32>
    %683 = arith.mulf %682, %681 : vector<1x256xf32>
    %684 = arith.addf %680, %683 : vector<1x256xf32>
    %685 = vector.extract_strided_slice %589 {offsets = [0, 65], sizes = [1, 256], strides = [1, 1]} : vector<1x358xf32> to vector<1x256xf32>
    %686 = vector.broadcast %65 : f32 to vector<1x256xf32>
    %687 = arith.mulf %686, %685 : vector<1x256xf32>
    %688 = arith.addf %684, %687 : vector<1x256xf32>
    %689 = vector.extract_strided_slice %590 {offsets = [0, 65], sizes = [1, 256], strides = [1, 1]} : vector<1x358xf32> to vector<1x256xf32>
    %690 = vector.broadcast %114 : f32 to vector<1x256xf32>
    %691 = arith.mulf %690, %689 : vector<1x256xf32>
    %692 = arith.addf %688, %691 : vector<1x256xf32>
    %693 = vector.extract_strided_slice %589 {offsets = [0, 81], sizes = [1, 256], strides = [1, 1]} : vector<1x358xf32> to vector<1x256xf32>
    %694 = vector.broadcast %72 : f32 to vector<1x256xf32>
    %695 = arith.mulf %694, %693 : vector<1x256xf32>
    %696 = arith.addf %692, %695 : vector<1x256xf32>
    %697 = vector.extract_strided_slice %590 {offsets = [0, 81], sizes = [1, 256], strides = [1, 1]} : vector<1x358xf32> to vector<1x256xf32>
    %698 = vector.broadcast %121 : f32 to vector<1x256xf32>
    %699 = arith.mulf %698, %697 : vector<1x256xf32>
    %700 = arith.addf %696, %699 : vector<1x256xf32>
    %701 = vector.extract_strided_slice %589 {offsets = [0, 97], sizes = [1, 256], strides = [1, 1]} : vector<1x358xf32> to vector<1x256xf32>
    %702 = vector.broadcast %79 : f32 to vector<1x256xf32>
    %703 = arith.mulf %702, %701 : vector<1x256xf32>
    %704 = arith.addf %700, %703 : vector<1x256xf32>
    %705 = vector.extract_strided_slice %590 {offsets = [0, 97], sizes = [1, 256], strides = [1, 1]} : vector<1x358xf32> to vector<1x256xf32>
    %706 = vector.broadcast %128 : f32 to vector<1x256xf32>
    %707 = arith.mulf %706, %705 : vector<1x256xf32>
    %708 = arith.addf %704, %707 : vector<1x256xf32>
    %709 = vector.extract_strided_slice %134 {offsets = [1, 0], sizes = [1, 256], strides = [1, 1]} : vector<7x256xf32> to vector<1x256xf32>
    %710 = arith.mulf %708, %709 : vector<1x256xf32>
    %711 = arith.addf %651, %710 : vector<1x256xf32>
    %cst_40 = arith.constant 0.000000e+00 : f32
    %712 = vector.broadcast %cst_40 : f32 to vector<1x256xf32>
    %713 = vector.extract_strided_slice %589 {offsets = [0, 2], sizes = [1, 256], strides = [1, 1]} : vector<1x358xf32> to vector<1x256xf32>
    %714 = vector.broadcast %38 : f32 to vector<1x256xf32>
    %715 = arith.mulf %714, %713 : vector<1x256xf32>
    %716 = arith.addf %712, %715 : vector<1x256xf32>
    %717 = vector.extract_strided_slice %590 {offsets = [0, 2], sizes = [1, 256], strides = [1, 1]} : vector<1x358xf32> to vector<1x256xf32>
    %718 = vector.broadcast %87 : f32 to vector<1x256xf32>
    %719 = arith.mulf %718, %717 : vector<1x256xf32>
    %720 = arith.addf %716, %719 : vector<1x256xf32>
    %721 = vector.extract_strided_slice %589 {offsets = [0, 18], sizes = [1, 256], strides = [1, 1]} : vector<1x358xf32> to vector<1x256xf32>
    %722 = vector.broadcast %45 : f32 to vector<1x256xf32>
    %723 = arith.mulf %722, %721 : vector<1x256xf32>
    %724 = arith.addf %720, %723 : vector<1x256xf32>
    %725 = vector.extract_strided_slice %590 {offsets = [0, 18], sizes = [1, 256], strides = [1, 1]} : vector<1x358xf32> to vector<1x256xf32>
    %726 = vector.broadcast %94 : f32 to vector<1x256xf32>
    %727 = arith.mulf %726, %725 : vector<1x256xf32>
    %728 = arith.addf %724, %727 : vector<1x256xf32>
    %729 = vector.extract_strided_slice %589 {offsets = [0, 34], sizes = [1, 256], strides = [1, 1]} : vector<1x358xf32> to vector<1x256xf32>
    %730 = vector.broadcast %52 : f32 to vector<1x256xf32>
    %731 = arith.mulf %730, %729 : vector<1x256xf32>
    %732 = arith.addf %728, %731 : vector<1x256xf32>
    %733 = vector.extract_strided_slice %590 {offsets = [0, 34], sizes = [1, 256], strides = [1, 1]} : vector<1x358xf32> to vector<1x256xf32>
    %734 = vector.broadcast %101 : f32 to vector<1x256xf32>
    %735 = arith.mulf %734, %733 : vector<1x256xf32>
    %736 = arith.addf %732, %735 : vector<1x256xf32>
    %737 = vector.extract_strided_slice %589 {offsets = [0, 50], sizes = [1, 256], strides = [1, 1]} : vector<1x358xf32> to vector<1x256xf32>
    %738 = vector.broadcast %59 : f32 to vector<1x256xf32>
    %739 = arith.mulf %738, %737 : vector<1x256xf32>
    %740 = arith.addf %736, %739 : vector<1x256xf32>
    %741 = vector.extract_strided_slice %590 {offsets = [0, 50], sizes = [1, 256], strides = [1, 1]} : vector<1x358xf32> to vector<1x256xf32>
    %742 = vector.broadcast %108 : f32 to vector<1x256xf32>
    %743 = arith.mulf %742, %741 : vector<1x256xf32>
    %744 = arith.addf %740, %743 : vector<1x256xf32>
    %745 = vector.extract_strided_slice %589 {offsets = [0, 66], sizes = [1, 256], strides = [1, 1]} : vector<1x358xf32> to vector<1x256xf32>
    %746 = vector.broadcast %66 : f32 to vector<1x256xf32>
    %747 = arith.mulf %746, %745 : vector<1x256xf32>
    %748 = arith.addf %744, %747 : vector<1x256xf32>
    %749 = vector.extract_strided_slice %590 {offsets = [0, 66], sizes = [1, 256], strides = [1, 1]} : vector<1x358xf32> to vector<1x256xf32>
    %750 = vector.broadcast %115 : f32 to vector<1x256xf32>
    %751 = arith.mulf %750, %749 : vector<1x256xf32>
    %752 = arith.addf %748, %751 : vector<1x256xf32>
    %753 = vector.extract_strided_slice %589 {offsets = [0, 82], sizes = [1, 256], strides = [1, 1]} : vector<1x358xf32> to vector<1x256xf32>
    %754 = vector.broadcast %73 : f32 to vector<1x256xf32>
    %755 = arith.mulf %754, %753 : vector<1x256xf32>
    %756 = arith.addf %752, %755 : vector<1x256xf32>
    %757 = vector.extract_strided_slice %590 {offsets = [0, 82], sizes = [1, 256], strides = [1, 1]} : vector<1x358xf32> to vector<1x256xf32>
    %758 = vector.broadcast %122 : f32 to vector<1x256xf32>
    %759 = arith.mulf %758, %757 : vector<1x256xf32>
    %760 = arith.addf %756, %759 : vector<1x256xf32>
    %761 = vector.extract_strided_slice %589 {offsets = [0, 98], sizes = [1, 256], strides = [1, 1]} : vector<1x358xf32> to vector<1x256xf32>
    %762 = vector.broadcast %80 : f32 to vector<1x256xf32>
    %763 = arith.mulf %762, %761 : vector<1x256xf32>
    %764 = arith.addf %760, %763 : vector<1x256xf32>
    %765 = vector.extract_strided_slice %590 {offsets = [0, 98], sizes = [1, 256], strides = [1, 1]} : vector<1x358xf32> to vector<1x256xf32>
    %766 = vector.broadcast %129 : f32 to vector<1x256xf32>
    %767 = arith.mulf %766, %765 : vector<1x256xf32>
    %768 = arith.addf %764, %767 : vector<1x256xf32>
    %769 = vector.extract_strided_slice %134 {offsets = [2, 0], sizes = [1, 256], strides = [1, 1]} : vector<7x256xf32> to vector<1x256xf32>
    %770 = arith.mulf %768, %769 : vector<1x256xf32>
    %771 = arith.addf %711, %770 : vector<1x256xf32>
    %cst_41 = arith.constant 0.000000e+00 : f32
    %772 = vector.broadcast %cst_41 : f32 to vector<1x256xf32>
    %773 = vector.extract_strided_slice %589 {offsets = [0, 3], sizes = [1, 256], strides = [1, 1]} : vector<1x358xf32> to vector<1x256xf32>
    %774 = vector.broadcast %39 : f32 to vector<1x256xf32>
    %775 = arith.mulf %774, %773 : vector<1x256xf32>
    %776 = arith.addf %772, %775 : vector<1x256xf32>
    %777 = vector.extract_strided_slice %590 {offsets = [0, 3], sizes = [1, 256], strides = [1, 1]} : vector<1x358xf32> to vector<1x256xf32>
    %778 = vector.broadcast %88 : f32 to vector<1x256xf32>
    %779 = arith.mulf %778, %777 : vector<1x256xf32>
    %780 = arith.addf %776, %779 : vector<1x256xf32>
    %781 = vector.extract_strided_slice %589 {offsets = [0, 19], sizes = [1, 256], strides = [1, 1]} : vector<1x358xf32> to vector<1x256xf32>
    %782 = vector.broadcast %46 : f32 to vector<1x256xf32>
    %783 = arith.mulf %782, %781 : vector<1x256xf32>
    %784 = arith.addf %780, %783 : vector<1x256xf32>
    %785 = vector.extract_strided_slice %590 {offsets = [0, 19], sizes = [1, 256], strides = [1, 1]} : vector<1x358xf32> to vector<1x256xf32>
    %786 = vector.broadcast %95 : f32 to vector<1x256xf32>
    %787 = arith.mulf %786, %785 : vector<1x256xf32>
    %788 = arith.addf %784, %787 : vector<1x256xf32>
    %789 = vector.extract_strided_slice %589 {offsets = [0, 35], sizes = [1, 256], strides = [1, 1]} : vector<1x358xf32> to vector<1x256xf32>
    %790 = vector.broadcast %53 : f32 to vector<1x256xf32>
    %791 = arith.mulf %790, %789 : vector<1x256xf32>
    %792 = arith.addf %788, %791 : vector<1x256xf32>
    %793 = vector.extract_strided_slice %590 {offsets = [0, 35], sizes = [1, 256], strides = [1, 1]} : vector<1x358xf32> to vector<1x256xf32>
    %794 = vector.broadcast %102 : f32 to vector<1x256xf32>
    %795 = arith.mulf %794, %793 : vector<1x256xf32>
    %796 = arith.addf %792, %795 : vector<1x256xf32>
    %797 = vector.extract_strided_slice %589 {offsets = [0, 51], sizes = [1, 256], strides = [1, 1]} : vector<1x358xf32> to vector<1x256xf32>
    %798 = vector.broadcast %60 : f32 to vector<1x256xf32>
    %799 = arith.mulf %798, %797 : vector<1x256xf32>
    %800 = arith.addf %796, %799 : vector<1x256xf32>
    %801 = vector.extract_strided_slice %590 {offsets = [0, 51], sizes = [1, 256], strides = [1, 1]} : vector<1x358xf32> to vector<1x256xf32>
    %802 = vector.broadcast %109 : f32 to vector<1x256xf32>
    %803 = arith.mulf %802, %801 : vector<1x256xf32>
    %804 = arith.addf %800, %803 : vector<1x256xf32>
    %805 = vector.extract_strided_slice %589 {offsets = [0, 67], sizes = [1, 256], strides = [1, 1]} : vector<1x358xf32> to vector<1x256xf32>
    %806 = vector.broadcast %67 : f32 to vector<1x256xf32>
    %807 = arith.mulf %806, %805 : vector<1x256xf32>
    %808 = arith.addf %804, %807 : vector<1x256xf32>
    %809 = vector.extract_strided_slice %590 {offsets = [0, 67], sizes = [1, 256], strides = [1, 1]} : vector<1x358xf32> to vector<1x256xf32>
    %810 = vector.broadcast %116 : f32 to vector<1x256xf32>
    %811 = arith.mulf %810, %809 : vector<1x256xf32>
    %812 = arith.addf %808, %811 : vector<1x256xf32>
    %813 = vector.extract_strided_slice %589 {offsets = [0, 83], sizes = [1, 256], strides = [1, 1]} : vector<1x358xf32> to vector<1x256xf32>
    %814 = vector.broadcast %74 : f32 to vector<1x256xf32>
    %815 = arith.mulf %814, %813 : vector<1x256xf32>
    %816 = arith.addf %812, %815 : vector<1x256xf32>
    %817 = vector.extract_strided_slice %590 {offsets = [0, 83], sizes = [1, 256], strides = [1, 1]} : vector<1x358xf32> to vector<1x256xf32>
    %818 = vector.broadcast %123 : f32 to vector<1x256xf32>
    %819 = arith.mulf %818, %817 : vector<1x256xf32>
    %820 = arith.addf %816, %819 : vector<1x256xf32>
    %821 = vector.extract_strided_slice %589 {offsets = [0, 99], sizes = [1, 256], strides = [1, 1]} : vector<1x358xf32> to vector<1x256xf32>
    %822 = vector.broadcast %81 : f32 to vector<1x256xf32>
    %823 = arith.mulf %822, %821 : vector<1x256xf32>
    %824 = arith.addf %820, %823 : vector<1x256xf32>
    %825 = vector.extract_strided_slice %590 {offsets = [0, 99], sizes = [1, 256], strides = [1, 1]} : vector<1x358xf32> to vector<1x256xf32>
    %826 = vector.broadcast %130 : f32 to vector<1x256xf32>
    %827 = arith.mulf %826, %825 : vector<1x256xf32>
    %828 = arith.addf %824, %827 : vector<1x256xf32>
    %829 = arith.addf %771, %828 : vector<1x256xf32>
    %cst_42 = arith.constant 0.000000e+00 : f32
    %830 = vector.broadcast %cst_42 : f32 to vector<1x256xf32>
    %831 = vector.extract_strided_slice %589 {offsets = [0, 4], sizes = [1, 256], strides = [1, 1]} : vector<1x358xf32> to vector<1x256xf32>
    %832 = vector.broadcast %40 : f32 to vector<1x256xf32>
    %833 = arith.mulf %832, %831 : vector<1x256xf32>
    %834 = arith.addf %830, %833 : vector<1x256xf32>
    %835 = vector.extract_strided_slice %590 {offsets = [0, 4], sizes = [1, 256], strides = [1, 1]} : vector<1x358xf32> to vector<1x256xf32>
    %836 = vector.broadcast %89 : f32 to vector<1x256xf32>
    %837 = arith.mulf %836, %835 : vector<1x256xf32>
    %838 = arith.addf %834, %837 : vector<1x256xf32>
    %839 = vector.extract_strided_slice %589 {offsets = [0, 20], sizes = [1, 256], strides = [1, 1]} : vector<1x358xf32> to vector<1x256xf32>
    %840 = vector.broadcast %47 : f32 to vector<1x256xf32>
    %841 = arith.mulf %840, %839 : vector<1x256xf32>
    %842 = arith.addf %838, %841 : vector<1x256xf32>
    %843 = vector.extract_strided_slice %590 {offsets = [0, 20], sizes = [1, 256], strides = [1, 1]} : vector<1x358xf32> to vector<1x256xf32>
    %844 = vector.broadcast %96 : f32 to vector<1x256xf32>
    %845 = arith.mulf %844, %843 : vector<1x256xf32>
    %846 = arith.addf %842, %845 : vector<1x256xf32>
    %847 = vector.extract_strided_slice %589 {offsets = [0, 36], sizes = [1, 256], strides = [1, 1]} : vector<1x358xf32> to vector<1x256xf32>
    %848 = vector.broadcast %54 : f32 to vector<1x256xf32>
    %849 = arith.mulf %848, %847 : vector<1x256xf32>
    %850 = arith.addf %846, %849 : vector<1x256xf32>
    %851 = vector.extract_strided_slice %590 {offsets = [0, 36], sizes = [1, 256], strides = [1, 1]} : vector<1x358xf32> to vector<1x256xf32>
    %852 = vector.broadcast %103 : f32 to vector<1x256xf32>
    %853 = arith.mulf %852, %851 : vector<1x256xf32>
    %854 = arith.addf %850, %853 : vector<1x256xf32>
    %855 = vector.extract_strided_slice %589 {offsets = [0, 52], sizes = [1, 256], strides = [1, 1]} : vector<1x358xf32> to vector<1x256xf32>
    %856 = vector.broadcast %61 : f32 to vector<1x256xf32>
    %857 = arith.mulf %856, %855 : vector<1x256xf32>
    %858 = arith.addf %854, %857 : vector<1x256xf32>
    %859 = vector.extract_strided_slice %590 {offsets = [0, 52], sizes = [1, 256], strides = [1, 1]} : vector<1x358xf32> to vector<1x256xf32>
    %860 = vector.broadcast %110 : f32 to vector<1x256xf32>
    %861 = arith.mulf %860, %859 : vector<1x256xf32>
    %862 = arith.addf %858, %861 : vector<1x256xf32>
    %863 = vector.extract_strided_slice %589 {offsets = [0, 68], sizes = [1, 256], strides = [1, 1]} : vector<1x358xf32> to vector<1x256xf32>
    %864 = vector.broadcast %68 : f32 to vector<1x256xf32>
    %865 = arith.mulf %864, %863 : vector<1x256xf32>
    %866 = arith.addf %862, %865 : vector<1x256xf32>
    %867 = vector.extract_strided_slice %590 {offsets = [0, 68], sizes = [1, 256], strides = [1, 1]} : vector<1x358xf32> to vector<1x256xf32>
    %868 = vector.broadcast %117 : f32 to vector<1x256xf32>
    %869 = arith.mulf %868, %867 : vector<1x256xf32>
    %870 = arith.addf %866, %869 : vector<1x256xf32>
    %871 = vector.extract_strided_slice %589 {offsets = [0, 84], sizes = [1, 256], strides = [1, 1]} : vector<1x358xf32> to vector<1x256xf32>
    %872 = vector.broadcast %75 : f32 to vector<1x256xf32>
    %873 = arith.mulf %872, %871 : vector<1x256xf32>
    %874 = arith.addf %870, %873 : vector<1x256xf32>
    %875 = vector.extract_strided_slice %590 {offsets = [0, 84], sizes = [1, 256], strides = [1, 1]} : vector<1x358xf32> to vector<1x256xf32>
    %876 = vector.broadcast %124 : f32 to vector<1x256xf32>
    %877 = arith.mulf %876, %875 : vector<1x256xf32>
    %878 = arith.addf %874, %877 : vector<1x256xf32>
    %879 = vector.extract_strided_slice %589 {offsets = [0, 100], sizes = [1, 256], strides = [1, 1]} : vector<1x358xf32> to vector<1x256xf32>
    %880 = vector.broadcast %82 : f32 to vector<1x256xf32>
    %881 = arith.mulf %880, %879 : vector<1x256xf32>
    %882 = arith.addf %878, %881 : vector<1x256xf32>
    %883 = vector.extract_strided_slice %590 {offsets = [0, 100], sizes = [1, 256], strides = [1, 1]} : vector<1x358xf32> to vector<1x256xf32>
    %884 = vector.broadcast %131 : f32 to vector<1x256xf32>
    %885 = arith.mulf %884, %883 : vector<1x256xf32>
    %886 = arith.addf %882, %885 : vector<1x256xf32>
    %887 = vector.extract_strided_slice %134 {offsets = [4, 0], sizes = [1, 256], strides = [1, 1]} : vector<7x256xf32> to vector<1x256xf32>
    %888 = arith.mulf %886, %887 : vector<1x256xf32>
    %889 = arith.addf %829, %888 : vector<1x256xf32>
    %cst_43 = arith.constant 0.000000e+00 : f32
    %890 = vector.broadcast %cst_43 : f32 to vector<1x256xf32>
    %891 = vector.extract_strided_slice %589 {offsets = [0, 5], sizes = [1, 256], strides = [1, 1]} : vector<1x358xf32> to vector<1x256xf32>
    %892 = vector.broadcast %41 : f32 to vector<1x256xf32>
    %893 = arith.mulf %892, %891 : vector<1x256xf32>
    %894 = arith.addf %890, %893 : vector<1x256xf32>
    %895 = vector.extract_strided_slice %590 {offsets = [0, 5], sizes = [1, 256], strides = [1, 1]} : vector<1x358xf32> to vector<1x256xf32>
    %896 = vector.broadcast %90 : f32 to vector<1x256xf32>
    %897 = arith.mulf %896, %895 : vector<1x256xf32>
    %898 = arith.addf %894, %897 : vector<1x256xf32>
    %899 = vector.extract_strided_slice %589 {offsets = [0, 21], sizes = [1, 256], strides = [1, 1]} : vector<1x358xf32> to vector<1x256xf32>
    %900 = vector.broadcast %48 : f32 to vector<1x256xf32>
    %901 = arith.mulf %900, %899 : vector<1x256xf32>
    %902 = arith.addf %898, %901 : vector<1x256xf32>
    %903 = vector.extract_strided_slice %590 {offsets = [0, 21], sizes = [1, 256], strides = [1, 1]} : vector<1x358xf32> to vector<1x256xf32>
    %904 = vector.broadcast %97 : f32 to vector<1x256xf32>
    %905 = arith.mulf %904, %903 : vector<1x256xf32>
    %906 = arith.addf %902, %905 : vector<1x256xf32>
    %907 = vector.extract_strided_slice %589 {offsets = [0, 37], sizes = [1, 256], strides = [1, 1]} : vector<1x358xf32> to vector<1x256xf32>
    %908 = vector.broadcast %55 : f32 to vector<1x256xf32>
    %909 = arith.mulf %908, %907 : vector<1x256xf32>
    %910 = arith.addf %906, %909 : vector<1x256xf32>
    %911 = vector.extract_strided_slice %590 {offsets = [0, 37], sizes = [1, 256], strides = [1, 1]} : vector<1x358xf32> to vector<1x256xf32>
    %912 = vector.broadcast %104 : f32 to vector<1x256xf32>
    %913 = arith.mulf %912, %911 : vector<1x256xf32>
    %914 = arith.addf %910, %913 : vector<1x256xf32>
    %915 = vector.extract_strided_slice %589 {offsets = [0, 53], sizes = [1, 256], strides = [1, 1]} : vector<1x358xf32> to vector<1x256xf32>
    %916 = vector.broadcast %62 : f32 to vector<1x256xf32>
    %917 = arith.mulf %916, %915 : vector<1x256xf32>
    %918 = arith.addf %914, %917 : vector<1x256xf32>
    %919 = vector.extract_strided_slice %590 {offsets = [0, 53], sizes = [1, 256], strides = [1, 1]} : vector<1x358xf32> to vector<1x256xf32>
    %920 = vector.broadcast %111 : f32 to vector<1x256xf32>
    %921 = arith.mulf %920, %919 : vector<1x256xf32>
    %922 = arith.addf %918, %921 : vector<1x256xf32>
    %923 = vector.extract_strided_slice %589 {offsets = [0, 69], sizes = [1, 256], strides = [1, 1]} : vector<1x358xf32> to vector<1x256xf32>
    %924 = vector.broadcast %69 : f32 to vector<1x256xf32>
    %925 = arith.mulf %924, %923 : vector<1x256xf32>
    %926 = arith.addf %922, %925 : vector<1x256xf32>
    %927 = vector.extract_strided_slice %590 {offsets = [0, 69], sizes = [1, 256], strides = [1, 1]} : vector<1x358xf32> to vector<1x256xf32>
    %928 = vector.broadcast %118 : f32 to vector<1x256xf32>
    %929 = arith.mulf %928, %927 : vector<1x256xf32>
    %930 = arith.addf %926, %929 : vector<1x256xf32>
    %931 = vector.extract_strided_slice %589 {offsets = [0, 85], sizes = [1, 256], strides = [1, 1]} : vector<1x358xf32> to vector<1x256xf32>
    %932 = vector.broadcast %76 : f32 to vector<1x256xf32>
    %933 = arith.mulf %932, %931 : vector<1x256xf32>
    %934 = arith.addf %930, %933 : vector<1x256xf32>
    %935 = vector.extract_strided_slice %590 {offsets = [0, 85], sizes = [1, 256], strides = [1, 1]} : vector<1x358xf32> to vector<1x256xf32>
    %936 = vector.broadcast %125 : f32 to vector<1x256xf32>
    %937 = arith.mulf %936, %935 : vector<1x256xf32>
    %938 = arith.addf %934, %937 : vector<1x256xf32>
    %939 = vector.extract_strided_slice %589 {offsets = [0, 101], sizes = [1, 256], strides = [1, 1]} : vector<1x358xf32> to vector<1x256xf32>
    %940 = vector.broadcast %83 : f32 to vector<1x256xf32>
    %941 = arith.mulf %940, %939 : vector<1x256xf32>
    %942 = arith.addf %938, %941 : vector<1x256xf32>
    %943 = vector.extract_strided_slice %590 {offsets = [0, 101], sizes = [1, 256], strides = [1, 1]} : vector<1x358xf32> to vector<1x256xf32>
    %944 = vector.broadcast %132 : f32 to vector<1x256xf32>
    %945 = arith.mulf %944, %943 : vector<1x256xf32>
    %946 = arith.addf %942, %945 : vector<1x256xf32>
    %947 = vector.extract_strided_slice %134 {offsets = [5, 0], sizes = [1, 256], strides = [1, 1]} : vector<7x256xf32> to vector<1x256xf32>
    %948 = arith.mulf %946, %947 : vector<1x256xf32>
    %949 = arith.addf %889, %948 : vector<1x256xf32>
    %cst_44 = arith.constant 0.000000e+00 : f32
    %950 = vector.broadcast %cst_44 : f32 to vector<1x256xf32>
    %951 = vector.extract_strided_slice %589 {offsets = [0, 6], sizes = [1, 256], strides = [1, 1]} : vector<1x358xf32> to vector<1x256xf32>
    %952 = vector.broadcast %42 : f32 to vector<1x256xf32>
    %953 = arith.mulf %952, %951 : vector<1x256xf32>
    %954 = arith.addf %950, %953 : vector<1x256xf32>
    %955 = vector.extract_strided_slice %590 {offsets = [0, 6], sizes = [1, 256], strides = [1, 1]} : vector<1x358xf32> to vector<1x256xf32>
    %956 = vector.broadcast %91 : f32 to vector<1x256xf32>
    %957 = arith.mulf %956, %955 : vector<1x256xf32>
    %958 = arith.addf %954, %957 : vector<1x256xf32>
    %959 = vector.extract_strided_slice %589 {offsets = [0, 22], sizes = [1, 256], strides = [1, 1]} : vector<1x358xf32> to vector<1x256xf32>
    %960 = vector.broadcast %49 : f32 to vector<1x256xf32>
    %961 = arith.mulf %960, %959 : vector<1x256xf32>
    %962 = arith.addf %958, %961 : vector<1x256xf32>
    %963 = vector.extract_strided_slice %590 {offsets = [0, 22], sizes = [1, 256], strides = [1, 1]} : vector<1x358xf32> to vector<1x256xf32>
    %964 = vector.broadcast %98 : f32 to vector<1x256xf32>
    %965 = arith.mulf %964, %963 : vector<1x256xf32>
    %966 = arith.addf %962, %965 : vector<1x256xf32>
    %967 = vector.extract_strided_slice %589 {offsets = [0, 38], sizes = [1, 256], strides = [1, 1]} : vector<1x358xf32> to vector<1x256xf32>
    %968 = vector.broadcast %56 : f32 to vector<1x256xf32>
    %969 = arith.mulf %968, %967 : vector<1x256xf32>
    %970 = arith.addf %966, %969 : vector<1x256xf32>
    %971 = vector.extract_strided_slice %590 {offsets = [0, 38], sizes = [1, 256], strides = [1, 1]} : vector<1x358xf32> to vector<1x256xf32>
    %972 = vector.broadcast %105 : f32 to vector<1x256xf32>
    %973 = arith.mulf %972, %971 : vector<1x256xf32>
    %974 = arith.addf %970, %973 : vector<1x256xf32>
    %975 = vector.extract_strided_slice %589 {offsets = [0, 54], sizes = [1, 256], strides = [1, 1]} : vector<1x358xf32> to vector<1x256xf32>
    %976 = vector.broadcast %63 : f32 to vector<1x256xf32>
    %977 = arith.mulf %976, %975 : vector<1x256xf32>
    %978 = arith.addf %974, %977 : vector<1x256xf32>
    %979 = vector.extract_strided_slice %590 {offsets = [0, 54], sizes = [1, 256], strides = [1, 1]} : vector<1x358xf32> to vector<1x256xf32>
    %980 = vector.broadcast %112 : f32 to vector<1x256xf32>
    %981 = arith.mulf %980, %979 : vector<1x256xf32>
    %982 = arith.addf %978, %981 : vector<1x256xf32>
    %983 = vector.extract_strided_slice %589 {offsets = [0, 70], sizes = [1, 256], strides = [1, 1]} : vector<1x358xf32> to vector<1x256xf32>
    %984 = vector.broadcast %70 : f32 to vector<1x256xf32>
    %985 = arith.mulf %984, %983 : vector<1x256xf32>
    %986 = arith.addf %982, %985 : vector<1x256xf32>
    %987 = vector.extract_strided_slice %590 {offsets = [0, 70], sizes = [1, 256], strides = [1, 1]} : vector<1x358xf32> to vector<1x256xf32>
    %988 = vector.broadcast %119 : f32 to vector<1x256xf32>
    %989 = arith.mulf %988, %987 : vector<1x256xf32>
    %990 = arith.addf %986, %989 : vector<1x256xf32>
    %991 = vector.extract_strided_slice %589 {offsets = [0, 86], sizes = [1, 256], strides = [1, 1]} : vector<1x358xf32> to vector<1x256xf32>
    %992 = vector.broadcast %77 : f32 to vector<1x256xf32>
    %993 = arith.mulf %992, %991 : vector<1x256xf32>
    %994 = arith.addf %990, %993 : vector<1x256xf32>
    %995 = vector.extract_strided_slice %590 {offsets = [0, 86], sizes = [1, 256], strides = [1, 1]} : vector<1x358xf32> to vector<1x256xf32>
    %996 = vector.broadcast %126 : f32 to vector<1x256xf32>
    %997 = arith.mulf %996, %995 : vector<1x256xf32>
    %998 = arith.addf %994, %997 : vector<1x256xf32>
    %999 = vector.extract_strided_slice %589 {offsets = [0, 102], sizes = [1, 256], strides = [1, 1]} : vector<1x358xf32> to vector<1x256xf32>
    %1000 = vector.broadcast %84 : f32 to vector<1x256xf32>
    %1001 = arith.mulf %1000, %999 : vector<1x256xf32>
    %1002 = arith.addf %998, %1001 : vector<1x256xf32>
    %1003 = vector.extract_strided_slice %590 {offsets = [0, 102], sizes = [1, 256], strides = [1, 1]} : vector<1x358xf32> to vector<1x256xf32>
    %1004 = vector.broadcast %133 : f32 to vector<1x256xf32>
    %1005 = arith.mulf %1004, %1003 : vector<1x256xf32>
    %1006 = arith.addf %1002, %1005 : vector<1x256xf32>
    %1007 = vector.extract_strided_slice %134 {offsets = [6, 0], sizes = [1, 256], strides = [1, 1]} : vector<7x256xf32> to vector<1x256xf32>
    %1008 = arith.mulf %1006, %1007 : vector<1x256xf32>
    %1009 = arith.addf %949, %1008 : vector<1x256xf32>
    %1010 = arith.negf %1009 : vector<1x256xf32>
    %1011 = math.exp %1010 : vector<1x256xf32>
    %cst_45 = arith.constant 1.000000e+00 : f32
    %1012 = vector.broadcast %cst_45 : f32 to vector<1x256xf32>
    %1013 = arith.addf %1012, %1011 : vector<1x256xf32>
    %1014 = arith.divf %1012, %1013 : vector<1x256xf32>
    %1015 = vector.broadcast %1014 : vector<1x256xf32> to vector<16x256xf32>
    %1016 = arith.mulf %582, %1015 : vector<16x256xf32>
    %c1_46 = arith.constant 1 : index
    %c0_47 = arith.constant 0 : index
    %c0_48 = arith.constant 0 : index
    %1017 = vector.load %arg6[%c1_46, %c0_47, %c0_48] : memref<2x16x256xf32, #tpu.memory_space<vmem>>, vector<1x16x256xf32>
    %1018 = vector.shape_cast %1017 : vector<1x16x256xf32> to vector<16x256xf32>
    %1019 = vector.shape_cast %1016 : vector<16x256xf32> to vector<1x16x256xf32>
    tpu.vector_store %arg6[%c1_46, %c0_47, %c0_48], %1019 {strides = array<i32>} : memref<2x16x256xf32, #tpu.memory_space<vmem>>, vector<1x16x256xf32>,
    return
  }
  func.func @transform_0(%arg0: i32) -> (i32, i32, i32) {
    %c0_i32 = arith.constant 0 : i32
    %c0_i32_0 = arith.constant 0 : i32
    %c0_i32_1 = arith.constant 0 : i32
    return %arg0, %c0_i32, %c0_i32_0 : i32, i32, i32
  }
  func.func @transform_1(%arg0: i32) -> (i32, i32) {
    %c0_i32 = arith.constant 0 : i32
    %c0_i32_0 = arith.constant 0 : i32
    %c0_i32_1 = arith.constant 0 : i32
    return %c0_i32, %c0_i32_0 : i32, i32
  }
  func.func @transform_2(%arg0: i32) -> (i32, i32) {
    %c0_i32 = arith.constant 0 : i32
    %c0_i32_0 = arith.constant 0 : i32
    %c0_i32_1 = arith.constant 0 : i32
    return %c0_i32, %c0_i32_0 : i32, i32
  }
  func.func @transform_3(%arg0: i32) -> i32 {
    %c0_i32 = arith.constant 0 : i32
    %c0_i32_0 = arith.constant 0 : i32
    return %c0_i32 : i32
  }
  func.func @transform_4(%arg0: i32) -> (i32, i32) {
    %c0_i32 = arith.constant 0 : i32
    %c0_i32_0 = arith.constant 0 : i32
    %c0_i32_1 = arith.constant 0 : i32
    return %c0_i32, %c0_i32_0 : i32, i32
  }
  func.func @transform_5(%arg0: i32) -> (i32, i32, i32) {
    %c0_i32 = arith.constant 0 : i32
    %c0_i32_0 = arith.constant 0 : i32
    %c0_i32_1 = arith.constant 0 : i32
    return %arg0, %c0_i32, %c0_i32_0 : i32, i32, i32
  }
}

</mosaic_0001>

<bundles_post_ra>
// kernel: tpu_custom_call.1
= control target key start
LH: loop header
LB: loop body
LE: loop exit
PB: predicated region body
PF: predicated region fallthrough
CT: control target
= control target key end

     0   :  { %10 = vsyncpa [#allocation3], 0  ;;  %s10216_s0 = inlined_call_operand.hbm [shape: f32[4,16,256], index: 0, kind: input, shape index: {}]   ;;  %s10217_s1 = inlined_call_operand.vmem [shape: f32[4,16], index: 1, kind: input, shape index: {}]   ;;  %s10218_s2 = inlined_call_operand.vmem [shape: f32[16,4], index: 2, kind: input, shape index: {}]   ;;  %s10219_s3 = inlined_call_operand.vmem [shape: f32[98], index: 3, kind: input, shape index: {}]   ;;  %s10220_s4 = inlined_call_operand.vmem [shape: f32[7,256], index: 4, kind: input, shape index: {}]   ;;  %s10221_s5 = inlined_call_operand.hbm [shape: f32[4,16,256], index: 5, kind: output, shape index: {}]  }
   0x1   :  { %12 = vsyncpa [#allocation3 + $0x1], 0 }
   0x2   :  { %13 = vsyncpa [#allocation5], 0 }
   0x3   :  { %14 = vsyncpa [#allocation4], 0 }
   0x4   :  { %16 = vsyncpa [#allocation4 + $0x1], 0  ;;  %s5175_s18 = smov 0   ;;  %s5177_s19 = smov 0  }
   0x5   :  { %s5179_s20 = smov 0   ;;  %s5181_s21 = smov 0  }
   0x6 LB: > { %s5196_s22 = sadd.s32 4294967295, %s5114_s21   ;;  %s4739_s23 = sadd.s32 4294967294, %s5114_s21   ;;  %s5114_s21 = sphi %s5181_s21, %s11842_s21   ;;  %s5110_s20 = sphi %s5179_s20, %s11841_s20   ;;  %s5106_s19 = sphi %s5177_s19, %s11840_s19   ;;  %s5102_s18 = sphi %s5175_s18, %s11839_s18  }
   0x7   : > { %s5200_s24 = sadd.s32 1, %s5114_s21   ;;  %s29_s25 = sadd.s32 1, %s5110_s20 }
   0x8   : > { %s26_s26 = ssub.s32 %s5114_s21, %s5200_s24  ;;  %p36_p0 = scmp.ne.s32.totalorder %s5110_s20, %s5106_s19 }
   0x9   : > { %p27_p1 = scmp.eq.s32.totalorder %s26_s26, 0  ;;  %p37_p2 = scmp.eq.s32.totalorder %s5114_s21, 0 }
   0xa   : > { %p42_p3 = scmp.ne.s32.totalorder %s5106_s19, %s5102_s18  ;;  %p10223_p4 = scmp.eq.s32.totalorder %s5196_s22, 0 }
   0xb   : > { %s5212_s27 = scalar_select %p27_p1, %s5110_s20, %s29_s25  }
   0xc   : > { %p5214_p5 = por %p37_p2, %p36_p0  ;;  %p5220_p6 = por %p10223_p4, %p42_p3 }
   0xd   : > { %p150_p7 = scmp.eq.s32.totalorder %s5196_s22, 1  ;;  %p156_p8 = scmp.eq.s32.totalorder %s4739_s23, 1 }
   0xe   : > { %s10559_s29 = scalar_select %p5220_p6, 1, 0 }
   0xf   : > { %p4740_p9 = scmp.ge.s32.totalorder %s5114_s21, 1  ;;  %p163_p10 = scmp.lt.s32.totalorder %s5114_s21, 3 }
  0x10   : > { %p5227_p11 = por %p150_p7, %p36_p0  ;;  %p5231_p12 = por %p156_p8, %p42_p3 }
  0x11   : > { %p5235_p13 = pnand %p4740_p9, %p163_p10  ;;  %s182_s10 = sshll.u32 %s10219_s3, 4  ;;  %s183_s10 = int_to_ptr.vmem [resolvable:$true] %s182_s10 }
  0x12   : > { %s10560_s30 = scalar_select %p5227_p11, 1, 0 }
  0x13   : > { %s10561_s6 = scalar_select %p5231_p12, 1, 0 }
  0x14   : > { %s10562_s7 = scalar_select %p5235_p13, 1, 0 }
  0x15   : > { %p4898_p1 = pneg %p5235_p13  ;;  %p4911_p2 = scmp.lt.s32.totalorder %s5114_s21, 2 }
  0x16   : > { %s196_s12 = sand.u32 1, %s5110_s20   ;;  %s5003_s15 = scalar_lea.vmem %s183_s10, 16 }
  0x17   : > { %p5248_p7 = pnand %p4898_p1, %p10223_p4  ;;  %p5255_p3 = pnand %p4911_p2, %p5214_p5 }
  0x18   : > { %s4743_s14 = sshll.u32 %s196_s12, 6  ;;  %p5004_p8 = scmp.ne.s32.totalorder %s183_s10, %s5003_s15 }
  0x19   : > { %p5005_p9 = pneg %p5248_p7  ;;  %p5011_p12 = scmp.lt.s32.totalorder %s183_s10, %s183_s10 }
  0x1a   : > { %p5012_p11 = scmp.lt.s32.totalorder %s5003_s15, %s5003_s15 }
  0x1b   : > { %p5006_p10 = pnand %p5005_p9, %p5004_p8 }
  0x1c   : > { %p5013_p1 = por %p5012_p11, %p5011_p12 }
  0x1d   : > { %p5007_p0 = pneg %p5006_p10 }
  0x1f   : > { %p5014_p4 = pnand %p5013_p1, %p5007_p0 }
  0x21   : > { %5017 = shalt.err (!%p5014_p4)
}
  0x22   : > { %s5116_s16 = smov [#allocation6]   ;;  %s4869_s17 = sshll.u32 %s5114_s21, 10 }
  0x23   : > { %4901 = dma.vmem_to_smem (!%p5248_p7), %s183_s10, 16, %s5116_s16, [#allocation5]  }
  0x24   : > { %s200_s23 = scalar_lea.vmem [#allocation2], %s4743_s14  ;;  %s5267_s8 = scalar_lea.hbm %s10216_s0, %s4869_s17 }
  0x25   : > { %s208_s25 = sshll.u32 %s200_s23, 4  ;;  %s5271_s9 = scalar_lea.sflag [#allocation3], %s196_s12  ;;  %s5269_s25 = int_to_ptr.vmem [resolvable:$true] %s208_s25 }
  0x26   : > { %s5018_s15 = scalar_lea.hbm %s5267_s8, 1024  ;;  %p5020_p5 = pneg %p5255_p3 }
  0x27   : > { %p5019_p4 = scmp.ne.s32.totalorder %s5267_s8, %s5018_s15  ;;  %s5023_s14 = scalar_lea.hbm %s10216_s0, 2048 }
  0x28   : > { %p5024_p0 = scmp.lt.s32.totalorder %s5267_s8, %s10216_s0  ;;  %p5025_p2 = scmp.lt.s32.totalorder %s5023_s14, %s5018_s15 }
  0x29   : > { %p5021_p11 = pnand %p5020_p5, %p5019_p4 }
  0x2a   : > { %p5026_p7 = por %p5025_p2, %p5024_p0 }
  0x2b   : > { %p5022_p12 = pneg %p5021_p11 }
  0x2d   : > { %p5027_p8 = pnand %p5026_p7, %p5022_p12 }
  0x2f   : > { %5030 = shalt.err (!%p5027_p8)
}
  0x30   : > { %s5031_s12 = scalar_lea.vmem %s5269_s25, 1024  ;;  %s5117_s23 = smov [#allocation2]  }
  0x31   : > { %p5032_p9 = scmp.ne.s32.totalorder %s5269_s25, %s5031_s12  ;;  %s5036_s26 = sshll.u32 %s5117_s23, 4  ;;  %s5037_s26 = int_to_ptr.vmem [resolvable:$false] %s5036_s26 }
  0x32   : > { %s5038_s28 = scalar_lea.vmem %s5037_s26, 2048  ;;  %p5039_p4 = scmp.lt.s32.totalorder %s5269_s25, %s5037_s26 }
  0x33   : > { %p5034_p10 = pnand %p5032_p9, %p5020_p5  ;;  %p5040_p11 = scmp.lt.s32.totalorder %s5038_s28, %s5031_s12 }
  0x35   : > { %p5035_p1 = pneg %p5034_p10  ;;  %p5041_p6 = por %p5040_p11, %p5039_p4 }
  0x37   : > { %p5042_p13 = pnand %p5041_p6, %p5035_p1 }
  0x39   : > { %5045 = shalt.err (!%p5042_p13)
}
  0x3a   : > { %s5118_s15 = smov 256   ;;  %s5119_s10 = smov 16  }
  0x3b   : > { %4905 = dma.hbm_to_vmem [thread:$0]  (!%p5255_p3), %s5267_s8, 1024, %s5269_s25, %s5271_s9, %s5118_s15, %s5118_s15, %s5119_s10  }
  0x3c   : > { %p10565_p5 = scmp.ne.s32.totalorder %s10562_s7, 0 }
  0x3e   : > { %220 = sbr.rel (%p10565_p5) target bundleno = 2436 (0x984), region = 40 }
  0x43   : > { %s5295_s11 = sand.u32 1, %s5106_s19   ;;  %p10566_p6 = scmp.ne.s32.totalorder %s10559_s29, 0 }
  0x44   : > { %s10239_s14 = sshll.u32 %s5295_s11, 6  ;;  %s223_s16 = scalar_lea.sflag [#allocation3], %s5295_s11 }
  0x45   : > { %s226_s17 = scalar_lea.vmem [#allocation2], %s10239_s14 }
  0x46   : > { %5089 = dma.done.wait (%p10566_p6), %s223_s16, 1024  }
  0x47   : > { %5091 = vsyncadd (%p10566_p6), %s223_s16, 4294966272  ;;  %p10567_p13 = scmp.eq.s32.totalorder %s5196_s22, 0 }
  0x49   : > { %5093 = dma.done.wait (%p10567_p13), [#allocation5], 16   ;;  %p10568_p3 = pmov %p10567_p13 }
  0x4b   : > { %5095 = vsyncadd (%p10568_p3), [#allocation5], 4294967280 }
  0x4c   : > { %235 = sfence }
  0x4d   : > { %v5309_v0 = vld [vmem:[%s226_s17 + $0x20] sm:$0xff]  ;;  %v5311_v1 = vld [vmem:[%s226_s17 + $0x28] sm:$0xff]  ;;  %v5319_v5 = vld [vmem:[%s226_s17 + $0x30] sm:$0xff]  ;;  %v5120_v16 = vmov 0.0   ;;  %vm5121_vm0 = vmmov 0   ;;  %vm297_vm1 = vcmask 7168  }
  0x4e   : > { %v5313_v2 = vld [vmem:[%s226_s17] sm:$0xff]  ;;  %v277_v3 = vadd.f32 %v5311_v1, %v5309_v0  ;;  %v5317_v4 = vld [vmem:[%s226_s17 + $0x8] sm:$0xff]  ;;  %v5321_v6 = vld [vmem:[%s226_s17 + $0x38] sm:$0xff]  ;;  %v291_v15 = vmax.f32 %v5309_v0, %v5311_v1  ;;  %4878 = vmatprep.subr.mxu0 %v5120_v16  ;;  %4882 = vmatprep.mubr.msk.f32.mxu0 %vm5121_vm0, %v5120_v16  ;;  %vm300_vm2 = vcmask 15360   ;;  %vm303_vm3 = vcmask 23552   ;;  %s5122_s26 = smov 1  }
  0x4f   : > { %v268_v7 = vadd.f32 %v5317_v4, %v5313_v2  ;;  %v5325_v8 = vld [vmem:[%s226_s17 + $0x10] sm:$0xff]  ;;  %v5327_v9 = vld [vmem:[%s226_s17 + $0x18] sm:$0xff]  ;;  %v280_v10 = vadd.f32 %v5321_v6, %v5319_v5  ;;  %v285_v13 = vmax.f32 %v5313_v2, %v5317_v4  ;;  %v294_v14 = vmax.f32 %v5319_v5, %v5321_v6  ;;  %v306_v34 = vld [vmem:[%s10217_s1] sm:$0xf]  ;;  %s5123_s28 = smov 2   ;;  %s5124_s15 = smov 4  }
  0x50   : > { %278 = vadd.xlane.f32.xlu1 %v277_v3  ;;  %v271_v11 = vadd.f32 %v5327_v9, %v5325_v8  ;;  %v288_v12 = vmax.f32 %v5325_v8, %v5327_v9  ;;  %vm307_vm4 = vcmask 130048   ;;  %v382_v36 = vld [vmem:[%s10218_s2] sm:$0xff]  ;;  %vm384_vm5 = vcmask 31744   ;;  %v591_v37 = vld [vmem:[%s10220_s4 + $0x8] sm:$0x7f]  ;;  %s5125_s10 = smov 5  }
  0x51   : > { %269 = vadd.xlane.f32.xlu0 %v268_v7  ;;  %4887 = vmatprep.mubr.msk.f32.mxu1 %vm384_vm5, %v382_v36  ;;  %v590_v38 = vld [vmem:[%s10220_s4] sm:$0x7f]  ;;  %v1179_v39 = vrot.slane %v591_v37, 1  ;;  %v1474_v42 = vrot.slane %v591_v37, 2  ;;  %v2051_v44 = vrot.slane %v591_v37, 4  ;;  %v2346_v45 = vrot.slane %v591_v37, 5 }
  0x52   : > { %v1178_v40 = vrot.slane %v590_v38, 1  ;;  %v1473_v41 = vrot.slane %v590_v38, 2  ;;  %v2050_v43 = vrot.slane %v590_v38, 4  ;;  %v2345_v46 = vrot.slane %v590_v38, 5  ;;  %s5126_s16 = smov 6   ;;  %v383_v52 = vld [vmem:[%s10218_s2 + $0x8] sm:$0xff] }
  0x53   : > { %v2641_v47 = vrot.slane %v590_v38, 6  ;;  %v2642_v48 = vrot.slane %v591_v37, 6  ;;  %vm391_vm6 = vcmask 1043456   ;;  %s5127_s7 = smov 126   ;;  %v5128_v55 = vmov 0   ;;  %s5130_s13 = smov 51  }
  0x54   : > { %281 = vadd.xlane.f32.xlu1 %v280_v10  ;;  %v5129_v56 = vmov 1   ;;  %s4812_s25 = sld [smem:[#allocation6 + $0x38]]  ;;  %vm643_vm7 = vcmask 416768   ;;  %s5131_s23 = smov 112   ;;  %vm2351_vm8 = vcmask 39936   ;;  %vm2647_vm9 = vcmask 48128  }
  0x55   : > { %272 = vadd.xlane.f32.xlu0 %v271_v11  ;;  %4973 = vset.pattern.permute.xlu1 %v5128_v55  ;;  %s4819_s8 = sld [smem:[#allocation6 + $0x3f]]  ;;  %s5134_s17 = smov 64   ;;  %vm685_vm10 = vcmask 916480   ;;  %vm724_vm11 = vcmask 785408   ;;  %vm763_vm12 = vcmask 654336   ;;  %vm802_vm13 = vcmask 523264  }
  0x56   : > { %4976 = vset.pattern.permute.xlu0 %v5129_v56  ;;  %s4826_s9 = sld [smem:[#allocation6 + $0x46]]  ;;  %vm841_vm14 = vcmask 392192   ;;  %vm880_vm15 = vcmask 261120   ;;  %vm1777_vm0 = vcmask 1022976   ;;  %p11836_p0 = scmp.ne.s32.totalorder %s10560_s30, 0 }
  0x57   : > { %s4833_s12 = sld [smem:[#allocation6 + $0x4d]] }
  0x58   : > { %289 = vmax.xlane.f32.xlu1 %v288_v12  ;;  %s4820_s29 = sld [smem:[#allocation6 + $0x40]] }
  0x59   : > { %286 = vmax.xlane.f32.xlu0 %v285_v13  ;;  %s5793_s14 = sld [smem:[#allocation6 + $0x36]] }
  0x5c   : > { %295 = vmax.xlane.f32.xlu1 %v294_v14 }
  0x5d   : > { %292 = vmax.xlane.f32.xlu0 %v291_v15 }
  0x6d   : > { %1182 = vrot.lane.b32.xlu1 %v1179_v39, %s5122_s26 }
  0x71   : > { %1475 = vrot.lane.b32.xlu1 %v1473_v41, %s5123_s28 }
  0x73   : > { %1180 = vrot.lane.b32.xlu0 %v1178_v40, %s5122_s26  ;;  %s4840_s26 = sld [smem:[#allocation6 + $0x54]] }
  0x75   : > { %2052 = vrot.lane.b32.xlu1 %v2050_v43, %s5124_s15 }
  0x77   : > { %1477 = vrot.lane.b32.xlu0 %v1474_v42, %s5123_s28  ;;  %s5132_s28 = smov 96  }
  0x79   : > { %2349 = vrot.lane.b32.xlu1 %v2346_v45, %s5125_s10 }
  0x7b   : > { %2054 = vrot.lane.b32.xlu0 %v2051_v44, %s5124_s15  ;;  %s4847_s15 = sld [smem:[#allocation6 + $0x5b]] }
  0x7d   : > { %2643 = vrot.lane.b32.xlu1 %v2641_v47, %s5126_s16 }
  0x7f   : > { %2347 = vrot.lane.b32.xlu0 %v2345_v46, %s5125_s10  ;;  %s5133_s10 = smov 80  }
  0x83   : > { %2645 = vrot.lane.b32.xlu0 %v2642_v48, %s5126_s16  ;;  %s4813_s16 = sld [smem:[#allocation6 + $0x39]] }
  0xd9   : > { %v279_v17 = vpop.xlane.xlu1 %278 }
  0xda   : > { %v270_v18 = vpop.xlane.xlu0 %269  ;;  %v283_v24 = vmul.f32 0.00390625, %v279_v17 }
  0xdb   : > { %v275_v25 = vmul.f32 0.00390625, %v270_v18 }
  0xdd   : > { %v282_v19 = vpop.xlane.xlu1 %281  ;;  %v298_v30 = vsel %vm297_vm1, %v275_v25, %v283_v24 }
  0xde   : > { %v284_v20 = vmul.f32 0.00390625, %v282_v19  ;;  %v273_v21 = vpop.xlane.xlu0 %272 }
  0xdf   : > { %v276_v22 = vmul.f32 0.00390625, %v273_v21 }
  0xe1   : > { %v290_v23 = vpop.xlane.xlu1 %289  ;;  %v299_v26 = vsel %vm297_vm1, %v276_v22, %v284_v20 }
  0xe2   : > { %v287_v27 = vpop.xlane.xlu0 %286  ;;  %v302_v28 = vsel %vm300_vm2, %v299_v26, %v290_v23 }
  0xe3   : > { %v301_v33 = vsel %vm300_vm2, %v298_v30, %v287_v27 }
  0xe5   : > { %v296_v29 = vpop.xlane.xlu1 %295 }
  0xe6   : > { %v293_v31 = vpop.xlane.xlu0 %292  ;;  %v305_v32 = vsel %vm303_vm3, %v302_v28, %v296_v29 }
  0xe7   : > { %4879 = vmatpush3.msra.mxu0 %v305_v32  ;;  %v304_v35 = vsel %vm303_vm3, %v301_v33, %v293_v31  ;;  %vm2072_vm3 = vcmask 1014784  }
  0xe8   : > { %4880 = vmatprep.subr.mxu0 %v5120_v16 }
  0xe9   : > { %4881 = vmatpush3.msra.mxu0 %v304_v35  ;;  %v5364_v57 = vpop.permute.xlu1 %1182 }
  0xea   : > { %4883 = vmatmul.mubr.msk.f32.vlgmr.msra.gmra.mxu0 %vm307_vm4, %v306_v34  ;;  %10569 = vst [vmem:[#allocation11_spill] sm:$0xff] %v5364_v57  ;;  %v5366_v58 = vpop.permute.xlu0 %1180  ;;  %vm2368_vm4 = vcmask 1006592  }
  0xeb   : > { %10570 = vst [vmem:[#allocation12_spill] sm:$0xff] %v5366_v58 }
  0xed   : > { %v5368_v59 = vpop.permute.xlu1 %1475 }
  0xee   : > { %10571 = vst [vmem:[#allocation13_spill] sm:$0xff] %v5368_v59  ;;  %v5370_v60 = vpop.permute.xlu0 %1477 }
  0xef   : > { %10572 = vst [vmem:[#allocation14_spill] sm:$0xff] %v5370_v60 }
  0xf1   : > { %v5372_v61 = vpop.permute.xlu1 %2052 }
  0xf2   : > { %10573 = vst [vmem:[#allocation15_spill] sm:$0xff] %v5372_v61  ;;  %v5374_v62 = vpop.permute.xlu0 %2054 }
  0xf3   : > { %10574 = vst [vmem:[#allocation16_spill] sm:$0xff] %v5374_v62 }
  0xf5   : > { %v5376_v63 = vpop.permute.xlu1 %2349 }
  0xf6   : > { %10575 = vst [vmem:[#allocation17_spill] sm:$0xff] %v5376_v63  ;;  %v5378_v3 = vpop.permute.xlu0 %2347 }
  0xf7   : > { %10576 = vst [vmem:[#allocation18_spill] sm:$0xff] %v5378_v3 }
  0xf9   : > { %v5380_v7 = vpop.permute.xlu1 %2643 }
  0xfa   : > { %10577 = vst [vmem:[#allocation19_spill] sm:$0xff] %v5380_v7  ;;  %v5382_v10 = vpop.permute.xlu0 %2645 }
  0xfb   : > { %10578 = vst [vmem:[#allocation20_spill] sm:$0xff] %v5382_v10 }
 0x1aa   : > { %v377_v49 = vpop.f32.mrf.mxu0 }
 0x1ab   : > { %v381_v50 = vmax.f32 %v377_v49, 0.0 }
 0x1ac   : > { %v4884_v51 = vpop.f32.mrf.mxu0 }
 0x1ad   : > { %4885 = vmatprep.subr.msk.mxu1 %vm391_vm6, %v381_v50 }
 0x1ae   : > { %4886 = vmatpush3.msk.msra.mxu1 %vm391_vm6, %v381_v50 }
 0x1af   : > { %4888 = vmatmul.mubr.msk.f32.vlgmr.msra.gmra.mxu1 %vm384_vm5, %v383_v52 }
 0x26f   : > { %v4889_v53 = vpop.f32.mrf.mxu1 }
 0x270   : > { %474 = vrot.lane.b32.xlu1 %v4889_v53, %s5127_s7 }
 0x271   : > { %v461_v54 = vpop.f32.mrf.mxu1 }
 0x272   : > { %472 = vrot.lane.b32.xlu0 %v461_v54, %s5127_s7 }
 0x2e2   : > { %v475_v11 = vpop.permute.xlu1 %474 }
 0x2e3   : > { %v479_v12 = vadd.f32 %v4889_v53, %v475_v11 }
 0x2e4   : > { %v473_v13 = vpop.permute.xlu0 %472 }
 0x2e5   : > { %v4756_v14 = vmul.f32 -1.442695, %v479_v12  ;;  %v478_v15 = vadd.f32 %v473_v13, %v461_v54 }
 0x2e7   : > { %4977 = vpow2.f32 %v4756_v14  ;;  %v4755_v16 = vmul.f32 -1.442695, %v478_v15 }
 0x2e9   : > { %4979 = vpow2.f32 %v4755_v16 }
 0x2f4   : > { %v4978_v17 = vpop.eup %4977 }
 0x2f5   : > { %v487_v18 = vadd.f32 1.0, %v4978_v17 }
 0x2f6   : > { %v4980_v19 = vpop.eup %4979 }
 0x2f7   : > { %4981 = vrcp.f32 %v487_v18  ;;  %v486_v20 = vadd.f32 1.0, %v4980_v19 }
 0x2f9   : > { %4983 = vrcp.f32 %v486_v20 }
 0x304   : > { %v4982_v21 = vpop.eup %4981 }
 0x305   : > { %599 = vperm.xlu1 %4973, %v4982_v21  }
 0x306   : > { %v4984_v22 = vpop.eup %4983 }
 0x307   : > { %2700 = vperm.xlu0 %4976, %v4984_v22  }
 0x309   : > { %4974 = vset.pattern.permute.xlu1 %v5129_v56 }
 0x30a   : > { %2704 = vperm.xlu1 %4974, %v4982_v21  }
 0x30e   : > { %4975 = vset.pattern.permute.xlu1 %v5128_v55 }
 0x30f   : > { %594 = vperm.xlu1 %4975, %v4984_v22  }
 0x380   : > { %v600_v23 = vpop.permute.xlu1 %599 }
 0x382   : > { %v2701_v24 = vpop.permute.xlu0 %2700 }
 0x383   : > { %v5385_v26 = vmul.f32 %v2701_v24, %v5309_v0  ;;  %v5388_v27 = vmul.f32 %v2701_v24, %v5311_v1 }
 0x385   : > { %v2705_v25 = vpop.permute.xlu1 %2704  ;;  %10579 = vst [vmem:[#allocation21_spill] sm:$0xff] %v5385_v26  ;;  %10580 = vst [vmem:[#allocation22_spill] sm:$0xff] %v5388_v27 }
 0x386   : > { %v5391_v28 = vmul.f32 %v2705_v25, %v5319_v5  ;;  %v5394_v29 = vmul.f32 %v2705_v25, %v5321_v6  ;;  %v5405_v5 = vmul.f32 %v600_v23, %v5325_v8  ;;  %v5408_v6 = vmul.f32 %v600_v23, %v5327_v9 }
 0x388   : > { %10581 = vst [vmem:[#allocation23_spill] sm:$0xff] %v5391_v28  ;;  %10582 = vst [vmem:[#allocation24_spill] sm:$0xff] %v5394_v29  ;;  %v2711_v30 = vadd.f32 %v5391_v28, %v5385_v26  ;;  %v2718_v31 = vadd.f32 %v5394_v29, %v5388_v27  ;;  %v2727_v32 = vmax.f32 %v5385_v26, %v5391_v28 }
 0x389   : > { %v2734_v0 = vmax.f32 %v5388_v27, %v5394_v29  ;;  %10583 = vst [vmem:[#allocation25_spill] sm:$0xff] %v5405_v5  ;;  %10584 = vst [vmem:[#allocation26_spill] sm:$0xff] %v5408_v6 }
 0x38a   : > { %v595_v1 = vpop.permute.xlu1 %594  ;;  %v2728_v33 = vrot.slane %v2727_v32, 4  ;;  %v2712_v37 = vrot.slane %v2711_v30, 4  ;;  %v2719_v38 = vrot.slane %v2718_v31, 4 }
 0x38b   : > { %v2735_v34 = vrot.slane %v2734_v0, 4  ;;  %v5411_v35 = vmul.f32 %v595_v1, %v5313_v2  ;;  %v5414_v36 = vmul.f32 %v595_v1, %v5317_v4 }
 0x38c   : > { %v2729_v39 = vmax.f32 %v2727_v32, %v2728_v33  ;;  %v2713_v47 = vadd.f32 %v2712_v37, %v2711_v30  ;;  %v2720_v48 = vadd.f32 %v2719_v38, %v2718_v31 }
 0x38d   : > { %10585 = vst [vmem:[#allocation27_spill] sm:$0xff] %v5411_v35  ;;  %10586 = vst [vmem:[#allocation28_spill] sm:$0xff] %v5414_v36  ;;  %v2736_v40 = vmax.f32 %v2734_v0, %v2735_v34  ;;  %v606_v41 = vadd.f32 %v5405_v5, %v5411_v35  ;;  %v613_v8 = vadd.f32 %v5408_v6, %v5414_v36 }
 0x38e   : > { %v623_v9 = vmax.f32 %v5411_v35, %v5405_v5  ;;  %v630_v2 = vmax.f32 %v5414_v36, %v5408_v6  ;;  %v2730_v45 = vrot.slane %v2729_v39, 2  ;;  %v2714_v13 = vrot.slane %v2713_v47, 2 }
 0x38f   : > { %v607_v42 = vrot.slane %v606_v41, 4  ;;  %v614_v43 = vrot.slane %v613_v8, 4  ;;  %v2737_v46 = vrot.slane %v2736_v40, 2  ;;  %v2721_v14 = vrot.slane %v2720_v48, 2 }
 0x390   : > { %v631_v4 = vrot.slane %v630_v2, 4  ;;  %v624_v44 = vrot.slane %v623_v9, 4  ;;  %v2731_v11 = vmax.f32 %v2729_v39, %v2730_v45  ;;  %v2715_v23 = vadd.f32 %v2714_v13, %v2713_v47 }
 0x391   : > { %v615_v51 = vadd.f32 %v614_v43, %v613_v8  ;;  %v608_v52 = vadd.f32 %v607_v42, %v606_v41  ;;  %v2738_v12 = vmax.f32 %v2736_v40, %v2737_v46  ;;  %v2722_v24 = vadd.f32 %v2721_v14, %v2720_v48 }
 0x392   : > { %v632_v49 = vmax.f32 %v630_v2, %v631_v4  ;;  %v625_v50 = vmax.f32 %v623_v9, %v624_v44  ;;  %v2732_v21 = vrot.slane %v2731_v11, 1  ;;  %v2716_v0 = vrot.slane %v2715_v23, 1 }
 0x393   : > { %v616_v55 = vrot.slane %v615_v51, 2  ;;  %v609_v56 = vrot.slane %v608_v52, 2  ;;  %v2739_v22 = vrot.slane %v2738_v12, 1  ;;  %v2723_v1 = vrot.slane %v2722_v24, 1 }
 0x394   : > { %v633_v53 = vrot.slane %v632_v49, 2  ;;  %v626_v54 = vrot.slane %v625_v50, 2  ;;  %v2733_v33 = vmax.f32 %v2731_v11, %v2732_v21  ;;  %v2717_v41 = vadd.f32 %v2716_v0, %v2715_v23 }
 0x395   : > { %v617_v17 = vadd.f32 %v616_v55, %v615_v51  ;;  %v610_v18 = vadd.f32 %v609_v56, %v608_v52  ;;  %v2740_v34 = vmax.f32 %v2738_v12, %v2739_v22  ;;  %v2724_v8 = vadd.f32 %v2723_v1, %v2722_v24 }
 0x396   : > { %v634_v15 = vmax.f32 %v632_v49, %v633_v53  ;;  %v627_v16 = vmax.f32 %v625_v50, %v626_v54  ;;  %v2725_v9 = vmul.f32 0.0625, %v2717_v41  ;;  %v5424_v42 = vstv %s4812_s25  ;;  %s4827_s25 = sld [smem:[#allocation6 + $0x47]] }
 0x397   : > { %v618_v31 = vrot.slane %v617_v17, 1  ;;  %v611_v32 = vrot.slane %v610_v18, 1  ;;  %v2726_v2 = vmul.f32 0.0625, %v2724_v8  ;;  %v5439_v49 = vstv %s4819_s8  ;;  %s5136_s8 = smov 32  }
 0x398   : > { %v635_v19 = vrot.slane %v634_v15, 1  ;;  %v628_v20 = vrot.slane %v627_v16, 1  ;;  %v5447_v52 = vstv %s4826_s9  ;;  %v5455_v55 = vstv %s4833_s12  ;;  %s4834_s9 = sld [smem:[#allocation6 + $0x4e]] }
 0x399   : > { %v619_v37 = vadd.f32 %v618_v31, %v617_v17  ;;  %v612_v38 = vadd.f32 %v611_v32, %v610_v18  ;;  %v5463_v12 = vstv %s4840_s26  ;;  %v5479_v18 = vstv %s4813_s16  ;;  %s4841_s12 = sld [smem:[#allocation6 + $0x55]] }
 0x39a   : > { %v636_v25 = vmax.f32 %v634_v15, %v635_v19  ;;  %v629_v30 = vmax.f32 %v627_v16, %v628_v20  ;;  %v5471_v15 = vstv %s4847_s15  ;;  %v5487_v21 = vstv %s4820_s29  ;;  %s4848_s26 = sld [smem:[#allocation6 + $0x5c]] }
 0x39b   : > { %v622_v39 = vmul.f32 0.0625, %v619_v37  ;;  %v621_v40 = vmul.f32 0.0625, %v612_v38  ;;  %s4814_s15 = sld [smem:[#allocation6 + $0x3a]] }
 0x39c   : > { %654 = vrot.lane.b32.xlu1 %v636_v25, %s5130_s13  ;;  %652 = vrot.lane.b32.xlu0 %v629_v30, %s5130_s13  ;;  %v5495_v24 = vstv %s4827_s25  ;;  %s4821_s16 = sld [smem:[#allocation6 + $0x41]] }
 0x39d   : > { %s4828_s29 = sld [smem:[#allocation6 + $0x48]] }
 0x39e   : > { %v5503_v31 = vstv %s4834_s9  ;;  %s4835_s25 = sld [smem:[#allocation6 + $0x4f]] }
 0x39f   : > { %v5511_v1 = vstv %s4841_s12  ;;  %s4842_s9 = sld [smem:[#allocation6 + $0x56]] }
 0x3a0   : > { %2755 = vrot.lane.b32.xlu1 %v2733_v33, %s5130_s13  ;;  %2757 = vrot.lane.b32.xlu0 %v2740_v34, %s5130_s13  ;;  %v5519_v37 = vstv %s4848_s26  ;;  %s4849_s12 = sld [smem:[#allocation6 + $0x5d]] }
 0x3a1   : > { %s4815_s26 = sld [smem:[#allocation6 + $0x3b]] }
 0x3a4   : > { %641 = vrot.lane.b32.xlu1 %v622_v39, %s5130_s13  ;;  %639 = vrot.lane.b32.xlu0 %v621_v40, %s5130_s13  ;;  %v5527_v40 = vstv %s4814_s15  ;;  %s4822_s15 = sld [smem:[#allocation6 + $0x42]] }
 0x3a8   : > { %2743 = vrot.lane.b32.xlu1 %v2725_v9, %s5130_s13  ;;  %2745 = vrot.lane.b32.xlu0 %v2726_v2, %s5130_s13  ;;  %s5135_s13 = smov 48  }
 0x40e   : > { %v655_v43 = vpop.permute.xlu1 %654  ;;  %v653_v4 = vpop.permute.xlu0 %652 }
 0x40f   : > { %v5427_v44 = vsel %vm643_vm7, %v653_v4, %v655_v43  ;;  %v5430_v45 = vsel %vm643_vm7, 0.0, %v653_v4  ;;  %v5437_v48 = vsel %vm643_vm7, %v655_v43, 0.0  ;;  %v5541_v43 = vstv %s4821_s16  ;;  %s4829_s16 = sld [smem:[#allocation6 + $0x49]] }
 0x410   : > { %10587 = vst [vmem:[#allocation29_spill] sm:$0xff] %v5427_v44  ;;  %10588 = vst [vmem:[#allocation30_spill] sm:$0xff] %v5430_v45  ;;  %v693_v46 = vmul.f32 %v5424_v42, %v5430_v45  ;;  %v694_v47 = vmul.f32 %v5424_v42, %v5427_v44  ;;  %v695_v50 = vmul.f32 %v5424_v42, %v5437_v48 }
 0x411   : > { %v733_v51 = vmul.f32 %v5439_v49, %v5427_v44  ;;  %v732_v53 = vmul.f32 %v5439_v49, %v5430_v45  ;;  %v772_v54 = vmul.f32 %v5447_v52, %v5427_v44  ;;  %v734_v56 = vmul.f32 %v5439_v49, %v5437_v48 }
 0x412   : > { %699 = vrot.lane.b32.xlu1 %v693_v46, %s5131_s23  ;;  %701 = vrot.lane.b32.xlu0 %v694_v47, %s5131_s23  ;;  %v811_v11 = vmul.f32 %v5455_v55, %v5427_v44  ;;  %v771_v13 = vmul.f32 %v5447_v52, %v5430_v45  ;;  %v850_v14 = vmul.f32 %v5463_v12, %v5427_v44 }
 0x413   : > { %v773_v16 = vmul.f32 %v5447_v52, %v5437_v48  ;;  %v889_v17 = vmul.f32 %v5471_v15, %v5427_v44  ;;  %v810_v19 = vmul.f32 %v5455_v55, %v5430_v45  ;;  %v947_v20 = vmul.f32 %v5479_v18, %v5427_v44 }
 0x414   : > { %v812_v22 = vmul.f32 %v5455_v55, %v5437_v48  ;;  %v989_v23 = vmul.f32 %v5487_v21, %v5427_v44  ;;  %v849_v25 = vmul.f32 %v5463_v12, %v5430_v45  ;;  %v1031_v30 = vmul.f32 %v5495_v24, %v5427_v44 }
 0x415   : > { %v851_v32 = vmul.f32 %v5463_v12, %v5437_v48  ;;  %v1073_v0 = vmul.f32 %v5503_v31, %v5427_v44  ;;  %v888_v33 = vmul.f32 %v5471_v15, %v5430_v45  ;;  %v1115_v34 = vmul.f32 %v5511_v1, %v5427_v44 }
 0x416   : > { %703 = vrot.lane.b32.xlu1 %v695_v50, %s5131_s23  ;;  %740 = vrot.lane.b32.xlu0 %v733_v51, %s5132_s28  ;;  %v890_v38 = vmul.f32 %v5471_v15, %v5437_v48  ;;  %v1157_v39 = vmul.f32 %v5519_v37, %v5427_v44  ;;  %v946_v41 = vmul.f32 %v5479_v18, %v5430_v45  ;;  %v5555_v51 = vstv %s4828_s29  ;;  %s4836_s29 = sld [smem:[#allocation6 + $0x50]] }
 0x417   : > { %v1243_v8 = vmul.f32 %v5527_v40, %v5430_v45  ;;  %v948_v9 = vmul.f32 %v5479_v18, %v5437_v48  ;;  %v1245_v2 = vmul.f32 %v5527_v40, %v5437_v48  ;;  %v988_v4 = vmul.f32 %v5487_v21, %v5430_v45 }
 0x418   : > { %v1285_v46 = vmul.f32 %v5541_v43, %v5430_v45  ;;  %v990_v47 = vmul.f32 %v5487_v21, %v5437_v48  ;;  %v1287_v50 = vmul.f32 %v5541_v43, %v5437_v48 }
 0x41a   : > { %738 = vrot.lane.b32.xlu1 %v732_v53, %s5132_s28  ;;  %779 = vrot.lane.b32.xlu0 %v772_v54, %s5133_s10  ;;  %v1030_v53 = vmul.f32 %v5495_v24, %v5430_v45  ;;  %v1327_v54 = vmul.f32 %v5555_v51, %v5430_v45 }
 0x41e   : > { %742 = vrot.lane.b32.xlu1 %v734_v56, %s5132_s28  ;;  %818 = vrot.lane.b32.xlu0 %v811_v11, %s5134_s17  ;;  %v1032_v56 = vmul.f32 %v5495_v24, %v5437_v48  ;;  %v1329_v11 = vmul.f32 %v5555_v51, %v5437_v48 }
 0x422   : > { %777 = vrot.lane.b32.xlu1 %v771_v13, %s5133_s10  ;;  %857 = vrot.lane.b32.xlu0 %v850_v14, %s5135_s13  ;;  %v5569_v13 = vstv %s4835_s25  ;;  %v1072_v14 = vmul.f32 %v5503_v31, %v5430_v45  ;;  %s4843_s25 = sld [smem:[#allocation6 + $0x57]] }
 0x426   : > { %781 = vrot.lane.b32.xlu1 %v773_v16, %s5133_s10  ;;  %896 = vrot.lane.b32.xlu0 %v889_v17, %s5136_s8  ;;  %v1369_v16 = vmul.f32 %v5569_v13, %v5430_v45  ;;  %v1074_v17 = vmul.f32 %v5503_v31, %v5437_v48 }
 0x42a   : > { %816 = vrot.lane.b32.xlu1 %v810_v19, %s5134_s17  ;;  %954 = vrot.lane.b32.xlu0 %v947_v20, %s5131_s23  ;;  %v1371_v19 = vmul.f32 %v5569_v13, %v5437_v48  ;;  %v5583_v20 = vstv %s4842_s9  ;;  %s4850_s9 = sld [smem:[#allocation6 + $0x5e]] }
 0x42e   : > { %820 = vrot.lane.b32.xlu1 %v812_v22, %s5134_s17  ;;  %996 = vrot.lane.b32.xlu0 %v989_v23, %s5132_s28  ;;  %v1114_v22 = vmul.f32 %v5511_v1, %v5430_v45  ;;  %v1411_v23 = vmul.f32 %v5583_v20, %v5430_v45 }
 0x432   : > { %855 = vrot.lane.b32.xlu1 %v849_v25, %s5135_s13  ;;  %1038 = vrot.lane.b32.xlu0 %v1031_v30, %s5133_s10  ;;  %v1116_v25 = vmul.f32 %v5511_v1, %v5437_v48  ;;  %v1413_v30 = vmul.f32 %v5583_v20, %v5437_v48 }
 0x436   : > { %859 = vrot.lane.b32.xlu1 %v851_v32, %s5135_s13  ;;  %1080 = vrot.lane.b32.xlu0 %v1073_v0, %s5134_s17  ;;  %v5597_v32 = vstv %s4849_s12  ;;  %v1156_v0 = vmul.f32 %v5519_v37, %v5430_v45  ;;  %s4816_s12 = sld [smem:[#allocation6 + $0x3c]] }
 0x43a   : > { %894 = vrot.lane.b32.xlu1 %v888_v33, %s5136_s8  ;;  %1122 = vrot.lane.b32.xlu0 %v1115_v34, %s5135_s13  ;;  %v1453_v33 = vmul.f32 %v5597_v32, %v5430_v45  ;;  %v1158_v34 = vmul.f32 %v5519_v37, %v5437_v48 }
 0x43e   : > { %898 = vrot.lane.b32.xlu1 %v890_v38, %s5136_s8  ;;  %1164 = vrot.lane.b32.xlu0 %v1157_v39, %s5136_s8  ;;  %v1455_v38 = vmul.f32 %v5597_v32, %v5437_v48  ;;  %v5611_v39 = vstv %s4815_s26  ;;  %s4823_s26 = sld [smem:[#allocation6 + $0x43]] }
 0x442   : > { %952 = vrot.lane.b32.xlu1 %v946_v41, %s5131_s23  ;;  %1249 = vrot.lane.b32.xlu0 %v1243_v8, %s5131_s23  ;;  %v1244_v41 = vmul.f32 %v5527_v40, %v5427_v44  ;;  %v1539_v8 = vmul.f32 %v5611_v39, %v5427_v44 }
 0x446   : > { %956 = vrot.lane.b32.xlu1 %v948_v9, %s5131_s23  ;;  %1253 = vrot.lane.b32.xlu0 %v1245_v2, %s5131_s23  ;;  %v5619_v9 = vstv %s4822_s15  ;;  %v2756_v2 = vpop.permute.xlu1 %2755  ;;  %s492_s15 = sld [smem:[#allocation6]] }
 0x447   : > { %v1580_v27 = vmul.f32 %v5619_v9, %v5430_v45 }
 0x44a   : > { %994 = vrot.lane.b32.xlu1 %v988_v4, %s5132_s28  ;;  %1291 = vrot.lane.b32.xlu0 %v1285_v46, %s5132_s28  ;;  %v5623_v4 = vpop.permute.xlu0 %2757  ;;  %v1286_v46 = vmul.f32 %v5541_v43, %v5427_v44 }
 0x44e   : > { %998 = vrot.lane.b32.xlu1 %v990_v47, %s5132_s28  ;;  %1295 = vrot.lane.b32.xlu0 %v1287_v50, %s5132_s28  ;;  %v1581_v47 = vmul.f32 %v5619_v9, %v5427_v44  ;;  %v5629_v50 = vstv %s4829_s16  ;;  %s4805_s16 = sld [smem:[#allocation6 + $0x31]] }
 0x452   : > { %1036 = vrot.lane.b32.xlu1 %v1030_v53, %s5133_s10  ;;  %1333 = vrot.lane.b32.xlu0 %v1327_v54, %s5133_s10  ;;  %v1328_v53 = vmul.f32 %v5555_v51, %v5427_v44  ;;  %v1623_v54 = vmul.f32 %v5629_v50, %v5427_v44 }
 0x454   : > { %v5717_v26 = vstv %s4805_s16  ;;  %s4811_s16 = sld [smem:[#allocation6 + $0x37]] }
 0x455   : > { %10600 = vst [vmem:[#allocation42_spill] sm:$0xff] %v5717_v26 }
 0x456   : > { %1040 = vrot.lane.b32.xlu1 %v1032_v56, %s5133_s10  ;;  %1337 = vrot.lane.b32.xlu0 %v1329_v11, %s5133_s10  ;;  %v5637_v56 = vstv %s4836_s29  ;;  %v5639_v11 = vpop.permute.xlu1 %641  ;;  %s4830_s29 = sld [smem:[#allocation6 + $0x4a]] }
 0x45a   : > { %1078 = vrot.lane.b32.xlu1 %v1072_v14, %s5134_s17  ;;  %1375 = vrot.lane.b32.xlu0 %v1369_v16, %s5134_s17  ;;  %v5641_v14 = vpop.permute.xlu0 %639  ;;  %v1370_v16 = vmul.f32 %v5569_v13, %v5427_v44 }
 0x45e   : > { %1082 = vrot.lane.b32.xlu1 %v1074_v17, %s5134_s17  ;;  %1379 = vrot.lane.b32.xlu0 %v1371_v19, %s5134_s17  ;;  %v1665_v17 = vmul.f32 %v5637_v56, %v5427_v44  ;;  %v5649_v19 = vstv %s4843_s25  ;;  %s4837_s25 = sld [smem:[#allocation6 + $0x51]] }
 0x462   : > { %1120 = vrot.lane.b32.xlu1 %v1114_v22, %s5135_s13  ;;  %1417 = vrot.lane.b32.xlu0 %v1411_v23, %s5135_s13  ;;  %v2744_v22 = vpop.permute.xlu1 %2743  ;;  %v5653_v23 = vpop.permute.xlu0 %2745 }
 0x463   : > { %v5707_v29 = vsel %vm643_vm7, %v2744_v22, %v5653_v23 }
 0x464   : > { %10598 = vst [vmem:[#allocation40_spill] sm:$0xff] %v5707_v29 }
 0x466   : > { %1124 = vrot.lane.b32.xlu1 %v1116_v25, %s5135_s13  ;;  %1421 = vrot.lane.b32.xlu0 %v1413_v30, %s5135_s13  ;;  %v1412_v25 = vmul.f32 %v5583_v20, %v5427_v44  ;;  %v1707_v30 = vmul.f32 %v5649_v19, %v5427_v44 }
 0x46a   : > { %1162 = vrot.lane.b32.xlu1 %v1156_v0, %s5136_s8  ;;  %1459 = vrot.lane.b32.xlu0 %v1453_v33, %s5136_s8  ;;  %v5659_v0 = vstv %s4850_s9  ;;  %s4844_s9 = sld [smem:[#allocation6 + $0x58]] }
 0x46b   : > { %v1750_v61 = vmul.f32 %v5659_v0, %v5437_v48 }
 0x46e   : > { %1166 = vrot.lane.b32.xlu1 %v1158_v34, %s5136_s8  ;;  %1463 = vrot.lane.b32.xlu0 %v1455_v38, %s5136_s8  ;;  %v1454_v38 = vmul.f32 %v5597_v32, %v5427_v44 }
 0x472   : > { %1251 = vrot.lane.b32.xlu1 %v1244_v41, %s5131_s23  ;;  %1546 = vrot.lane.b32.xlu0 %v1539_v8, %s5131_s23  ;;  %v1749_v41 = vmul.f32 %v5659_v0, %v5427_v44  ;;  %v5671_v8 = vstv %s4816_s12  ;;  %s4760_s12 = sld [smem:[#allocation6 + $0x4]] }
 0x476   : > { %1293 = vrot.lane.b32.xlu1 %v1286_v46, %s5132_s28  ;;  %1588 = vrot.lane.b32.xlu0 %v1581_v47, %s5132_s28 }
 0x47a   : > { %1335 = vrot.lane.b32.xlu1 %v1328_v53, %s5133_s10  ;;  %1630 = vrot.lane.b32.xlu0 %v1623_v54, %s5133_s10  ;;  %v1538_v53 = vmul.f32 %v5611_v39, %v5430_v45  ;;  %v1820_v54 = vmul.f32 %v5671_v8, %v5430_v45 }
 0x47e   : > { %1377 = vrot.lane.b32.xlu1 %v1370_v16, %s5134_s17  ;;  %1672 = vrot.lane.b32.xlu0 %v1665_v17, %s5134_s17 }
 0x482   : > { %1419 = vrot.lane.b32.xlu1 %v1412_v25, %s5135_s13  ;;  %1714 = vrot.lane.b32.xlu0 %v1707_v30, %s5135_s13  ;;  %v1540_v25 = vmul.f32 %v5611_v39, %v5437_v48  ;;  %v1822_v30 = vmul.f32 %v5671_v8, %v5437_v48 }
 0x484   : > { %v5663_v33 = vpop.permute.xlu1 %699  ;;  %v5665_v34 = vpop.permute.xlu0 %701 }
 0x485   : > { %10589 = vst [vmem:[#allocation31_spill] sm:$0xff] %v5663_v33  ;;  %10590 = vst [vmem:[#allocation32_spill] sm:$0xff] %v5665_v34 }
 0x486   : > { %1461 = vrot.lane.b32.xlu1 %v1454_v38, %s5136_s8  ;;  %1756 = vrot.lane.b32.xlu0 %v1749_v41, %s5136_s8  ;;  %v5693_v38 = vstv %s4823_s26  ;;  %v5696_v41 = vsel %vm643_vm7, 0.0, %v2756_v2  ;;  %s4809_s26 = sld [smem:[#allocation6 + $0x35]] }
 0x487   : > { %10595 = vst [vmem:[#allocation37_spill] sm:$0xff] %v5696_v41  ;;  %v1862_v28 = vmul.f32 %v5693_v38, %v5430_v45 }
 0x488   : > { %v5675_v46 = vpop.permute.xlu1 %703  ;;  %v5677_v47 = vpop.permute.xlu0 %740 }
 0x489   : > { %10591 = vst [vmem:[#allocation33_spill] sm:$0xff] %v5675_v46  ;;  %10592 = vst [vmem:[#allocation34_spill] sm:$0xff] %v5677_v47  ;;  %v1864_v47 = vmul.f32 %v5693_v38, %v5437_v48  ;;  %v5745_v46 = vstv %s4830_s29  ;;  %s4762_s29 = sld [smem:[#allocation6 + $0x6]] }
 0x48a   : > { %1544 = vrot.lane.b32.xlu1 %v1538_v53, %s5131_s23  ;;  %1826 = vrot.lane.b32.xlu0 %v1820_v54, %s5131_s23  ;;  %v5700_v53 = vsel %vm643_vm7, %v2756_v2, %v5623_v4  ;;  %v5703_v54 = vsel %vm643_vm7, 0.0, %v2744_v22  ;;  %v5715_v2 = vstv %s492_s15  ;;  %s4851_s15 = sld [smem:[#allocation6 + $0x5f]] }
 0x48b   : > { %10596 = vst [vmem:[#allocation38_spill] sm:$0xff] %v5700_v53  ;;  %10597 = vst [vmem:[#allocation39_spill] sm:$0xff] %v5703_v54  ;;  %v2765_v22 = vmul.f32 %v5703_v54, %v5715_v2  ;;  %v2770_v5 = vmul.f32 %v5700_v53, %v5717_v26 }
 0x48c   : > { %v5685_v16 = vpop.permute.xlu1 %738  ;;  %v5687_v17 = vpop.permute.xlu0 %779  ;;  %10599 = vst [vmem:[#allocation41_spill] sm:$0xff] %v5715_v2 }
 0x48d   : > { %10593 = vst [vmem:[#allocation35_spill] sm:$0xff] %v5685_v16  ;;  %10594 = vst [vmem:[#allocation36_spill] sm:$0xff] %v5687_v17  ;;  %v1582_v16 = vmul.f32 %v5619_v9, %v5437_v48 }
 0x48e   : > { %1548 = vrot.lane.b32.xlu1 %v1540_v25, %s5131_s23  ;;  %1830 = vrot.lane.b32.xlu0 %v1822_v30, %s5131_s23  ;;  %v2766_v25 = vmul.f32 %v5707_v29, %v5715_v2  ;;  %v2769_v30 = vmul.f32 %v5696_v41, %v5717_v26  ;;  %v1708_v26 = vmul.f32 %v5649_v19, %v5437_v48 }
 0x48f   : > { %v5833_v2 = vstv %s4762_s29  ;;  %s4818_s29 = sld [smem:[#allocation6 + $0x3e]] }
 0x490   : > { %v5719_v6 = vpop.permute.xlu1 %742  ;;  %v5721_v36 = vpop.permute.xlu0 %818  ;;  %v5733_v35 = vadd.f32 %v2769_v30, %v2765_v22  ;;  %v5735_v17 = vadd.f32 %v2770_v5, %v2766_v25  ;;  %v1622_v5 = vmul.f32 %v5629_v50, %v5430_v45  ;;  %v1904_v22 = vmul.f32 %v5745_v46, %v5430_v45 }
 0x491   : > { %10601 = vst [vmem:[#allocation43_spill] sm:$0xff] %v5719_v6  ;;  %10602 = vst [vmem:[#allocation44_spill] sm:$0xff] %v5721_v36 }
 0x492   : > { %1586 = vrot.lane.b32.xlu1 %v1580_v27, %s5132_s28  ;;  %1868 = vrot.lane.b32.xlu0 %v1862_v28, %s5132_s28  ;;  %10603 = vst [vmem:[#allocation45_spill] sm:$0xff] %v5733_v35  ;;  %10604 = vst [vmem:[#allocation46_spill] sm:$0xff] %v5735_v17  ;;  %v5815_v35 = vstv %s4809_s26  ;;  %s4838_s26 = sld [smem:[#allocation6 + $0x52]] }
 0x493   : > { %10621 = vst [vmem:[#allocation63_spill] sm:$0xff] %v5815_v35  ;;  %v3807_v7 = vmul.f32 %v5700_v53, %v5815_v35 }
 0x494   : > { %v5737_v36 = vpop.permute.xlu1 %777  ;;  %v5739_v6 = vpop.permute.xlu0 %857 }
 0x495   : > { %10605 = vst [vmem:[#allocation47_spill] sm:$0xff] %v5737_v36  ;;  %10606 = vst [vmem:[#allocation48_spill] sm:$0xff] %v5739_v6  ;;  %v1664_v6 = vmul.f32 %v5637_v56, %v5430_v45  ;;  %v5789_v36 = vstv %s4844_s9  ;;  %s5831_s9 = sld [smem:[#allocation6 + $0x3d]] }
 0x496   : > { %1590 = vrot.lane.b32.xlu1 %v1582_v16, %s5132_s28  ;;  %1872 = vrot.lane.b32.xlu0 %v1864_v47, %s5132_s28  ;;  %v1624_v47 = vmul.f32 %v5629_v50, %v5437_v48  ;;  %v1906_v16 = vmul.f32 %v5745_v46, %v5437_v48  ;;  %10615 = vst [vmem:[#allocation57_spill] sm:$0xff] %v5789_v36 }
 0x498   : > { %v5749_v27 = vpop.permute.xlu1 %781  ;;  %v5751_v28 = vpop.permute.xlu0 %896 }
 0x499   : > { %10607 = vst [vmem:[#allocation49_spill] sm:$0xff] %v5749_v27  ;;  %10608 = vst [vmem:[#allocation50_spill] sm:$0xff] %v5751_v28  ;;  %v5767_v28 = vstv %s4837_s25  ;;  %s4761_s25 = sld [smem:[#allocation6 + $0x5]] }
 0x49a   : > { %1628 = vrot.lane.b32.xlu1 %v1622_v5, %s5133_s10  ;;  %1910 = vrot.lane.b32.xlu0 %v1904_v22, %s5133_s10  ;;  %v1948_v27 = vmul.f32 %v5767_v28, %v5437_v48 }
 0x49c   : > { %v5759_v25 = vpop.permute.xlu1 %816  ;;  %v5761_v30 = vpop.permute.xlu0 %954 }
 0x49d   : > { %10609 = vst [vmem:[#allocation51_spill] sm:$0xff] %v5759_v25  ;;  %10610 = vst [vmem:[#allocation52_spill] sm:$0xff] %v5761_v30  ;;  %v1946_v25 = vmul.f32 %v5767_v28, %v5430_v45  ;;  %v3806_v30 = vmul.f32 %v5696_v41, %v5815_v35 }
 0x49e   : > { %1632 = vrot.lane.b32.xlu1 %v1624_v47, %s5133_s10  ;;  %1914 = vrot.lane.b32.xlu0 %v1906_v16, %s5133_s10 }
 0x4a0   : > { %v5771_v5 = vpop.permute.xlu1 %820  ;;  %v5773_v22 = vpop.permute.xlu0 %996 }
 0x4a1   : > { %10611 = vst [vmem:[#allocation53_spill] sm:$0xff] %v5771_v5  ;;  %10612 = vst [vmem:[#allocation54_spill] sm:$0xff] %v5773_v22  ;;  %v1666_v5 = vmul.f32 %v5637_v56, %v5437_v48 }
 0x4a2   : > { %1670 = vrot.lane.b32.xlu1 %v1664_v6, %s5134_s17  ;;  %1952 = vrot.lane.b32.xlu0 %v1946_v25, %s5134_s17  ;;  %v5797_v6 = vsel %vm643_vm7, %v5623_v4, 0.0  ;;  %v5801_v25 = vsel %vm643_vm7, %v5653_v23, 0.0  ;;  %v5813_v4 = vstv %s4760_s12  ;;  %s4831_s12 = sld [smem:[#allocation6 + $0x4b]] }
 0x4a3   : > { %10616 = vst [vmem:[#allocation58_spill] sm:$0xff] %v5797_v6  ;;  %10617 = vst [vmem:[#allocation59_spill] sm:$0xff] %v5801_v25  ;;  %v3802_v23 = vmul.f32 %v5801_v25, %v5813_v4  ;;  %v3801_v22 = vmul.f32 %v5707_v29, %v5813_v4 }
 0x4a4   : > { %v5781_v47 = vpop.permute.xlu1 %855  ;;  %v5783_v16 = vpop.permute.xlu0 %1038  ;;  %10620 = vst [vmem:[#allocation62_spill] sm:$0xff] %v5813_v4 }
 0x4a5   : > { %10613 = vst [vmem:[#allocation55_spill] sm:$0xff] %v5781_v47  ;;  %10614 = vst [vmem:[#allocation56_spill] sm:$0xff] %v5783_v16  ;;  %v5866_v3 = vadd.f32 %v3807_v7, %v3801_v22 }
 0x4a6   : > { %1674 = vrot.lane.b32.xlu1 %v1666_v5, %s5134_s17  ;;  %1956 = vrot.lane.b32.xlu0 %v1948_v27, %s5134_s17  ;;  %v1706_v5 = vmul.f32 %v5649_v19, %v5430_v45  ;;  %v1988_v27 = vmul.f32 %v5789_v36, %v5430_v45 }
 0x4a7   : > { %10630 = vst [vmem:[#allocation72_spill] sm:$0xff] %v5866_v3 }
 0x4a8   : > { %v5803_v47 = vpop.permute.xlu1 %859  ;;  %v5805_v17 = vpop.permute.xlu0 %1080 }
 0x4a9   : > { %10618 = vst [vmem:[#allocation60_spill] sm:$0xff] %v5803_v47  ;;  %10619 = vst [vmem:[#allocation61_spill] sm:$0xff] %v5805_v17  ;;  %v3808_v47 = vmul.f32 %v5797_v6, %v5815_v35  ;;  %v5835_v17 = vstv %s4811_s16  ;;  %s4852_s16 = sld [smem:[#allocation6 + $0x60]] }
 0x4aa   : > { %1712 = vrot.lane.b32.xlu1 %v1706_v5, %s5135_s13  ;;  %1994 = vrot.lane.b32.xlu0 %v1988_v27, %s5135_s13  ;;  %v1990_v5 = vmul.f32 %v5789_v36, %v5437_v48  ;;  %v5829_v27 = vstv %s4851_s15  ;;  %v4346_v22 = vmul.f32 %v5696_v41, %v5835_v17  ;;  %s4845_s15 = sld [smem:[#allocation6 + $0x59]] }
 0x4ab   : > { %10624 = vst [vmem:[#allocation66_spill] sm:$0xff] %v5829_v27  ;;  %v5837_v16 = vadd.f32 %v3808_v47, %v3802_v23  ;;  %v1748_v47 = vmul.f32 %v5659_v0, %v5430_v45  ;;  %v2030_v23 = vmul.f32 %v5829_v27, %v5430_v45 }
 0x4ac   : > { %v5821_v33 = vpop.permute.xlu1 %894  ;;  %v5823_v34 = vpop.permute.xlu0 %1122 }
 0x4ad   : > { %10622 = vst [vmem:[#allocation64_spill] sm:$0xff] %v5821_v33  ;;  %10623 = vst [vmem:[#allocation65_spill] sm:$0xff] %v5823_v34  ;;  %v3800_v33 = vmul.f32 %v5703_v54, %v5813_v4  ;;  %v5843_v34 = vstv %s4761_s25  ;;  %s4825_s25 = sld [smem:[#allocation6 + $0x45]] }
 0x4ae   : > { %10625 = vst [vmem:[#allocation67_spill] sm:$0xff] %v5837_v16  ;;  %1716 = vrot.lane.b32.xlu1 %v1708_v26, %s5135_s13  ;;  %1998 = vrot.lane.b32.xlu0 %v1990_v5, %s5135_s13  ;;  %v5856_v26 = vstv %s5793_s14  ;;  %v4072_v5 = vmul.f32 %v5801_v25, %v5843_v34  ;;  %v4070_v63 = vmul.f32 %v5703_v54, %v5843_v34  ;;  %s4824_s14 = sld [smem:[#allocation6 + $0x44]] }
 0x4af   : > { %10626 = vst [vmem:[#allocation68_spill] sm:$0xff] %v5856_v26  ;;  %v5864_v10 = vadd.f32 %v3806_v30, %v3800_v33  ;;  %v4078_v35 = vmul.f32 %v5797_v6, %v5856_v26  ;;  %v4071_v62 = vmul.f32 %v5707_v29, %v5843_v34  ;;  %v4077_v7 = vmul.f32 %v5700_v53, %v5856_v26 }
 0x4b0   : > { %v5860_v16 = vpop.permute.xlu1 %898  ;;  %v5862_v4 = vpop.permute.xlu0 %1164  ;;  %v4340_v30 = vmul.f32 %v5703_v54, %v5833_v2 }
 0x4b1   : > { %10627 = vst [vmem:[#allocation69_spill] sm:$0xff] %v5860_v16  ;;  %10628 = vst [vmem:[#allocation70_spill] sm:$0xff] %v5862_v4  ;;  %v4076_v16 = vmul.f32 %v5696_v41, %v5856_v26  ;;  %v5882_v33 = vadd.f32 %v4078_v35, %v4072_v5  ;;  %v4341_v4 = vmul.f32 %v5707_v29, %v5833_v2 }
 0x4b2   : > { %10629 = vst [vmem:[#allocation71_spill] sm:$0xff] %v5864_v10  ;;  %1754 = vrot.lane.b32.xlu1 %v1748_v47, %s5136_s8  ;;  %2036 = vrot.lane.b32.xlu0 %v2030_v23, %s5136_s8  ;;  %v5890_v10 = vadd.f32 %v4077_v7, %v4071_v62  ;;  %v4342_v47 = vmul.f32 %v5801_v25, %v5833_v2 }
 0x4b3   : > { %10631 = vst [vmem:[#allocation73_spill] sm:$0xff] %v5882_v33  ;;  %v5888_v3 = vadd.f32 %v4076_v16, %v4070_v63  ;;  %v2032_v23 = vmul.f32 %v5829_v27, %v5437_v48  ;;  %v5902_v5 = vadd.f32 %v4346_v22, %v4340_v30  ;;  %v4347_v63 = vmul.f32 %v5700_v53, %v5835_v17 }
 0x4b4   : > { %10633 = vst [vmem:[#allocation75_spill] sm:$0xff] %v5890_v10  ;;  %v5896_v26 = vpop.permute.xlu1 %952  ;;  %v5898_v35 = vpop.permute.xlu0 %1249  ;;  %v4348_v62 = vmul.f32 %v5797_v6, %v5835_v17  ;;  %v5909_v16 = vstv %s5831_s9  ;;  %v1821_v22 = vmul.f32 %v5671_v8, %v5427_v44  ;;  %s4832_s9 = sld [smem:[#allocation6 + $0x4c]] }
 0x4b5   : > { %10632 = vst [vmem:[#allocation74_spill] sm:$0xff] %v5888_v3  ;;  %10634 = vst [vmem:[#allocation76_spill] sm:$0xff] %v5896_v26  ;;  %v5913_v7 = vadd.f32 %v4347_v63, %v4341_v4  ;;  %v5925_v3 = vstv %s4824_s14  ;;  %v5937_v63 = vstv %s4831_s12  ;;  %s4839_s14 = sld [smem:[#allocation6 + $0x53]] }
 0x4b6   : > { %10635 = vst [vmem:[#allocation77_spill] sm:$0xff] %v5898_v35  ;;  %10636 = vst [vmem:[#allocation78_spill] sm:$0xff] %v5902_v5  ;;  %1758 = vrot.lane.b32.xlu1 %v1750_v61, %s5136_s8  ;;  %2040 = vrot.lane.b32.xlu0 %v2032_v23, %s5136_s8  ;;  %v5915_v10 = vadd.f32 %v4348_v62, %v4342_v47  ;;  %v2116_v5 = vmul.f32 %v5909_v16, %v5427_v44  ;;  %s4846_s12 = sld [smem:[#allocation6 + $0x5a]] }
 0x4b7   : > { %10637 = vst [vmem:[#allocation79_spill] sm:$0xff] %v5913_v7  ;;  %10641 = vst [vmem:[#allocation83_spill] sm:$0xff] %v5925_v3  ;;  %v1863_v47 = vmul.f32 %v5693_v38, %v5427_v44  ;;  %v2158_v23 = vmul.f32 %v5925_v3, %v5427_v44  ;;  %v2200_v7 = vmul.f32 %v5937_v63, %v5427_v44 }
 0x4b8   : > { %10638 = vst [vmem:[#allocation80_spill] sm:$0xff] %v5915_v10  ;;  %v5917_v33 = vpop.permute.xlu1 %956  ;;  %v5919_v30 = vpop.permute.xlu0 %1253  ;;  %10644 = vst [vmem:[#allocation86_spill] sm:$0xff] %v5937_v63  ;;  %v5949_v10 = vstv %s4838_s26  ;;  %s4853_s26 = sld [smem:[#allocation6 + $0x61]] }
 0x4b9   : > { %10639 = vst [vmem:[#allocation81_spill] sm:$0xff] %v5917_v33  ;;  %10640 = vst [vmem:[#allocation82_spill] sm:$0xff] %v5919_v30  ;;  %v5961_v30 = vstv %s4845_s15  ;;  %s4763_s15 = sld [smem:[#allocation6 + $0x7]] }
 0x4ba   : > { %1828 = vrot.lane.b32.xlu1 %v1821_v22, %s5131_s23  ;;  %2123 = vrot.lane.b32.xlu0 %v2116_v5, %s5131_s23  ;;  %v1905_v22 = vmul.f32 %v5745_v46, %v5427_v44  ;;  %10647 = vst [vmem:[#allocation89_spill] sm:$0xff] %v5949_v10  ;;  %10650 = vst [vmem:[#allocation92_spill] sm:$0xff] %v5961_v30  ;;  %v2284_v35 = vmul.f32 %v5961_v30, %v5427_v44 }
 0x4bc   : > { %v5929_v61 = vpop.permute.xlu1 %994  ;;  %v5931_v4 = vpop.permute.xlu0 %1291 }
 0x4bd   : > { %10642 = vst [vmem:[#allocation84_spill] sm:$0xff] %v5929_v61  ;;  %10643 = vst [vmem:[#allocation85_spill] sm:$0xff] %v5931_v4  ;;  %v2242_v4 = vmul.f32 %v5949_v10, %v5427_v44 }
 0x4be   : > { %1870 = vrot.lane.b32.xlu1 %v1863_v47, %s5132_s28  ;;  %2165 = vrot.lane.b32.xlu0 %v2158_v23, %s5132_s28 }
 0x4c0   : > { %v5941_v62 = vpop.permute.xlu1 %998  ;;  %v5943_v5 = vpop.permute.xlu0 %1295 }
 0x4c1   : > { %10645 = vst [vmem:[#allocation87_spill] sm:$0xff] %v5941_v62  ;;  %10646 = vst [vmem:[#allocation88_spill] sm:$0xff] %v5943_v5  ;;  %v1947_v5 = vmul.f32 %v5767_v28, %v5427_v44 }
 0x4c2   : > { %1912 = vrot.lane.b32.xlu1 %v1905_v22, %s5133_s10  ;;  %2207 = vrot.lane.b32.xlu0 %v2200_v7, %s5133_s10 }
 0x4c4   : > { %v5953_v47 = vpop.permute.xlu1 %1036  ;;  %v5955_v23 = vpop.permute.xlu0 %1333 }
 0x4c5   : > { %10648 = vst [vmem:[#allocation90_spill] sm:$0xff] %v5953_v47  ;;  %10649 = vst [vmem:[#allocation91_spill] sm:$0xff] %v5955_v23  ;;  %v1989_v23 = vmul.f32 %v5789_v36, %v5427_v44  ;;  %v5973_v47 = vstv %s4852_s16  ;;  %s4770_s16 = sld [smem:[#allocation6 + $0xe]] }
 0x4c6   : > { %1954 = vrot.lane.b32.xlu1 %v1947_v5, %s5134_s17  ;;  %2249 = vrot.lane.b32.xlu0 %v2242_v4, %s5134_s17  ;;  %10653 = vst [vmem:[#allocation95_spill] sm:$0xff] %v5973_v47  ;;  %v2031_v4 = vmul.f32 %v5829_v27, %v5427_v44 }
 0x4c8   : > { %v5965_v22 = vpop.permute.xlu1 %1040  ;;  %v5967_v7 = vpop.permute.xlu0 %1337 }
 0x4c9   : > { %10651 = vst [vmem:[#allocation93_spill] sm:$0xff] %v5965_v22  ;;  %10652 = vst [vmem:[#allocation94_spill] sm:$0xff] %v5967_v7  ;;  %v2326_v7 = vmul.f32 %v5973_v47, %v5427_v44  ;;  %v5985_v22 = vstv %s4818_s29  ;;  %s4777_s29 = sld [smem:[#allocation6 + $0x15]] }
 0x4ca   : > { %1996 = vrot.lane.b32.xlu1 %v1989_v23, %s5135_s13  ;;  %2291 = vrot.lane.b32.xlu0 %v2284_v35, %s5135_s13  ;;  %v2411_v27 = vmul.f32 %v5985_v22, %v5430_v45 }
 0x4cc   : > { %v5977_v62 = vpop.permute.xlu1 %1078  ;;  %v5979_v5 = vpop.permute.xlu0 %1375 }
 0x4cd   : > { %10654 = vst [vmem:[#allocation96_spill] sm:$0xff] %v5977_v62  ;;  %10655 = vst [vmem:[#allocation97_spill] sm:$0xff] %v5979_v5  ;;  %v2115_v5 = vmul.f32 %v5909_v16, %v5430_v45 }
 0x4ce   : > { %2038 = vrot.lane.b32.xlu1 %v2031_v4, %s5136_s8  ;;  %2333 = vrot.lane.b32.xlu0 %v2326_v7, %s5136_s8  ;;  %v2117_v7 = vmul.f32 %v5909_v16, %v5437_v48  ;;  %v2413_v4 = vmul.f32 %v5985_v22, %v5437_v48 }
 0x4d0   : > { %v5989_v23 = vpop.permute.xlu1 %1082  ;;  %v5991_v35 = vpop.permute.xlu0 %1379 }
 0x4d1   : > { %10656 = vst [vmem:[#allocation98_spill] sm:$0xff] %v5989_v23  ;;  %10657 = vst [vmem:[#allocation99_spill] sm:$0xff] %v5991_v35  ;;  %v6007_v35 = vstv %s4825_s25  ;;  %s4784_s25 = sld [smem:[#allocation6 + $0x1c]] }
 0x4d2   : > { %2121 = vrot.lane.b32.xlu1 %v2115_v5, %s5131_s23  ;;  %2417 = vrot.lane.b32.xlu0 %v2411_v27, %s5131_s23  ;;  %10660 = vst [vmem:[#allocation102_spill] sm:$0xff] %v6007_v35 }
 0x4d4   : > { %v5999_v62 = vpop.permute.xlu1 %1120  ;;  %v6001_v61 = vpop.permute.xlu0 %1417 }
 0x4d5   : > { %10658 = vst [vmem:[#allocation100_spill] sm:$0xff] %v5999_v62  ;;  %10659 = vst [vmem:[#allocation101_spill] sm:$0xff] %v6001_v61  ;;  %v2157_v61 = vmul.f32 %v5925_v3, %v5430_v45  ;;  %v2453_v62 = vmul.f32 %v6007_v35, %v5430_v45 }
 0x4d6   : > { %2125 = vrot.lane.b32.xlu1 %v2117_v7, %s5131_s23  ;;  %2421 = vrot.lane.b32.xlu0 %v2413_v4, %s5131_s23  ;;  %v2159_v7 = vmul.f32 %v5925_v3, %v5437_v48  ;;  %v2455_v4 = vmul.f32 %v6007_v35, %v5437_v48 }
 0x4d8   : > { %v6011_v5 = vpop.permute.xlu1 %1124  ;;  %v6013_v27 = vpop.permute.xlu0 %1421 }
 0x4d9   : > { %10661 = vst [vmem:[#allocation103_spill] sm:$0xff] %v6011_v5  ;;  %10662 = vst [vmem:[#allocation104_spill] sm:$0xff] %v6013_v27  ;;  %v6029_v27 = vstv %s4832_s9  ;;  %s4791_s9 = sld [smem:[#allocation6 + $0x23]] }
 0x4da   : > { %2163 = vrot.lane.b32.xlu1 %v2157_v61, %s5132_s28  ;;  %2459 = vrot.lane.b32.xlu0 %v2453_v62, %s5132_s28  ;;  %10665 = vst [vmem:[#allocation107_spill] sm:$0xff] %v6029_v27 }
 0x4dc   : > { %v6021_v23 = vpop.permute.xlu1 %1162  ;;  %v6023_v33 = vpop.permute.xlu0 %1459 }
 0x4dd   : > { %10663 = vst [vmem:[#allocation105_spill] sm:$0xff] %v6021_v23  ;;  %10664 = vst [vmem:[#allocation106_spill] sm:$0xff] %v6023_v33  ;;  %v2199_v33 = vmul.f32 %v5937_v63, %v5430_v45  ;;  %v2495_v23 = vmul.f32 %v6029_v27, %v5430_v45 }
 0x4de   : > { %2167 = vrot.lane.b32.xlu1 %v2159_v7, %s5132_s28  ;;  %2463 = vrot.lane.b32.xlu0 %v2455_v4, %s5132_s28  ;;  %v2201_v7 = vmul.f32 %v5937_v63, %v5437_v48  ;;  %v2497_v4 = vmul.f32 %v6029_v27, %v5437_v48 }
 0x4e0   : > { %v6033_v61 = vpop.permute.xlu1 %1166  ;;  %v6035_v62 = vpop.permute.xlu0 %1463 }
 0x4e1   : > { %10666 = vst [vmem:[#allocation108_spill] sm:$0xff] %v6033_v61  ;;  %10667 = vst [vmem:[#allocation109_spill] sm:$0xff] %v6035_v62  ;;  %v6051_v62 = vstv %s4839_s14  ;;  %s4798_s14 = sld [smem:[#allocation6 + $0x2a]] }
 0x4e2   : > { %2205 = vrot.lane.b32.xlu1 %v2199_v33, %s5133_s10  ;;  %2501 = vrot.lane.b32.xlu0 %v2495_v23, %s5133_s10  ;;  %10670 = vst [vmem:[#allocation112_spill] sm:$0xff] %v6051_v62 }
 0x4e4   : > { %v6043_v5 = vpop.permute.xlu1 %1251  ;;  %v6045_v26 = vpop.permute.xlu0 %1546 }
 0x4e5   : > { %10668 = vst [vmem:[#allocation110_spill] sm:$0xff] %v6043_v5  ;;  %10669 = vst [vmem:[#allocation111_spill] sm:$0xff] %v6045_v26  ;;  %v2241_v26 = vmul.f32 %v5949_v10, %v5430_v45  ;;  %v2537_v5 = vmul.f32 %v6051_v62, %v5430_v45 }
 0x4e6   : > { %2209 = vrot.lane.b32.xlu1 %v2201_v7, %s5133_s10  ;;  %2505 = vrot.lane.b32.xlu0 %v2497_v4, %s5133_s10  ;;  %v2243_v7 = vmul.f32 %v5949_v10, %v5437_v48  ;;  %v2539_v4 = vmul.f32 %v6051_v62, %v5437_v48 }
 0x4e8   : > { %v6055_v33 = vpop.permute.xlu1 %1293  ;;  %v6057_v23 = vpop.permute.xlu0 %1588 }
 0x4e9   : > { %10671 = vst [vmem:[#allocation113_spill] sm:$0xff] %v6055_v33  ;;  %10672 = vst [vmem:[#allocation114_spill] sm:$0xff] %v6057_v23  ;;  %v6073_v23 = vstv %s4846_s12  ;;  %s4764_s12 = sld [smem:[#allocation6 + $0x8]] }
 0x4ea   : > { %2247 = vrot.lane.b32.xlu1 %v2241_v26, %s5134_s17  ;;  %2543 = vrot.lane.b32.xlu0 %v2537_v5, %s5134_s17  ;;  %10675 = vst [vmem:[#allocation117_spill] sm:$0xff] %v6073_v23 }
 0x4ec   : > { %v6065_v61 = vpop.permute.xlu1 %1335  ;;  %v6067_v36 = vpop.permute.xlu0 %1630 }
 0x4ed   : > { %10673 = vst [vmem:[#allocation115_spill] sm:$0xff] %v6065_v61  ;;  %10674 = vst [vmem:[#allocation116_spill] sm:$0xff] %v6067_v36  ;;  %v2283_v36 = vmul.f32 %v5961_v30, %v5430_v45  ;;  %v2579_v61 = vmul.f32 %v6073_v23, %v5430_v45 }
 0x4ee   : > { %2251 = vrot.lane.b32.xlu1 %v2243_v7, %s5134_s17  ;;  %2547 = vrot.lane.b32.xlu0 %v2539_v4, %s5134_s17  ;;  %v2285_v7 = vmul.f32 %v5961_v30, %v5437_v48  ;;  %v2581_v4 = vmul.f32 %v6073_v23, %v5437_v48 }
 0x4f0   : > { %v6077_v26 = vpop.permute.xlu1 %1377  ;;  %v6079_v5 = vpop.permute.xlu0 %1672 }
 0x4f1   : > { %10676 = vst [vmem:[#allocation118_spill] sm:$0xff] %v6077_v26  ;;  %10677 = vst [vmem:[#allocation119_spill] sm:$0xff] %v6079_v5  ;;  %v6095_v5 = vstv %s4853_s26  ;;  %s4771_s26 = sld [smem:[#allocation6 + $0xf]] }
 0x4f2   : > { %2289 = vrot.lane.b32.xlu1 %v2283_v36, %s5135_s13  ;;  %2585 = vrot.lane.b32.xlu0 %v2579_v61, %s5135_s13  ;;  %10680 = vst [vmem:[#allocation122_spill] sm:$0xff] %v6095_v5  ;;  %v2325_v61 = vmul.f32 %v5973_v47, %v5430_v45 }
 0x4f4   : > { %v6087_v33 = vpop.permute.xlu1 %1419  ;;  %v6089_v10 = vpop.permute.xlu0 %1714 }
 0x4f5   : > { %10678 = vst [vmem:[#allocation120_spill] sm:$0xff] %v6087_v33  ;;  %10679 = vst [vmem:[#allocation121_spill] sm:$0xff] %v6089_v10  ;;  %v2621_v10 = vmul.f32 %v6095_v5, %v5430_v45 }
 0x4f6   : > { %2293 = vrot.lane.b32.xlu1 %v2285_v7, %s5135_s13  ;;  %2589 = vrot.lane.b32.xlu0 %v2581_v4, %s5135_s13  ;;  %v2327_v7 = vmul.f32 %v5973_v47, %v5437_v48  ;;  %v2623_v4 = vmul.f32 %v6095_v5, %v5437_v48 }
 0x4f8   : > { %v6099_v26 = vpop.permute.xlu1 %1461  ;;  %v6101_v36 = vpop.permute.xlu0 %1756 }
 0x4f9   : > { %10681 = vst [vmem:[#allocation123_spill] sm:$0xff] %v6099_v26  ;;  %10682 = vst [vmem:[#allocation124_spill] sm:$0xff] %v6101_v36 }
 0x4fa   : > { %2331 = vrot.lane.b32.xlu1 %v2325_v61, %s5136_s8  ;;  %2627 = vrot.lane.b32.xlu0 %v2621_v10, %s5136_s8  ;;  %v2412_v10 = vmul.f32 %v5985_v22, %v5427_v44  ;;  %v2791_v61 = vmul.f32 %v5696_v41, %v5424_v42 }
 0x4fc   : > { %v6109_v30 = vpop.permute.xlu1 %1544  ;;  %v6111_v33 = vpop.permute.xlu0 %1826 }
 0x4fd   : > { %10683 = vst [vmem:[#allocation125_spill] sm:$0xff] %v6109_v30  ;;  %10684 = vst [vmem:[#allocation126_spill] sm:$0xff] %v6111_v33 }
 0x4fe   : > { %2335 = vrot.lane.b32.xlu1 %v2327_v7, %s5136_s8  ;;  %2631 = vrot.lane.b32.xlu0 %v2623_v4, %s5136_s8  ;;  %v2454_v7 = vmul.f32 %v6007_v35, %v5427_v44  ;;  %v2793_v4 = vmul.f32 %v5797_v6, %v5424_v42 }
 0x500   : > { %v6119_v36 = vpop.permute.xlu1 %1548  ;;  %v6121_v26 = vpop.permute.xlu0 %1830 }
 0x501   : > { %10685 = vst [vmem:[#allocation127_spill] sm:$0xff] %v6119_v36  ;;  %10686 = vst [vmem:[#allocation128_spill] sm:$0xff] %v6121_v26 }
 0x502   : > { %2419 = vrot.lane.b32.xlu1 %v2412_v10, %s5131_s23  ;;  %2797 = vrot.lane.b32.xlu0 %v2791_v61, %s5131_s23  ;;  %v2496_v10 = vmul.f32 %v6029_v27, %v5427_v44  ;;  %v2827_v61 = vmul.f32 %v5696_v41, %v5439_v49 }
 0x504   : > { %v6129_v47 = vpop.permute.xlu1 %1586  ;;  %v6131_v33 = vpop.permute.xlu0 %1868 }
 0x505   : > { %10687 = vst [vmem:[#allocation129_spill] sm:$0xff] %v6129_v47  ;;  %10688 = vst [vmem:[#allocation130_spill] sm:$0xff] %v6131_v33 }
 0x506   : > { %2461 = vrot.lane.b32.xlu1 %v2454_v7, %s5132_s28  ;;  %2801 = vrot.lane.b32.xlu0 %v2793_v4, %s5131_s23  ;;  %v2538_v7 = vmul.f32 %v6051_v62, %v5427_v44  ;;  %v2829_v4 = vmul.f32 %v5797_v6, %v5439_v49 }
 0x508   : > { %v6139_v26 = vpop.permute.xlu1 %1590  ;;  %v6141_v36 = vpop.permute.xlu0 %1872 }
 0x509   : > { %10689 = vst [vmem:[#allocation131_spill] sm:$0xff] %v6139_v26  ;;  %10690 = vst [vmem:[#allocation132_spill] sm:$0xff] %v6141_v36 }
 0x50a   : > { %2503 = vrot.lane.b32.xlu1 %v2496_v10, %s5133_s10  ;;  %2833 = vrot.lane.b32.xlu0 %v2827_v61, %s5132_s28  ;;  %v2580_v10 = vmul.f32 %v6073_v23, %v5427_v44  ;;  %v2863_v61 = vmul.f32 %v5696_v41, %v5447_v52 }
 0x50c   : > { %v6149_v33 = vpop.permute.xlu1 %1628  ;;  %v6151_v47 = vpop.permute.xlu0 %1910 }
 0x50d   : > { %10691 = vst [vmem:[#allocation133_spill] sm:$0xff] %v6149_v33  ;;  %10692 = vst [vmem:[#allocation134_spill] sm:$0xff] %v6151_v47 }
 0x50e   : > { %2545 = vrot.lane.b32.xlu1 %v2538_v7, %s5134_s17  ;;  %2837 = vrot.lane.b32.xlu0 %v2829_v4, %s5132_s28  ;;  %v2622_v7 = vmul.f32 %v6095_v5, %v5427_v44  ;;  %v2865_v4 = vmul.f32 %v5797_v6, %v5447_v52 }
 0x510   : > { %v6159_v36 = vpop.permute.xlu1 %1632  ;;  %v6161_v26 = vpop.permute.xlu0 %1914 }
 0x511   : > { %10693 = vst [vmem:[#allocation135_spill] sm:$0xff] %v6159_v36  ;;  %10694 = vst [vmem:[#allocation136_spill] sm:$0xff] %v6161_v26 }
 0x512   : > { %2587 = vrot.lane.b32.xlu1 %v2580_v10, %s5135_s13  ;;  %2869 = vrot.lane.b32.xlu0 %v2863_v61, %s5133_s10  ;;  %v2792_v10 = vmul.f32 %v5700_v53, %v5424_v42  ;;  %v2899_v61 = vmul.f32 %v5696_v41, %v5455_v55 }
 0x514   : > { %v6169_v47 = vpop.permute.xlu1 %1670  ;;  %v6171_v33 = vpop.permute.xlu0 %1952 }
 0x515   : > { %10695 = vst [vmem:[#allocation137_spill] sm:$0xff] %v6169_v47  ;;  %10696 = vst [vmem:[#allocation138_spill] sm:$0xff] %v6171_v33 }
 0x516   : > { %2629 = vrot.lane.b32.xlu1 %v2622_v7, %s5136_s8  ;;  %2873 = vrot.lane.b32.xlu0 %v2865_v4, %s5133_s10  ;;  %v2828_v7 = vmul.f32 %v5700_v53, %v5439_v49  ;;  %v2901_v4 = vmul.f32 %v5797_v6, %v5455_v55 }
 0x518   : > { %v6179_v23 = vpop.permute.xlu1 %1674  ;;  %v6181_v26 = vpop.permute.xlu0 %1956 }
 0x519   : > { %10697 = vst [vmem:[#allocation139_spill] sm:$0xff] %v6179_v23  ;;  %10698 = vst [vmem:[#allocation140_spill] sm:$0xff] %v6181_v26 }
 0x51a   : > { %2799 = vrot.lane.b32.xlu1 %v2792_v10, %s5131_s23  ;;  %2905 = vrot.lane.b32.xlu0 %v2899_v61, %s5134_s17  ;;  %v2864_v10 = vmul.f32 %v5700_v53, %v5447_v52  ;;  %v2935_v61 = vmul.f32 %v5696_v41, %v5463_v12 }
 0x51c   : > { %v6189_v5 = vpop.permute.xlu1 %1712  ;;  %v6191_v33 = vpop.permute.xlu0 %1994 }
 0x51d   : > { %10699 = vst [vmem:[#allocation141_spill] sm:$0xff] %v6189_v5  ;;  %10700 = vst [vmem:[#allocation142_spill] sm:$0xff] %v6191_v33 }
 0x51e   : > { %2835 = vrot.lane.b32.xlu1 %v2828_v7, %s5132_s28  ;;  %2909 = vrot.lane.b32.xlu0 %v2901_v4, %s5134_s17  ;;  %v2900_v7 = vmul.f32 %v5700_v53, %v5455_v55  ;;  %v2937_v4 = vmul.f32 %v5797_v6, %v5463_v12 }
 0x520   : > { %v6199_v42 = vpop.permute.xlu1 %1716  ;;  %v6201_v26 = vpop.permute.xlu0 %1998 }
 0x521   : > { %10701 = vst [vmem:[#allocation143_spill] sm:$0xff] %v6199_v42  ;;  %10702 = vst [vmem:[#allocation144_spill] sm:$0xff] %v6201_v26 }
 0x522   : > { %2871 = vrot.lane.b32.xlu1 %v2864_v10, %s5133_s10  ;;  %2941 = vrot.lane.b32.xlu0 %v2935_v61, %s5135_s13  ;;  %v2936_v10 = vmul.f32 %v5700_v53, %v5463_v12  ;;  %v2971_v61 = vmul.f32 %v5696_v41, %v5471_v15 }
 0x524   : > { %v6209_v49 = vpop.permute.xlu1 %1754  ;;  %v6211_v33 = vpop.permute.xlu0 %2036 }
 0x525   : > { %10703 = vst [vmem:[#allocation145_spill] sm:$0xff] %v6209_v49  ;;  %10704 = vst [vmem:[#allocation146_spill] sm:$0xff] %v6211_v33 }
 0x526   : > { %2907 = vrot.lane.b32.xlu1 %v2900_v7, %s5134_s17  ;;  %2945 = vrot.lane.b32.xlu0 %v2937_v4, %s5135_s13  ;;  %v2972_v7 = vmul.f32 %v5700_v53, %v5471_v15  ;;  %v2973_v4 = vmul.f32 %v5797_v6, %v5471_v15 }
 0x528   : > { %v6219_v52 = vpop.permute.xlu1 %1758  ;;  %v6221_v26 = vpop.permute.xlu0 %2040 }
 0x529   : > { %10705 = vst [vmem:[#allocation147_spill] sm:$0xff] %v6219_v52  ;;  %10706 = vst [vmem:[#allocation148_spill] sm:$0xff] %v6221_v26 }
 0x52a   : > { %2943 = vrot.lane.b32.xlu1 %v2936_v10, %s5135_s13  ;;  %2977 = vrot.lane.b32.xlu0 %v2971_v61, %s5136_s8  ;;  %v3026_v10 = vmul.f32 %v5700_v53, %v5479_v18  ;;  %v3025_v61 = vmul.f32 %v5696_v41, %v5479_v18 }
 0x52c   : > { %v6229_v55 = vpop.permute.xlu1 %1828  ;;  %v6231_v33 = vpop.permute.xlu0 %2123 }
 0x52d   : > { %10707 = vst [vmem:[#allocation149_spill] sm:$0xff] %v6229_v55  ;;  %10708 = vst [vmem:[#allocation150_spill] sm:$0xff] %v6231_v33 }
 0x52e   : > { %2979 = vrot.lane.b32.xlu1 %v2972_v7, %s5136_s8  ;;  %2981 = vrot.lane.b32.xlu0 %v2973_v4, %s5136_s8  ;;  %v3066_v7 = vmul.f32 %v5700_v53, %v5487_v21  ;;  %v3027_v4 = vmul.f32 %v5797_v6, %v5479_v18 }
 0x530   : > { %v6239_v12 = vpop.permute.xlu1 %1870  ;;  %v6241_v26 = vpop.permute.xlu0 %2165 }
 0x531   : > { %10709 = vst [vmem:[#allocation151_spill] sm:$0xff] %v6239_v12  ;;  %10710 = vst [vmem:[#allocation152_spill] sm:$0xff] %v6241_v26 }
 0x532   : > { %3033 = vrot.lane.b32.xlu1 %v3026_v10, %s5131_s23  ;;  %3031 = vrot.lane.b32.xlu0 %v3025_v61, %s5131_s23  ;;  %v3106_v10 = vmul.f32 %v5700_v53, %v5495_v24  ;;  %v3065_v61 = vmul.f32 %v5696_v41, %v5487_v21 }
 0x534   : > { %v6249_v33 = vpop.permute.xlu1 %1912  ;;  %v6251_v15 = vpop.permute.xlu0 %2207 }
 0x535   : > { %10711 = vst [vmem:[#allocation153_spill] sm:$0xff] %v6249_v33  ;;  %10712 = vst [vmem:[#allocation154_spill] sm:$0xff] %v6251_v15 }
 0x536   : > { %3073 = vrot.lane.b32.xlu1 %v3066_v7, %s5132_s28  ;;  %3035 = vrot.lane.b32.xlu0 %v3027_v4, %s5131_s23  ;;  %v3146_v7 = vmul.f32 %v5700_v53, %v5503_v31  ;;  %v3067_v4 = vmul.f32 %v5797_v6, %v5487_v21 }
 0x538   : > { %v6259_v26 = vpop.permute.xlu1 %1954  ;;  %v6261_v12 = vpop.permute.xlu0 %2249 }
 0x539   : > { %10713 = vst [vmem:[#allocation155_spill] sm:$0xff] %v6259_v26  ;;  %10714 = vst [vmem:[#allocation156_spill] sm:$0xff] %v6261_v12 }
 0x53a   : > { %3113 = vrot.lane.b32.xlu1 %v3106_v10, %s5133_s10  ;;  %3071 = vrot.lane.b32.xlu0 %v3065_v61, %s5132_s28  ;;  %v3186_v10 = vmul.f32 %v5700_v53, %v5511_v1  ;;  %v3105_v61 = vmul.f32 %v5696_v41, %v5495_v24 }
 0x53c   : > { %v6269_v15 = vpop.permute.xlu1 %1996  ;;  %v6271_v18 = vpop.permute.xlu0 %2291 }
 0x53d   : > { %10715 = vst [vmem:[#allocation157_spill] sm:$0xff] %v6269_v15  ;;  %10716 = vst [vmem:[#allocation158_spill] sm:$0xff] %v6271_v18 }
 0x53e   : > { %3153 = vrot.lane.b32.xlu1 %v3146_v7, %s5134_s17  ;;  %3075 = vrot.lane.b32.xlu0 %v3067_v4, %s5132_s28  ;;  %v3226_v7 = vmul.f32 %v5700_v53, %v5519_v37  ;;  %v3107_v4 = vmul.f32 %v5797_v6, %v5495_v24 }
 0x540   : > { %v6279_v12 = vpop.permute.xlu1 %2038  ;;  %v6281_v26 = vpop.permute.xlu0 %2333 }
 0x541   : > { %10717 = vst [vmem:[#allocation159_spill] sm:$0xff] %v6279_v12  ;;  %10718 = vst [vmem:[#allocation160_spill] sm:$0xff] %v6281_v26 }
 0x542   : > { %3193 = vrot.lane.b32.xlu1 %v3186_v10, %s5135_s13  ;;  %3111 = vrot.lane.b32.xlu0 %v3105_v61, %s5133_s10  ;;  %v3295_v10 = vmul.f32 %v5696_v41, %v5527_v40  ;;  %v3145_v61 = vmul.f32 %v5696_v41, %v5503_v31 }
 0x544   : > { %v6289_v18 = vpop.permute.xlu1 %2121  ;;  %v6291_v21 = vpop.permute.xlu0 %2417 }
 0x545   : > { %10719 = vst [vmem:[#allocation161_spill] sm:$0xff] %v6289_v18  ;;  %10720 = vst [vmem:[#allocation162_spill] sm:$0xff] %v6291_v21 }
 0x546   : > { %3233 = vrot.lane.b32.xlu1 %v3226_v7, %s5136_s8  ;;  %3115 = vrot.lane.b32.xlu0 %v3107_v4, %s5133_s10  ;;  %v3297_v7 = vmul.f32 %v5797_v6, %v5527_v40  ;;  %v3147_v4 = vmul.f32 %v5797_v6, %v5503_v31 }
 0x548   : > { %v6299_v26 = vpop.permute.xlu1 %2125  ;;  %v6301_v12 = vpop.permute.xlu0 %2421 }
 0x549   : > { %10721 = vst [vmem:[#allocation163_spill] sm:$0xff] %v6299_v26  ;;  %10722 = vst [vmem:[#allocation164_spill] sm:$0xff] %v6301_v12 }
 0x54a   : > { %3301 = vrot.lane.b32.xlu1 %v3295_v10, %s5131_s23  ;;  %3151 = vrot.lane.b32.xlu0 %v3145_v61, %s5134_s17  ;;  %v3335_v10 = vmul.f32 %v5696_v41, %v5541_v43  ;;  %v3185_v61 = vmul.f32 %v5696_v41, %v5511_v1 }
 0x54c   : > { %v6309_v21 = vpop.permute.xlu1 %2163  ;;  %v6311_v24 = vpop.permute.xlu0 %2459 }
 0x54d   : > { %10723 = vst [vmem:[#allocation165_spill] sm:$0xff] %v6309_v21  ;;  %10724 = vst [vmem:[#allocation166_spill] sm:$0xff] %v6311_v24 }
 0x54e   : > { %3305 = vrot.lane.b32.xlu1 %v3297_v7, %s5131_s23  ;;  %3155 = vrot.lane.b32.xlu0 %v3147_v4, %s5134_s17  ;;  %v3337_v7 = vmul.f32 %v5797_v6, %v5541_v43  ;;  %v3187_v4 = vmul.f32 %v5797_v6, %v5511_v1 }
 0x550   : > { %v6319_v12 = vpop.permute.xlu1 %2167  ;;  %v6321_v26 = vpop.permute.xlu0 %2463 }
 0x551   : > { %10725 = vst [vmem:[#allocation167_spill] sm:$0xff] %v6319_v12  ;;  %10726 = vst [vmem:[#allocation168_spill] sm:$0xff] %v6321_v26 }
 0x552   : > { %3341 = vrot.lane.b32.xlu1 %v3335_v10, %s5132_s28  ;;  %3191 = vrot.lane.b32.xlu0 %v3185_v61, %s5135_s13  ;;  %v3375_v10 = vmul.f32 %v5696_v41, %v5555_v51  ;;  %v3225_v61 = vmul.f32 %v5696_v41, %v5519_v37 }
 0x554   : > { %v6329_v24 = vpop.permute.xlu1 %2205  ;;  %v6331_v31 = vpop.permute.xlu0 %2501 }
 0x555   : > { %10727 = vst [vmem:[#allocation169_spill] sm:$0xff] %v6329_v24  ;;  %10728 = vst [vmem:[#allocation170_spill] sm:$0xff] %v6331_v31 }
 0x556   : > { %3345 = vrot.lane.b32.xlu1 %v3337_v7, %s5132_s28  ;;  %3195 = vrot.lane.b32.xlu0 %v3187_v4, %s5135_s13  ;;  %v3377_v7 = vmul.f32 %v5797_v6, %v5555_v51  ;;  %v3227_v4 = vmul.f32 %v5797_v6, %v5519_v37 }
 0x558   : > { %v6339_v26 = vpop.permute.xlu1 %2209  ;;  %v6341_v12 = vpop.permute.xlu0 %2505 }
 0x559   : > { %10729 = vst [vmem:[#allocation171_spill] sm:$0xff] %v6339_v26  ;;  %10730 = vst [vmem:[#allocation172_spill] sm:$0xff] %v6341_v12 }
 0x55a   : > { %3381 = vrot.lane.b32.xlu1 %v3375_v10, %s5133_s10  ;;  %3231 = vrot.lane.b32.xlu0 %v3225_v61, %s5136_s8  ;;  %v3415_v10 = vmul.f32 %v5696_v41, %v5569_v13  ;;  %v3296_v61 = vmul.f32 %v5700_v53, %v5527_v40 }
 0x55c   : > { %v6349_v31 = vpop.permute.xlu1 %2247  ;;  %v6351_v1 = vpop.permute.xlu0 %2543 }
 0x55d   : > { %10731 = vst [vmem:[#allocation173_spill] sm:$0xff] %v6349_v31  ;;  %10732 = vst [vmem:[#allocation174_spill] sm:$0xff] %v6351_v1 }
 0x55e   : > { %3385 = vrot.lane.b32.xlu1 %v3377_v7, %s5133_s10  ;;  %3235 = vrot.lane.b32.xlu0 %v3227_v4, %s5136_s8  ;;  %v3417_v7 = vmul.f32 %v5797_v6, %v5569_v13  ;;  %v3336_v4 = vmul.f32 %v5700_v53, %v5541_v43 }
 0x560   : > { %v6359_v12 = vpop.permute.xlu1 %2251  ;;  %v6361_v26 = vpop.permute.xlu0 %2547 }
 0x561   : > { %10733 = vst [vmem:[#allocation175_spill] sm:$0xff] %v6359_v12  ;;  %10734 = vst [vmem:[#allocation176_spill] sm:$0xff] %v6361_v26 }
 0x562   : > { %3421 = vrot.lane.b32.xlu1 %v3415_v10, %s5134_s17  ;;  %3303 = vrot.lane.b32.xlu0 %v3296_v61, %s5131_s23  ;;  %v3455_v10 = vmul.f32 %v5696_v41, %v5583_v20  ;;  %v3376_v61 = vmul.f32 %v5700_v53, %v5555_v51 }
 0x564   : > { %v6369_v1 = vpop.permute.xlu1 %2289  ;;  %v6371_v37 = vpop.permute.xlu0 %2585 }
 0x565   : > { %10735 = vst [vmem:[#allocation177_spill] sm:$0xff] %v6369_v1  ;;  %10736 = vst [vmem:[#allocation178_spill] sm:$0xff] %v6371_v37 }
 0x566   : > { %3425 = vrot.lane.b32.xlu1 %v3417_v7, %s5134_s17  ;;  %3343 = vrot.lane.b32.xlu0 %v3336_v4, %s5132_s28  ;;  %v3457_v7 = vmul.f32 %v5797_v6, %v5583_v20  ;;  %v3416_v4 = vmul.f32 %v5700_v53, %v5569_v13 }
 0x568   : > { %v6379_v26 = vpop.permute.xlu1 %2293  ;;  %v6381_v40 = vpop.permute.xlu0 %2589 }
 0x569   : > { %10737 = vst [vmem:[#allocation179_spill] sm:$0xff] %v6379_v26  ;;  %10738 = vst [vmem:[#allocation180_spill] sm:$0xff] %v6381_v40 }
 0x56a   : > { %3461 = vrot.lane.b32.xlu1 %v3455_v10, %s5135_s13  ;;  %3383 = vrot.lane.b32.xlu0 %v3376_v61, %s5133_s10  ;;  %v3495_v10 = vmul.f32 %v5696_v41, %v5597_v32  ;;  %v3456_v61 = vmul.f32 %v5700_v53, %v5583_v20 }
 0x56c   : > { %v6389_v37 = vpop.permute.xlu1 %2331  ;;  %v6391_v43 = vpop.permute.xlu0 %2627 }
 0x56d   : > { %10739 = vst [vmem:[#allocation181_spill] sm:$0xff] %v6389_v37  ;;  %10740 = vst [vmem:[#allocation182_spill] sm:$0xff] %v6391_v43 }
 0x56e   : > { %3465 = vrot.lane.b32.xlu1 %v3457_v7, %s5135_s13  ;;  %3423 = vrot.lane.b32.xlu0 %v3416_v4, %s5134_s17  ;;  %v3497_v7 = vmul.f32 %v5797_v6, %v5597_v32  ;;  %v3496_v4 = vmul.f32 %v5700_v53, %v5597_v32 }
 0x570   : > { %v6399_v40 = vpop.permute.xlu1 %2335  ;;  %v6401_v51 = vpop.permute.xlu0 %2631 }
 0x571   : > { %10741 = vst [vmem:[#allocation183_spill] sm:$0xff] %v6399_v40  ;;  %10742 = vst [vmem:[#allocation184_spill] sm:$0xff] %v6401_v51 }
 0x572   : > { %3501 = vrot.lane.b32.xlu1 %v3495_v10, %s5136_s8  ;;  %3463 = vrot.lane.b32.xlu0 %v3456_v61, %s5135_s13  ;;  %v3566_v10 = vmul.f32 %v5700_v53, %v5611_v39  ;;  %v3565_v61 = vmul.f32 %v5696_v41, %v5611_v39 }
 0x574   : > { %v6409_v43 = vpop.permute.xlu1 %2419  ;;  %v6411_v13 = vpop.permute.xlu0 %2797 }
 0x575   : > { %10743 = vst [vmem:[#allocation185_spill] sm:$0xff] %v6409_v43  ;;  %10744 = vst [vmem:[#allocation186_spill] sm:$0xff] %v6411_v13 }
 0x576   : > { %3505 = vrot.lane.b32.xlu1 %v3497_v7, %s5136_s8  ;;  %3503 = vrot.lane.b32.xlu0 %v3496_v4, %s5136_s8  ;;  %v3606_v7 = vmul.f32 %v5700_v53, %v5619_v9  ;;  %v3567_v4 = vmul.f32 %v5797_v6, %v5611_v39 }
 0x578   : > { %v6419_v51 = vpop.permute.xlu1 %2461  ;;  %v6421_v20 = vpop.permute.xlu0 %2801 }
 0x579   : > { %10745 = vst [vmem:[#allocation187_spill] sm:$0xff] %v6419_v51  ;;  %10746 = vst [vmem:[#allocation188_spill] sm:$0xff] %v6421_v20 }
 0x57a   : > { %3573 = vrot.lane.b32.xlu1 %v3566_v10, %s5131_s23  ;;  %3571 = vrot.lane.b32.xlu0 %v3565_v61, %s5131_s23  ;;  %v3646_v10 = vmul.f32 %v5700_v53, %v5629_v50  ;;  %v3605_v61 = vmul.f32 %v5696_v41, %v5619_v9 }
 0x57c   : > { %v6429_v13 = vpop.permute.xlu1 %2503  ;;  %v6431_v32 = vpop.permute.xlu0 %2833 }
 0x57d   : > { %10747 = vst [vmem:[#allocation189_spill] sm:$0xff] %v6429_v13  ;;  %10748 = vst [vmem:[#allocation190_spill] sm:$0xff] %v6431_v32 }
 0x57e   : > { %3613 = vrot.lane.b32.xlu1 %v3606_v7, %s5132_s28  ;;  %3575 = vrot.lane.b32.xlu0 %v3567_v4, %s5131_s23  ;;  %v3686_v7 = vmul.f32 %v5700_v53, %v5637_v56  ;;  %v3607_v4 = vmul.f32 %v5797_v6, %v5619_v9 }
 0x580   : > { %v6439_v20 = vpop.permute.xlu1 %2545  ;;  %v6441_v51 = vpop.permute.xlu0 %2837 }
 0x581   : > { %10749 = vst [vmem:[#allocation191_spill] sm:$0xff] %v6439_v20  ;;  %10750 = vst [vmem:[#allocation192_spill] sm:$0xff] %v6441_v51 }
 0x582   : > { %3653 = vrot.lane.b32.xlu1 %v3646_v10, %s5133_s10  ;;  %3611 = vrot.lane.b32.xlu0 %v3605_v61, %s5132_s28  ;;  %v3726_v10 = vmul.f32 %v5700_v53, %v5649_v19  ;;  %v3645_v61 = vmul.f32 %v5696_v41, %v5629_v50 }
 0x584   : > { %v6449_v32 = vpop.permute.xlu1 %2587  ;;  %v6451_v39 = vpop.permute.xlu0 %2869 }
 0x585   : > { %10751 = vst [vmem:[#allocation193_spill] sm:$0xff] %v6449_v32  ;;  %10752 = vst [vmem:[#allocation194_spill] sm:$0xff] %v6451_v39 }
 0x586   : > { %3693 = vrot.lane.b32.xlu1 %v3686_v7, %s5134_s17  ;;  %3615 = vrot.lane.b32.xlu0 %v3607_v4, %s5132_s28  ;;  %v3766_v7 = vmul.f32 %v5700_v53, %v5659_v0  ;;  %v3647_v4 = vmul.f32 %v5797_v6, %v5629_v50 }
 0x588   : > { %v6459_v51 = vpop.permute.xlu1 %2629  ;;  %v6461_v20 = vpop.permute.xlu0 %2873 }
 0x589   : > { %10753 = vst [vmem:[#allocation195_spill] sm:$0xff] %v6459_v51  ;;  %10754 = vst [vmem:[#allocation196_spill] sm:$0xff] %v6461_v20 }
 0x58a   : > { %3733 = vrot.lane.b32.xlu1 %v3726_v10, %s5135_s13  ;;  %3651 = vrot.lane.b32.xlu0 %v3645_v61, %s5133_s10  ;;  %v3832_v10 = vmul.f32 %v5696_v41, %v5671_v8  ;;  %v3685_v61 = vmul.f32 %v5696_v41, %v5637_v56 }
 0x58c   : > { %v6469_v39 = vpop.permute.xlu1 %2799  ;;  %v6471_v9 = vpop.permute.xlu0 %2905 }
 0x58d   : > { %10755 = vst [vmem:[#allocation197_spill] sm:$0xff] %v6469_v39  ;;  %10756 = vst [vmem:[#allocation198_spill] sm:$0xff] %v6471_v9  ;;  %v3953_v39 = vmul.f32 %v5700_v53, %v5767_v28 }
 0x58e   : > { %3773 = vrot.lane.b32.xlu1 %v3766_v7, %s5136_s8  ;;  %3655 = vrot.lane.b32.xlu0 %v3647_v4, %s5133_s10  ;;  %v3834_v7 = vmul.f32 %v5797_v6, %v5671_v8  ;;  %v3687_v4 = vmul.f32 %v5797_v6, %v5637_v56 }
 0x590   : > { %v6479_v20 = vpop.permute.xlu1 %2835  ;;  %v6481_v51 = vpop.permute.xlu0 %2909 }
 0x591   : > { %10757 = vst [vmem:[#allocation199_spill] sm:$0xff] %v6479_v20  ;;  %10758 = vst [vmem:[#allocation200_spill] sm:$0xff] %v6481_v51 }
 0x592   : > { %3838 = vrot.lane.b32.xlu1 %v3832_v10, %s5131_s23  ;;  %3691 = vrot.lane.b32.xlu0 %v3685_v61, %s5134_s17  ;;  %v3872_v10 = vmul.f32 %v5696_v41, %v5693_v38  ;;  %v3725_v61 = vmul.f32 %v5696_v41, %v5649_v19 }
 0x594   : > { %v6489_v9 = vpop.permute.xlu1 %2871  ;;  %v6491_v50 = vpop.permute.xlu0 %2941 }
 0x595   : > { %10759 = vst [vmem:[#allocation201_spill] sm:$0xff] %v6489_v9  ;;  %10760 = vst [vmem:[#allocation202_spill] sm:$0xff] %v6491_v50 }
 0x596   : > { %3842 = vrot.lane.b32.xlu1 %v3834_v7, %s5131_s23  ;;  %3695 = vrot.lane.b32.xlu0 %v3687_v4, %s5134_s17  ;;  %v3874_v7 = vmul.f32 %v5797_v6, %v5693_v38  ;;  %v3727_v4 = vmul.f32 %v5797_v6, %v5649_v19 }
 0x598   : > { %v6499_v51 = vpop.permute.xlu1 %2907  ;;  %v6501_v20 = vpop.permute.xlu0 %2945 }
 0x599   : > { %10761 = vst [vmem:[#allocation203_spill] sm:$0xff] %v6499_v51  ;;  %10762 = vst [vmem:[#allocation204_spill] sm:$0xff] %v6501_v20 }
 0x59a   : > { %3878 = vrot.lane.b32.xlu1 %v3872_v10, %s5132_s28  ;;  %3731 = vrot.lane.b32.xlu0 %v3725_v61, %s5135_s13  ;;  %v3912_v10 = vmul.f32 %v5696_v41, %v5745_v46  ;;  %v3765_v61 = vmul.f32 %v5696_v41, %v5659_v0 }
 0x59c   : > { %v6509_v50 = vpop.permute.xlu1 %2943  ;;  %v6511_v56 = vpop.permute.xlu0 %2977 }
 0x59d   : > { %10763 = vst [vmem:[#allocation205_spill] sm:$0xff] %v6509_v50  ;;  %10764 = vst [vmem:[#allocation206_spill] sm:$0xff] %v6511_v56 }
 0x59e   : > { %3882 = vrot.lane.b32.xlu1 %v3874_v7, %s5132_s28  ;;  %3735 = vrot.lane.b32.xlu0 %v3727_v4, %s5135_s13  ;;  %v3914_v7 = vmul.f32 %v5797_v6, %v5745_v46  ;;  %v3767_v4 = vmul.f32 %v5797_v6, %v5659_v0 }
 0x5a0   : > { %v6519_v20 = vpop.permute.xlu1 %2979  ;;  %v6521_v51 = vpop.permute.xlu0 %2981 }
 0x5a1   : > { %10765 = vst [vmem:[#allocation207_spill] sm:$0xff] %v6519_v20  ;;  %10766 = vst [vmem:[#allocation208_spill] sm:$0xff] %v6521_v51 }
 0x5a2   : > { %3918 = vrot.lane.b32.xlu1 %v3912_v10, %s5133_s10  ;;  %3771 = vrot.lane.b32.xlu0 %v3765_v61, %s5136_s8  ;;  %v3952_v10 = vmul.f32 %v5696_v41, %v5767_v28  ;;  %v3833_v61 = vmul.f32 %v5700_v53, %v5671_v8 }
 0x5a4   : > { %v6529_v56 = vpop.permute.xlu1 %3033  ;;  %v6531_v19 = vpop.permute.xlu0 %3031 }
 0x5a5   : > { %10767 = vst [vmem:[#allocation209_spill] sm:$0xff] %v6529_v56  ;;  %10768 = vst [vmem:[#allocation210_spill] sm:$0xff] %v6531_v19 }
 0x5a6   : > { %3922 = vrot.lane.b32.xlu1 %v3914_v7, %s5133_s10  ;;  %3775 = vrot.lane.b32.xlu0 %v3767_v4, %s5136_s8  ;;  %v3954_v7 = vmul.f32 %v5797_v6, %v5767_v28  ;;  %v3873_v4 = vmul.f32 %v5700_v53, %v5693_v38  ;;  %v6592_v28 = vstv %s4763_s15  ;;  %s4778_s15 = sld [smem:[#allocation6 + $0x16]] }
 0x5a8   : > { %v6539_v51 = vpop.permute.xlu1 %3073  ;;  %v6541_v20 = vpop.permute.xlu0 %3035 }
 0x5a9   : > { %10769 = vst [vmem:[#allocation211_spill] sm:$0xff] %v6539_v51  ;;  %10770 = vst [vmem:[#allocation212_spill] sm:$0xff] %v6541_v20  ;;  %v6684_v51 = vstv %s4771_s26  ;;  %s4786_s26 = sld [smem:[#allocation6 + $0x1e]] }
 0x5aa   : > { %3958 = vrot.lane.b32.xlu1 %v3952_v10, %s5134_s17  ;;  %3840 = vrot.lane.b32.xlu0 %v3833_v61, %s5131_s23  ;;  %v4103_v10 = vmul.f32 %v5700_v53, %v5909_v16  ;;  %v3913_v61 = vmul.f32 %v5700_v53, %v5745_v46 }
 0x5ac   : > { %v6549_v50 = vpop.permute.xlu1 %3113  ;;  %v6551_v0 = vpop.permute.xlu0 %3071  ;;  %v6696_v20 = vstv %s4778_s15  ;;  %s4793_s15 = sld [smem:[#allocation6 + $0x25]] }
 0x5ad   : > { %10771 = vst [vmem:[#allocation213_spill] sm:$0xff] %v6549_v50  ;;  %10772 = vst [vmem:[#allocation214_spill] sm:$0xff] %v6551_v0  ;;  %v6620_v50 = vstv %s4777_s29  ;;  %v6672_v0 = vstv %s4764_s12  ;;  %s4792_s29 = sld [smem:[#allocation6 + $0x24]] }
 0x5ae   : > { %3962 = vrot.lane.b32.xlu1 %v3954_v7, %s5134_s17  ;;  %3880 = vrot.lane.b32.xlu0 %v3873_v4, %s5132_s28  ;;  %v4372_v4 = vmul.f32 %v5696_v41, %v5985_v22  ;;  %s4779_s12 = sld [smem:[#allocation6 + $0x17]] }
 0x5b0   : > { %v6559_v9 = vpop.permute.xlu1 %3153  ;;  %v6561_v8 = vpop.permute.xlu0 %3075 }
 0x5b1   : > { %10773 = vst [vmem:[#allocation215_spill] sm:$0xff] %v6559_v9  ;;  %10774 = vst [vmem:[#allocation216_spill] sm:$0xff] %v6561_v8  ;;  %v6590_v9 = vsel %vm643_vm7, %v5641_v14, %v5639_v11  ;;  %v6648_v8 = vstv %s4791_s9  ;;  %s4765_s9 = sld [smem:[#allocation6 + $0x9]] }
 0x5b2   : > { %4110 = vrot.lane.b32.xlu1 %v4103_v10, %s5131_s23  ;;  %3920 = vrot.lane.b32.xlu0 %v3913_v61, %s5133_s10  ;;  %v4374_v61 = vmul.f32 %v5797_v6, %v5985_v22  ;;  %10779 = vst [vmem:[#allocation221_spill] sm:$0xff] %v6590_v9 }
 0x5b3   : > { %v6720_v56 = vstv %s4792_s29  ;;  %s4766_s29 = sld [smem:[#allocation6 + $0xa]] }
 0x5b4   : > { %v6569_v38 = vpop.permute.xlu1 %3193  ;;  %v6571_v7 = vpop.permute.xlu0 %3111 }
 0x5b5   : > { %10775 = vst [vmem:[#allocation217_spill] sm:$0xff] %v6569_v38  ;;  %10776 = vst [vmem:[#allocation218_spill] sm:$0xff] %v6571_v7  ;;  %v4102_v38 = vmul.f32 %v5696_v41, %v5909_v16  ;;  %v6604_v7 = vstv %s4770_s16  ;;  %s4785_s16 = sld [smem:[#allocation6 + $0x1d]] }
 0x5b6   : > { %4378 = vrot.lane.b32.xlu1 %v4372_v4, %s5131_s23  ;;  %3960 = vrot.lane.b32.xlu0 %v3953_v39, %s5134_s17 }
 0x5b8   : > { %v6579_v46 = vpop.permute.xlu1 %3233  ;;  %v6581_v10 = vpop.permute.xlu0 %3115 }
 0x5b9   : > { %10777 = vst [vmem:[#allocation219_spill] sm:$0xff] %v6579_v46  ;;  %10778 = vst [vmem:[#allocation220_spill] sm:$0xff] %v6581_v10  ;;  %v674_v46 = vmul.f32 %v6592_v28, %v6590_v9  ;;  %v4104_v10 = vmul.f32 %v5797_v6, %v5909_v16  ;;  %v6618_v16 = vsel %vm643_vm7, 0.0, %v5641_v14  ;;  %v6634_v14 = vsel %vm643_vm7, %v5639_v11, 0.0 }
 0x5ba   : > { %4382 = vrot.lane.b32.xlu1 %v4374_v61, %s5131_s23  ;;  %4108 = vrot.lane.b32.xlu0 %v4102_v38, %s5131_s23  ;;  %10784 = vst [vmem:[#allocation226_spill] sm:$0xff] %v6618_v16 }
 0x5bb   : > { %v6708_v19 = vstv %s4785_s16  ;;  %s4800_s16 = sld [smem:[#allocation6 + $0x2c]] }
 0x5bc   : > { %v6596_v39 = vpop.permute.xlu1 %3301  ;;  %v6598_v4 = vpop.permute.xlu0 %3151 }
 0x5bd   : > { %10780 = vst [vmem:[#allocation222_spill] sm:$0xff] %v6596_v39  ;;  %10781 = vst [vmem:[#allocation223_spill] sm:$0xff] %v6598_v4  ;;  %v713_v39 = vmul.f32 %v6604_v7, %v6590_v9  ;;  %v4373_v4 = vmul.f32 %v5700_v53, %v5985_v22  ;;  %v673_v22 = vmul.f32 %v6592_v28, %v6618_v16 }
 0x5be   : > { %681 = vrot.lane.b32.xlu1 %v674_v46, %s5131_s23  ;;  %4112 = vrot.lane.b32.xlu0 %v4104_v10, %s5131_s23 }
 0x5c0   : > { %v6608_v61 = vpop.permute.xlu1 %3305  ;;  %v6610_v38 = vpop.permute.xlu0 %3155 }
 0x5c1   : > { %10782 = vst [vmem:[#allocation224_spill] sm:$0xff] %v6608_v61  ;;  %10783 = vst [vmem:[#allocation225_spill] sm:$0xff] %v6610_v38  ;;  %v752_v61 = vmul.f32 %v6620_v50, %v6590_v9  ;;  %v6636_v38 = vstv %s4784_s25  ;;  %s4799_s25 = sld [smem:[#allocation6 + $0x2b]] }
 0x5c2   : > { %720 = vrot.lane.b32.xlu1 %v713_v39, %s5132_s28  ;;  %4380 = vrot.lane.b32.xlu0 %v4373_v4, %s5131_s23 }
 0x5c4   : > { %v6624_v46 = vpop.permute.xlu1 %3341  ;;  %v6626_v10 = vpop.permute.xlu0 %3191 }
 0x5c5   : > { %10785 = vst [vmem:[#allocation227_spill] sm:$0xff] %v6624_v46  ;;  %10786 = vst [vmem:[#allocation228_spill] sm:$0xff] %v6626_v10  ;;  %v791_v46 = vmul.f32 %v6636_v38, %v6590_v9  ;;  %v675_v10 = vmul.f32 %v6592_v28, %v6634_v14 }
 0x5c6   : > { %759 = vrot.lane.b32.xlu1 %v752_v61, %s5133_s10  ;;  %679 = vrot.lane.b32.xlu0 %v673_v22, %s5131_s23  ;;  %v830_v22 = vmul.f32 %v6648_v8, %v6590_v9 }
 0x5c7   : > { %v6732_v32 = vstv %s4799_s25  ;;  %s4773_s25 = sld [smem:[#allocation6 + $0x11]] }
 0x5c8   : > { %v6640_v39 = vpop.permute.xlu1 %3345  ;;  %v6642_v4 = vpop.permute.xlu0 %3195 }
 0x5c9   : > { %10787 = vst [vmem:[#allocation229_spill] sm:$0xff] %v6640_v39  ;;  %10788 = vst [vmem:[#allocation230_spill] sm:$0xff] %v6642_v4  ;;  %v712_v39 = vmul.f32 %v6604_v7, %v6618_v16  ;;  %v6660_v4 = vstv %s4798_s14  ;;  %s4772_s14 = sld [smem:[#allocation6 + $0x10]] }
 0x5ca   : > { %798 = vrot.lane.b32.xlu1 %v791_v46, %s5134_s17  ;;  %683 = vrot.lane.b32.xlu0 %v675_v10, %s5131_s23 }
 0x5cc   : > { %v6652_v11 = vpop.permute.xlu1 %3381  ;;  %v6654_v61 = vpop.permute.xlu0 %3231 }
 0x5cd   : > { %10789 = vst [vmem:[#allocation231_spill] sm:$0xff] %v6652_v11  ;;  %10790 = vst [vmem:[#allocation232_spill] sm:$0xff] %v6654_v61  ;;  %v869_v11 = vmul.f32 %v6660_v4, %v6590_v9  ;;  %v714_v61 = vmul.f32 %v6604_v7, %v6634_v14  ;;  %v6888_v31 = vstv %s4773_s25  ;;  %s4788_s25 = sld [smem:[#allocation6 + $0x20]] }
 0x5ce   : > { %837 = vrot.lane.b32.xlu1 %v830_v22, %s5135_s13  ;;  %718 = vrot.lane.b32.xlu0 %v712_v39, %s5132_s28 }
 0x5d0   : > { %v6664_v46 = vpop.permute.xlu1 %3385  ;;  %v6666_v10 = vpop.permute.xlu0 %3235 }
 0x5d1   : > { %10791 = vst [vmem:[#allocation233_spill] sm:$0xff] %v6664_v46  ;;  %10792 = vst [vmem:[#allocation234_spill] sm:$0xff] %v6666_v10  ;;  %v926_v46 = vmul.f32 %v6672_v0, %v6590_v9  ;;  %v751_v10 = vmul.f32 %v6620_v50, %v6618_v16 }
 0x5d2   : > { %876 = vrot.lane.b32.xlu1 %v869_v11, %s5136_s8  ;;  %722 = vrot.lane.b32.xlu0 %v714_v61, %s5132_s28 }
 0x5d4   : > { %v6676_v22 = vpop.permute.xlu1 %3421  ;;  %v6678_v39 = vpop.permute.xlu0 %3303 }
 0x5d5   : > { %10793 = vst [vmem:[#allocation235_spill] sm:$0xff] %v6676_v22  ;;  %10794 = vst [vmem:[#allocation236_spill] sm:$0xff] %v6678_v39  ;;  %v968_v22 = vmul.f32 %v6684_v51, %v6590_v9  ;;  %v753_v39 = vmul.f32 %v6620_v50, %v6634_v14 }
 0x5d6   : > { %933 = vrot.lane.b32.xlu1 %v926_v46, %s5131_s23  ;;  %757 = vrot.lane.b32.xlu0 %v751_v10, %s5133_s10 }
 0x5d8   : > { %v6688_v11 = vpop.permute.xlu1 %3425  ;;  %v6690_v61 = vpop.permute.xlu0 %3343 }
 0x5d9   : > { %10795 = vst [vmem:[#allocation237_spill] sm:$0xff] %v6688_v11  ;;  %10796 = vst [vmem:[#allocation238_spill] sm:$0xff] %v6690_v61  ;;  %v1010_v11 = vmul.f32 %v6696_v20, %v6590_v9  ;;  %v790_v61 = vmul.f32 %v6636_v38, %v6618_v16 }
 0x5da   : > { %975 = vrot.lane.b32.xlu1 %v968_v22, %s5132_s28  ;;  %761 = vrot.lane.b32.xlu0 %v753_v39, %s5133_s10 }
 0x5dc   : > { %v6700_v46 = vpop.permute.xlu1 %3461  ;;  %v6702_v10 = vpop.permute.xlu0 %3383 }
 0x5dd   : > { %10797 = vst [vmem:[#allocation239_spill] sm:$0xff] %v6700_v46  ;;  %10798 = vst [vmem:[#allocation240_spill] sm:$0xff] %v6702_v10  ;;  %v1052_v46 = vmul.f32 %v6708_v19, %v6590_v9  ;;  %v792_v10 = vmul.f32 %v6636_v38, %v6634_v14 }
 0x5de   : > { %1017 = vrot.lane.b32.xlu1 %v1010_v11, %s5133_s10  ;;  %796 = vrot.lane.b32.xlu0 %v790_v61, %s5134_s17 }
 0x5e0   : > { %v6712_v22 = vpop.permute.xlu1 %3465  ;;  %v6714_v39 = vpop.permute.xlu0 %3423 }
 0x5e1   : > { %10799 = vst [vmem:[#allocation241_spill] sm:$0xff] %v6712_v22  ;;  %10800 = vst [vmem:[#allocation242_spill] sm:$0xff] %v6714_v39  ;;  %v1094_v22 = vmul.f32 %v6720_v56, %v6590_v9  ;;  %v829_v39 = vmul.f32 %v6648_v8, %v6618_v16 }
 0x5e2   : > { %1059 = vrot.lane.b32.xlu1 %v1052_v46, %s5134_s17  ;;  %800 = vrot.lane.b32.xlu0 %v792_v10, %s5134_s17  ;;  %v1136_v10 = vmul.f32 %v6732_v32, %v6590_v9 }
 0x5e4   : > { %v6724_v11 = vpop.permute.xlu1 %3501  ;;  %v6726_v61 = vpop.permute.xlu0 %3463 }
 0x5e5   : > { %10801 = vst [vmem:[#allocation243_spill] sm:$0xff] %v6724_v11  ;;  %10802 = vst [vmem:[#allocation244_spill] sm:$0xff] %v6726_v61  ;;  %v831_v11 = vmul.f32 %v6648_v8, %v6634_v14  ;;  %v6744_v61 = vstv %s4765_s9  ;;  %s4780_s9 = sld [smem:[#allocation6 + $0x18]] }
 0x5e6   : > { %1101 = vrot.lane.b32.xlu1 %v1094_v22, %s5135_s13  ;;  %835 = vrot.lane.b32.xlu0 %v829_v39, %s5135_s13 }
 0x5e8   : > { %v6736_v13 = vpop.permute.xlu1 %3505  ;;  %v6738_v46 = vpop.permute.xlu0 %3503 }
 0x5e9   : > { %10803 = vst [vmem:[#allocation245_spill] sm:$0xff] %v6736_v13  ;;  %10804 = vst [vmem:[#allocation246_spill] sm:$0xff] %v6738_v46  ;;  %v1222_v13 = vmul.f32 %v6744_v61, %v6618_v16  ;;  %v868_v46 = vmul.f32 %v6660_v4, %v6618_v16 }
 0x5ea   : > { %1143 = vrot.lane.b32.xlu1 %v1136_v10, %s5136_s8  ;;  %839 = vrot.lane.b32.xlu0 %v831_v11, %s5135_s13  ;;  %v1224_v11 = vmul.f32 %v6744_v61, %v6634_v14  ;;  %v870_v10 = vmul.f32 %v6660_v4, %v6634_v14 }
 0x5eb   : > { %v6900_v24 = vstv %s4780_s9  ;;  %s4795_s9 = sld [smem:[#allocation6 + $0x27]] }
 0x5ec   : > { %v6748_v22 = vpop.permute.xlu1 %3573  ;;  %v6750_v39 = vpop.permute.xlu0 %3571 }
 0x5ed   : > { %10805 = vst [vmem:[#allocation247_spill] sm:$0xff] %v6748_v22  ;;  %10806 = vst [vmem:[#allocation248_spill] sm:$0xff] %v6750_v39  ;;  %v6766_v39 = vstv %s4772_s14  ;;  %s4787_s14 = sld [smem:[#allocation6 + $0x1f]] }
 0x5ee   : > { %1228 = vrot.lane.b32.xlu1 %v1222_v13, %s5131_s23  ;;  %874 = vrot.lane.b32.xlu0 %v868_v46, %s5136_s8 }
 0x5f0   : > { %v6758_v43 = vpop.permute.xlu1 %3613  ;;  %v6760_v40 = vpop.permute.xlu0 %3575 }
 0x5f1   : > { %10807 = vst [vmem:[#allocation249_spill] sm:$0xff] %v6758_v43  ;;  %10808 = vst [vmem:[#allocation250_spill] sm:$0xff] %v6760_v40  ;;  %v1264_v43 = vmul.f32 %v6766_v39, %v6618_v16  ;;  %v925_v40 = vmul.f32 %v6672_v0, %v6618_v16 }
 0x5f2   : > { %1232 = vrot.lane.b32.xlu1 %v1224_v11, %s5131_s23  ;;  %878 = vrot.lane.b32.xlu0 %v870_v10, %s5136_s8  ;;  %v1266_v11 = vmul.f32 %v6766_v39, %v6634_v14  ;;  %v927_v10 = vmul.f32 %v6672_v0, %v6634_v14 }
 0x5f3   : > { %v6912_v21 = vstv %s4787_s14  ;;  %s4802_s14 = sld [smem:[#allocation6 + $0x2e]] }
 0x5f4   : > { %v6770_v13 = vpop.permute.xlu1 %3653  ;;  %v6772_v46 = vpop.permute.xlu0 %3611 }
 0x5f5   : > { %10809 = vst [vmem:[#allocation251_spill] sm:$0xff] %v6770_v13  ;;  %10810 = vst [vmem:[#allocation252_spill] sm:$0xff] %v6772_v46  ;;  %v6788_v13 = vstv %s4779_s12  ;;  %s4794_s12 = sld [smem:[#allocation6 + $0x26]] }
 0x5f6   : > { %1270 = vrot.lane.b32.xlu1 %v1264_v43, %s5132_s28  ;;  %931 = vrot.lane.b32.xlu0 %v925_v40, %s5131_s23 }
 0x5f8   : > { %v6780_v22 = vpop.permute.xlu1 %3693  ;;  %v6782_v37 = vpop.permute.xlu0 %3615 }
 0x5f9   : > { %10811 = vst [vmem:[#allocation253_spill] sm:$0xff] %v6780_v22  ;;  %10812 = vst [vmem:[#allocation254_spill] sm:$0xff] %v6782_v37  ;;  %v1306_v22 = vmul.f32 %v6788_v13, %v6618_v16  ;;  %v967_v37 = vmul.f32 %v6684_v51, %v6618_v16 }
 0x5fa   : > { %1274 = vrot.lane.b32.xlu1 %v1266_v11, %s5132_s28  ;;  %935 = vrot.lane.b32.xlu0 %v927_v10, %s5131_s23  ;;  %v1308_v11 = vmul.f32 %v6788_v13, %v6634_v14  ;;  %v969_v10 = vmul.f32 %v6684_v51, %v6634_v14 }
 0x5fb   : > { %v6924_v18 = vstv %s4794_s12  ;;  %s4768_s12 = sld [smem:[#allocation6 + $0xc]] }
 0x5fc   : > { %v6792_v43 = vpop.permute.xlu1 %3733  ;;  %v6794_v40 = vpop.permute.xlu0 %3651 }
 0x5fd   : > { %10813 = vst [vmem:[#allocation255_spill] sm:$0xff] %v6792_v43  ;;  %10814 = vst [vmem:[#allocation256_spill] sm:$0xff] %v6794_v40  ;;  %v6810_v43 = vstv %s4786_s26  ;;  %s4801_s26 = sld [smem:[#allocation6 + $0x2d]] }
 0x5fe   : > { %1312 = vrot.lane.b32.xlu1 %v1306_v22, %s5133_s10  ;;  %973 = vrot.lane.b32.xlu0 %v967_v37, %s5132_s28 }
 0x600   : > { %v6802_v46 = vpop.permute.xlu1 %3773  ;;  %v6804_v26 = vpop.permute.xlu0 %3655 }
 0x601   : > { %10815 = vst [vmem:[#allocation257_spill] sm:$0xff] %v6802_v46  ;;  %10816 = vst [vmem:[#allocation258_spill] sm:$0xff] %v6804_v26  ;;  %v1348_v46 = vmul.f32 %v6810_v43, %v6618_v16  ;;  %v1009_v26 = vmul.f32 %v6696_v20, %v6618_v16 }
 0x602   : > { %1316 = vrot.lane.b32.xlu1 %v1308_v11, %s5133_s10  ;;  %977 = vrot.lane.b32.xlu0 %v969_v10, %s5132_s28  ;;  %v1350_v11 = vmul.f32 %v6810_v43, %v6634_v14  ;;  %v1011_v10 = vmul.f32 %v6696_v20, %v6634_v14 }
 0x603   : > { %v6936_v15 = vstv %s4801_s26  ;;  %s4775_s26 = sld [smem:[#allocation6 + $0x13]] }
 0x604   : > { %v6814_v22 = vpop.permute.xlu1 %3838  ;;  %v6816_v37 = vpop.permute.xlu0 %3691 }
 0x605   : > { %10817 = vst [vmem:[#allocation259_spill] sm:$0xff] %v6814_v22  ;;  %10818 = vst [vmem:[#allocation260_spill] sm:$0xff] %v6816_v37  ;;  %v6832_v22 = vstv %s4793_s15  ;;  %s4767_s15 = sld [smem:[#allocation6 + $0xb]] }
 0x606   : > { %1354 = vrot.lane.b32.xlu1 %v1348_v46, %s5134_s17  ;;  %1015 = vrot.lane.b32.xlu0 %v1009_v26, %s5133_s10 }
 0x608   : > { %v6824_v40 = vpop.permute.xlu1 %3842  ;;  %v6826_v1 = vpop.permute.xlu0 %3695 }
 0x609   : > { %10819 = vst [vmem:[#allocation261_spill] sm:$0xff] %v6824_v40  ;;  %10820 = vst [vmem:[#allocation262_spill] sm:$0xff] %v6826_v1  ;;  %v1390_v40 = vmul.f32 %v6832_v22, %v6618_v16  ;;  %v1051_v1 = vmul.f32 %v6708_v19, %v6618_v16  ;;  %v7092_v47 = vstv %s4775_s26  ;;  %s4790_s26 = sld [smem:[#allocation6 + $0x22]] }
 0x60a   : > { %1358 = vrot.lane.b32.xlu1 %v1350_v11, %s5134_s17  ;;  %1019 = vrot.lane.b32.xlu0 %v1011_v10, %s5133_s10  ;;  %v1392_v11 = vmul.f32 %v6832_v22, %v6634_v14  ;;  %v1053_v10 = vmul.f32 %v6708_v19, %v6634_v14  ;;  %10869 = vst [vmem:[#allocation311_spill] sm:$0xff] %v7092_v47 }
 0x60c   : > { %v6836_v46 = vpop.permute.xlu1 %3878  ;;  %v6838_v26 = vpop.permute.xlu0 %3731 }
 0x60d   : > { %10821 = vst [vmem:[#allocation263_spill] sm:$0xff] %v6836_v46  ;;  %10822 = vst [vmem:[#allocation264_spill] sm:$0xff] %v6838_v26  ;;  %v6854_v46 = vstv %s4800_s16  ;;  %s4774_s16 = sld [smem:[#allocation6 + $0x12]] }
 0x60e   : > { %1396 = vrot.lane.b32.xlu1 %v1390_v40, %s5135_s13  ;;  %1057 = vrot.lane.b32.xlu0 %v1051_v1, %s5134_s17 }
 0x610   : > { %v6846_v37 = vpop.permute.xlu1 %3882  ;;  %v6848_v12 = vpop.permute.xlu0 %3735 }
 0x611   : > { %10823 = vst [vmem:[#allocation265_spill] sm:$0xff] %v6846_v37  ;;  %10824 = vst [vmem:[#allocation266_spill] sm:$0xff] %v6848_v12  ;;  %v1432_v37 = vmul.f32 %v6854_v46, %v6618_v16  ;;  %v1093_v12 = vmul.f32 %v6720_v56, %v6618_v16 }
 0x612   : > { %1400 = vrot.lane.b32.xlu1 %v1392_v11, %s5135_s13  ;;  %1061 = vrot.lane.b32.xlu0 %v1053_v10, %s5134_s17  ;;  %v1434_v10 = vmul.f32 %v6854_v46, %v6634_v14 }
 0x614   : > { %v6858_v40 = vpop.permute.xlu1 %3918  ;;  %v6860_v1 = vpop.permute.xlu0 %3771 }
 0x615   : > { %10825 = vst [vmem:[#allocation267_spill] sm:$0xff] %v6858_v40  ;;  %10826 = vst [vmem:[#allocation268_spill] sm:$0xff] %v6860_v1  ;;  %v1095_v40 = vmul.f32 %v6720_v56, %v6634_v14  ;;  %v6876_v1 = vstv %s4766_s29  ;;  %s4781_s29 = sld [smem:[#allocation6 + $0x19]] }
 0x616   : > { %1438 = vrot.lane.b32.xlu1 %v1432_v37, %s5136_s8  ;;  %1099 = vrot.lane.b32.xlu0 %v1093_v12, %s5135_s13 }
 0x618   : > { %v6868_v26 = vpop.permute.xlu1 %3922  ;;  %v6870_v11 = vpop.permute.xlu0 %3775 }
 0x619   : > { %10827 = vst [vmem:[#allocation269_spill] sm:$0xff] %v6868_v26  ;;  %10828 = vst [vmem:[#allocation270_spill] sm:$0xff] %v6870_v11  ;;  %v1518_v26 = vmul.f32 %v6876_v1, %v6590_v9  ;;  %v1135_v11 = vmul.f32 %v6732_v32, %v6618_v16 }
 0x61a   : > { %1442 = vrot.lane.b32.xlu1 %v1434_v10, %s5136_s8  ;;  %1103 = vrot.lane.b32.xlu0 %v1095_v40, %s5135_s13 }
 0x61c   : > { %v6880_v37 = vpop.permute.xlu1 %3958  ;;  %v6882_v12 = vpop.permute.xlu0 %3840 }
 0x61d   : > { %10829 = vst [vmem:[#allocation271_spill] sm:$0xff] %v6880_v37  ;;  %10830 = vst [vmem:[#allocation272_spill] sm:$0xff] %v6882_v12  ;;  %v1560_v37 = vmul.f32 %v6888_v31, %v6590_v9  ;;  %v1137_v12 = vmul.f32 %v6732_v32, %v6634_v14 }
 0x61e   : > { %1525 = vrot.lane.b32.xlu1 %v1518_v26, %s5131_s23  ;;  %1141 = vrot.lane.b32.xlu0 %v1135_v11, %s5136_s8 }
 0x620   : > { %v6892_v10 = vpop.permute.xlu1 %3962  ;;  %v6894_v40 = vpop.permute.xlu0 %3880 }
 0x621   : > { %10831 = vst [vmem:[#allocation273_spill] sm:$0xff] %v6892_v10  ;;  %10832 = vst [vmem:[#allocation274_spill] sm:$0xff] %v6894_v40  ;;  %v1602_v10 = vmul.f32 %v6900_v24, %v6590_v9  ;;  %v1223_v40 = vmul.f32 %v6744_v61, %v6590_v9 }
 0x622   : > { %1567 = vrot.lane.b32.xlu1 %v1560_v37, %s5132_s28  ;;  %1145 = vrot.lane.b32.xlu0 %v1137_v12, %s5136_s8 }
 0x624   : > { %v6904_v26 = vpop.permute.xlu1 %4110  ;;  %v6906_v11 = vpop.permute.xlu0 %3920 }
 0x625   : > { %10833 = vst [vmem:[#allocation275_spill] sm:$0xff] %v6904_v26  ;;  %10834 = vst [vmem:[#allocation276_spill] sm:$0xff] %v6906_v11  ;;  %v1644_v11 = vmul.f32 %v6912_v21, %v6590_v9  ;;  %v1265_v26 = vmul.f32 %v6766_v39, %v6590_v9 }
 0x626   : > { %1609 = vrot.lane.b32.xlu1 %v1602_v10, %s5133_s10  ;;  %1230 = vrot.lane.b32.xlu0 %v1223_v40, %s5131_s23 }
 0x628   : > { %v6916_v37 = vpop.permute.xlu1 %4378  ;;  %v6918_v12 = vpop.permute.xlu0 %3960 }
 0x629   : > { %10835 = vst [vmem:[#allocation277_spill] sm:$0xff] %v6916_v37  ;;  %10836 = vst [vmem:[#allocation278_spill] sm:$0xff] %v6918_v12  ;;  %v1686_v12 = vmul.f32 %v6924_v18, %v6590_v9  ;;  %v1307_v37 = vmul.f32 %v6788_v13, %v6590_v9 }
 0x62a   : > { %1651 = vrot.lane.b32.xlu1 %v1644_v11, %s5134_s17  ;;  %1272 = vrot.lane.b32.xlu0 %v1265_v26, %s5132_s28  ;;  %v1728_v26 = vmul.f32 %v6936_v15, %v6590_v9 }
 0x62c   : > { %v6928_v10 = vpop.permute.xlu1 %4382  ;;  %v6930_v40 = vpop.permute.xlu0 %4108 }
 0x62d   : > { %10837 = vst [vmem:[#allocation279_spill] sm:$0xff] %v6928_v10  ;;  %10838 = vst [vmem:[#allocation280_spill] sm:$0xff] %v6930_v40  ;;  %v1349_v10 = vmul.f32 %v6810_v43, %v6590_v9  ;;  %v6948_v40 = vstv %s4767_s15  ;;  %s4782_s15 = sld [smem:[#allocation6 + $0x1a]] }
 0x62e   : > { %1693 = vrot.lane.b32.xlu1 %v1686_v12, %s5135_s13  ;;  %1314 = vrot.lane.b32.xlu0 %v1307_v37, %s5133_s10 }
 0x630   : > { %v6940_v33 = vpop.permute.xlu1 %681  ;;  %v6942_v11 = vpop.permute.xlu0 %4112 }
 0x631   : > { %10839 = vst [vmem:[#allocation281_spill] sm:$0xff] %v6940_v33  ;;  %10840 = vst [vmem:[#allocation282_spill] sm:$0xff] %v6942_v11  ;;  %v1799_v33 = vmul.f32 %v6948_v40, %v6618_v16  ;;  %v1391_v11 = vmul.f32 %v6832_v22, %v6590_v9 }
 0x632   : > { %1735 = vrot.lane.b32.xlu1 %v1728_v26, %s5136_s8  ;;  %1356 = vrot.lane.b32.xlu0 %v1349_v10, %s5134_s17  ;;  %v1801_v10 = vmul.f32 %v6948_v40, %v6634_v14  ;;  %v1433_v26 = vmul.f32 %v6854_v46, %v6590_v9 }
 0x633   : > { %v7104_v36 = vstv %s4782_s15  ;;  %s4797_s15 = sld [smem:[#allocation6 + $0x29]] }
 0x634   : > { %v6952_v12 = vpop.permute.xlu1 %720  ;;  %v6954_v37 = vpop.permute.xlu0 %4380  ;;  %10872 = vst [vmem:[#allocation314_spill] sm:$0xff] %v7104_v36 }
 0x635   : > { %10841 = vst [vmem:[#allocation283_spill] sm:$0xff] %v6952_v12  ;;  %10842 = vst [vmem:[#allocation284_spill] sm:$0xff] %v6954_v37  ;;  %v6970_v12 = vstv %s4774_s16  ;;  %s4789_s16 = sld [smem:[#allocation6 + $0x21]] }
 0x636   : > { %1805 = vrot.lane.b32.xlu1 %v1799_v33, %s5131_s23  ;;  %1398 = vrot.lane.b32.xlu0 %v1391_v11, %s5135_s13 }
 0x638   : > { %v6962_v55 = vpop.permute.xlu1 %759  ;;  %v6964_v52 = vpop.permute.xlu0 %679 }
 0x639   : > { %10843 = vst [vmem:[#allocation285_spill] sm:$0xff] %v6962_v55  ;;  %10844 = vst [vmem:[#allocation286_spill] sm:$0xff] %v6964_v52  ;;  %v1841_v55 = vmul.f32 %v6970_v12, %v6618_v16  ;;  %v1517_v52 = vmul.f32 %v6876_v1, %v6618_v16 }
 0x63a   : > { %1809 = vrot.lane.b32.xlu1 %v1801_v10, %s5131_s23  ;;  %1440 = vrot.lane.b32.xlu0 %v1433_v26, %s5136_s8  ;;  %v1843_v10 = vmul.f32 %v6970_v12, %v6634_v14  ;;  %v1519_v26 = vmul.f32 %v6876_v1, %v6634_v14 }
 0x63b   : > { %v7116_v30 = vstv %s4789_s16  ;;  %s4804_s16 = sld [smem:[#allocation6 + $0x30]] }
 0x63c   : > { %v6974_v33 = vpop.permute.xlu1 %798  ;;  %v6976_v11 = vpop.permute.xlu0 %683  ;;  %10875 = vst [vmem:[#allocation317_spill] sm:$0xff] %v7116_v30 }
 0x63d   : > { %10845 = vst [vmem:[#allocation287_spill] sm:$0xff] %v6974_v33  ;;  %10846 = vst [vmem:[#allocation288_spill] sm:$0xff] %v6976_v11  ;;  %v6992_v33 = vstv %s4781_s29  ;;  %s4796_s29 = sld [smem:[#allocation6 + $0x28]] }
 0x63e   : > { %1847 = vrot.lane.b32.xlu1 %v1841_v55, %s5132_s28  ;;  %1523 = vrot.lane.b32.xlu0 %v1517_v52, %s5131_s23 }
 0x640   : > { %v6984_v37 = vpop.permute.xlu1 %837  ;;  %v6986_v49 = vpop.permute.xlu0 %718 }
 0x641   : > { %10847 = vst [vmem:[#allocation289_spill] sm:$0xff] %v6984_v37  ;;  %10848 = vst [vmem:[#allocation290_spill] sm:$0xff] %v6986_v49  ;;  %v1883_v37 = vmul.f32 %v6992_v33, %v6618_v16  ;;  %v1559_v49 = vmul.f32 %v6888_v31, %v6618_v16 }
 0x642   : > { %1851 = vrot.lane.b32.xlu1 %v1843_v10, %s5132_s28  ;;  %1527 = vrot.lane.b32.xlu0 %v1519_v26, %s5131_s23  ;;  %v1885_v10 = vmul.f32 %v6992_v33, %v6634_v14  ;;  %v1561_v26 = vmul.f32 %v6888_v31, %v6634_v14 }
 0x643   : > { %v7128_v62 = vstv %s4796_s29  ;;  %s4758_s29 = sld [smem:[#allocation6 + $0x2]] }
 0x644   : > { %v6996_v55 = vpop.permute.xlu1 %876  ;;  %v6998_v52 = vpop.permute.xlu0 %722 }
 0x645   : > { %10849 = vst [vmem:[#allocation291_spill] sm:$0xff] %v6996_v55  ;;  %10850 = vst [vmem:[#allocation292_spill] sm:$0xff] %v6998_v52  ;;  %v7014_v55 = vstv %s4788_s25  ;;  %v1601_v52 = vmul.f32 %v6900_v24, %v6618_v16  ;;  %s4803_s25 = sld [smem:[#allocation6 + $0x2f]] }
 0x646   : > { %1889 = vrot.lane.b32.xlu1 %v1883_v37, %s5133_s10  ;;  %1565 = vrot.lane.b32.xlu0 %v1559_v49, %s5132_s28 }
 0x648   : > { %v7006_v11 = vpop.permute.xlu1 %933  ;;  %v7008_v42 = vpop.permute.xlu0 %757 }
 0x649   : > { %10851 = vst [vmem:[#allocation293_spill] sm:$0xff] %v7006_v11  ;;  %10852 = vst [vmem:[#allocation294_spill] sm:$0xff] %v7008_v42  ;;  %v1925_v42 = vmul.f32 %v7014_v55, %v6618_v16 }
 0x64a   : > { %1893 = vrot.lane.b32.xlu1 %v1885_v10, %s5133_s10  ;;  %1569 = vrot.lane.b32.xlu0 %v1561_v26, %s5132_s28  ;;  %v1927_v10 = vmul.f32 %v7014_v55, %v6634_v14  ;;  %v1603_v26 = vmul.f32 %v6900_v24, %v6634_v14 }
 0x64b   : > { %v7140_v27 = vstv %s4803_s25  ;;  %s4757_s25 = sld [smem:[#allocation6 + $0x1]] }
 0x64c   : > { %v7018_v37 = vpop.permute.xlu1 %975  ;;  %v7020_v49 = vpop.permute.xlu0 %761  ;;  %10880 = vst [vmem:[#allocation322_spill] sm:$0xff] %v7140_v27 }
 0x64d   : > { %10853 = vst [vmem:[#allocation295_spill] sm:$0xff] %v7018_v37  ;;  %10854 = vst [vmem:[#allocation296_spill] sm:$0xff] %v7020_v49  ;;  %v7036_v49 = vstv %s4795_s9  ;;  %s4769_s9 = sld [smem:[#allocation6 + $0xd]] }
 0x64e   : > { %1931 = vrot.lane.b32.xlu1 %v1925_v42, %s5134_s17  ;;  %1607 = vrot.lane.b32.xlu0 %v1601_v52, %s5133_s10  ;;  %10857 = vst [vmem:[#allocation299_spill] sm:$0xff] %v7036_v49 }
 0x650   : > { %v7028_v11 = vpop.permute.xlu1 %1017  ;;  %v7030_v5 = vpop.permute.xlu0 %796 }
 0x651   : > { %10855 = vst [vmem:[#allocation297_spill] sm:$0xff] %v7028_v11  ;;  %10856 = vst [vmem:[#allocation298_spill] sm:$0xff] %v7030_v5  ;;  %v1967_v5 = vmul.f32 %v7036_v49, %v6618_v16  ;;  %v1643_v11 = vmul.f32 %v6912_v21, %v6618_v16 }
 0x652   : > { %1935 = vrot.lane.b32.xlu1 %v1927_v10, %s5134_s17  ;;  %1611 = vrot.lane.b32.xlu0 %v1603_v26, %s5133_s10  ;;  %v1969_v10 = vmul.f32 %v7036_v49, %v6634_v14  ;;  %v1645_v26 = vmul.f32 %v6912_v21, %v6634_v14 }
 0x654   : > { %v7040_v42 = vpop.permute.xlu1 %1059  ;;  %v7042_v52 = vpop.permute.xlu0 %800 }
 0x655   : > { %10858 = vst [vmem:[#allocation300_spill] sm:$0xff] %v7040_v42  ;;  %10859 = vst [vmem:[#allocation301_spill] sm:$0xff] %v7042_v52  ;;  %v7058_v52 = vstv %s4802_s14  ;;  %s4776_s14 = sld [smem:[#allocation6 + $0x14]] }
 0x656   : > { %1973 = vrot.lane.b32.xlu1 %v1967_v5, %s5135_s13  ;;  %1649 = vrot.lane.b32.xlu0 %v1643_v11, %s5134_s17  ;;  %10862 = vst [vmem:[#allocation304_spill] sm:$0xff] %v7058_v52 }
 0x658   : > { %v7050_v37 = vpop.permute.xlu1 %1101  ;;  %v7052_v23 = vpop.permute.xlu0 %835 }
 0x659   : > { %10860 = vst [vmem:[#allocation302_spill] sm:$0xff] %v7050_v37  ;;  %10861 = vst [vmem:[#allocation303_spill] sm:$0xff] %v7052_v23  ;;  %v2009_v23 = vmul.f32 %v7058_v52, %v6618_v16  ;;  %v1685_v37 = vmul.f32 %v6924_v18, %v6618_v16 }
 0x65a   : > { %1977 = vrot.lane.b32.xlu1 %v1969_v10, %s5135_s13  ;;  %1653 = vrot.lane.b32.xlu0 %v1645_v26, %s5134_s17  ;;  %v2011_v26 = vmul.f32 %v7058_v52, %v6634_v14 }
 0x65c   : > { %v7062_v5 = vpop.permute.xlu1 %1143  ;;  %v7064_v11 = vpop.permute.xlu0 %839 }
 0x65d   : > { %10863 = vst [vmem:[#allocation305_spill] sm:$0xff] %v7062_v5  ;;  %10864 = vst [vmem:[#allocation306_spill] sm:$0xff] %v7064_v11  ;;  %v1687_v11 = vmul.f32 %v6924_v18, %v6634_v14  ;;  %v7080_v5 = vstv %s4768_s12  ;;  %s4783_s12 = sld [smem:[#allocation6 + $0x1b]] }
 0x65e   : > { %2015 = vrot.lane.b32.xlu1 %v2009_v23, %s5136_s8  ;;  %1691 = vrot.lane.b32.xlu0 %v1685_v37, %s5135_s13 }
 0x660   : > { %v7072_v42 = vpop.permute.xlu1 %1228  ;;  %v7074_v10 = vpop.permute.xlu0 %874 }
 0x661   : > { %10865 = vst [vmem:[#allocation307_spill] sm:$0xff] %v7072_v42  ;;  %10866 = vst [vmem:[#allocation308_spill] sm:$0xff] %v7074_v10  ;;  %v2095_v10 = vmul.f32 %v7080_v5, %v6590_v9  ;;  %v1727_v42 = vmul.f32 %v6936_v15, %v6618_v16 }
 0x662   : > { %2019 = vrot.lane.b32.xlu1 %v2011_v26, %s5136_s8  ;;  %1695 = vrot.lane.b32.xlu0 %v1687_v11, %s5135_s13 }
 0x664   : > { %v7084_v23 = vpop.permute.xlu1 %1232  ;;  %v7086_v37 = vpop.permute.xlu0 %878 }
 0x665   : > { %10867 = vst [vmem:[#allocation309_spill] sm:$0xff] %v7084_v23  ;;  %10868 = vst [vmem:[#allocation310_spill] sm:$0xff] %v7086_v37  ;;  %v2137_v37 = vmul.f32 %v7092_v47, %v6590_v9  ;;  %v1729_v23 = vmul.f32 %v6936_v15, %v6634_v14 }
 0x666   : > { %2102 = vrot.lane.b32.xlu1 %v2095_v10, %s5131_s23  ;;  %1733 = vrot.lane.b32.xlu0 %v1727_v42, %s5136_s8 }
 0x668   : > { %v7096_v26 = vpop.permute.xlu1 %1270  ;;  %v7098_v11 = vpop.permute.xlu0 %931 }
 0x669   : > { %10870 = vst [vmem:[#allocation312_spill] sm:$0xff] %v7096_v26  ;;  %10871 = vst [vmem:[#allocation313_spill] sm:$0xff] %v7098_v11  ;;  %v2179_v26 = vmul.f32 %v7104_v36, %v6590_v9  ;;  %v1800_v11 = vmul.f32 %v6948_v40, %v6590_v9 }
 0x66a   : > { %2144 = vrot.lane.b32.xlu1 %v2137_v37, %s5132_s28  ;;  %1737 = vrot.lane.b32.xlu0 %v1729_v23, %s5136_s8 }
 0x66c   : > { %v7108_v10 = vpop.permute.xlu1 %1274  ;;  %v7110_v42 = vpop.permute.xlu0 %935 }
 0x66d   : > { %10873 = vst [vmem:[#allocation315_spill] sm:$0xff] %v7108_v10  ;;  %10874 = vst [vmem:[#allocation316_spill] sm:$0xff] %v7110_v42  ;;  %v2221_v10 = vmul.f32 %v7116_v30, %v6590_v9  ;;  %v1842_v42 = vmul.f32 %v6970_v12, %v6590_v9 }
 0x66e   : > { %2186 = vrot.lane.b32.xlu1 %v2179_v26, %s5133_s10  ;;  %1807 = vrot.lane.b32.xlu0 %v1800_v11, %s5131_s23 }
 0x670   : > { %v7120_v37 = vpop.permute.xlu1 %1312  ;;  %v7122_v23 = vpop.permute.xlu0 %973 }
 0x671   : > { %10876 = vst [vmem:[#allocation318_spill] sm:$0xff] %v7120_v37  ;;  %10877 = vst [vmem:[#allocation319_spill] sm:$0xff] %v7122_v23  ;;  %v2263_v37 = vmul.f32 %v7128_v62, %v6590_v9  ;;  %v1884_v23 = vmul.f32 %v6992_v33, %v6590_v9 }
 0x672   : > { %2228 = vrot.lane.b32.xlu1 %v2221_v10, %s5134_s17  ;;  %1849 = vrot.lane.b32.xlu0 %v1842_v42, %s5132_s28  ;;  %v2305_v42 = vmul.f32 %v7140_v27, %v6590_v9 }
 0x674   : > { %v7132_v26 = vpop.permute.xlu1 %1316  ;;  %v7134_v11 = vpop.permute.xlu0 %977 }
 0x675   : > { %10878 = vst [vmem:[#allocation320_spill] sm:$0xff] %v7132_v26  ;;  %10879 = vst [vmem:[#allocation321_spill] sm:$0xff] %v7134_v11  ;;  %v1926_v26 = vmul.f32 %v7014_v55, %v6590_v9  ;;  %v7152_v11 = vstv %s4769_s9  ;;  %s4807_s9 = sld [smem:[#allocation6 + $0x33]] }
 0x676   : > { %2270 = vrot.lane.b32.xlu1 %v2263_v37, %s5135_s13  ;;  %1891 = vrot.lane.b32.xlu0 %v1884_v23, %s5133_s10 }
 0x678   : > { %v7144_v63 = vpop.permute.xlu1 %1354  ;;  %v7146_v10 = vpop.permute.xlu0 %1015 }
 0x679   : > { %10881 = vst [vmem:[#allocation323_spill] sm:$0xff] %v7144_v63  ;;  %10882 = vst [vmem:[#allocation324_spill] sm:$0xff] %v7146_v10  ;;  %v2390_v63 = vmul.f32 %v7152_v11, %v6618_v16  ;;  %v1968_v10 = vmul.f32 %v7036_v49, %v6590_v9 }
 0x67a   : > { %2312 = vrot.lane.b32.xlu1 %v2305_v42, %s5136_s8  ;;  %1933 = vrot.lane.b32.xlu0 %v1926_v26, %s5134_s17  ;;  %v2392_v26 = vmul.f32 %v7152_v11, %v6634_v14  ;;  %v2010_v42 = vmul.f32 %v7058_v52, %v6590_v9 }
 0x67c   : > { %v7156_v37 = vpop.permute.xlu1 %1358  ;;  %v7158_v23 = vpop.permute.xlu0 %1019 }
 0x67d   : > { %10883 = vst [vmem:[#allocation325_spill] sm:$0xff] %v7156_v37  ;;  %10884 = vst [vmem:[#allocation326_spill] sm:$0xff] %v7158_v23  ;;  %v7174_v37 = vstv %s4776_s14  ;;  %s4806_s14 = sld [smem:[#allocation6 + $0x32]] }
 0x67e   : > { %2396 = vrot.lane.b32.xlu1 %v2390_v63, %s5131_s23  ;;  %1975 = vrot.lane.b32.xlu0 %v1968_v10, %s5135_s13 }
 0x680   : > { %v7166_v35 = vpop.permute.xlu1 %1396  ;;  %v7168_v3 = vpop.permute.xlu0 %1057 }
 0x681   : > { %10885 = vst [vmem:[#allocation327_spill] sm:$0xff] %v7166_v35  ;;  %10886 = vst [vmem:[#allocation328_spill] sm:$0xff] %v7168_v3  ;;  %v2432_v35 = vmul.f32 %v7174_v37, %v6618_v16  ;;  %v2094_v3 = vmul.f32 %v7080_v5, %v6618_v16 }
 0x682   : > { %2400 = vrot.lane.b32.xlu1 %v2392_v26, %s5131_s23  ;;  %2017 = vrot.lane.b32.xlu0 %v2010_v42, %s5136_s8  ;;  %v2434_v26 = vmul.f32 %v7174_v37, %v6634_v14  ;;  %v2096_v42 = vmul.f32 %v7080_v5, %v6634_v14 }
 0x684   : > { %v7178_v63 = vpop.permute.xlu1 %1400  ;;  %v7180_v10 = vpop.permute.xlu0 %1061 }
 0x685   : > { %10887 = vst [vmem:[#allocation329_spill] sm:$0xff] %v7178_v63  ;;  %10888 = vst [vmem:[#allocation330_spill] sm:$0xff] %v7180_v10  ;;  %v7196_v63 = vstv %s4783_s12  ;;  %s7616_s12 = sld [smem:[#allocation6 + $0x3]] }
 0x686   : > { %2438 = vrot.lane.b32.xlu1 %v2432_v35, %s5132_s28  ;;  %2100 = vrot.lane.b32.xlu0 %v2094_v3, %s5131_s23 }
 0x688   : > { %v7188_v23 = vpop.permute.xlu1 %1438  ;;  %v7190_v52 = vpop.permute.xlu0 %1099 }
 0x689   : > { %10889 = vst [vmem:[#allocation331_spill] sm:$0xff] %v7188_v23  ;;  %10890 = vst [vmem:[#allocation332_spill] sm:$0xff] %v7190_v52  ;;  %v2474_v23 = vmul.f32 %v7196_v63, %v6618_v16  ;;  %v2136_v52 = vmul.f32 %v7092_v47, %v6618_v16 }
 0x68a   : > { %2442 = vrot.lane.b32.xlu1 %v2434_v26, %s5132_s28  ;;  %2104 = vrot.lane.b32.xlu0 %v2096_v42, %s5131_s23  ;;  %v2476_v26 = vmul.f32 %v7196_v63, %v6634_v14  ;;  %v2138_v42 = vmul.f32 %v7092_v47, %v6634_v14 }
 0x68c   : > { %v7200_v35 = vpop.permute.xlu1 %1442  ;;  %v7202_v3 = vpop.permute.xlu0 %1103 }
 0x68d   : > { %10891 = vst [vmem:[#allocation333_spill] sm:$0xff] %v7200_v35  ;;  %10892 = vst [vmem:[#allocation334_spill] sm:$0xff] %v7202_v3  ;;  %v7218_v3 = vstv %s4790_s26  ;;  %v2178_v35 = vmul.f32 %v7104_v36, %v6618_v16  ;;  %s7630_s26 = sld [smem:[#allocation6 + $0x34]] }
 0x68e   : > { %2480 = vrot.lane.b32.xlu1 %v2474_v23, %s5133_s10  ;;  %2142 = vrot.lane.b32.xlu0 %v2136_v52, %s5132_s28 }
 0x690   : > { %v7210_v10 = vpop.permute.xlu1 %1525  ;;  %v7212_v49 = vpop.permute.xlu0 %1141 }
 0x691   : > { %10893 = vst [vmem:[#allocation335_spill] sm:$0xff] %v7210_v10  ;;  %10894 = vst [vmem:[#allocation336_spill] sm:$0xff] %v7212_v49  ;;  %v2516_v49 = vmul.f32 %v7218_v3, %v6618_v16 }
 0x692   : > { %2484 = vrot.lane.b32.xlu1 %v2476_v26, %s5133_s10  ;;  %2146 = vrot.lane.b32.xlu0 %v2138_v42, %s5132_s28  ;;  %v2518_v26 = vmul.f32 %v7218_v3, %v6634_v14  ;;  %v2180_v42 = vmul.f32 %v7104_v36, %v6634_v14 }
 0x694   : > { %v7222_v23 = vpop.permute.xlu1 %1567  ;;  %v7224_v52 = vpop.permute.xlu0 %1145 }
 0x695   : > { %10895 = vst [vmem:[#allocation337_spill] sm:$0xff] %v7222_v23  ;;  %10896 = vst [vmem:[#allocation338_spill] sm:$0xff] %v7224_v52  ;;  %v7240_v52 = vstv %s4797_s15  ;;  %v2220_v23 = vmul.f32 %v7116_v30, %v6618_v16  ;;  %s5141_s15 = smov 122  }
 0x696   : > { %2522 = vrot.lane.b32.xlu1 %v2516_v49, %s5134_s17  ;;  %2184 = vrot.lane.b32.xlu0 %v2178_v35, %s5133_s10  ;;  %10899 = vst [vmem:[#allocation341_spill] sm:$0xff] %v7240_v52 }
 0x698   : > { %v7232_v10 = vpop.permute.xlu1 %1609  ;;  %v7234_v47 = vpop.permute.xlu0 %1230 }
 0x699   : > { %10897 = vst [vmem:[#allocation339_spill] sm:$0xff] %v7232_v10  ;;  %10898 = vst [vmem:[#allocation340_spill] sm:$0xff] %v7234_v47  ;;  %v2558_v10 = vmul.f32 %v7240_v52, %v6618_v16 }
 0x69a   : > { %2526 = vrot.lane.b32.xlu1 %v2518_v26, %s5134_s17  ;;  %2188 = vrot.lane.b32.xlu0 %v2180_v42, %s5133_s10  ;;  %v2560_v26 = vmul.f32 %v7240_v52, %v6634_v14  ;;  %v2222_v42 = vmul.f32 %v7116_v30, %v6634_v14 }
 0x69c   : > { %v7244_v49 = vpop.permute.xlu1 %1651  ;;  %v7246_v35 = vpop.permute.xlu0 %1272 }
 0x69d   : > { %10900 = vst [vmem:[#allocation342_spill] sm:$0xff] %v7244_v49  ;;  %10901 = vst [vmem:[#allocation343_spill] sm:$0xff] %v7246_v35  ;;  %v7262_v49 = vstv %s4804_s16 }
 0x69e   : > { %2564 = vrot.lane.b32.xlu1 %v2558_v10, %s5135_s13  ;;  %2226 = vrot.lane.b32.xlu0 %v2220_v23, %s5134_s17  ;;  %10904 = vst [vmem:[#allocation346_spill] sm:$0xff] %v7262_v49  ;;  %v2600_v23 = vmul.f32 %v7262_v49, %v6618_v16 }
 0x6a0   : > { %v7254_v47 = vpop.permute.xlu1 %1693  ;;  %v7256_v36 = vpop.permute.xlu0 %1314 }
 0x6a1   : > { %10902 = vst [vmem:[#allocation344_spill] sm:$0xff] %v7254_v47  ;;  %10903 = vst [vmem:[#allocation345_spill] sm:$0xff] %v7256_v36  ;;  %v2262_v47 = vmul.f32 %v7128_v62, %v6618_v16 }
 0x6a2   : > { %2568 = vrot.lane.b32.xlu1 %v2560_v26, %s5135_s13  ;;  %2230 = vrot.lane.b32.xlu0 %v2222_v42, %s5134_s17  ;;  %v2602_v26 = vmul.f32 %v7262_v49, %v6634_v14  ;;  %v2264_v42 = vmul.f32 %v7128_v62, %v6634_v14 }
 0x6a4   : > { %v7266_v35 = vpop.permute.xlu1 %1735  ;;  %v7268_v10 = vpop.permute.xlu0 %1356 }
 0x6a5   : > { %10905 = vst [vmem:[#allocation347_spill] sm:$0xff] %v7266_v35  ;;  %10906 = vst [vmem:[#allocation348_spill] sm:$0xff] %v7268_v10 }
 0x6a6   : > { %2606 = vrot.lane.b32.xlu1 %v2600_v23, %s5136_s8  ;;  %2268 = vrot.lane.b32.xlu0 %v2262_v47, %s5135_s13  ;;  %v2773_v47 = vmul.f32 %v5703_v54, %v6592_v28  ;;  %v2304_v23 = vmul.f32 %v7140_v27, %v6618_v16 }
 0x6a8   : > { %v7276_v36 = vpop.permute.xlu1 %1805  ;;  %v7278_v30 = vpop.permute.xlu0 %1398 }
 0x6a9   : > { %10907 = vst [vmem:[#allocation349_spill] sm:$0xff] %v7276_v36  ;;  %10908 = vst [vmem:[#allocation350_spill] sm:$0xff] %v7278_v30 }
 0x6aa   : > { %2610 = vrot.lane.b32.xlu1 %v2602_v26, %s5136_s8  ;;  %2272 = vrot.lane.b32.xlu0 %v2264_v42, %s5135_s13  ;;  %v2775_v26 = vmul.f32 %v5801_v25, %v6592_v28  ;;  %v2306_v42 = vmul.f32 %v7140_v27, %v6634_v14 }
 0x6ac   : > { %v7286_v35 = vpop.permute.xlu1 %1809  ;;  %v7288_v10 = vpop.permute.xlu0 %1440 }
 0x6ad   : > { %10909 = vst [vmem:[#allocation351_spill] sm:$0xff] %v7286_v35  ;;  %10910 = vst [vmem:[#allocation352_spill] sm:$0xff] %v7288_v10 }
 0x6ae   : > { %2779 = vrot.lane.b32.xlu1 %v2773_v47, %s5131_s23  ;;  %2310 = vrot.lane.b32.xlu0 %v2304_v23, %s5136_s8  ;;  %v2809_v47 = vmul.f32 %v5703_v54, %v6604_v7  ;;  %v2391_v23 = vmul.f32 %v7152_v11, %v6590_v9 }
 0x6b0   : > { %v7296_v30 = vpop.permute.xlu1 %1847  ;;  %v7298_v36 = vpop.permute.xlu0 %1523 }
 0x6b1   : > { %10911 = vst [vmem:[#allocation353_spill] sm:$0xff] %v7296_v30 }
 0x6b2   : > { %2783 = vrot.lane.b32.xlu1 %v2775_v26, %s5131_s23  ;;  %2314 = vrot.lane.b32.xlu0 %v2306_v42, %s5136_s8  ;;  %v2811_v26 = vmul.f32 %v5801_v25, %v6604_v7  ;;  %v2433_v42 = vmul.f32 %v7174_v37, %v6590_v9 }
 0x6b4   : > { %v7306_v10 = vpop.permute.xlu1 %1851  ;;  %v7308_v35 = vpop.permute.xlu0 %1527 }
 0x6b5   : > { %10912 = vst [vmem:[#allocation354_spill] sm:$0xff] %v7306_v10  ;;  %10913 = vst [vmem:[#allocation355_spill] sm:$0xff] %v7308_v35 }
 0x6b6   : > { %2815 = vrot.lane.b32.xlu1 %v2809_v47, %s5132_s28  ;;  %2398 = vrot.lane.b32.xlu0 %v2391_v23, %s5131_s23  ;;  %v2845_v47 = vmul.f32 %v5703_v54, %v6620_v50  ;;  %v2475_v23 = vmul.f32 %v7196_v63, %v6590_v9 }
 0x6b8   : > { %v7316_v30 = vpop.permute.xlu1 %1889  ;;  %v7318_v27 = vpop.permute.xlu0 %1565 }
 0x6b9   : > { %10914 = vst [vmem:[#allocation356_spill] sm:$0xff] %v7316_v30  ;;  %10915 = vst [vmem:[#allocation357_spill] sm:$0xff] %v7318_v27 }
 0x6ba   : > { %2819 = vrot.lane.b32.xlu1 %v2811_v26, %s5132_s28  ;;  %2440 = vrot.lane.b32.xlu0 %v2433_v42, %s5132_s28  ;;  %v2847_v26 = vmul.f32 %v5801_v25, %v6620_v50  ;;  %v2517_v42 = vmul.f32 %v7218_v3, %v6590_v9 }
 0x6bc   : > { %v7326_v10 = vpop.permute.xlu1 %1893  ;;  %v7328_v35 = vpop.permute.xlu0 %1569 }
 0x6bd   : > { %10916 = vst [vmem:[#allocation358_spill] sm:$0xff] %v7326_v10  ;;  %10917 = vst [vmem:[#allocation359_spill] sm:$0xff] %v7328_v35 }
 0x6be   : > { %2851 = vrot.lane.b32.xlu1 %v2845_v47, %s5133_s10  ;;  %2482 = vrot.lane.b32.xlu0 %v2475_v23, %s5133_s10  ;;  %v2881_v47 = vmul.f32 %v5703_v54, %v6636_v38  ;;  %v2559_v23 = vmul.f32 %v7240_v52, %v6590_v9 }
 0x6c0   : > { %v7336_v30 = vpop.permute.xlu1 %1931  ;;  %v7338_v27 = vpop.permute.xlu0 %1607 }
 0x6c1   : > { %10918 = vst [vmem:[#allocation360_spill] sm:$0xff] %v7336_v30  ;;  %10919 = vst [vmem:[#allocation361_spill] sm:$0xff] %v7338_v27 }
 0x6c2   : > { %2855 = vrot.lane.b32.xlu1 %v2847_v26, %s5133_s10  ;;  %2524 = vrot.lane.b32.xlu0 %v2517_v42, %s5134_s17  ;;  %v2883_v26 = vmul.f32 %v5801_v25, %v6636_v38  ;;  %v2601_v42 = vmul.f32 %v7262_v49, %v6590_v9 }
 0x6c4   : > { %v7346_v10 = vpop.permute.xlu1 %1935  ;;  %v7348_v35 = vpop.permute.xlu0 %1611 }
 0x6c5   : > { %10920 = vst [vmem:[#allocation362_spill] sm:$0xff] %v7346_v10  ;;  %10921 = vst [vmem:[#allocation363_spill] sm:$0xff] %v7348_v35 }
 0x6c6   : > { %2887 = vrot.lane.b32.xlu1 %v2881_v47, %s5134_s17  ;;  %2566 = vrot.lane.b32.xlu0 %v2559_v23, %s5135_s13  ;;  %v2917_v47 = vmul.f32 %v5703_v54, %v6648_v8  ;;  %v2774_v23 = vmul.f32 %v5707_v29, %v6592_v28 }
 0x6c8   : > { %v7356_v30 = vpop.permute.xlu1 %1973  ;;  %v7358_v27 = vpop.permute.xlu0 %1649 }
 0x6c9   : > { %10922 = vst [vmem:[#allocation364_spill] sm:$0xff] %v7356_v30  ;;  %10923 = vst [vmem:[#allocation365_spill] sm:$0xff] %v7358_v27 }
 0x6ca   : > { %2891 = vrot.lane.b32.xlu1 %v2883_v26, %s5134_s17  ;;  %2608 = vrot.lane.b32.xlu0 %v2601_v42, %s5136_s8  ;;  %v2919_v26 = vmul.f32 %v5801_v25, %v6648_v8  ;;  %v2810_v42 = vmul.f32 %v5707_v29, %v6604_v7 }
 0x6cc   : > { %v7366_v10 = vpop.permute.xlu1 %1977  ;;  %v7368_v52 = vpop.permute.xlu0 %1653 }
 0x6cd   : > { %10924 = vst [vmem:[#allocation366_spill] sm:$0xff] %v7366_v10  ;;  %10925 = vst [vmem:[#allocation367_spill] sm:$0xff] %v7368_v52 }
 0x6ce   : > { %2923 = vrot.lane.b32.xlu1 %v2917_v47, %s5135_s13  ;;  %2781 = vrot.lane.b32.xlu0 %v2774_v23, %s5131_s23  ;;  %v2953_v47 = vmul.f32 %v5703_v54, %v6660_v4  ;;  %v2846_v23 = vmul.f32 %v5707_v29, %v6620_v50 }
 0x6d0   : > { %v7376_v30 = vpop.permute.xlu1 %2015  ;;  %v7378_v49 = vpop.permute.xlu0 %1691 }
 0x6d1   : > { %10926 = vst [vmem:[#allocation368_spill] sm:$0xff] %v7376_v30  ;;  %10927 = vst [vmem:[#allocation369_spill] sm:$0xff] %v7378_v49 }
 0x6d2   : > { %2927 = vrot.lane.b32.xlu1 %v2919_v26, %s5135_s13  ;;  %2817 = vrot.lane.b32.xlu0 %v2810_v42, %s5132_s28  ;;  %v2955_v26 = vmul.f32 %v5801_v25, %v6660_v4  ;;  %v2882_v42 = vmul.f32 %v5707_v29, %v6636_v38 }
 0x6d4   : > { %v7386_v10 = vpop.permute.xlu1 %2019  ;;  %v7388_v28 = vpop.permute.xlu0 %1695 }
 0x6d5   : > { %10928 = vst [vmem:[#allocation370_spill] sm:$0xff] %v7386_v10  ;;  %10929 = vst [vmem:[#allocation371_spill] sm:$0xff] %v7388_v28 }
 0x6d6   : > { %2959 = vrot.lane.b32.xlu1 %v2953_v47, %s5136_s8  ;;  %2853 = vrot.lane.b32.xlu0 %v2846_v23, %s5133_s10  ;;  %v3005_v47 = vmul.f32 %v5703_v54, %v6672_v0  ;;  %v2918_v23 = vmul.f32 %v5707_v29, %v6648_v8 }
 0x6d8   : > { %v7396_v30 = vpop.permute.xlu1 %2102  ;;  %v7398_v7 = vpop.permute.xlu0 %1733 }
 0x6d9   : > { %10930 = vst [vmem:[#allocation372_spill] sm:$0xff] %v7396_v30  ;;  %10931 = vst [vmem:[#allocation373_spill] sm:$0xff] %v7398_v7  ;;  %v7718_v7 = vstv %s7630_s26 }
 0x6da   : > { %2963 = vrot.lane.b32.xlu1 %v2955_v26, %s5136_s8  ;;  %2889 = vrot.lane.b32.xlu0 %v2882_v42, %s5134_s17  ;;  %v3007_v26 = vmul.f32 %v5801_v25, %v6672_v0  ;;  %v2954_v42 = vmul.f32 %v5707_v29, %v6660_v4  ;;  %v1512_v49 = vmul.f32 %v7718_v7, %v5437_v48 }
 0x6dc   : > { %v7406_v10 = vpop.permute.xlu1 %2144  ;;  %v7408_v50 = vpop.permute.xlu0 %1737 }
 0x6dd   : > { %10932 = vst [vmem:[#allocation374_spill] sm:$0xff] %v7406_v10  ;;  %10933 = vst [vmem:[#allocation375_spill] sm:$0xff] %v7408_v50 }
 0x6de   : > { %3011 = vrot.lane.b32.xlu1 %v3005_v47, %s5131_s23  ;;  %2925 = vrot.lane.b32.xlu0 %v2918_v23, %s5135_s13  ;;  %v3045_v47 = vmul.f32 %v5703_v54, %v6684_v51  ;;  %v3006_v23 = vmul.f32 %v5707_v29, %v6672_v0 }
 0x6e0   : > { %v7416_v30 = vpop.permute.xlu1 %2186  ;;  %v7418_v38 = vpop.permute.xlu0 %1807 }
 0x6e1   : > { %10934 = vst [vmem:[#allocation376_spill] sm:$0xff] %v7416_v30 }
 0x6e2   : > { %3015 = vrot.lane.b32.xlu1 %v3007_v26, %s5131_s23  ;;  %2961 = vrot.lane.b32.xlu0 %v2954_v42, %s5136_s8  ;;  %v3047_v26 = vmul.f32 %v5801_v25, %v6684_v51  ;;  %v3046_v42 = vmul.f32 %v5707_v29, %v6684_v51 }
 0x6e4   : > { %v7426_v10 = vpop.permute.xlu1 %2228  ;;  %v7428_v8 = vpop.permute.xlu0 %1849 }
 0x6e5   : > { %10935 = vst [vmem:[#allocation377_spill] sm:$0xff] %v7426_v10  ;;  %10936 = vst [vmem:[#allocation378_spill] sm:$0xff] %v7428_v8  ;;  %v3541_v8 = vmul.f32 %v5797_v6, %v7718_v7 }
 0x6e6   : > { %3051 = vrot.lane.b32.xlu1 %v3045_v47, %s5132_s28  ;;  %3013 = vrot.lane.b32.xlu0 %v3006_v23, %s5131_s23  ;;  %v3085_v47 = vmul.f32 %v5703_v54, %v6696_v20  ;;  %v3086_v23 = vmul.f32 %v5707_v29, %v6696_v20 }
 0x6e8   : > { %v7436_v30 = vpop.permute.xlu1 %2270  ;;  %v7438_v4 = vpop.permute.xlu0 %1891 }
 0x6e9   : > { %10937 = vst [vmem:[#allocation379_spill] sm:$0xff] %v7436_v30  ;;  %10938 = vst [vmem:[#allocation380_spill] sm:$0xff] %v7438_v4 }
 0x6ea   : > { %3055 = vrot.lane.b32.xlu1 %v3047_v26, %s5132_s28  ;;  %3053 = vrot.lane.b32.xlu0 %v3046_v42, %s5132_s28  ;;  %v3087_v26 = vmul.f32 %v5801_v25, %v6696_v20  ;;  %v3126_v42 = vmul.f32 %v5707_v29, %v6708_v19 }
 0x6ec   : > { %v7446_v10 = vpop.permute.xlu1 %2312  ;;  %v7448_v0 = vpop.permute.xlu0 %1933 }
 0x6ed   : > { %10939 = vst [vmem:[#allocation381_spill] sm:$0xff] %v7446_v10  ;;  %10940 = vst [vmem:[#allocation382_spill] sm:$0xff] %v7448_v0  ;;  %v1510_v0 = vmul.f32 %v7718_v7, %v5430_v45 }
 0x6ee   : > { %3091 = vrot.lane.b32.xlu1 %v3085_v47, %s5133_s10  ;;  %3093 = vrot.lane.b32.xlu0 %v3086_v23, %s5133_s10  ;;  %v3125_v47 = vmul.f32 %v5703_v54, %v6708_v19  ;;  %v3166_v23 = vmul.f32 %v5707_v29, %v6720_v56 }
 0x6f0   : > { %v7456_v30 = vpop.permute.xlu1 %2396  ;;  %v7458_v51 = vpop.permute.xlu0 %1975 }
 0x6f1   : > { %10941 = vst [vmem:[#allocation383_spill] sm:$0xff] %v7456_v30  ;;  %10942 = vst [vmem:[#allocation384_spill] sm:$0xff] %v7458_v51 }
 0x6f2   : > { %3095 = vrot.lane.b32.xlu1 %v3087_v26, %s5133_s10  ;;  %3133 = vrot.lane.b32.xlu0 %v3126_v42, %s5134_s17  ;;  %v3127_v26 = vmul.f32 %v5801_v25, %v6708_v19  ;;  %v3206_v42 = vmul.f32 %v5707_v29, %v6732_v32 }
 0x6f4   : > { %v7466_v10 = vpop.permute.xlu1 %2400  ;;  %v7468_v50 = vpop.permute.xlu0 %2017 }
 0x6f5   : > { %10943 = vst [vmem:[#allocation385_spill] sm:$0xff] %v7466_v10  ;;  %10944 = vst [vmem:[#allocation386_spill] sm:$0xff] %v7468_v50 }
 0x6f6   : > { %3131 = vrot.lane.b32.xlu1 %v3125_v47, %s5134_s17  ;;  %3173 = vrot.lane.b32.xlu0 %v3166_v23, %s5135_s13  ;;  %v3165_v47 = vmul.f32 %v5703_v54, %v6720_v56  ;;  %v3275_v23 = vmul.f32 %v5703_v54, %v6744_v61 }
 0x6f8   : > { %v7476_v20 = vpop.permute.xlu1 %2438  ;;  %v7478_v30 = vpop.permute.xlu0 %2100 }
 0x6f9   : > { %10945 = vst [vmem:[#allocation387_spill] sm:$0xff] %v7476_v20  ;;  %10946 = vst [vmem:[#allocation388_spill] sm:$0xff] %v7478_v30 }
 0x6fa   : > { %3135 = vrot.lane.b32.xlu1 %v3127_v26, %s5134_s17  ;;  %3213 = vrot.lane.b32.xlu0 %v3206_v42, %s5136_s8  ;;  %v3167_v26 = vmul.f32 %v5801_v25, %v6720_v56  ;;  %v3277_v42 = vmul.f32 %v5801_v25, %v6744_v61 }
 0x6fc   : > { %v7486_v50 = vpop.permute.xlu1 %2442  ;;  %v7488_v51 = vpop.permute.xlu0 %2104 }
 0x6fd   : > { %10947 = vst [vmem:[#allocation389_spill] sm:$0xff] %v7486_v50  ;;  %10948 = vst [vmem:[#allocation390_spill] sm:$0xff] %v7488_v51 }
 0x6fe   : > { %3171 = vrot.lane.b32.xlu1 %v3165_v47, %s5135_s13  ;;  %3281 = vrot.lane.b32.xlu0 %v3275_v23, %s5131_s23  ;;  %v3205_v47 = vmul.f32 %v5703_v54, %v6732_v32  ;;  %v3315_v23 = vmul.f32 %v5703_v54, %v6766_v39 }
 0x700   : > { %v7496_v19 = vpop.permute.xlu1 %2480  ;;  %v7498_v20 = vpop.permute.xlu0 %2142 }
 0x701   : > { %10949 = vst [vmem:[#allocation391_spill] sm:$0xff] %v7496_v19  ;;  %10950 = vst [vmem:[#allocation392_spill] sm:$0xff] %v7498_v20 }
 0x702   : > { %3175 = vrot.lane.b32.xlu1 %v3167_v26, %s5135_s13  ;;  %3285 = vrot.lane.b32.xlu0 %v3277_v42, %s5131_s23  ;;  %v3207_v26 = vmul.f32 %v5801_v25, %v6732_v32  ;;  %v3317_v42 = vmul.f32 %v5801_v25, %v6766_v39 }
 0x704   : > { %v7506_v50 = vpop.permute.xlu1 %2484  ;;  %v7508_v51 = vpop.permute.xlu0 %2146 }
 0x705   : > { %10951 = vst [vmem:[#allocation393_spill] sm:$0xff] %v7506_v50  ;;  %10952 = vst [vmem:[#allocation394_spill] sm:$0xff] %v7508_v51 }
 0x706   : > { %3211 = vrot.lane.b32.xlu1 %v3205_v47, %s5136_s8  ;;  %3321 = vrot.lane.b32.xlu0 %v3315_v23, %s5132_s28  ;;  %v3276_v47 = vmul.f32 %v5707_v29, %v6744_v61  ;;  %v3355_v23 = vmul.f32 %v5703_v54, %v6788_v13 }
 0x708   : > { %v7516_v56 = vpop.permute.xlu1 %2522  ;;  %v7518_v19 = vpop.permute.xlu0 %2184 }
 0x709   : > { %10953 = vst [vmem:[#allocation395_spill] sm:$0xff] %v7516_v56  ;;  %10954 = vst [vmem:[#allocation396_spill] sm:$0xff] %v7518_v19  ;;  %v10986_v19 = vld [vmem:[#allocation19_spill] sm:$0xff] }
 0x70a   : > { %3215 = vrot.lane.b32.xlu1 %v3207_v26, %s5136_s8  ;;  %3325 = vrot.lane.b32.xlu0 %v3317_v42, %s5132_s28  ;;  %v3316_v26 = vmul.f32 %v5707_v29, %v6766_v39  ;;  %v3357_v42 = vmul.f32 %v5801_v25, %v6788_v13 }
 0x70c   : > { %v7526_v50 = vpop.permute.xlu1 %2526  ;;  %v7528_v51 = vpop.permute.xlu0 %2188 }
 0x70d   : > { %10955 = vst [vmem:[#allocation397_spill] sm:$0xff] %v7526_v50  ;;  %10956 = vst [vmem:[#allocation398_spill] sm:$0xff] %v7528_v51  ;;  %v10985_v50 = vld [vmem:[#allocation20_spill] sm:$0xff] }
 0x70e   : > { %3283 = vrot.lane.b32.xlu1 %v3276_v47, %s5131_s23  ;;  %3361 = vrot.lane.b32.xlu0 %v3355_v23, %s5133_s10  ;;  %v3356_v47 = vmul.f32 %v5707_v29, %v6788_v13  ;;  %v3395_v23 = vmul.f32 %v5703_v54, %v6810_v43  ;;  %v7674_v20 = vsel %vm2647_vm9, %v10986_v19, %v10985_v50 }
 0x70f   : > { %10987 = vst [vmem:[#allocation423_spill] sm:$0xff] %v7674_v20  ;;  %v7689_v20 = vstv %s7616_s12  ;;  %v3627_v50 = vmul.f32 %v5801_v25, %v6900_v24 }
 0x710   : > { %v7536_v32 = vpop.permute.xlu1 %2564  ;;  %v7538_v56 = vpop.permute.xlu0 %2226 }
 0x711   : > { %10957 = vst [vmem:[#allocation399_spill] sm:$0xff] %v7536_v32  ;;  %10958 = vst [vmem:[#allocation400_spill] sm:$0xff] %v7538_v56  ;;  %v10983_v56 = vld [vmem:[#allocation18_spill] sm:$0xff] }
 0x712   : > { %3323 = vrot.lane.b32.xlu1 %v3316_v26, %s5132_s28  ;;  %3365 = vrot.lane.b32.xlu0 %v3357_v42, %s5133_s10  ;;  %v3396_v26 = vmul.f32 %v5707_v29, %v6810_v43  ;;  %v3397_v42 = vmul.f32 %v5801_v25, %v6810_v43 }
 0x714   : > { %v7546_v61 = vpop.permute.xlu1 %2568  ;;  %v7548_v51 = vpop.permute.xlu0 %2230 }
 0x715   : > { %10959 = vst [vmem:[#allocation401_spill] sm:$0xff] %v7546_v61  ;;  %10960 = vst [vmem:[#allocation402_spill] sm:$0xff] %v7548_v51  ;;  %v10982_v51 = vld [vmem:[#allocation17_spill] sm:$0xff] }
 0x716   : > { %3363 = vrot.lane.b32.xlu1 %v3356_v47, %s5133_s10  ;;  %3401 = vrot.lane.b32.xlu0 %v3395_v23, %s5134_s17  ;;  %v3436_v47 = vmul.f32 %v5707_v29, %v6832_v22  ;;  %v3435_v23 = vmul.f32 %v5703_v54, %v6832_v22 }
 0x718   : > { %v7556_v39 = vpop.permute.xlu1 %2606  ;;  %v7558_v32 = vpop.permute.xlu0 %2268 }
 0x719   : > { %10961 = vst [vmem:[#allocation403_spill] sm:$0xff] %v7556_v39  ;;  %10962 = vst [vmem:[#allocation404_spill] sm:$0xff] %v7558_v32 }
 0x71a   : > { %3403 = vrot.lane.b32.xlu1 %v3396_v26, %s5134_s17  ;;  %3405 = vrot.lane.b32.xlu0 %v3397_v42, %s5134_s17  ;;  %v3476_v26 = vmul.f32 %v5707_v29, %v6854_v46  ;;  %v3437_v42 = vmul.f32 %v5801_v25, %v6832_v22 }
 0x71c   : > { %v7566_v13 = vpop.permute.xlu1 %2610  ;;  %v7568_v61 = vpop.permute.xlu0 %2272 }
 0x71d   : > { %10963 = vst [vmem:[#allocation405_spill] sm:$0xff] %v7566_v13  ;;  %10964 = vst [vmem:[#allocation406_spill] sm:$0xff] %v7568_v61  ;;  %v10980_v61 = vld [vmem:[#allocation15_spill] sm:$0xff] }
 0x71e   : > { %3443 = vrot.lane.b32.xlu1 %v3436_v47, %s5135_s13  ;;  %3441 = vrot.lane.b32.xlu0 %v3435_v23, %s5135_s13  ;;  %v3545_v47 = vmul.f32 %v5703_v54, %v6876_v1  ;;  %v3475_v23 = vmul.f32 %v5703_v54, %v6854_v46 }
 0x720   : > { %v7576_v39 = vpop.permute.xlu1 %2779  ;;  %v7578_v43 = vpop.permute.xlu0 %2310 }
 0x721   : > { %10965 = vst [vmem:[#allocation407_spill] sm:$0xff] %v7576_v39  ;;  %10966 = vst [vmem:[#allocation408_spill] sm:$0xff] %v7578_v43  ;;  %v7626_v43 = vstv %s4758_s29  ;;  %s11830_s29 = sshll.u32 %s5295_s11, 6 }
 0x722   : > { %3483 = vrot.lane.b32.xlu1 %v3476_v26, %s5136_s8  ;;  %3445 = vrot.lane.b32.xlu0 %v3437_v42, %s5135_s13  ;;  %v3547_v26 = vmul.f32 %v5801_v25, %v6876_v1  ;;  %v3477_v42 = vmul.f32 %v5801_v25, %v6854_v46  ;;  %v1208_v19 = vmul.f32 %v7626_v43, %v6618_v16 }
 0x724   : > { %v7586_v32 = vpop.permute.xlu1 %2783  ;;  %v7588_v13 = vpop.permute.xlu0 %2314 }
 0x725   : > { %10967 = vst [vmem:[#allocation409_spill] sm:$0xff] %v7586_v32  ;;  %10968 = vst [vmem:[#allocation410_spill] sm:$0xff] %v7588_v13  ;;  %v3546_v32 = vmul.f32 %v5707_v29, %v6876_v1  ;;  %v7628_v1 = vstv %s4757_s25  ;;  %v7648_v13 = vstv %s4806_s14  ;;  %s10106_s25 = scalar_lea.vmem [#allocation7], %s11830_s29 }
 0x726   : > { %3551 = vrot.lane.b32.xlu1 %v3545_v47, %s5131_s23  ;;  %3481 = vrot.lane.b32.xlu0 %v3475_v23, %s5136_s8  ;;  %s4654_s14 = sshll.u32 %s10106_s25, 4  ;;  %s10167_s14 = int_to_ptr.vmem [resolvable:$true] %s4654_s14 }
 0x728   : > { %v7596_v39 = vpop.permute.xlu1 %2815  ;;  %v7598_v22 = vpop.permute.xlu0 %2398 }
 0x729   : > { %10969 = vst [vmem:[#allocation411_spill] sm:$0xff] %v7596_v39  ;;  %10970 = vst [vmem:[#allocation412_spill] sm:$0xff] %v7598_v22  ;;  %v3585_v39 = vmul.f32 %v5703_v54, %v6888_v31  ;;  %v7666_v22 = vsel %vm2351_vm8, %v10983_v56, %v10982_v51  ;;  %v919_v56 = vmul.f32 %v7648_v13, %v5427_v44 }
 0x72a   : > { %3555 = vrot.lane.b32.xlu1 %v3547_v26, %s5131_s23  ;;  %3485 = vrot.lane.b32.xlu0 %v3477_v42, %s5136_s8  ;;  %v3587_v42 = vmul.f32 %v5801_v25, %v6888_v31  ;;  %10984 = vst [vmem:[#allocation422_spill] sm:$0xff] %v7666_v22  ;;  %v918_v22 = vmul.f32 %v7648_v13, %v5430_v45 }
 0x72b   : > { %v920_v51 = vmul.f32 %v7648_v13, %v5437_v48 }
 0x72c   : > { %v7606_v47 = vpop.permute.xlu1 %2819  ;;  %v7608_v23 = vpop.permute.xlu0 %2440 }
 0x72d   : > { %10971 = vst [vmem:[#allocation413_spill] sm:$0xff] %v7606_v47  ;;  %10972 = vst [vmem:[#allocation414_spill] sm:$0xff] %v7608_v23  ;;  %v3586_v47 = vmul.f32 %v5707_v29, %v6888_v31  ;;  %v7642_v31 = vsel %vm300_vm2, %v5368_v59, %v5370_v60  ;;  %v3626_v59 = vmul.f32 %v5707_v29, %v6900_v24  ;;  %vm1495_vm2 = vcmask 1031168  }
 0x72e   : > { %3591 = vrot.lane.b32.xlu1 %v3585_v39, %s5132_s28  ;;  %3553 = vrot.lane.b32.xlu0 %v3546_v32, %s5131_s23  ;;  %v7637_v32 = vsel %vm297_vm1, %v5366_v58, %v5364_v57  ;;  %10976 = vst [vmem:[#allocation418_spill] sm:$0xff] %v7642_v31  ;;  %v7644_v39 = vstv %s4807_s9  ;;  %v10979_v31 = vld [vmem:[#allocation16_spill] sm:$0xff]  ;;  %v1511_v58 = vmul.f32 %v7718_v7, %v5427_v44  ;;  %vm1200_vm1 = vcmask 1039360   ;;  %s4871_s9 = sshll.u32 %s5196_s22, 10  ;;  %s4640_s22 = scalar_lea.sflag [#allocation4], %s5295_s11 }
 0x72f   : > { %10975 = vst [vmem:[#allocation417_spill] sm:$0xff] %v7637_v32  ;;  %v7661_v23 = vsel %vm384_vm5, %v10980_v61, %v10979_v31  ;;  %v1217_v32 = vmul.f32 %v7644_v39, %v5437_v48  ;;  %v913_v61 = vmul.f32 %v7628_v1, %v6634_v14  ;;  %v3666_v31 = vmul.f32 %v5707_v29, %v6912_v21 }
 0x730   : > { %v7618_v46 = vpop.permute.xlu1 %2851  ;;  %v7620_v26 = vpop.permute.xlu0 %2482  ;;  %10981 = vst [vmem:[#allocation421_spill] sm:$0xff] %v7661_v23  ;;  %vm2664_vm5 = vcmask 998400  }
 0x731   : > { %10973 = vst [vmem:[#allocation415_spill] sm:$0xff] %v7618_v46  ;;  %10974 = vst [vmem:[#allocation416_spill] sm:$0xff] %v7620_v26  ;;  %v1210_v46 = vmul.f32 %v7626_v43, %v6634_v14  ;;  %v3625_v26 = vmul.f32 %v5703_v54, %v6900_v24  ;;  %v7711_v10 = vadd.f32 %v920_v51, %v913_v61  ;;  %v10990_v24 = vld [vmem:[#allocation62_spill] sm:$0xff] }
 0x732   : > { %3595 = vrot.lane.b32.xlu1 %v3587_v42, %s5132_s28  ;;  %3593 = vrot.lane.b32.xlu0 %v3586_v47, %s5132_s28  ;;  %v1504_v51 = vmul.f32 %v7689_v20, %v6590_v9  ;;  %v1505_v61 = vmul.f32 %v7689_v20, %v6634_v14  ;;  %v1785_v60 = vmul.f32 %v10990_v24, %v6618_v16 }
 0x733   : > { %v7691_v23 = vadd.f32 %v1217_v32, %v1210_v46  ;;  %v1209_v46 = vmul.f32 %v7626_v43, %v6590_v9  ;;  %v1215_v32 = vmul.f32 %v7644_v39, %v5430_v45 }
 0x734   : > { %v7650_v42 = vpop.permute.xlu1 %2855  ;;  %v7652_v47 = vpop.permute.xlu0 %2524  ;;  %v7762_v4 = vadd.f32 %v1512_v49, %v1505_v61  ;;  %v2385_v49 = vmul.f32 %v5835_v17, %v5437_v48  ;;  %v2377_v61 = vmul.f32 %v5833_v2, %v6590_v9 }
 0x735   : > { %10977 = vst [vmem:[#allocation419_spill] sm:$0xff] %v7650_v42  ;;  %10978 = vst [vmem:[#allocation420_spill] sm:$0xff] %v7652_v47  ;;  %v911_v42 = vmul.f32 %v7628_v1, %v6618_v16  ;;  %v912_v47 = vmul.f32 %v7628_v1, %v6590_v9 }
 0x736   : > { %3631 = vrot.lane.b32.xlu1 %v3625_v26, %s5133_s10  ;;  %3633 = vrot.lane.b32.xlu0 %v3626_v59, %s5133_s10  ;;  %10995 = vst [vmem:[#allocation427_spill] sm:$0xff] %v7762_v4 }
 0x737   : > { %v7703_v57 = vadd.f32 %v918_v22, %v911_v42  ;;  %v7705_v30 = vadd.f32 %v919_v56, %v912_v47  ;;  %v7722_v56 = vadd.f32 %v1215_v32, %v1208_v19  ;;  %v1503_v22 = vmul.f32 %v7689_v20, %v6618_v16  ;;  %v10991_v42 = vld [vmem:[#allocation63_spill] sm:$0xff] }
 0x738   : > { %v7695_v26 = vpop.permute.xlu1 %2887  ;;  %v7697_v59 = vpop.permute.xlu0 %2566  ;;  %v1794_v47 = vmul.f32 %v10991_v42, %v5437_v48  ;;  %v3665_v19 = vmul.f32 %v5703_v54, %v6912_v21  ;;  %v3706_v32 = vmul.f32 %v5707_v29, %v6924_v18  ;;  %v1792_v52 = vmul.f32 %v10991_v42, %v5430_v45 }
 0x739   : > { %10988 = vst [vmem:[#allocation424_spill] sm:$0xff] %v7695_v26  ;;  %10989 = vst [vmem:[#allocation425_spill] sm:$0xff] %v7697_v59  ;;  %v1216_v26 = vmul.f32 %v7644_v39, %v5427_v44  ;;  %v1787_v59 = vmul.f32 %v10990_v24, %v6634_v14 }
 0x73a   : > { %3635 = vrot.lane.b32.xlu1 %v3627_v50, %s5133_s10  ;;  %3673 = vrot.lane.b32.xlu0 %v3666_v31, %s5134_s17 }
 0x73b   : > { %v7742_v28 = vadd.f32 %v1216_v26, %v1209_v46  ;;  %v7758_v26 = vadd.f32 %v1510_v0, %v1503_v22  ;;  %v7760_v46 = vadd.f32 %v1511_v58, %v1504_v51  ;;  %v3667_v0 = vmul.f32 %v5801_v25, %v6912_v21 }
 0x73c   : > { %v7734_v50 = vpop.permute.xlu1 %2891  ;;  %v7736_v31 = vpop.permute.xlu0 %2608  ;;  %v3746_v58 = vmul.f32 %v5707_v29, %v6936_v15  ;;  %v2080_v22 = vmul.f32 %v5843_v34, %v6618_v16  ;;  %v2376_v21 = vmul.f32 %v5833_v2, %v6618_v16  ;;  %v3264_v16 = vmul.f32 %v5707_v29, %v7626_v43 }
 0x73d   : > { %10992 = vst [vmem:[#allocation62_spill] sm:$0xff] %v7734_v50  ;;  %10993 = vst [vmem:[#allocation63_spill] sm:$0xff] %v7736_v31  ;;  %v7750_v50 = vadd.f32 %v1794_v47, %v1787_v59  ;;  %v1786_v31 = vmul.f32 %v10990_v24, %v6590_v9  ;;  %v2378_v59 = vmul.f32 %v5833_v2, %v6634_v14 }
 0x73e   : > { %3671 = vrot.lane.b32.xlu1 %v3665_v19, %s5134_s17  ;;  %3713 = vrot.lane.b32.xlu0 %v3706_v32, %s5135_s13  ;;  %10994 = vst [vmem:[#allocation426_spill] sm:$0xff] %v7760_v46  ;;  %v1793_v47 = vmul.f32 %v10991_v42, %v5427_v44  ;;  %v7768_v24 = vadd.f32 %v1792_v52, %v1785_v60  ;;  %v11001_v19 = vld [vmem:[#allocation68_spill] sm:$0xff] }
 0x73f   : > { %v2081_v60 = vmul.f32 %v5843_v34, %v6590_v9  ;;  %v2082_v52 = vmul.f32 %v5843_v34, %v6634_v14  ;;  %v7794_v42 = vadd.f32 %v2385_v49, %v2378_v59  ;;  %v2087_v32 = vmul.f32 %v11001_v19, %v5430_v45 }
 0x740   : > { %10996 = vst [vmem:[#allocation428_spill] sm:$0xff] %v7768_v24  ;;  %v7770_v27 = vpop.permute.xlu1 %2923  ;;  %v7772_v35 = vpop.permute.xlu0 %2781  ;;  %v7786_v51 = vadd.f32 %v1793_v47, %v1786_v31  ;;  %v2088_v34 = vmul.f32 %v11001_v19, %v5427_v44  ;;  %v2089_v14 = vmul.f32 %v11001_v19, %v5437_v48  ;;  %v2383_v31 = vmul.f32 %v5835_v17, %v5430_v45  ;;  %v11017_v45 = vld [vmem:[#allocation311_spill] sm:$0xff]  ;;  %v11115_v24 = vld [vmem:[#allocation101_spill] sm:$0xff] }
 0x741   : > { %10997 = vst [vmem:[#allocation429_spill] sm:$0xff] %v7770_v27  ;;  %10998 = vst [vmem:[#allocation430_spill] sm:$0xff] %v7772_v35  ;;  %v2384_v2 = vmul.f32 %v5835_v17, %v5427_v44  ;;  %v3705_v59 = vmul.f32 %v5703_v54, %v6924_v18  ;;  %v7814_v49 = vadd.f32 %v2087_v32, %v2080_v22 }
 0x742   : > { %10999 = vst [vmem:[#allocation431_spill] sm:$0xff] %v7786_v51  ;;  %3675 = vrot.lane.b32.xlu1 %v3667_v0, %s5134_s17  ;;  %3753 = vrot.lane.b32.xlu0 %v3746_v58, %s5136_s8  ;;  %11000 = vst [vmem:[#allocation432_spill] sm:$0xff] %v7794_v42  ;;  %v3812_v58 = vmul.f32 %v5703_v54, %v6948_v40  ;;  %v7816_v27 = vadd.f32 %v2088_v34, %v2081_v60 }
 0x743   : > { %11004 = vst [vmem:[#allocation434_spill] sm:$0xff] %v7814_v49  ;;  %v7818_v48 = vadd.f32 %v2089_v14, %v2082_v52  ;;  %v2995_v19 = vmul.f32 %v5801_v25, %v7628_v1  ;;  %v7822_v17 = vadd.f32 %v2383_v31, %v2376_v21  ;;  %v3814_v22 = vmul.f32 %v5801_v25, %v6948_v40 }
 0x744   : > { %v7806_v47 = vpop.permute.xlu1 %2927  ;;  %v7808_v0 = vpop.permute.xlu0 %2817  ;;  %11005 = vst [vmem:[#allocation435_spill] sm:$0xff] %v7816_v27  ;;  %v3745_v60 = vmul.f32 %v5703_v54, %v6936_v15  ;;  %v3001_v52 = vmul.f32 %v5797_v6, %v7648_v13  ;;  %v2993_v21 = vmul.f32 %v5703_v54, %v7628_v1  ;;  %v3852_v34 = vmul.f32 %v5703_v54, %v6970_v12 }
 0x745   : > { %11002 = vst [vmem:[#allocation68_spill] sm:$0xff] %v7806_v47  ;;  %11003 = vst [vmem:[#allocation433_spill] sm:$0xff] %v7808_v0  ;;  %v7824_v47 = vadd.f32 %v2384_v2, %v2377_v61  ;;  %v3707_v0 = vmul.f32 %v5801_v25, %v6924_v18  ;;  %v3747_v18 = vmul.f32 %v5801_v25, %v6936_v15 }
 0x746   : > { %11006 = vst [vmem:[#allocation436_spill] sm:$0xff] %v7818_v48  ;;  %11007 = vst [vmem:[#allocation437_spill] sm:$0xff] %v7822_v17  ;;  %3711 = vrot.lane.b32.xlu1 %v3705_v59, %s5135_s13  ;;  %3818 = vrot.lane.b32.xlu0 %v3812_v58, %s5131_s23  ;;  %v3854_v14 = vmul.f32 %v5801_v25, %v6970_v12  ;;  %v2994_v31 = vmul.f32 %v5707_v29, %v7628_v1  ;;  %v11020_v17 = vld [vmem:[#allocation83_spill] sm:$0xff] }
 0x747   : > { %11008 = vst [vmem:[#allocation438_spill] sm:$0xff] %v7824_v47  ;;  %v7850_v2 = vadd.f32 %v3001_v52, %v2995_v19  ;;  %v3813_v59 = vmul.f32 %v5707_v29, %v6948_v40  ;;  %v3892_v58 = vmul.f32 %v5703_v54, %v6992_v33  ;;  %v3000_v15 = vmul.f32 %v5700_v53, %v7648_v13 }
 0x748   : > { %v7838_v61 = vpop.permute.xlu1 %2959  ;;  %v7840_v32 = vpop.permute.xlu0 %2853  ;;  %v7864_v1 = vmul.f32 %v5707_v29, %v6970_v12  ;;  %v7868_v40 = vmul.f32 %v5801_v25, %v6992_v33  ;;  %v7874_v52 = vmul.f32 %v5707_v29, %v6992_v33  ;;  %v7896_v33 = vmul.f32 %v5703_v54, %v7080_v5 }
 0x749   : > { %11009 = vst [vmem:[#allocation439_spill] sm:$0xff] %v7838_v61  ;;  %11010 = vst [vmem:[#allocation440_spill] sm:$0xff] %v7840_v32  ;;  %v2999_v61 = vmul.f32 %v5696_v41, %v7648_v13  ;;  %v7882_v13 = vmul.f32 %v5707_v29, %v7014_v55  ;;  %v7888_v32 = vadd.f32 %v3000_v15, %v2994_v31 }
 0x74a   : > { %11011 = vst [vmem:[#allocation441_spill] sm:$0xff] %v7850_v2  ;;  %3715 = vrot.lane.b32.xlu1 %v3707_v0, %s5135_s13  ;;  %3822 = vrot.lane.b32.xlu0 %v3814_v22, %s5131_s23  ;;  %v7878_v0 = vmul.f32 %v5703_v54, %v7014_v55  ;;  %v7904_v44 = vmul.f32 %v5801_v25, %v7080_v5 }
 0x74b   : > { %v7870_v19 = vadd.f32 %v2999_v61, %v2993_v21  ;;  %11015 = vst [vmem:[#allocation445_spill] sm:$0xff] %v7888_v32  ;;  %v7892_v21 = vmul.f32 %v5801_v25, %v7014_v55  ;;  %v11016_v61 = vld [vmem:[#allocation299_spill] sm:$0xff]  ;;  %v7908_v31 = vmul.f32 %v5707_v29, %v7080_v5  ;;  %v7912_v55 = vmul.f32 %v5703_v54, %v7152_v11 }
 0x74c   : > { %v7884_v12 = vpop.permute.xlu1 %2963  ;;  %v7886_v22 = vpop.permute.xlu0 %2889  ;;  %v7900_v35 = vmul.f32 %v5703_v54, %v11016_v61  ;;  %v3265_v15 = vmul.f32 %v5801_v25, %v7626_v43  ;;  %v3263_v5 = vmul.f32 %v5703_v54, %v7626_v43  ;;  %v7930_v9 = vmul.f32 %v5703_v54, %v11017_v45 }
 0x74d   : > { %11012 = vst [vmem:[#allocation442_spill] sm:$0xff] %v7870_v19  ;;  %11013 = vst [vmem:[#allocation443_spill] sm:$0xff] %v7884_v12  ;;  %v7920_v12 = vmul.f32 %v5707_v29, %v7152_v11  ;;  %v7946_v19 = vmul.f32 %v5801_v25, %v11017_v45  ;;  %v7950_v47 = vmul.f32 %v5700_v53, %v11020_v17 }
 0x74e   : > { %11014 = vst [vmem:[#allocation444_spill] sm:$0xff] %v7886_v22  ;;  %3751 = vrot.lane.b32.xlu1 %v3745_v60, %s5136_s8  ;;  %3858 = vrot.lane.b32.xlu0 %v3852_v34, %s5132_s28  ;;  %v7924_v22 = vmul.f32 %v5801_v25, %v7152_v11  ;;  %v3271_v60 = vmul.f32 %v5797_v6, %v7644_v39 }
 0x74f   : > { %v7936_v34 = vmul.f32 %v5707_v29, %v11017_v45  ;;  %v7954_v2 = vmul.f32 %v5696_v41, %v11020_v17  ;;  %v3269_v48 = vmul.f32 %v5696_v41, %v7644_v39  ;;  %v7966_v45 = vmul.f32 %v5797_v6, %v11020_v17  ;;  %v11024_v17 = vld [vmem:[#allocation314_spill] sm:$0xff] }
 0x750   : > { %v7940_v32 = vpop.permute.xlu1 %3011  ;;  %v7942_v11 = vpop.permute.xlu0 %2925  ;;  %v7958_v43 = vadd.f32 %v3271_v60, %v3265_v15  ;;  %v7976_v15 = vmul.f32 %v5801_v25, %v7174_v37  ;;  %v7980_v60 = vmul.f32 %v5707_v29, %v7174_v37  ;;  %v7986_v49 = vmul.f32 %v5707_v29, %v11024_v17 }
 0x751   : > { %11018 = vst [vmem:[#allocation299_spill] sm:$0xff] %v7940_v32  ;;  %11019 = vst [vmem:[#allocation311_spill] sm:$0xff] %v7942_v11  ;;  %v7962_v11 = vmul.f32 %v5703_v54, %v7174_v37  ;;  %v3270_v32 = vmul.f32 %v5700_v53, %v7644_v39  ;;  %v7972_v27 = vadd.f32 %v3269_v48, %v3263_v5  ;;  %v11025_v48 = vld [vmem:[#allocation102_spill] sm:$0xff] }
 0x752   : > { %11021 = vst [vmem:[#allocation83_spill] sm:$0xff] %v7958_v43  ;;  %3755 = vrot.lane.b32.xlu1 %v3747_v18, %s5136_s8  ;;  %3862 = vrot.lane.b32.xlu0 %v3854_v14, %s5132_s28  ;;  %v7990_v39 = vmul.f32 %v5703_v54, %v11024_v17  ;;  %v7994_v18 = vmul.f32 %v5696_v41, %v11025_v48 }
 0x753   : > { %11022 = vst [vmem:[#allocation446_spill] sm:$0xff] %v7972_v27  ;;  %v7982_v43 = vadd.f32 %v3270_v32, %v3264_v16  ;;  %v8002_v16 = vmul.f32 %v5801_v25, %v11024_v17  ;;  %v8006_v37 = vmul.f32 %v5797_v6, %v11025_v48  ;;  %v8010_v32 = vmul.f32 %v5700_v53, %v11025_v48  ;;  %v11030_v27 = vld [vmem:[#allocation86_spill] sm:$0xff] }
 0x754   : > { %v7996_v14 = vpop.permute.xlu1 %3015  ;;  %v7998_v5 = vpop.permute.xlu0 %2961  ;;  %v8024_v17 = vmul.f32 %v5703_v54, %v7196_v63  ;;  %v3533_v42 = vmul.f32 %v5703_v54, %v7689_v20  ;;  %v8032_v48 = vmul.f32 %v5797_v6, %v11030_v27  ;;  %v3534_v51 = vmul.f32 %v5707_v29, %v7689_v20 }
 0x755   : > { %11023 = vst [vmem:[#allocation447_spill] sm:$0xff] %v7982_v43  ;;  %11026 = vst [vmem:[#allocation314_spill] sm:$0xff] %v7996_v14  ;;  %v3535_v43 = vmul.f32 %v5801_v25, %v7689_v20  ;;  %v8016_v14 = vmul.f32 %v5700_v53, %v11030_v27 }
 0x756   : > { %11027 = vst [vmem:[#allocation102_spill] sm:$0xff] %v7998_v5  ;;  %11028 = vst [vmem:[#allocation448_spill] sm:$0xff] %v8006_v37  ;;  %v8020_v5 = vmul.f32 %v5696_v41, %v11030_v27  ;;  %3820 = vrot.lane.b32.xlu1 %v3813_v59, %s5131_s23  ;;  %3898 = vrot.lane.b32.xlu0 %v3892_v58, %s5133_s10  ;;  %v8044_v59 = vmul.f32 %v5707_v29, %v7196_v63  ;;  %v11037_v58 = vld [vmem:[#allocation317_spill] sm:$0xff] }
 0x757   : > { %11029 = vst [vmem:[#allocation449_spill] sm:$0xff] %v8010_v32  ;;  %11031 = vst [vmem:[#allocation86_spill] sm:$0xff] %v8016_v14  ;;  %v8048_v27 = vmul.f32 %v5707_v29, %v11037_v58  ;;  %v8056_v14 = vadd.f32 %v3541_v8, %v3535_v43  ;;  %v11131_v37 = vld [vmem:[#allocation129_spill] sm:$0xff] }
 0x758   : > { %11032 = vst [vmem:[#allocation450_spill] sm:$0xff] %v8020_v5  ;;  %11033 = vst [vmem:[#allocation451_spill] sm:$0xff] %v8024_v17  ;;  %v8040_v17 = vmul.f32 %v5801_v25, %v7196_v63  ;;  %v8052_v5 = vpop.permute.xlu1 %3051  ;;  %v8054_v20 = vpop.permute.xlu0 %3013  ;;  %v3540_v63 = vmul.f32 %v5700_v53, %v7718_v7 }
 0x759   : > { %11034 = vst [vmem:[#allocation452_spill] sm:$0xff] %v8032_v48  ;;  %11036 = vst [vmem:[#allocation454_spill] sm:$0xff] %v8044_v59  ;;  %v3539_v48 = vmul.f32 %v5696_v41, %v7718_v7  ;;  %v11043_v59 = vld [vmem:[#allocation107_spill] sm:$0xff] }
 0x75a   : > { %11035 = vst [vmem:[#allocation453_spill] sm:$0xff] %v8040_v17  ;;  %11038 = vst [vmem:[#allocation317_spill] sm:$0xff] %v8048_v27  ;;  %v8060_v17 = vmul.f32 %v5703_v54, %v11037_v58  ;;  %v8066_v27 = vmul.f32 %v5696_v41, %v11043_v59  ;;  %v8076_v8 = vmul.f32 %v5797_v6, %v11043_v59  ;;  %3860 = vrot.lane.b32.xlu1 %v7864_v1, %s5132_s28 }
 0x75b   : > { %11039 = vst [vmem:[#allocation455_spill] sm:$0xff] %v8052_v5  ;;  %11040 = vst [vmem:[#allocation456_spill] sm:$0xff] %v8054_v20  ;;  %v8068_v46 = vadd.f32 %v3539_v48, %v3533_v42  ;;  %v8072_v5 = vmul.f32 %v5801_v25, %v11037_v58  ;;  %v8080_v43 = vmul.f32 %v5700_v53, %v11043_v59  ;;  %3902 = vrot.lane.b32.xlu0 %v7868_v40, %s5133_s10  ;;  %v11052_v58 = vld [vmem:[#allocation89_spill] sm:$0xff] }
 0x75c   : > { %11041 = vst [vmem:[#allocation457_spill] sm:$0xff] %v8056_v14  ;;  %11042 = vst [vmem:[#allocation458_spill] sm:$0xff] %v8060_v17  ;;  %v8086_v7 = vadd.f32 %v3540_v63, %v3534_v51  ;;  %v8090_v42 = vmul.f32 %v5801_v25, %v11016_v61  ;;  %v8094_v48 = vmul.f32 %v5707_v29, %v11016_v61  ;;  %v8112_v63 = vpop.permute.xlu1 %3055  ;;  %v8114_v61 = vpop.permute.xlu0 %3053  ;;  %v11098_v14 = vld [vmem:[#allocation110_spill] sm:$0xff] }
 0x75d   : > { %11044 = vst [vmem:[#allocation107_spill] sm:$0xff] %v8066_v27  ;;  %11045 = vst [vmem:[#allocation459_spill] sm:$0xff] %v8068_v46  ;;  %v8098_v59 = vmul.f32 %v5700_v53, %v11052_v58  ;;  %v8102_v1 = vmul.f32 %v5696_v41, %v11052_v58  ;;  %v8106_v51 = vmul.f32 %v5703_v54, %v7218_v3  ;;  %v11109_v17 = vld [vmem:[#allocation118_spill] sm:$0xff] }
 0x75e   : > { %11046 = vst [vmem:[#allocation460_spill] sm:$0xff] %v8072_v5  ;;  %11047 = vst [vmem:[#allocation461_spill] sm:$0xff] %v8076_v8  ;;  %v8110_v40 = vmul.f32 %v5797_v6, %v11052_v58  ;;  %v8118_v20 = vmul.f32 %v5801_v25, %v7218_v3  ;;  %3900 = vrot.lane.b32.xlu1 %v7874_v52, %s5133_s10  ;;  %v11075_v52 = vld [vmem:[#allocation81_spill] sm:$0xff] }
 0x75f   : > { %11048 = vst [vmem:[#allocation462_spill] sm:$0xff] %v8080_v43  ;;  %11049 = vst [vmem:[#allocation463_spill] sm:$0xff] %v8086_v7  ;;  %v8122_v7 = vmul.f32 %v5707_v29, %v7218_v3  ;;  %v8142_v3 = vmul.f32 %v5801_v25, %v7128_v62  ;;  %3938 = vrot.lane.b32.xlu0 %v7878_v0, %s5134_s17  ;;  %v11071_v25 = vld [vmem:[#allocation304_spill] sm:$0xff]  ;;  %v11099_v43 = vld [vmem:[#allocation77_spill] sm:$0xff] }
 0x760   : > { %11050 = vst [vmem:[#allocation464_spill] sm:$0xff] %v8090_v42  ;;  %11051 = vst [vmem:[#allocation465_spill] sm:$0xff] %v8094_v48  ;;  %v11094_v48 = vld [vmem:[#allocation105_spill] sm:$0xff]  ;;  %v11096_v42 = vld [vmem:[#allocation108_spill] sm:$0xff] }
 0x761   : > { %11053 = vst [vmem:[#allocation89_spill] sm:$0xff] %v8098_v59  ;;  %11054 = vst [vmem:[#allocation466_spill] sm:$0xff] %v8102_v1  ;;  %v11061_v1 = vld [vmem:[#allocation57_spill] sm:$0xff] }
 0x762   : > { %11055 = vst [vmem:[#allocation467_spill] sm:$0xff] %v8106_v51  ;;  %11056 = vst [vmem:[#allocation468_spill] sm:$0xff] %v8110_v40  ;;  %v8126_v59 = vmul.f32 %v5700_v53, %v11061_v1  ;;  %v8130_v58 = vmul.f32 %v5696_v41, %v11061_v1  ;;  %v11090_v51 = vld [vmem:[#allocation100_spill] sm:$0xff]  ;;  %3940 = vrot.lane.b32.xlu1 %v7882_v13, %s5134_s17  ;;  %v11101_v8 = vld [vmem:[#allocation113_spill] sm:$0xff] }
 0x763   : > { %11057 = vst [vmem:[#allocation469_spill] sm:$0xff] %v8112_v63  ;;  %11058 = vst [vmem:[#allocation470_spill] sm:$0xff] %v8114_v61  ;;  %v8134_v63 = vmul.f32 %v5703_v54, %v7128_v62  ;;  %v8138_v61 = vmul.f32 %v5797_v6, %v11061_v1  ;;  %3942 = vrot.lane.b32.xlu0 %v7892_v21, %s5134_s17  ;;  %v11102_v5 = vld [vmem:[#allocation85_spill] sm:$0xff]  ;;  %v11105_v13 = vld [vmem:[#allocation91_spill] sm:$0xff] }
 0x764   : > { %11059 = vst [vmem:[#allocation471_spill] sm:$0xff] %v8118_v20  ;;  %11060 = vst [vmem:[#allocation472_spill] sm:$0xff] %v8122_v7  ;;  %v8146_v7 = vmul.f32 %v5707_v29, %v7128_v62  ;;  %v11073_v62 = vld [vmem:[#allocation52_spill] sm:$0xff]  ;;  %v11107_v21 = vld [vmem:[#allocation94_spill] sm:$0xff] }
 0x765   : > { %11062 = vst [vmem:[#allocation57_spill] sm:$0xff] %v8126_v59  ;;  %11063 = vst [vmem:[#allocation473_spill] sm:$0xff] %v8130_v58  ;;  %v8172_v0 = vsel %vm685_vm10, %v11073_v62, %v11075_v52  ;;  %v11082_v59 = vld [vmem:[#allocation90_spill] sm:$0xff] }
 0x766   : > { %11064 = vst [vmem:[#allocation474_spill] sm:$0xff] %v8134_v63  ;;  %11065 = vst [vmem:[#allocation475_spill] sm:$0xff] %v8138_v61  ;;  %v11068_v63 = vld [vmem:[#allocation112_spill] sm:$0xff]  ;;  %4088 = vrot.lane.b32.xlu1 %v7896_v33, %s5131_s23 }
 0x767   : > { %11066 = vst [vmem:[#allocation476_spill] sm:$0xff] %v8142_v3  ;;  %11067 = vst [vmem:[#allocation477_spill] sm:$0xff] %v8146_v7  ;;  %v8154_v58 = vmul.f32 %v5700_v53, %v11068_v63  ;;  %v8158_v1 = vmul.f32 %v5696_v41, %v11068_v63  ;;  %v8162_v3 = vmul.f32 %v5703_v54, %v11071_v25  ;;  %v11074_v7 = vld [vmem:[#allocation76_spill] sm:$0xff]  ;;  %v11078_v54 = vld [vmem:[#allocation54_spill] sm:$0xff]  ;;  %3978 = vrot.lane.b32.xlu0 %v7900_v35, %s5135_s13 }
 0x768   : > { %v8167_v61 = vsel %vm685_vm10, %v11074_v7, %v11073_v62  ;;  %v8176_v53 = vmul.f32 %v5797_v6, %v11068_v63  ;;  %v8180_v41 = vmul.f32 %v5707_v29, %v11071_v25  ;;  %v11080_v7 = vld [vmem:[#allocation87_spill] sm:$0xff]  ;;  %v11081_v62 = vld [vmem:[#allocation56_spill] sm:$0xff]  ;;  %v11083_v63 = vld [vmem:[#allocation93_spill] sm:$0xff]  ;;  %v8202_v6 = vpop.permute.xlu1 %3091  ;;  %v8204_v25 = vpop.permute.xlu0 %3093 }
 0x769   : > { %11069 = vst [vmem:[#allocation112_spill] sm:$0xff] %v8154_v58  ;;  %11070 = vst [vmem:[#allocation478_spill] sm:$0xff] %v8158_v1  ;;  %v8190_v58 = vsel %vm724_vm11, %v11078_v54, %v11080_v7  ;;  %v8195_v20 = vsel %vm763_vm12, %v11082_v59, %v11081_v62  ;;  %v8200_v29 = vsel %vm763_vm12, %v11081_v62, %v11083_v63  ;;  %v11089_v59 = vld [vmem:[#allocation65_spill] sm:$0xff]  ;;  %v11091_v62 = vld [vmem:[#allocation103_spill] sm:$0xff] }
 0x76a   : > { %11072 = vst [vmem:[#allocation479_spill] sm:$0xff] %v8162_v3  ;;  %11076 = vst [vmem:[#allocation52_spill] sm:$0xff] %v8176_v53  ;;  %v11079_v3 = vld [vmem:[#allocation84_spill] sm:$0xff]  ;;  %v8219_v46 = vsel %vm841_vm14, %v11090_v51, %v11089_v59  ;;  %v8239_v51 = vsel %vm685_vm10, %v11099_v43, %v11098_v14  ;;  %v11145_v35 = vld [vmem:[#allocation121_spill] sm:$0xff]  ;;  %4092 = vrot.lane.b32.xlu1 %v7904_v44, %s5131_s23 }
 0x76b   : > { %11077 = vst [vmem:[#allocation76_spill] sm:$0xff] %v8180_v41  ;;  %v8185_v1 = vsel %vm724_vm11, %v11079_v3, %v11078_v54  ;;  %11084 = vst [vmem:[#allocation81_spill] sm:$0xff] %v8202_v6  ;;  %v11086_v3 = vld [vmem:[#allocation61_spill] sm:$0xff]  ;;  %v11087_v41 = vld [vmem:[#allocation96_spill] sm:$0xff]  ;;  %v8224_v6 = vsel %vm841_vm14, %v11089_v59, %v11091_v62  ;;  %4090 = vrot.lane.b32.xlu0 %v7908_v31, %s5131_s23 }
 0x76c   : > { %11085 = vst [vmem:[#allocation54_spill] sm:$0xff] %v8204_v25  ;;  %v8209_v53 = vsel %vm802_vm13, %v11087_v41, %v11086_v3  ;;  %v11088_v54 = vld [vmem:[#allocation98_spill] sm:$0xff]  ;;  %11092 = vst [vmem:[#allocation84_spill] sm:$0xff] %v8224_v6  ;;  %v11112_v6 = vld [vmem:[#allocation99_spill] sm:$0xff]  ;;  %v8285_v4 = vpop.permute.xlu1 %3095 }
 0x76d   : > { %v8214_v40 = vsel %vm802_vm13, %v11086_v3, %v11088_v54  ;;  %v11093_v25 = vld [vmem:[#allocation70_spill] sm:$0xff]  ;;  %v11114_v62 = vld [vmem:[#allocation120_spill] sm:$0xff]  ;;  %11117 = vst [vmem:[#allocation65_spill] sm:$0xff] %v8285_v4 }
 0x76e   : > { %v8229_v41 = vsel %vm880_vm15, %v11094_v48, %v11093_v25  ;;  %v8234_v3 = vsel %vm880_vm15, %v11093_v25, %v11096_v42  ;;  %v11100_v59 = vld [vmem:[#allocation82_spill] sm:$0xff]  ;;  %v8253_v25 = vsel %vm724_vm11, %v11102_v5, %v11101_v8  ;;  %v11103_v42 = vld [vmem:[#allocation88_spill] sm:$0xff]  ;;  %4358 = vrot.lane.b32.xlu1 %v7912_v55, %s5131_s23  ;;  %v11221_v55 = vld [vmem:[#allocation309_spill] sm:$0xff] }
 0x76f   : > { %11095 = vst [vmem:[#allocation87_spill] sm:$0xff] %v8229_v41  ;;  %11097 = vst [vmem:[#allocation56_spill] sm:$0xff] %v8234_v3  ;;  %v8248_v48 = vsel %vm685_vm10, %v11098_v14, %v11100_v59  ;;  %v8258_v43 = vsel %vm724_vm11, %v11101_v8, %v11103_v42  ;;  %v11104_v3 = vld [vmem:[#allocation115_spill] sm:$0xff]  ;;  %v11110_v41 = vld [vmem:[#allocation97_spill] sm:$0xff]  ;;  %v8278_v8 = vsel %vm802_vm13, %v11109_v17, %v11112_v6  ;;  %4360 = vrot.lane.b32.xlu0 %v7920_v12, %s5131_s23 }
 0x770   : > { %v8263_v27 = vsel %vm763_vm12, %v11105_v13, %v11104_v3  ;;  %v8268_v14 = vsel %vm763_vm12, %v11104_v3, %v11107_v21  ;;  %v8273_v5 = vsel %vm802_vm13, %v11110_v41, %v11109_v17  ;;  %11113 = vst [vmem:[#allocation96_spill] sm:$0xff] %v8278_v8  ;;  %v8283_v13 = vsel %vm841_vm14, %v11115_v24, %v11114_v62  ;;  %v11119_v3 = vld [vmem:[#allocation104_spill] sm:$0xff]  ;;  %v11121_v41 = vld [vmem:[#allocation123_spill] sm:$0xff]  ;;  %v11124_v17 = vld [vmem:[#allocation109_spill] sm:$0xff] }
 0x771   : > { %11106 = vst [vmem:[#allocation90_spill] sm:$0xff] %v8263_v27  ;;  %11108 = vst [vmem:[#allocation93_spill] sm:$0xff] %v8268_v14  ;;  %v8287_v27 = vpop.permute.xlu0 %3133  ;;  %v8292_v14 = vsel %vm841_vm14, %v11114_v62, %v11119_v3  ;;  %v8302_v8 = vsel %vm880_vm15, %v11121_v41, %v11124_v17  ;;  %v11126_v24 = vld [vmem:[#allocation111_spill] sm:$0xff]  ;;  %v11183_v44 = vld [vmem:[#allocation146_spill] sm:$0xff] }
 0x772   : > { %11111 = vst [vmem:[#allocation61_spill] sm:$0xff] %v8273_v5  ;;  %11116 = vst [vmem:[#allocation98_spill] sm:$0xff] %v8283_v13  ;;  %v11122_v5 = vld [vmem:[#allocation106_spill] sm:$0xff]  ;;  %v11127_v13 = vld [vmem:[#allocation125_spill] sm:$0xff]  ;;  %4362 = vrot.lane.b32.xlu1 %v7924_v22, %s5131_s23  ;;  %s5137_s23 = smov 125  }
 0x773   : > { %11118 = vst [vmem:[#allocation100_spill] sm:$0xff] %v8287_v27  ;;  %11120 = vst [vmem:[#allocation70_spill] sm:$0xff] %v8292_v14  ;;  %v8297_v32 = vsel %vm880_vm15, %v11122_v5, %v11121_v41  ;;  %v8307_v4 = vsel %vm685_vm10, %v11127_v13, %v11126_v24  ;;  %v11128_v27 = vld [vmem:[#allocation127_spill] sm:$0xff]  ;;  %v11130_v14 = vld [vmem:[#allocation114_spill] sm:$0xff]  ;;  %4128 = vrot.lane.b32.xlu0 %v7930_v9, %s5132_s28 }
 0x774   : > { %11123 = vst [vmem:[#allocation105_spill] sm:$0xff] %v8297_v32  ;;  %11125 = vst [vmem:[#allocation110_spill] sm:$0xff] %v8302_v8  ;;  %v8312_v62 = vsel %vm685_vm10, %v11126_v24, %v11128_v27  ;;  %v8317_v5 = vsel %vm724_vm11, %v11131_v37, %v11130_v14  ;;  %v11133_v32 = vld [vmem:[#allocation131_spill] sm:$0xff]  ;;  %v11135_v13 = vld [vmem:[#allocation116_spill] sm:$0xff] }
 0x775   : > { %11129 = vst [vmem:[#allocation77_spill] sm:$0xff] %v8312_v62  ;;  %11132 = vst [vmem:[#allocation82_spill] sm:$0xff] %v8317_v5  ;;  %v8322_v41 = vsel %vm724_vm11, %v11130_v14, %v11133_v32  ;;  %v11136_v8 = vld [vmem:[#allocation133_spill] sm:$0xff]  ;;  %v11138_v17 = vld [vmem:[#allocation135_spill] sm:$0xff] }
 0x776   : > { %11134 = vst [vmem:[#allocation113_spill] sm:$0xff] %v8322_v41  ;;  %v8331_v24 = vsel %vm763_vm12, %v11136_v8, %v11135_v13  ;;  %v8336_v37 = vsel %vm763_vm12, %v11135_v13, %v11138_v17  ;;  %v11140_v5 = vld [vmem:[#allocation119_spill] sm:$0xff]  ;;  %v11141_v62 = vld [vmem:[#allocation137_spill] sm:$0xff]  ;;  %v11185_v31 = vld [vmem:[#allocation148_spill] sm:$0xff]  ;;  %4130 = vrot.lane.b32.xlu1 %v7936_v34, %s5132_s28 }
 0x777   : > { %11137 = vst [vmem:[#allocation85_spill] sm:$0xff] %v8331_v24  ;;  %11139 = vst [vmem:[#allocation88_spill] sm:$0xff] %v8336_v37  ;;  %v8341_v14 = vsel %vm802_vm13, %v11141_v62, %v11140_v5  ;;  %v11143_v41 = vld [vmem:[#allocation139_spill] sm:$0xff]  ;;  %v11146_v32 = vld [vmem:[#allocation141_spill] sm:$0xff]  ;;  %4132 = vrot.lane.b32.xlu0 %v7946_v19, %s5132_s28 }
 0x778   : > { %11142 = vst [vmem:[#allocation115_spill] sm:$0xff] %v8341_v14  ;;  %v8346_v33 = vsel %vm802_vm13, %v11140_v5, %v11143_v41  ;;  %v8351_v8 = vsel %vm841_vm14, %v11146_v32, %v11145_v35  ;;  %v11148_v24 = vld [vmem:[#allocation143_spill] sm:$0xff]  ;;  %v11150_v37 = vld [vmem:[#allocation124_spill] sm:$0xff]  ;;  %v11151_v17 = vld [vmem:[#allocation145_spill] sm:$0xff]  ;;  %v8370_v41 = vpop.permute.xlu0 %3173 }
 0x779   : > { %11144 = vst [vmem:[#allocation91_spill] sm:$0xff] %v8346_v33  ;;  %11147 = vst [vmem:[#allocation94_spill] sm:$0xff] %v8351_v8  ;;  %v8356_v13 = vsel %vm841_vm14, %v11145_v35, %v11148_v24  ;;  %v8361_v62 = vsel %vm880_vm15, %v11151_v17, %v11150_v37  ;;  %v11153_v14 = vld [vmem:[#allocation147_spill] sm:$0xff]  ;;  %v8368_v33 = vpop.permute.xlu1 %3131  ;;  %v11157_v32 = vld [vmem:[#allocation149_spill] sm:$0xff] }
 0x77a   : > { %11149 = vst [vmem:[#allocation118_spill] sm:$0xff] %v8356_v13  ;;  %11152 = vst [vmem:[#allocation97_spill] sm:$0xff] %v8361_v62  ;;  %v8366_v5 = vsel %vm880_vm15, %v11150_v37, %v11153_v14  ;;  %v11158_v8 = vld [vmem:[#allocation126_spill] sm:$0xff]  ;;  %v11160_v35 = vld [vmem:[#allocation128_spill] sm:$0xff]  ;;  %4150 = vrot.lane.b32.xlu1 %v7950_v47, %s5132_s28 }
 0x77b   : > { %11154 = vst [vmem:[#allocation99_spill] sm:$0xff] %v8366_v5  ;;  %11155 = vst [vmem:[#allocation120_spill] sm:$0xff] %v8368_v33  ;;  %v8375_v27 = vsel %vm685_vm10, %v11158_v8, %v11157_v32  ;;  %v8380_v13 = vsel %vm685_vm10, %v11157_v32, %v11160_v35  ;;  %v11162_v17 = vld [vmem:[#allocation151_spill] sm:$0xff]  ;;  %v11163_v62 = vld [vmem:[#allocation130_spill] sm:$0xff]  ;;  %4148 = vrot.lane.b32.xlu0 %v7954_v2, %s5132_s28 }
 0x77c   : > { %11156 = vst [vmem:[#allocation101_spill] sm:$0xff] %v8370_v41  ;;  %11159 = vst [vmem:[#allocation104_spill] sm:$0xff] %v8375_v27  ;;  %v8385_v24 = vsel %vm724_vm11, %v11163_v62, %v11162_v17  ;;  %v11165_v37 = vld [vmem:[#allocation132_spill] sm:$0xff]  ;;  %v11167_v41 = vld [vmem:[#allocation153_spill] sm:$0xff] }
 0x77d   : > { %11161 = vst [vmem:[#allocation123_spill] sm:$0xff] %v8380_v13  ;;  %11164 = vst [vmem:[#allocation106_spill] sm:$0xff] %v8385_v24  ;;  %v8390_v33 = vsel %vm724_vm11, %v11162_v17, %v11165_v37  ;;  %v11168_v5 = vld [vmem:[#allocation134_spill] sm:$0xff]  ;;  %v11170_v14 = vld [vmem:[#allocation136_spill] sm:$0xff] }
 0x77e   : > { %11166 = vst [vmem:[#allocation111_spill] sm:$0xff] %v8390_v33  ;;  %v8395_v8 = vsel %vm763_vm12, %v11168_v5, %v11167_v41  ;;  %v8400_v32 = vsel %vm763_vm12, %v11167_v41, %v11170_v14  ;;  %v11172_v13 = vld [vmem:[#allocation155_spill] sm:$0xff]  ;;  %v11173_v27 = vld [vmem:[#allocation138_spill] sm:$0xff]  ;;  %v11175_v17 = vld [vmem:[#allocation140_spill] sm:$0xff]  ;;  %v8453_v14 = vpop.permute.xlu0 %3213  ;;  %4398 = vrot.lane.b32.xlu1 %v7962_v11, %s5132_s28 }
 0x77f   : > { %11169 = vst [vmem:[#allocation125_spill] sm:$0xff] %v8395_v8  ;;  %11171 = vst [vmem:[#allocation114_spill] sm:$0xff] %v8400_v32  ;;  %v8405_v62 = vsel %vm802_vm13, %v11173_v27, %v11172_v13  ;;  %v8414_v5 = vsel %vm802_vm13, %v11172_v13, %v11175_v17  ;;  %v11177_v8 = vld [vmem:[#allocation157_spill] sm:$0xff]  ;;  %v11178_v33 = vld [vmem:[#allocation142_spill] sm:$0xff]  ;;  %4152 = vrot.lane.b32.xlu0 %v7966_v45, %s5132_s28 }
 0x780   : > { %11174 = vst [vmem:[#allocation129_spill] sm:$0xff] %v8405_v62  ;;  %11176 = vst [vmem:[#allocation116_spill] sm:$0xff] %v8414_v5  ;;  %v8419_v41 = vsel %vm841_vm14, %v11178_v33, %v11177_v8  ;;  %v11180_v32 = vld [vmem:[#allocation144_spill] sm:$0xff]  ;;  %v11182_v62 = vld [vmem:[#allocation159_spill] sm:$0xff] }
 0x781   : > { %11179 = vst [vmem:[#allocation133_spill] sm:$0xff] %v8419_v41  ;;  %v8424_v27 = vsel %vm841_vm14, %v11177_v8, %v11180_v32  ;;  %v8429_v24 = vsel %vm880_vm15, %v11183_v44, %v11182_v62  ;;  %v8434_v13 = vsel %vm880_vm15, %v11182_v62, %v11185_v31  ;;  %v11187_v5 = vld [vmem:[#allocation150_spill] sm:$0xff]  ;;  %v11188_v17 = vld [vmem:[#allocation161_spill] sm:$0xff]  ;;  %v11190_v41 = vld [vmem:[#allocation163_spill] sm:$0xff] }
 0x782   : > { %11181 = vst [vmem:[#allocation119_spill] sm:$0xff] %v8424_v27  ;;  %11184 = vst [vmem:[#allocation137_spill] sm:$0xff] %v8429_v24  ;;  %v8439_v33 = vsel %vm685_vm10, %v11188_v17, %v11187_v5  ;;  %v8444_v8 = vsel %vm685_vm10, %v11187_v5, %v11190_v41  ;;  %v11192_v27 = vld [vmem:[#allocation152_spill] sm:$0xff]  ;;  %v11193_v32 = vld [vmem:[#allocation165_spill] sm:$0xff]  ;;  %v8451_v24 = vpop.permute.xlu1 %3135  ;;  %4402 = vrot.lane.b32.xlu1 %v7976_v15, %s5132_s28 }
 0x783   : > { %11186 = vst [vmem:[#allocation121_spill] sm:$0xff] %v8434_v13  ;;  %11189 = vst [vmem:[#allocation141_spill] sm:$0xff] %v8439_v33  ;;  %v8449_v44 = vsel %vm724_vm11, %v11193_v32, %v11192_v27  ;;  %v11197_v62 = vld [vmem:[#allocation167_spill] sm:$0xff]  ;;  %v11199_v17 = vld [vmem:[#allocation154_spill] sm:$0xff]  ;;  %4400 = vrot.lane.b32.xlu0 %v7980_v60, %s5132_s28 }
 0x784   : > { %11191 = vst [vmem:[#allocation124_spill] sm:$0xff] %v8444_v8  ;;  %11194 = vst [vmem:[#allocation145_spill] sm:$0xff] %v8449_v44  ;;  %v8458_v13 = vsel %vm724_vm11, %v11192_v27, %v11197_v62  ;;  %v11200_v33 = vld [vmem:[#allocation169_spill] sm:$0xff]  ;;  %v11202_v5 = vld [vmem:[#allocation171_spill] sm:$0xff] }
 0x785   : > { %11195 = vst [vmem:[#allocation149_spill] sm:$0xff] %v8451_v24  ;;  %11196 = vst [vmem:[#allocation126_spill] sm:$0xff] %v8453_v14  ;;  %v8463_v31 = vsel %vm763_vm12, %v11200_v33, %v11199_v17  ;;  %v8468_v41 = vsel %vm763_vm12, %v11199_v17, %v11202_v5  ;;  %v11204_v32 = vld [vmem:[#allocation156_spill] sm:$0xff]  ;;  %v11205_v44 = vld [vmem:[#allocation173_spill] sm:$0xff] }
 0x786   : > { %11198 = vst [vmem:[#allocation128_spill] sm:$0xff] %v8458_v13  ;;  %11201 = vst [vmem:[#allocation151_spill] sm:$0xff] %v8463_v31  ;;  %v8473_v24 = vsel %vm802_vm13, %v11205_v44, %v11204_v32  ;;  %v11207_v14 = vld [vmem:[#allocation175_spill] sm:$0xff]  ;;  %v11209_v62 = vld [vmem:[#allocation158_spill] sm:$0xff]  ;;  %4170 = vrot.lane.b32.xlu1 %v7986_v49, %s5133_s10 }
 0x787   : > { %11203 = vst [vmem:[#allocation130_spill] sm:$0xff] %v8468_v41  ;;  %11206 = vst [vmem:[#allocation153_spill] sm:$0xff] %v8473_v24  ;;  %v8478_v27 = vsel %vm802_vm13, %v11204_v32, %v11207_v14  ;;  %v11210_v13 = vld [vmem:[#allocation177_spill] sm:$0xff]  ;;  %v11214_v44 = vld [vmem:[#allocation179_spill] sm:$0xff]  ;;  %v1241_v24 = vadd.f32 %v11221_v55, %v7691_v23  ;;  %v8529_v23 = vpop.permute.xlu1 %3171  ;;  %4168 = vrot.lane.b32.xlu0 %v7990_v39, %s5133_s10 }
 0x788   : > { %11208 = vst [vmem:[#allocation134_spill] sm:$0xff] %v8478_v27  ;;  %v8483_v33 = vsel %vm841_vm14, %v11210_v13, %v11209_v62  ;;  %v11212_v31 = vld [vmem:[#allocation293_spill] sm:$0xff]  ;;  %v8495_v32 = vsel %vm841_vm14, %v11209_v62, %v11214_v44  ;;  %v11216_v14 = vld [vmem:[#allocation160_spill] sm:$0xff]  ;;  %v11223_v12 = vld [vmem:[#allocation162_spill] sm:$0xff] }
 0x789   : > { %11211 = vst [vmem:[#allocation155_spill] sm:$0xff] %v8483_v33  ;;  %v11213_v8 = vld [vmem:[#allocation313_spill] sm:$0xff]  ;;  %11215 = vst [vmem:[#allocation138_spill] sm:$0xff] %v8495_v32  ;;  %v11219_v33 = vld [vmem:[#allocation183_spill] sm:$0xff]  ;;  %v1262_v22 = vadd.f32 %v11100_v59, %v1241_v24 }
 0x78a   : > { %v937_v17 = vsel %vm685_vm10, %v11213_v8, %v11212_v31  ;;  %v11217_v27 = vld [vmem:[#allocation181_spill] sm:$0xff]  ;;  %v8505_v8 = vsel %vm880_vm15, %v11216_v14, %v11219_v33  ;;  %v11225_v62 = vld [vmem:[#allocation164_spill] sm:$0xff]  ;;  %11232 = vst [vmem:[#allocation152_spill] sm:$0xff] %v8529_v23  ;;  %v8531_v33 = vpop.permute.xlu0 %3281  ;;  %v11341_v15 = vld [vmem:[#allocation254_spill] sm:$0xff]  ;;  %4418 = vrot.lane.b32.xlu1 %v7994_v18, %s5132_s28 }
 0x78b   : > { %v8500_v13 = vsel %vm880_vm15, %v11217_v27, %v11216_v14  ;;  %11220 = vst [vmem:[#allocation142_spill] sm:$0xff] %v8505_v8  ;;  %v11222_v5 = vld [vmem:[#allocation185_spill] sm:$0xff]  ;;  %v11227_v27 = vld [vmem:[#allocation187_spill] sm:$0xff]  ;;  %v11230_v14 = vld [vmem:[#allocation168_spill] sm:$0xff]  ;;  %4172 = vrot.lane.b32.xlu0 %v8002_v16, %s5133_s10 }
 0x78c   : > { %11218 = vst [vmem:[#allocation157_spill] sm:$0xff] %v8500_v13  ;;  %v8512_v41 = vsel %vm685_vm10, %v11223_v12, %v11222_v5  ;;  %v8517_v32 = vsel %vm685_vm10, %v11222_v5, %v11225_v62  ;;  %v11228_v13 = vld [vmem:[#allocation166_spill] sm:$0xff]  ;;  %v8527_v8 = vsel %vm724_vm11, %v11227_v27, %v11230_v14  ;;  %11233 = vst [vmem:[#allocation165_spill] sm:$0xff] %v8531_v33  ;;  %v11234_v12 = vld [vmem:[#allocation189_spill] sm:$0xff] }
 0x78d   : > { %11224 = vst [vmem:[#allocation159_spill] sm:$0xff] %v8512_v41  ;;  %11226 = vst [vmem:[#allocation146_spill] sm:$0xff] %v8517_v32  ;;  %v8522_v44 = vsel %vm724_vm11, %v11228_v13, %v11227_v27  ;;  %v11235_v41 = vld [vmem:[#allocation170_spill] sm:$0xff]  ;;  %v11237_v5 = vld [vmem:[#allocation172_spill] sm:$0xff]  ;;  %v942_v27 = vadd.f32 %v937_v17, %v7703_v57 }
 0x78e   : > { %11229 = vst [vmem:[#allocation150_spill] sm:$0xff] %v8522_v44  ;;  %11231 = vst [vmem:[#allocation161_spill] sm:$0xff] %v8527_v8  ;;  %v8536_v37 = vsel %vm763_vm12, %v11235_v41, %v11234_v12  ;;  %v8541_v32 = vsel %vm763_vm12, %v11234_v12, %v11237_v5  ;;  %v11239_v13 = vld [vmem:[#allocation191_spill] sm:$0xff]  ;;  %v11240_v44 = vld [vmem:[#allocation174_spill] sm:$0xff]  ;;  %v8602_v59 = vpop.permute.xlu0 %3285 }
 0x78f   : > { %11236 = vst [vmem:[#allocation154_spill] sm:$0xff] %v8536_v37  ;;  %11238 = vst [vmem:[#allocation169_spill] sm:$0xff] %v8541_v32  ;;  %v8546_v62 = vsel %vm802_vm13, %v11240_v44, %v11239_v13  ;;  %v11242_v23 = vld [vmem:[#allocation176_spill] sm:$0xff]  ;;  %v11244_v8 = vld [vmem:[#allocation193_spill] sm:$0xff] }
 0x790   : > { %11241 = vst [vmem:[#allocation156_spill] sm:$0xff] %v8546_v62  ;;  %v8552_v33 = vsel %vm802_vm13, %v11239_v13, %v11242_v23  ;;  %v11245_v41 = vld [vmem:[#allocation178_spill] sm:$0xff]  ;;  %v11247_v14 = vld [vmem:[#allocation180_spill] sm:$0xff]  ;;  %v11249_v57 = vld [vmem:[#allocation195_spill] sm:$0xff] }
 0x791   : > { %11243 = vst [vmem:[#allocation173_spill] sm:$0xff] %v8552_v33  ;;  %v8557_v37 = vsel %vm841_vm14, %v11245_v41, %v11244_v8  ;;  %v8562_v12 = vsel %vm841_vm14, %v11244_v8, %v11247_v14  ;;  %v11250_v17 = vld [vmem:[#allocation182_spill] sm:$0xff]  ;;  %v11252_v13 = vld [vmem:[#allocation184_spill] sm:$0xff]  ;;  %v11259_v33 = vld [vmem:[#allocation211_spill] sm:$0xff] }
 0x792   : > { %11246 = vst [vmem:[#allocation158_spill] sm:$0xff] %v8557_v37  ;;  %11248 = vst [vmem:[#allocation177_spill] sm:$0xff] %v8562_v12  ;;  %v8571_v44 = vsel %vm880_vm15, %v11250_v17, %v11249_v57  ;;  %v8576_v41 = vsel %vm880_vm15, %v11249_v57, %v11252_v13  ;;  %v11254_v37 = vld [vmem:[#allocation209_spill] sm:$0xff]  ;;  %v11255_v62 = vld [vmem:[#allocation210_spill] sm:$0xff] }
 0x793   : > { %11251 = vst [vmem:[#allocation293_spill] sm:$0xff] %v8571_v44  ;;  %11253 = vst [vmem:[#allocation313_spill] sm:$0xff] %v8576_v41  ;;  %v8581_v8 = vsel %vm685_vm10, %v11255_v62, %v11254_v37  ;;  %v11257_v12 = vld [vmem:[#allocation212_spill] sm:$0xff]  ;;  %v11260_v17 = vld [vmem:[#allocation214_spill] sm:$0xff] }
 0x794   : > { %11256 = vst [vmem:[#allocation160_spill] sm:$0xff] %v8581_v8  ;;  %v8587_v9 = vsel %vm685_vm10, %v11254_v37, %v11257_v12  ;;  %v8592_v44 = vsel %vm724_vm11, %v11260_v17, %v11259_v33  ;;  %v11262_v32 = vld [vmem:[#allocation316_spill] sm:$0xff]  ;;  %v11263_v41 = vld [vmem:[#allocation295_spill] sm:$0xff]  ;;  %v8600_v8 = vpop.permute.xlu1 %3175  ;;  %11266 = vst [vmem:[#allocation162_spill] sm:$0xff] %v8602_v59 }
 0x795   : > { %11258 = vst [vmem:[#allocation181_spill] sm:$0xff] %v8587_v9  ;;  %11261 = vst [vmem:[#allocation309_spill] sm:$0xff] %v8592_v44  ;;  %v938_v57 = vsel %vm685_vm10, %v11212_v31, %v11262_v32  ;;  %v11264_v13 = vld [vmem:[#allocation319_spill] sm:$0xff]  ;;  %v11267_v24 = vld [vmem:[#allocation216_spill] sm:$0xff]  ;;  %v944_v44 = vadd.f32 %v11262_v32, %v7711_v10  ;;  %v963_v31 = vadd.f32 %v8167_v61, %v942_v27 }
 0x796   : > { %v979_v62 = vsel %vm724_vm11, %v11264_v13, %v11263_v41  ;;  %11265 = vst [vmem:[#allocation185_spill] sm:$0xff] %v8600_v8  ;;  %v8607_v37 = vsel %vm724_vm11, %v11259_v33, %v11267_v24  ;;  %v11269_v9 = vld [vmem:[#allocation315_spill] sm:$0xff]  ;;  %v11270_v14 = vld [vmem:[#allocation213_spill] sm:$0xff]  ;;  %v11271_v12 = vld [vmem:[#allocation218_spill] sm:$0xff] }
 0x797   : > { %11268 = vst [vmem:[#allocation187_spill] sm:$0xff] %v8607_v37  ;;  %v1283_v17 = vadd.f32 %v11269_v9, %v1262_v22  ;;  %v8616_v13 = vsel %vm763_vm12, %v11271_v12, %v11270_v14  ;;  %v11273_v8 = vld [vmem:[#allocation220_spill] sm:$0xff]  ;;  %v11275_v59 = vld [vmem:[#allocation215_spill] sm:$0xff]  ;;  %v11278_v10 = vld [vmem:[#allocation225_spill] sm:$0xff]  ;;  %v943_v12 = vadd.f32 %v938_v57, %v7705_v30  ;;  %v984_v22 = vadd.f32 %v979_v62, %v963_v31  ;;  %v8663_v62 = vpop.permute.xlu0 %3321 }
 0x798   : > { %11272 = vst [vmem:[#allocation166_spill] sm:$0xff] %v8616_v13  ;;  %v8621_v23 = vsel %vm763_vm12, %v11270_v14, %v11273_v8  ;;  %v11276_v33 = vld [vmem:[#allocation223_spill] sm:$0xff]  ;;  %v8635_v61 = vsel %vm802_vm13, %v11275_v59, %v11278_v10  ;;  %v11280_v32 = vld [vmem:[#allocation217_spill] sm:$0xff]  ;;  %v11281_v27 = vld [vmem:[#allocation228_spill] sm:$0xff]  ;;  %v8661_v57 = vpop.permute.xlu1 %3211 }
 0x799   : > { %11274 = vst [vmem:[#allocation189_spill] sm:$0xff] %v8621_v23  ;;  %v8626_v37 = vsel %vm802_vm13, %v11276_v33, %v11275_v59  ;;  %11279 = vst [vmem:[#allocation172_spill] sm:$0xff] %v8635_v61  ;;  %v8640_v14 = vsel %vm841_vm14, %v11281_v27, %v11280_v32  ;;  %v11283_v33 = vld [vmem:[#allocation230_spill] sm:$0xff]  ;;  %v11286_v19 = vld [vmem:[#allocation232_spill] sm:$0xff] }
 0x79a   : > { %11277 = vst [vmem:[#allocation170_spill] sm:$0xff] %v8626_v37  ;;  %11282 = vst [vmem:[#allocation191_spill] sm:$0xff] %v8640_v14  ;;  %v8646_v34 = vsel %vm841_vm14, %v11280_v32, %v11283_v33  ;;  %v11285_v37 = vld [vmem:[#allocation219_spill] sm:$0xff]  ;;  %v11288_v59 = vld [vmem:[#allocation234_spill] sm:$0xff] }
 0x79b   : > { %11284 = vst [vmem:[#allocation174_spill] sm:$0xff] %v8646_v34  ;;  %v8651_v23 = vsel %vm880_vm15, %v11286_v19, %v11285_v37  ;;  %v8656_v61 = vsel %vm880_vm15, %v11285_v37, %v11288_v59  ;;  %v11290_v27 = vld [vmem:[#allocation340_spill] sm:$0xff]  ;;  %v11291_v14 = vld [vmem:[#allocation307_spill] sm:$0xff]  ;;  %11292 = vst [vmem:[#allocation195_spill] sm:$0xff] %v8661_v57  ;;  %v1304_v37 = vadd.f32 %v11103_v42, %v1283_v17 }
 0x79c   : > { %11287 = vst [vmem:[#allocation193_spill] sm:$0xff] %v8651_v23  ;;  %11289 = vst [vmem:[#allocation178_spill] sm:$0xff] %v8656_v61  ;;  %v1234_v30 = vsel %vm685_vm10, %v11291_v14, %v11290_v27  ;;  %v11294_v31 = vld [vmem:[#allocation236_spill] sm:$0xff]  ;;  %v11295_v32 = vld [vmem:[#allocation222_spill] sm:$0xff]  ;;  %v965_v61 = vadd.f32 %v11075_v52, %v944_v44  ;;  %v1005_v17 = vadd.f32 %v8185_v1, %v984_v22 }
 0x79d   : > { %11293 = vst [vmem:[#allocation182_spill] sm:$0xff] %v8663_v62  ;;  %v8668_v34 = vsel %vm685_vm10, %v11295_v32, %v11294_v31  ;;  %v11297_v19 = vld [vmem:[#allocation224_spill] sm:$0xff]  ;;  %v11299_v13 = vld [vmem:[#allocation321_spill] sm:$0xff]  ;;  %v1235_v32 = vsel %vm685_vm10, %v11290_v27, %v11221_v55  ;;  %v11302_v42 = vld [vmem:[#allocation238_spill] sm:$0xff] }
 0x79e   : > { %11296 = vst [vmem:[#allocation209_spill] sm:$0xff] %v8668_v34  ;;  %v8673_v23 = vsel %vm685_vm10, %v11294_v31, %v11297_v19  ;;  %v980_v14 = vsel %vm724_vm11, %v11263_v41, %v11299_v13  ;;  %v11300_v57 = vld [vmem:[#allocation297_spill] sm:$0xff]  ;;  %v11301_v59 = vld [vmem:[#allocation324_spill] sm:$0xff]  ;;  %v11303_v52 = vld [vmem:[#allocation227_spill] sm:$0xff]  ;;  %v964_v41 = vadd.f32 %v8172_v0, %v943_v12  ;;  %v8712_v0 = vpop.permute.xlu0 %3325 }
 0x79f   : > { %11298 = vst [vmem:[#allocation210_spill] sm:$0xff] %v8673_v23  ;;  %v1021_v33 = vsel %vm763_vm12, %v11301_v59, %v11300_v57  ;;  %v8693_v44 = vsel %vm724_vm11, %v11303_v52, %v11302_v42  ;;  %v1239_v59 = vadd.f32 %v1234_v30, %v7722_v56  ;;  %v11305_v31 = vld [vmem:[#allocation229_spill] sm:$0xff]  ;;  %v11307_v47 = vld [vmem:[#allocation240_spill] sm:$0xff]  ;;  %v11308_v27 = vld [vmem:[#allocation231_spill] sm:$0xff]  ;;  %v986_v52 = vadd.f32 %v11299_v13, %v965_v61 }
 0x7a0   : > { %11304 = vst [vmem:[#allocation211_spill] sm:$0xff] %v8693_v44  ;;  %v8701_v55 = vsel %vm724_vm11, %v11302_v42, %v11305_v31  ;;  %v8706_v2 = vsel %vm763_vm12, %v11308_v27, %v11307_v47  ;;  %v11310_v23 = vld [vmem:[#allocation320_spill] sm:$0xff]  ;;  %v8710_v44 = vpop.permute.xlu1 %3215  ;;  %v11312_v1 = vld [vmem:[#allocation233_spill] sm:$0xff]  ;;  %v985_v12 = vadd.f32 %v980_v14, %v964_v41  ;;  %v1026_v22 = vadd.f32 %v1021_v33, %v1005_v17  ;;  %v11314_v42 = vld [vmem:[#allocation242_spill] sm:$0xff] }
 0x7a1   : > { %11306 = vst [vmem:[#allocation214_spill] sm:$0xff] %v8701_v55  ;;  %11309 = vst [vmem:[#allocation316_spill] sm:$0xff] %v8706_v2  ;;  %v1325_v62 = vadd.f32 %v11310_v23, %v1304_v37  ;;  %v8717_v56 = vsel %vm763_vm12, %v11307_v47, %v11312_v1  ;;  %v1240_v30 = vadd.f32 %v1235_v32, %v7742_v28  ;;  %v11315_v27 = vld [vmem:[#allocation235_spill] sm:$0xff]  ;;  %v11317_v37 = vld [vmem:[#allocation237_spill] sm:$0xff] }
 0x7a2   : > { %11311 = vst [vmem:[#allocation295_spill] sm:$0xff] %v8710_v44  ;;  %11313 = vst [vmem:[#allocation319_spill] sm:$0xff] %v8717_v56  ;;  %v8723_v2 = vsel %vm802_vm13, %v11315_v27, %v11314_v42  ;;  %v8728_v13 = vsel %vm802_vm13, %v11314_v42, %v11317_v37  ;;  %v11319_v61 = vld [vmem:[#allocation244_spill] sm:$0xff]  ;;  %v11320_v55 = vld [vmem:[#allocation239_spill] sm:$0xff]  ;;  %v1260_v11 = vadd.f32 %v8239_v51, %v1239_v59 }
 0x7a3   : > { %11316 = vst [vmem:[#allocation216_spill] sm:$0xff] %v8723_v2  ;;  %11318 = vst [vmem:[#allocation315_spill] sm:$0xff] %v8728_v13  ;;  %v8733_v44 = vsel %vm841_vm14, %v11320_v55, %v11319_v61  ;;  %v11322_v28 = vld [vmem:[#allocation241_spill] sm:$0xff]  ;;  %v11324_v14 = vld [vmem:[#allocation246_spill] sm:$0xff]  ;;  %v1346_v47 = vadd.f32 %v11107_v21, %v1325_v62  ;;  %v1007_v45 = vadd.f32 %v11080_v7, %v986_v52 }
 0x7a4   : > { %11321 = vst [vmem:[#allocation213_spill] sm:$0xff] %v8733_v44  ;;  %v8742_v33 = vsel %vm841_vm14, %v11319_v61, %v11322_v28  ;;  %v11325_v32 = vld [vmem:[#allocation243_spill] sm:$0xff]  ;;  %v11327_v17 = vld [vmem:[#allocation245_spill] sm:$0xff]  ;;  %v11329_v42 = vld [vmem:[#allocation326_spill] sm:$0xff]  ;;  %v8765_v44 = vpop.permute.xlu0 %3361  ;;  %v1047_v51 = vadd.f32 %v8195_v20, %v1026_v22  ;;  %v1261_v62 = vadd.f32 %v8248_v48, %v1240_v30 }
 0x7a5   : > { %11323 = vst [vmem:[#allocation218_spill] sm:$0xff] %v8742_v33  ;;  %v8747_v41 = vsel %vm880_vm15, %v11325_v32, %v11324_v14  ;;  %v8752_v55 = vsel %vm880_vm15, %v11324_v14, %v11327_v17  ;;  %v1022_v27 = vsel %vm763_vm12, %v11300_v57, %v11329_v42  ;;  %v11330_v61 = vld [vmem:[#allocation343_spill] sm:$0xff]  ;;  %v11331_v33 = vld [vmem:[#allocation312_spill] sm:$0xff]  ;;  %11332 = vst [vmem:[#allocation223_spill] sm:$0xff] %v8765_v44 }
 0x7a6   : > { %11326 = vst [vmem:[#allocation220_spill] sm:$0xff] %v8747_v41  ;;  %11328 = vst [vmem:[#allocation215_spill] sm:$0xff] %v8752_v55  ;;  %v1276_v32 = vsel %vm724_vm11, %v11331_v33, %v11330_v61  ;;  %v8763_v41 = vpop.permute.xlu1 %3283  ;;  %v1006_v14 = vadd.f32 %v8190_v58, %v985_v12  ;;  %v11333_v59 = vld [vmem:[#allocation300_spill] sm:$0xff]  ;;  %v11335_v52 = vld [vmem:[#allocation325_spill] sm:$0xff]  ;;  %v1028_v55 = vadd.f32 %v11329_v42, %v1007_v45 }
 0x7a7   : > { %v11334_v21 = vld [vmem:[#allocation328_spill] sm:$0xff]  ;;  %v1367_v57 = vadd.f32 %v11335_v52, %v1346_v47  ;;  %v1277_v33 = vsel %vm724_vm11, %v11330_v61, %v11269_v9  ;;  %v11336_v20 = vld [vmem:[#allocation247_spill] sm:$0xff]  ;;  %v11338_v48 = vld [vmem:[#allocation250_spill] sm:$0xff]  ;;  %v1281_v47 = vadd.f32 %v1276_v32, %v1260_v11 }
 0x7a8   : > { %v1063_v7 = vsel %vm802_vm13, %v11334_v21, %v11333_v59  ;;  %v11337_v58 = vld [vmem:[#allocation248_spill] sm:$0xff]  ;;  %v8790_v22 = vsel %vm685_vm10, %v11336_v20, %v11338_v48  ;;  %v1027_v30 = vadd.f32 %v1022_v27, %v1006_v14  ;;  %v11339_v45 = vld [vmem:[#allocation249_spill] sm:$0xff]  ;;  %v11342_v61 = vld [vmem:[#allocation251_spill] sm:$0xff]  ;;  %v8809_v27 = vpop.permute.xlu0 %3365  ;;  %v1049_v56 = vadd.f32 %v11083_v63, %v1028_v55 }
 0x7a9   : > { %v8785_v12 = vsel %vm685_vm10, %v11337_v58, %v11336_v20  ;;  %v11340_v9 = vld [vmem:[#allocation252_spill] sm:$0xff]  ;;  %v8800_v60 = vsel %vm724_vm11, %v11339_v45, %v11341_v15  ;;  %v1068_v13 = vadd.f32 %v1063_v7, %v1047_v51  ;;  %v11345_v11 = vld [vmem:[#allocation258_spill] sm:$0xff]  ;;  %v11346_v14 = vld [vmem:[#allocation253_spill] sm:$0xff]  ;;  %v1282_v51 = vadd.f32 %v1277_v33, %v1261_v62 }
 0x7aa   : > { %v8795_v42 = vsel %vm724_vm11, %v11340_v9, %v11339_v45  ;;  %v11343_v21 = vld [vmem:[#allocation256_spill] sm:$0xff]  ;;  %v8807_v20 = vpop.permute.xlu1 %3323  ;;  %v8814_v32 = vsel %vm763_vm12, %v11342_v61, %v11345_v11  ;;  %v11348_v2 = vld [vmem:[#allocation262_spill] sm:$0xff]  ;;  %v1388_v7 = vadd.f32 %v11112_v6, %v1367_v57  ;;  %v1048_v62 = vadd.f32 %v8200_v29, %v1027_v30  ;;  %v11356_v39 = vld [vmem:[#allocation345_spill] sm:$0xff] }
 0x7ab   : > { %v8805_v58 = vsel %vm763_vm12, %v11343_v21, %v11342_v61  ;;  %11344 = vst [vmem:[#allocation217_spill] sm:$0xff] %v8807_v20  ;;  %v11347_v9 = vld [vmem:[#allocation260_spill] sm:$0xff]  ;;  %v8824_v21 = vsel %vm802_vm13, %v11346_v14, %v11348_v2  ;;  %v11349_v17 = vld [vmem:[#allocation330_spill] sm:$0xff]  ;;  %v1302_v55 = vadd.f32 %v8253_v25, %v1281_v47  ;;  %v1089_v28 = vadd.f32 %v8209_v53, %v1068_v13 }
 0x7ac   : > { %v8819_v45 = vsel %vm802_vm13, %v11347_v9, %v11346_v14  ;;  %v1064_v61 = vsel %vm802_vm13, %v11333_v59, %v11349_v17  ;;  %v11350_v9 = vld [vmem:[#allocation255_spill] sm:$0xff]  ;;  %v11351_v44 = vld [vmem:[#allocation264_spill] sm:$0xff]  ;;  %v11353_v6 = vld [vmem:[#allocation302_spill] sm:$0xff]  ;;  %v1070_v49 = vadd.f32 %v11349_v17, %v1049_v56  ;;  %v8853_v34 = vpop.permute.xlu0 %3401  ;;  %v1303_v47 = vadd.f32 %v8258_v43, %v1282_v51 }
 0x7ad   : > { %v8838_v14 = vsel %vm841_vm14, %v11351_v44, %v11350_v9  ;;  %v11354_v57 = vld [vmem:[#allocation332_spill] sm:$0xff]  ;;  %v11355_v59 = vld [vmem:[#allocation329_spill] sm:$0xff]  ;;  %v11357_v20 = vld [vmem:[#allocation318_spill] sm:$0xff]  ;;  %11359 = vst [vmem:[#allocation232_spill] sm:$0xff] %v8853_v34  ;;  %v1069_v25 = vadd.f32 %v1064_v61, %v1048_v62  ;;  %v1319_v13 = vsel %vm763_vm12, %v11356_v39, %v11310_v23 }
 0x7ae   : > { %11352 = vst [vmem:[#allocation228_spill] sm:$0xff] %v8838_v14  ;;  %v1105_v63 = vsel %vm841_vm14, %v11354_v57, %v11353_v6  ;;  %v1409_v33 = vadd.f32 %v11355_v59, %v1388_v7  ;;  %v1318_v37 = vsel %vm763_vm12, %v11357_v20, %v11356_v39  ;;  %v8851_v44 = vpop.permute.xlu1 %3363  ;;  %v11360_v29 = vld [vmem:[#allocation266_spill] sm:$0xff]  ;;  %v11362_v56 = vld [vmem:[#allocation351_spill] sm:$0xff]  ;;  %v11364_v61 = vld [vmem:[#allocation257_spill] sm:$0xff] }
 0x7af   : > { %11358 = vst [vmem:[#allocation219_spill] sm:$0xff] %v8851_v44  ;;  %v8858_v30 = vsel %vm841_vm14, %v11350_v9, %v11360_v29  ;;  %v1818_v17 = vadd.f32 %v11362_v56, %v7750_v50  ;;  %v1110_v53 = vadd.f32 %v1105_v63, %v1089_v28  ;;  %v11363_v20 = vld [vmem:[#allocation335_spill] sm:$0xff]  ;;  %v11365_v43 = vld [vmem:[#allocation268_spill] sm:$0xff]  ;;  %v11367_v50 = vld [vmem:[#allocation270_spill] sm:$0xff]  ;;  %v1323_v62 = vadd.f32 %v1318_v37, %v1302_v55 }
 0x7b0   : > { %11361 = vst [vmem:[#allocation340_spill] sm:$0xff] %v8858_v30  ;;  %v1529_v7 = vsel %vm685_vm10, %v7298_v36, %v11363_v20  ;;  %v8876_v51 = vsel %vm880_vm15, %v11365_v43, %v11364_v61  ;;  %v8881_v28 = vsel %vm880_vm15, %v11364_v61, %v11367_v50  ;;  %v11369_v23 = vld [vmem:[#allocation275_spill] sm:$0xff]  ;;  %v11370_v9 = vld [vmem:[#allocation280_spill] sm:$0xff]  ;;  %v11372_v18 = vld [vmem:[#allocation282_spill] sm:$0xff]  ;;  %v1430_v43 = vadd.f32 %v11119_v3, %v1409_v33  ;;  %v8902_v44 = vpop.permute.xlu0 %3405 }
 0x7b1   : > { %11366 = vst [vmem:[#allocation307_spill] sm:$0xff] %v8876_v51  ;;  %11368 = vst [vmem:[#allocation236_spill] sm:$0xff] %v8881_v28  ;;  %v8886_v36 = vsel %vm685_vm10, %v11370_v9, %v11369_v23  ;;  %v8891_v16 = vsel %vm685_vm10, %v11369_v23, %v11372_v18  ;;  %v11374_v57 = vld [vmem:[#allocation284_spill] sm:$0xff]  ;;  %v11375_v63 = vld [vmem:[#allocation277_spill] sm:$0xff]  ;;  %v1091_v61 = vadd.f32 %v11088_v54, %v1070_v49 }
 0x7b2   : > { %11371 = vst [vmem:[#allocation222_spill] sm:$0xff] %v8886_v36  ;;  %11373 = vst [vmem:[#allocation224_spill] sm:$0xff] %v8891_v16  ;;  %v8896_v39 = vsel %vm685_vm10, %v11375_v63, %v11374_v57  ;;  %v8900_v34 = vpop.permute.xlu1 %3403  ;;  %v1324_v9 = vadd.f32 %v1319_v13, %v1303_v47  ;;  %v1534_v37 = vadd.f32 %v1529_v7, %v7758_v26  ;;  %v11379_v23 = vld [vmem:[#allocation349_spill] sm:$0xff]  ;;  %v11380_v3 = vld [vmem:[#allocation355_spill] sm:$0xff] }
 0x7b3   : > { %11376 = vst [vmem:[#allocation321_spill] sm:$0xff] %v8896_v39  ;;  %11377 = vst [vmem:[#allocation297_spill] sm:$0xff] %v8900_v34  ;;  %v1839_v55 = vadd.f32 %v11160_v35, %v1818_v17  ;;  %v1811_v16 = vsel %vm685_vm10, %v11379_v23, %v7418_v38  ;;  %v1090_v63 = vadd.f32 %v8214_v40, %v1069_v25  ;;  %v11381_v33 = vld [vmem:[#allocation448_spill] sm:$0xff]  ;;  %v11382_v49 = vld [vmem:[#allocation449_spill] sm:$0xff] }
 0x7b4   : > { %11378 = vst [vmem:[#allocation324_spill] sm:$0xff] %v8902_v44  ;;  %v1131_v39 = vadd.f32 %v8219_v46, %v1110_v53  ;;  %v1530_v54 = vsel %vm685_vm10, %v11363_v20, %v11380_v3  ;;  %4422 = vrot.lane.b32.xlu1 %v11381_v33, %s5132_s28  ;;  %4420 = vrot.lane.b32.xlu0 %v11382_v49, %s5132_s28  ;;  %v11383_v26 = vld [vmem:[#allocation333_spill] sm:$0xff]  ;;  %v11384_v47 = vld [vmem:[#allocation334_spill] sm:$0xff]  ;;  %v11387_v13 = vld [vmem:[#allocation427_spill] sm:$0xff]  ;;  %s5138_s28 = smov 127  }
 0x7b5   : > { %v8919_v35 = vadd.f32 %v11383_v26, %v1430_v43  ;;  %v1106_v17 = vsel %vm841_vm14, %v11353_v6, %v11384_v47  ;;  %v11385_v40 = vld [vmem:[#allocation90_spill] sm:$0xff]  ;;  %v1536_v20 = vadd.f32 %v11380_v3, %v11387_v13  ;;  %v11388_v7 = vld [vmem:[#allocation337_spill] sm:$0xff]  ;;  %v1812_v43 = vsel %vm685_vm10, %v7418_v38, %v11362_v56  ;;  %v11390_v49 = vld [vmem:[#allocation428_spill] sm:$0xff]  ;;  %v8937_v6 = vpop.permute.xlu0 %3441 }
 0x7b6   : > { %v1344_v25 = vadd.f32 %v11385_v40, %v1323_v62  ;;  %v11386_v46 = vld [vmem:[#allocation354_spill] sm:$0xff]  ;;  %v11389_v23 = vld [vmem:[#allocation357_spill] sm:$0xff]  ;;  %v1816_v18 = vadd.f32 %v1811_v16, %v11390_v49  ;;  %v8935_v36 = vpop.permute.xlu1 %3443  ;;  %11392 = vst [vmem:[#allocation227_spill] sm:$0xff] %v8937_v6  ;;  %v11395_v57 = vld [vmem:[#allocation323_spill] sm:$0xff]  ;;  %v1111_v28 = vadd.f32 %v1106_v17, %v1090_v63  ;;  %v1112_v51 = vadd.f32 %v11384_v47, %v1091_v61 }
 0x7b7   : > { %v1860_v53 = vadd.f32 %v11386_v46, %v1839_v55  ;;  %v1571_v33 = vsel %vm724_vm11, %v11389_v23, %v11388_v7  ;;  %11391 = vst [vmem:[#allocation238_spill] sm:$0xff] %v8935_v36  ;;  %v11393_v62 = vld [vmem:[#allocation93_spill] sm:$0xff]  ;;  %v11394_v55 = vld [vmem:[#allocation348_spill] sm:$0xff]  ;;  %v11396_v13 = vld [vmem:[#allocation426_spill] sm:$0xff]  ;;  %v1555_v23 = vadd.f32 %v8307_v4, %v1534_v37 }
 0x7b8   : > { %v1345_v40 = vadd.f32 %v11393_v62, %v1324_v9  ;;  %v1360_v3 = vsel %vm802_vm13, %v11395_v57, %v11394_v55  ;;  %v1535_v34 = vadd.f32 %v1530_v54, %v11396_v13  ;;  %v1361_v38 = vsel %vm802_vm13, %v11394_v55, %v11335_v52  ;;  %v11397_v56 = vld [vmem:[#allocation86_spill] sm:$0xff]  ;;  %v11399_v9 = vld [vmem:[#allocation305_spill] sm:$0xff]  ;;  %v11400_v49 = vld [vmem:[#allocation336_spill] sm:$0xff] }
 0x7b9   : > { %4190 = vrot.lane.b32.xlu1 %v11397_v56, %s5133_s10  ;;  %v11398_v16 = vld [vmem:[#allocation450_spill] sm:$0xff]  ;;  %v1147_v57 = vsel %vm880_vm15, %v11400_v49, %v11399_v9  ;;  %v1576_v54 = vadd.f32 %v1571_v33, %v1555_v23  ;;  %v11401_v62 = vld [vmem:[#allocation132_spill] sm:$0xff]  ;;  %v11402_v37 = vld [vmem:[#allocation431_spill] sm:$0xff]  ;;  %v1365_v61 = vadd.f32 %v1360_v3, %v1344_v25 }
 0x7ba   : > { %4188 = vrot.lane.b32.xlu0 %v11398_v16, %s5133_s10  ;;  %v1881_v4 = vadd.f32 %v11401_v62, %v1860_v53  ;;  %v1817_v63 = vadd.f32 %v1812_v43, %v11402_v37  ;;  %v11403_v47 = vld [vmem:[#allocation127_spill] sm:$0xff]  ;;  %v11405_v55 = vld [vmem:[#allocation104_spill] sm:$0xff]  ;;  %v8963_v6 = vpop.permute.xlu1 %3483  ;;  %v8965_v16 = vpop.permute.xlu0 %3445  ;;  %v1366_v36 = vadd.f32 %v1361_v38, %v1345_v40  ;;  %v11408_v49 = vld [vmem:[#allocation358_spill] sm:$0xff] }
 0x7bb   : > { %v1557_v17 = vadd.f32 %v11403_v47, %v1536_v20  ;;  %v11404_v13 = vld [vmem:[#allocation359_spill] sm:$0xff]  ;;  %v1837_v56 = vadd.f32 %v11405_v55, %v1816_v18  ;;  %11406 = vst [vmem:[#allocation229_spill] sm:$0xff] %v8963_v6  ;;  %11407 = vst [vmem:[#allocation240_spill] sm:$0xff] %v8965_v16  ;;  %v11409_v23 = vld [vmem:[#allocation77_spill] sm:$0xff] }
 0x7bc   : > { %v1572_v52 = vsel %vm724_vm11, %v11388_v7, %v11404_v13  ;;  %v1902_v33 = vadd.f32 %v11408_v49, %v1881_v4  ;;  %v1556_v53 = vadd.f32 %v11409_v23, %v1535_v34  ;;  %v11410_v62 = vld [vmem:[#allocation378_spill] sm:$0xff]  ;;  %v11411_v43 = vld [vmem:[#allocation353_spill] sm:$0xff]  ;;  %v11412_v20 = vld [vmem:[#allocation103_spill] sm:$0xff] }
 0x7bd   : > { %v1853_v25 = vsel %vm724_vm11, %v11411_v43, %v11410_v62  ;;  %v1133_v3 = vadd.f32 %v11412_v20, %v1112_v51  ;;  %v1578_v37 = vadd.f32 %v11404_v13, %v1557_v17  ;;  %v11413_v7 = vld [vmem:[#allocation339_spill] sm:$0xff]  ;;  %v11414_v47 = vld [vmem:[#allocation361_spill] sm:$0xff]  ;;  %v11416_v40 = vld [vmem:[#allocation452_spill] sm:$0xff]  ;;  %v1152_v51 = vadd.f32 %v1147_v57, %v1131_v39 }
 0x7be   : > { %v1613_v18 = vsel %vm763_vm12, %v11414_v47, %v11413_v7  ;;  %v11415_v55 = vld [vmem:[#allocation451_spill] sm:$0xff]  ;;  %4192 = vrot.lane.b32.xlu0 %v11416_v40, %s5133_s10  ;;  %v11417_v38 = vld [vmem:[#allocation84_spill] sm:$0xff]  ;;  %v1577_v4 = vadd.f32 %v1572_v52, %v1556_v53  ;;  %v11418_v23 = vld [vmem:[#allocation82_spill] sm:$0xff]  ;;  %v1854_v13 = vsel %vm724_vm11, %v11410_v62, %v11386_v46  ;;  %v1858_v47 = vadd.f32 %v1853_v25, %v1837_v56  ;;  %v8988_v10 = vpop.permute.xlu1 %3551 }
 0x7bf   : > { %4438 = vrot.lane.b32.xlu1 %v11415_v55, %s5133_s10  ;;  %v1132_v34 = vadd.f32 %v11417_v38, %v1111_v28  ;;  %v1597_v6 = vadd.f32 %v11418_v23, %v1576_v54  ;;  %v11419_v43 = vld [vmem:[#allocation123_spill] sm:$0xff]  ;;  %v11420_v20 = vld [vmem:[#allocation61_spill] sm:$0xff]  ;;  %v8990_v55 = vpop.permute.xlu0 %3481  ;;  %v11422_v40 = vld [vmem:[#allocation96_spill] sm:$0xff] }
 0x7c0   : > { %v1838_v16 = vadd.f32 %v11419_v43, %v1817_v63  ;;  %v1386_v17 = vadd.f32 %v11420_v20, %v1365_v61  ;;  %11421 = vst [vmem:[#allocation231_spill] sm:$0xff] %v8990_v55  ;;  %v1387_v30 = vadd.f32 %v11422_v40, %v1366_v36  ;;  %v11423_v28 = vld [vmem:[#allocation350_spill] sm:$0xff]  ;;  %v11424_v52 = vld [vmem:[#allocation327_spill] sm:$0xff]  ;;  %v11425_v63 = vld [vmem:[#allocation136_spill] sm:$0xff] }
 0x7c1   : > { %v1402_v54 = vsel %vm841_vm14, %v11424_v52, %v11423_v28  ;;  %v1618_v53 = vadd.f32 %v1613_v18, %v1597_v6  ;;  %v1923_v39 = vadd.f32 %v11425_v63, %v1902_v33  ;;  %v1403_v57 = vsel %vm841_vm14, %v11423_v28, %v11355_v59  ;;  %v11426_v61 = vld [vmem:[#allocation131_spill] sm:$0xff]  ;;  %v11428_v25 = vld [vmem:[#allocation453_spill] sm:$0xff]  ;;  %v11429_v36 = vld [vmem:[#allocation454_spill] sm:$0xff] }
 0x7c2   : > { %v1599_v46 = vadd.f32 %v11426_v61, %v1578_v37  ;;  %v11427_v56 = vld [vmem:[#allocation363_spill] sm:$0xff]  ;;  %4440 = vrot.lane.b32.xlu0 %v11429_v36, %s5133_s10  ;;  %v11430_v38 = vld [vmem:[#allocation338_spill] sm:$0xff]  ;;  %v11432_v23 = vld [vmem:[#allocation113_spill] sm:$0xff]  ;;  %v1859_v43 = vadd.f32 %v1854_v13, %v1838_v16  ;;  %v1407_v37 = vadd.f32 %v1402_v54, %v1386_v17  ;;  %v9018_v61 = vpop.permute.xlu1 %3555  ;;  %v1408_v36 = vadd.f32 %v1403_v57, %v1387_v30 }
 0x7c3   : > { %v1614_v62 = vsel %vm763_vm12, %v11413_v7, %v11427_v56  ;;  %4442 = vrot.lane.b32.xlu1 %v11428_v25, %s5133_s10  ;;  %v1148_v6 = vsel %vm880_vm15, %v11399_v9, %v11430_v38  ;;  %v11431_v33 = vld [vmem:[#allocation362_spill] sm:$0xff]  ;;  %v1598_v59 = vadd.f32 %v11432_v23, %v1577_v4  ;;  %v11434_v7 = vld [vmem:[#allocation365_spill] sm:$0xff]  ;;  %v9020_v25 = vpop.permute.xlu0 %3485  ;;  %v11438_v44 = vld [vmem:[#allocation380_spill] sm:$0xff] }
 0x7c4   : > { %v1944_v18 = vadd.f32 %v11431_v33, %v1923_v39  ;;  %v1620_v20 = vadd.f32 %v11427_v56, %v1599_v46  ;;  %v11433_v40 = vld [vmem:[#allocation342_spill] sm:$0xff]  ;;  %11436 = vst [vmem:[#allocation320_spill] sm:$0xff] %v9020_v25  ;;  %v11437_v55 = vld [vmem:[#allocation85_spill] sm:$0xff]  ;;  %v11439_v4 = vld [vmem:[#allocation356_spill] sm:$0xff]  ;;  %v1154_v56 = vadd.f32 %v11430_v38, %v1133_v3  ;;  %v1153_v30 = vadd.f32 %v1148_v6, %v1132_v34 }
 0x7c5   : > { %v1655_v28 = vsel %vm802_vm13, %v11434_v7, %v11433_v40  ;;  %v11435_v52 = vld [vmem:[#allocation106_spill] sm:$0xff]  ;;  %v1619_v9 = vadd.f32 %v1614_v62, %v1598_v59  ;;  %v1639_v39 = vadd.f32 %v11437_v55, %v1618_v53  ;;  %v1895_v16 = vsel %vm763_vm12, %v11439_v4, %v11438_v44  ;;  %v11440_v17 = vld [vmem:[#allocation109_spill] sm:$0xff]  ;;  %v11441_v54 = vld [vmem:[#allocation87_spill] sm:$0xff] }
 0x7c6   : > { %v1879_v63 = vadd.f32 %v11435_v52, %v1858_v47  ;;  %v1472_v13 = vadd.f32 %v11440_v17, %v8919_v35  ;;  %v1173_v46 = vadd.f32 %v11441_v54, %v1152_v51  ;;  %v11442_v47 = vld [vmem:[#allocation317_spill] sm:$0xff]  ;;  %v11443_v23 = vld [vmem:[#allocation458_spill] sm:$0xff]  ;;  %v11444_v55 = vld [vmem:[#allocation140_spill] sm:$0xff]  ;;  %v1896_v3 = vsel %vm763_vm12, %v11438_v44, %v11408_v49  ;;  %v9043_v38 = vpop.permute.xlu1 %3591 }
 0x7c7   : > { %4210 = vrot.lane.b32.xlu1 %v11442_v47, %s5134_s17  ;;  %4208 = vrot.lane.b32.xlu0 %v11443_v23, %s5134_s17  ;;  %v1660_v57 = vadd.f32 %v1655_v28, %v1639_v39  ;;  %v1965_v53 = vadd.f32 %v11444_v55, %v1944_v18  ;;  %v11445_v62 = vld [vmem:[#allocation111_spill] sm:$0xff]  ;;  %v9045_v17 = vpop.permute.xlu0 %3553  ;;  %v11448_v34 = vld [vmem:[#allocation98_spill] sm:$0xff]  ;;  %v11452_v47 = vld [vmem:[#allocation352_spill] sm:$0xff] }
 0x7c8   : > { %v1880_v59 = vadd.f32 %v11445_v62, %v1859_v43  ;;  %v11446_v7 = vld [vmem:[#allocation135_spill] sm:$0xff]  ;;  %v1900_v51 = vadd.f32 %v1895_v16, %v1879_v63  ;;  %v1428_v6 = vadd.f32 %v11448_v34, %v1407_v37  ;;  %v11449_v18 = vld [vmem:[#allocation70_spill] sm:$0xff]  ;;  %v11454_v44 = vld [vmem:[#allocation344_spill] sm:$0xff] }
 0x7c9   : > { %v1641_v52 = vadd.f32 %v11446_v7, %v1620_v20  ;;  %v11447_v4 = vld [vmem:[#allocation367_spill] sm:$0xff]  ;;  %v1429_v28 = vadd.f32 %v11449_v18, %v1408_v36  ;;  %v11450_v43 = vld [vmem:[#allocation366_spill] sm:$0xff]  ;;  %v11451_v20 = vld [vmem:[#allocation88_spill] sm:$0xff]  ;;  %v1445_v36 = vsel %vm880_vm15, %v11452_v47, %v11383_v26 }
 0x7ca   : > { %v1656_v35 = vsel %vm802_vm13, %v11433_v40, %v11447_v4  ;;  %v1986_v39 = vadd.f32 %v11450_v43, %v1965_v53  ;;  %v1640_v54 = vadd.f32 %v11451_v20, %v1619_v9  ;;  %v11453_v23 = vld [vmem:[#allocation331_spill] sm:$0xff]  ;;  %v11455_v49 = vld [vmem:[#allocation369_spill] sm:$0xff]  ;;  %v11457_v37 = vld [vmem:[#allocation460_spill] sm:$0xff]  ;;  %v1901_v7 = vadd.f32 %v1896_v3, %v1880_v59  ;;  %v9072_v25 = vpop.permute.xlu1 %3595 }
 0x7cb   : > { %v1444_v40 = vsel %vm880_vm15, %v11453_v23, %v11452_v47  ;;  %v1662_v55 = vadd.f32 %v11447_v4, %v1641_v52  ;;  %v1697_v63 = vsel %vm841_vm14, %v11455_v49, %v11454_v44  ;;  %v11456_v16 = vld [vmem:[#allocation107_spill] sm:$0xff]  ;;  %4212 = vrot.lane.b32.xlu0 %v11457_v37, %s5134_s17  ;;  %v11459_v34 = vld [vmem:[#allocation12_spill] sm:$0xff]  ;;  %v11463_v49 = vld [vmem:[#allocation125_spill] sm:$0xff]  ;;  %v9074_v37 = vpop.permute.xlu0 %3593 }
 0x7cc   : > { %4458 = vrot.lane.b32.xlu1 %v11456_v16, %s5133_s10  ;;  %v1661_v9 = vadd.f32 %v1656_v35, %v1640_v54  ;;  %v11458_v53 = vld [vmem:[#allocation115_spill] sm:$0xff]  ;;  %v9067_v52 = vmul.f32 %v11459_v34, %v1173_v46  ;;  %v11461_v4 = vld [vmem:[#allocation56_spill] sm:$0xff]  ;;  %v1921_v16 = vadd.f32 %v11463_v49, %v1900_v51  ;;  %v1449_v14 = vadd.f32 %v1444_v40, %v1428_v6  ;;  %v11465_v54 = vld [vmem:[#allocation382_spill] sm:$0xff] }
 0x7cd   : > { %v1681_v62 = vadd.f32 %v11458_v53, %v1660_v57  ;;  %v1174_v18 = vadd.f32 %v11461_v4, %v1153_v30  ;;  %v11462_v20 = vld [vmem:[#allocation108_spill] sm:$0xff]  ;;  %v1450_v46 = vadd.f32 %v1445_v36, %v1429_v28  ;;  %v11467_v3 = vld [vmem:[#allocation139_spill] sm:$0xff]  ;;  %v11469_v51 = vld [vmem:[#allocation461_spill] sm:$0xff] }
 0x7ce   : > { %11460 = vst [vmem:[#allocation242_spill] sm:$0xff] %v9067_v52  ;;  %v1175_v23 = vadd.f32 %v11462_v20, %v1154_v56  ;;  %v11464_v26 = vld [vmem:[#allocation144_spill] sm:$0xff]  ;;  %v1683_v47 = vadd.f32 %v11467_v3, %v1662_v55  ;;  %v11468_v30 = vld [vmem:[#allocation371_spill] sm:$0xff]  ;;  %v11470_v53 = vld [vmem:[#allocation462_spill] sm:$0xff]  ;;  %v9101_v3 = vpop.permute.xlu1 %3631 }
 0x7cf   : > { %v1702_v1 = vadd.f32 %v1697_v63, %v1681_v62  ;;  %v2007_v35 = vadd.f32 %v11464_v26, %v1986_v39  ;;  %v11466_v57 = vld [vmem:[#allocation360_spill] sm:$0xff]  ;;  %v1698_v56 = vsel %vm841_vm14, %v11454_v44, %v11468_v30  ;;  %4460 = vrot.lane.b32.xlu0 %v11470_v53, %s5133_s10  ;;  %v11471_v6 = vld [vmem:[#allocation370_spill] sm:$0xff]  ;;  %v11472_v39 = vld [vmem:[#allocation91_spill] sm:$0xff]  ;;  %v1938_v26 = vsel %vm802_vm13, %v11465_v54, %v11431_v33 }
 0x7d0   : > { %v1937_v59 = vsel %vm802_vm13, %v11466_v57, %v11465_v54  ;;  %4462 = vrot.lane.b32.xlu1 %v11469_v51, %s5133_s10  ;;  %v1682_v63 = vadd.f32 %v11472_v39, %v1661_v9  ;;  %v11473_v62 = vld [vmem:[#allocation114_spill] sm:$0xff]  ;;  %v1704_v55 = vadd.f32 %v11468_v30, %v1683_v47  ;;  %v11476_v36 = vld [vmem:[#allocation347_spill] sm:$0xff]  ;;  %v11477_v49 = vld [vmem:[#allocation373_spill] sm:$0xff]  ;;  %s5139_s10 = smov 124  }
 0x7d1   : > { %v2028_v40 = vadd.f32 %v11471_v6, %v2007_v35  ;;  %v1922_v4 = vadd.f32 %v11473_v62, %v1901_v7  ;;  %v11474_v20 = vld [vmem:[#allocation14_spill] sm:$0xff]  ;;  %v1739_v44 = vsel %vm880_vm15, %v11477_v49, %v11476_v36  ;;  %v1942_v57 = vadd.f32 %v1937_v59, %v1921_v16  ;;  %v9103_v35 = vpop.permute.xlu0 %3633  ;;  %v11478_v9 = vld [vmem:[#allocation105_spill] sm:$0xff]  ;;  %v11481_v47 = vld [vmem:[#allocation432_spill] sm:$0xff] }
 0x7d2   : > { %v9092_v28 = vmul.f32 %v11474_v20, %v1472_v13  ;;  %v9106_v7 = vadd.f32 %v11478_v9, %v1449_v14  ;;  %v1703_v13 = vadd.f32 %v1698_v56, %v1682_v63  ;;  %v11480_v51 = vld [vmem:[#allocation94_spill] sm:$0xff]  ;;  %v11482_v30 = vld [vmem:[#allocation385_spill] sm:$0xff]  ;;  %v11485_v34 = vld [vmem:[#allocation372_spill] sm:$0xff] }
 0x7d3   : > { %v1723_v53 = vadd.f32 %v11480_v51, %v1702_v1  ;;  %v2409_v39 = vadd.f32 %v11482_v30, %v11481_v47  ;;  %v11483_v62 = vld [vmem:[#allocation110_spill] sm:$0xff]  ;;  %v11486_v52 = vld [vmem:[#allocation388_spill] sm:$0xff]  ;;  %v11487_v16 = vld [vmem:[#allocation457_spill] sm:$0xff]  ;;  %v1943_v56 = vadd.f32 %v1938_v26, %v1922_v4 }
 0x7d4   : > { %11475 = vst [vmem:[#allocation235_spill] sm:$0xff] %v9092_v28  ;;  %11479 = vst [vmem:[#allocation244_spill] sm:$0xff] %v9106_v7  ;;  %v9112_v49 = vadd.f32 %v11483_v62, %v1450_v46  ;;  %v2106_v33 = vsel %vm685_vm10, %v11486_v52, %v11485_v34  ;;  %v3564_v54 = vadd.f32 %v9018_v61, %v11487_v16  ;;  %v11488_v59 = vld [vmem:[#allocation464_spill] sm:$0xff]  ;;  %v11489_v14 = vld [vmem:[#allocation465_spill] sm:$0xff] }
 0x7d5   : > { %3982 = vrot.lane.b32.xlu1 %v11488_v59, %s5135_s13  ;;  %3980 = vrot.lane.b32.xlu0 %v11489_v14, %s5135_s13  ;;  %v1744_v1 = vadd.f32 %v1739_v44, %v1723_v53  ;;  %v3557_v46 = vsel %vm685_vm10, %v8988_v10, %v9045_v17  ;;  %v11490_v63 = vld [vmem:[#allocation11_spill] sm:$0xff]  ;;  %v11492_v51 = vld [vmem:[#allocation148_spill] sm:$0xff]  ;;  %v11494_v16 = vld [vmem:[#allocation129_spill] sm:$0xff]  ;;  %v9134_v59 = vpop.permute.xlu1 %3635 }
 0x7d6   : > { %11484 = vst [vmem:[#allocation239_spill] sm:$0xff] %v9112_v49  ;;  %v9127_v9 = vmul.f32 %v11490_v63, %v1175_v23  ;;  %v9130_v52 = vadd.f32 %v11492_v51, %v2028_v40  ;;  %v11493_v47 = vld [vmem:[#allocation143_spill] sm:$0xff]  ;;  %v1963_v7 = vadd.f32 %v11494_v16, %v1942_v57  ;;  %v9136_v49 = vpop.permute.xlu0 %3673  ;;  %v11495_v44 = vld [vmem:[#allocation417_spill] sm:$0xff]  ;;  %v11497_v26 = vld [vmem:[#allocation118_spill] sm:$0xff] }
 0x7d7   : > { %v1725_v62 = vadd.f32 %v11493_v47, %v1704_v55  ;;  %v9139_v4 = vmul.f32 %v11495_v44, %v1174_v18  ;;  %v1724_v53 = vadd.f32 %v11497_v26, %v1703_v13  ;;  %v11498_v10 = vld [vmem:[#allocation384_spill] sm:$0xff]  ;;  %v11500_v63 = vld [vmem:[#allocation434_spill] sm:$0xff]  ;;  %v11503_v47 = vld [vmem:[#allocation459_spill] sm:$0xff] }
 0x7d8   : > { %11491 = vst [vmem:[#allocation246_spill] sm:$0xff] %v9127_v9  ;;  %v11499_v14 = vld [vmem:[#allocation364_spill] sm:$0xff]  ;;  %v2111_v40 = vadd.f32 %v2106_v33, %v11500_v63  ;;  %v11502_v55 = vld [vmem:[#allocation390_spill] sm:$0xff]  ;;  %v3562_v16 = vadd.f32 %v3557_v46, %v11503_v47  ;;  %v3584_v9 = vadd.f32 %v11338_v48, %v3564_v54  ;;  %v11504_v18 = vld [vmem:[#allocation89_spill] sm:$0xff]  ;;  %v1980_v48 = vsel %vm841_vm14, %v11498_v10, %v11450_v43 }
 0x7d9   : > { %11496 = vst [vmem:[#allocation243_spill] sm:$0xff] %v9139_v4  ;;  %v1979_v23 = vsel %vm841_vm14, %v11499_v14, %v11498_v10  ;;  %v11501_v51 = vld [vmem:[#allocation164_spill] sm:$0xff]  ;;  %v2107_v57 = vsel %vm685_vm10, %v11485_v34, %v11502_v55  ;;  %4230 = vrot.lane.b32.xlu1 %v11504_v18, %s5134_s17  ;;  %v11505_v13 = vld [vmem:[#allocation466_spill] sm:$0xff]  ;;  %v11506_v26 = vld [vmem:[#allocation97_spill] sm:$0xff]  ;;  %v3558_v43 = vsel %vm685_vm10, %v9045_v17, %v9018_v61 }
 0x7da   : > { %v2430_v20 = vadd.f32 %v11501_v51, %v2409_v39  ;;  %4228 = vrot.lane.b32.xlu0 %v11505_v13, %s5134_s17  ;;  %v9157_v14 = vadd.f32 %v11506_v26, %v1744_v1  ;;  %v11508_v33 = vld [vmem:[#allocation375_spill] sm:$0xff]  ;;  %v11509_v63 = vld [vmem:[#allocation116_spill] sm:$0xff]  ;;  %v11510_v34 = vld [vmem:[#allocation389_spill] sm:$0xff]  ;;  %v1984_v54 = vadd.f32 %v1979_v23, %v1963_v7  ;;  %v3604_v1 = vadd.f32 %v9072_v25, %v3584_v9  ;;  %v9171_v13 = vpop.permute.xlu1 %3671  ;;  %v9173_v26 = vpop.permute.xlu0 %3713 }
 0x7db   : > { %v1740_v39 = vsel %vm880_vm15, %v11476_v36, %v11508_v33  ;;  %v1964_v51 = vadd.f32 %v11509_v63, %v1943_v56  ;;  %v11511_v46 = vld [vmem:[#allocation374_spill] sm:$0xff]  ;;  %v11512_v47 = vld [vmem:[#allocation392_spill] sm:$0xff]  ;;  %v11513_v36 = vld [vmem:[#allocation435_spill] sm:$0xff]  ;;  %v1746_v10 = vadd.f32 %v11508_v33, %v1725_v62  ;;  %v3582_v9 = vadd.f32 %v8785_v12, %v3562_v16 }
 0x7dc   : > { %11507 = vst [vmem:[#allocation326_spill] sm:$0xff] %v9157_v14  ;;  %v2451_v44 = vadd.f32 %v11510_v34, %v2430_v20  ;;  %v2148_v18 = vsel %vm724_vm11, %v11512_v47, %v11511_v46  ;;  %v2112_v4 = vadd.f32 %v2107_v57, %v11513_v36  ;;  %v11514_v56 = vld [vmem:[#allocation436_spill] sm:$0xff]  ;;  %v11515_v63 = vld [vmem:[#allocation141_spill] sm:$0xff]  ;;  %v1745_v7 = vadd.f32 %v1740_v39, %v1724_v53  ;;  %v11516_v23 = vld [vmem:[#allocation467_spill] sm:$0xff] }
 0x7dd   : > { %v2113_v20 = vadd.f32 %v11502_v55, %v11514_v56  ;;  %v2132_v28 = vadd.f32 %v11515_v63, %v2111_v40  ;;  %4478 = vrot.lane.b32.xlu1 %v11516_v23, %s5134_s17  ;;  %v11517_v47 = vld [vmem:[#allocation468_spill] sm:$0xff]  ;;  %v1985_v57 = vadd.f32 %v1980_v48, %v1964_v51  ;;  %v3597_v40 = vsel %vm724_vm11, %v9043_v38, %v9074_v37  ;;  %v11519_v61 = vld [vmem:[#allocation133_spill] sm:$0xff]  ;;  %v11520_v53 = vld [vmem:[#allocation394_spill] sm:$0xff] }
 0x7de   : > { %4232 = vrot.lane.b32.xlu0 %v11517_v47, %s5134_s17  ;;  %v11518_v55 = vld [vmem:[#allocation168_spill] sm:$0xff]  ;;  %v2005_v17 = vadd.f32 %v11519_v61, %v1984_v54  ;;  %v2149_v12 = vsel %vm724_vm11, %v11511_v46, %v11520_v53  ;;  %v11521_v62 = vld [vmem:[#allocation463_spill] sm:$0xff]  ;;  %v3624_v33 = vadd.f32 %v11341_v15, %v3604_v1  ;;  %v9198_v39 = vpop.permute.xlu1 %3675  ;;  %v9200_v51 = vpop.permute.xlu0 %3753  ;;  %v3602_v61 = vadd.f32 %v3597_v40, %v3582_v9 }
 0x7df   : > { %v2153_v36 = vadd.f32 %v2148_v18, %v2132_v28  ;;  %v2472_v56 = vadd.f32 %v11518_v55, %v2451_v44  ;;  %v3563_v16 = vadd.f32 %v3558_v43, %v11521_v62  ;;  %11522 = vst [vmem:[#allocation343_spill] sm:$0xff] %v9200_v51  ;;  %v11523_v28 = vld [vmem:[#allocation386_spill] sm:$0xff]  ;;  %v11524_v44 = vld [vmem:[#allocation368_spill] sm:$0xff]  ;;  %v11525_v18 = vld [vmem:[#allocation393_spill] sm:$0xff] }
 0x7e0   : > { %v2021_v48 = vsel %vm880_vm15, %v11524_v44, %v11523_v28  ;;  %v11526_v63 = vld [vmem:[#allocation124_spill] sm:$0xff]  ;;  %v11527_v23 = vld [vmem:[#allocation163_spill] sm:$0xff]  ;;  %v3644_v15 = vadd.f32 %v9134_v59, %v3624_v33  ;;  %v9230_v33 = vsel %vm880_vm15, %v11523_v28, %v11471_v6  ;;  %v11536_v28 = vld [vmem:[#allocation57_spill] sm:$0xff] }
 0x7e1   : > { %v2493_v38 = vadd.f32 %v11525_v18, %v2472_v56  ;;  %v2133_v54 = vadd.f32 %v11526_v63, %v2112_v4  ;;  %v2134_v47 = vadd.f32 %v11527_v23, %v2113_v20  ;;  %v11528_v55 = vld [vmem:[#allocation376_spill] sm:$0xff]  ;;  %v11530_v1 = vld [vmem:[#allocation471_spill] sm:$0xff]  ;;  %v11533_v20 = vld [vmem:[#allocation145_spill] sm:$0xff] }
 0x7e2   : > { %v11529_v46 = vld [vmem:[#allocation396_spill] sm:$0xff]  ;;  %4482 = vrot.lane.b32.xlu1 %v11530_v1, %s5134_s17  ;;  %v11532_v44 = vld [vmem:[#allocation147_spill] sm:$0xff]  ;;  %v2174_v63 = vadd.f32 %v11533_v20, %v2153_v36  ;;  %v3664_v6 = vadd.f32 %v11345_v11, %v3644_v15  ;;  %v11542_v11 = vld [vmem:[#allocation398_spill] sm:$0xff] }
 0x7e3   : > { %v2190_v43 = vsel %vm763_vm12, %v11529_v46, %v11528_v55  ;;  %v11531_v62 = vld [vmem:[#allocation472_spill] sm:$0xff]  ;;  %v9217_v14 = vadd.f32 %v11532_v44, %v1746_v10  ;;  %v2154_v56 = vadd.f32 %v2149_v12, %v2133_v54  ;;  %v2155_v4 = vadd.f32 %v11520_v53, %v2134_v47  ;;  %v11534_v23 = vld [vmem:[#allocation99_spill] sm:$0xff]  ;;  %v9233_v10 = vpop.permute.xlu1 %3711  ;;  %v9235_v12 = vpop.permute.xlu0 %3818  ;;  %v11545_v20 = vld [vmem:[#allocation377_spill] sm:$0xff] }
 0x7e4   : > { %4480 = vrot.lane.b32.xlu0 %v11531_v62, %s5134_s17  ;;  %v9222_v51 = vadd.f32 %v11534_v23, %v1745_v7  ;;  %v11535_v9 = vld [vmem:[#allocation119_spill] sm:$0xff]  ;;  %v3583_v46 = vadd.f32 %v8790_v22, %v3563_v16  ;;  %v9237_v53 = vadd.f32 %v2021_v48, %v2005_v17  ;;  %v2195_v36 = vadd.f32 %v2190_v43, %v2174_v63  ;;  %v11537_v22 = vld [vmem:[#allocation473_spill] sm:$0xff]  ;;  %v11538_v17 = vld [vmem:[#allocation16_spill] sm:$0xff] }
 0x7e5   : > { %v9225_v40 = vadd.f32 %v11535_v9, %v1985_v57  ;;  %v2514_v7 = vadd.f32 %v11237_v5, %v2493_v38  ;;  %v3598_v57 = vsel %vm724_vm11, %v9074_v37, %v9072_v25  ;;  %v3622_v54 = vadd.f32 %v8795_v42, %v3602_v61  ;;  %v11539_v48 = vld [vmem:[#allocation397_spill] sm:$0xff]  ;;  %v11540_v38 = vld [vmem:[#allocation128_spill] sm:$0xff]  ;;  %v11541_v43 = vld [vmem:[#allocation167_spill] sm:$0xff] }
 0x7e6   : > { %4000 = vrot.lane.b32.xlu1 %v11536_v28, %s5135_s13  ;;  %v9251_v16 = vmul.f32 %v11538_v17, %v9130_v52  ;;  %v2175_v47 = vadd.f32 %v11540_v38, %v2154_v56  ;;  %v2176_v25 = vadd.f32 %v11541_v43, %v2155_v4  ;;  %v3637_v42 = vsel %vm763_vm12, %v9101_v3, %v9103_v35  ;;  %v11543_v61 = vld [vmem:[#allocation412_spill] sm:$0xff]  ;;  %v11544_v56 = vld [vmem:[#allocation151_spill] sm:$0xff]  ;;  %v11547_v23 = vld [vmem:[#allocation441_spill] sm:$0xff] }
 0x7e7   : > { %v2535_v5 = vadd.f32 %v11539_v48, %v2514_v7  ;;  %v2191_v37 = vsel %vm763_vm12, %v11528_v55, %v11542_v11  ;;  %v2403_v15 = vsel %vm685_vm10, %v11543_v61, %v11482_v30  ;;  %v3603_v52 = vadd.f32 %v3598_v57, %v3583_v46  ;;  %v9266_v62 = vpop.permute.xlu1 %3715  ;;  %v9268_v44 = vpop.permute.xlu0 %3822  ;;  %v11546_v63 = vld [vmem:[#allocation400_spill] sm:$0xff]  ;;  %v11548_v9 = vld [vmem:[#allocation314_spill] sm:$0xff]  ;;  %v11549_v7 = vld [vmem:[#allocation83_spill] sm:$0xff] }
 0x7e8   : > { %3998 = vrot.lane.b32.xlu0 %v11537_v22, %s5135_s13  ;;  %v3684_v1 = vadd.f32 %v9198_v39, %v3664_v6  ;;  %v2216_v4 = vadd.f32 %v11544_v56, %v2195_v36  ;;  %v2232_v3 = vsel %vm802_vm13, %v11546_v63, %v11545_v20  ;;  %v3024_v55 = vadd.f32 %v11548_v9, %v11547_v23  ;;  %v11550_v28 = vld [vmem:[#allocation162_spill] sm:$0xff]  ;;  %v11551_v46 = vld [vmem:[#allocation383_spill] sm:$0xff]  ;;  %v11554_v56 = vld [vmem:[#allocation176_spill] sm:$0xff] }
 0x7e9   : > { %v3294_v22 = vadd.f32 %v11550_v28, %v11549_v7  ;;  %v2197_v30 = vadd.f32 %v11542_v11, %v2176_v25  ;;  %v2402_v57 = vsel %vm685_vm10, %v11551_v46, %v11543_v61  ;;  %v3642_v6 = vadd.f32 %v3637_v42, %v3622_v54  ;;  %v11552_v38 = vld [vmem:[#allocation474_spill] sm:$0xff]  ;;  %v11553_v36 = vld [vmem:[#allocation475_spill] sm:$0xff] }
 0x7ea   : > { %4248 = vrot.lane.b32.xlu1 %v11552_v38, %s5135_s13  ;;  %v2196_v43 = vadd.f32 %v2191_v37, %v2175_v47  ;;  %v2556_v63 = vadd.f32 %v11554_v56, %v2535_v5  ;;  %v11555_v23 = vld [vmem:[#allocation438_spill] sm:$0xff]  ;;  %v3638_v25 = vsel %vm763_vm12, %v9103_v35, %v9134_v59  ;;  %v2237_v11 = vadd.f32 %v2232_v3, %v2216_v4  ;;  %v11557_v5 = vld [vmem:[#allocation437_spill] sm:$0xff]  ;;  %v11562_v3 = vld [vmem:[#allocation171_spill] sm:$0xff] }
 0x7eb   : > { %v2408_v17 = vadd.f32 %v2403_v15, %v11555_v23  ;;  %v11556_v7 = vld [vmem:[#allocation402_spill] sm:$0xff]  ;;  %v3623_v42 = vadd.f32 %v8800_v60, %v3603_v52  ;;  %v3704_v61 = vadd.f32 %v11348_v2, %v3684_v1  ;;  %v9296_v46 = vpop.permute.xlu1 %3751  ;;  %v9298_v47 = vpop.permute.xlu0 %3858  ;;  %v2407_v37 = vadd.f32 %v2402_v57, %v11557_v5  ;;  %v11558_v15 = vld [vmem:[#allocation212_spill] sm:$0xff]  ;;  %v11560_v52 = vld [vmem:[#allocation477_spill] sm:$0xff] }
 0x7ec   : > { %4002 = vrot.lane.b32.xlu0 %v11553_v36, %s5135_s13  ;;  %v2233_v54 = vsel %vm802_vm13, %v11545_v20, %v11556_v7  ;;  %v3044_v38 = vadd.f32 %v11558_v15, %v3024_v55  ;;  %v3314_v36 = vadd.f32 %v11297_v19, %v3294_v22  ;;  %v3677_v35 = vsel %vm802_vm13, %v9171_v13, %v9136_v49  ;;  %v11559_v2 = vld [vmem:[#allocation476_spill] sm:$0xff]  ;;  %v11561_v1 = vld [vmem:[#allocation130_spill] sm:$0xff]  ;;  %v11564_v57 = vld [vmem:[#allocation469_spill] sm:$0xff] }
 0x7ed   : > { %v3643_v59 = vadd.f32 %v3638_v25, %v3623_v42  ;;  %v3662_v4 = vadd.f32 %v8805_v58, %v3642_v6  ;;  %v3724_v60 = vadd.f32 %v9266_v62, %v3704_v61  ;;  %v2217_v20 = vadd.f32 %v11561_v1, %v2196_v43  ;;  %v11563_v19 = vld [vmem:[#allocation146_spill] sm:$0xff]  ;;  %v11565_v13 = vld [vmem:[#allocation153_spill] sm:$0xff]  ;;  %v11572_v1 = vld [vmem:[#allocation180_spill] sm:$0xff] }
 0x7ee   : > { %4252 = vrot.lane.b32.xlu1 %v11559_v2, %s5135_s13  ;;  %v2218_v55 = vadd.f32 %v11562_v3, %v2197_v30  ;;  %v2429_v22 = vadd.f32 %v11563_v19, %v2408_v17  ;;  %v3064_v56 = vadd.f32 %v11564_v57, %v3044_v38  ;;  %v9317_v23 = vadd.f32 %v11565_v13, %v2237_v11  ;;  %v11566_v58 = vld [vmem:[#allocation414_spill] sm:$0xff]  ;;  %v11567_v43 = vld [vmem:[#allocation401_spill] sm:$0xff]  ;;  %v11568_v38 = vld [vmem:[#allocation159_spill] sm:$0xff] }
 0x7ef   : > { %v2445_v6 = vsel %vm724_vm11, %v11566_v58, %v11510_v34  ;;  %v3334_v25 = vadd.f32 %v8712_v0, %v3314_v36  ;;  %v3682_v42 = vadd.f32 %v3677_v35, %v3662_v4  ;;  %v9323_v61 = vpop.permute.xlu1 %3755  ;;  %v9325_v5 = vpop.permute.xlu0 %3862  ;;  %v2577_v30 = vadd.f32 %v11567_v43, %v2556_v63  ;;  %v11569_v35 = vld [vmem:[#allocation112_spill] sm:$0xff]  ;;  %v11570_v4 = vld [vmem:[#allocation478_spill] sm:$0xff]  ;;  %v11571_v63 = vld [vmem:[#allocation387_spill] sm:$0xff] }
 0x7f0   : > { %4250 = vrot.lane.b32.xlu0 %v11560_v52, %s5135_s13  ;;  %v2238_v15 = vadd.f32 %v2233_v54, %v2217_v20  ;;  %v2239_v17 = vadd.f32 %v11556_v7, %v2218_v55  ;;  %v3678_v11 = vsel %vm802_vm13, %v9136_v49, %v9198_v39  ;;  %v2428_v2 = vadd.f32 %v11568_v38, %v2407_v37  ;;  %v11573_v3 = vld [vmem:[#allocation134_spill] sm:$0xff] }
 0x7f1   : > { %v3663_v34 = vadd.f32 %v8814_v32, %v3643_v59  ;;  %v3744_v36 = vadd.f32 %v11360_v29, %v3724_v60  ;;  %v2444_v7 = vsel %vm724_vm11, %v11571_v63, %v11566_v58  ;;  %v2450_v54 = vadd.f32 %v2445_v6, %v2429_v22  ;;  %v11575_v22 = vld [vmem:[#allocation65_spill] sm:$0xff]  ;;  %v11578_v6 = vld [vmem:[#allocation479_spill] sm:$0xff] }
 0x7f2   : > { %4500 = vrot.lane.b32.xlu1 %v11569_v35, %s5134_s17  ;;  %v3084_v52 = vadd.f32 %v11267_v24, %v3064_v56  ;;  %v3717_v49 = vsel %vm841_vm14, %v9233_v10, %v9173_v26  ;;  %v3354_v32 = vadd.f32 %v11305_v31, %v3334_v25  ;;  %v3702_v39 = vadd.f32 %v8819_v45, %v3682_v42  ;;  %v11574_v24 = vld [vmem:[#allocation175_spill] sm:$0xff]  ;;  %v11576_v56 = vld [vmem:[#allocation456_spill] sm:$0xff]  ;;  %v11580_v42 = vld [vmem:[#allocation406_spill] sm:$0xff] }
 0x7f3   : > { %v3683_v29 = vadd.f32 %v3678_v11, %v3663_v34  ;;  %v3764_v37 = vadd.f32 %v9323_v61, %v3744_v36  ;;  %v9349_v59 = vpop.permute.xlu1 %3820  ;;  %v9351_v60 = vpop.permute.xlu0 %3898  ;;  %v2598_v20 = vadd.f32 %v11572_v1, %v2577_v30  ;;  %v9355_v55 = vadd.f32 %v11573_v3, %v2238_v15  ;;  %v11577_v31 = vld [vmem:[#allocation299_spill] sm:$0xff]  ;;  %v11579_v25 = vld [vmem:[#allocation52_spill] sm:$0xff]  ;;  %v11581_v11 = vld [vmem:[#allocation161_spill] sm:$0xff] }
 0x7f4   : > { %4498 = vrot.lane.b32.xlu0 %v11570_v4, %s5134_s17  ;;  %v2260_v19 = vadd.f32 %v11574_v24, %v2239_v17  ;;  %v3104_v10 = vadd.f32 %v11575_v22, %v3084_v52  ;;  %v3017_v13 = vsel %vm685_vm10, %v11577_v31, %v11576_v56  ;;  %v3374_v45 = vadd.f32 %v8809_v27, %v3354_v32  ;;  %v11582_v34 = vld [vmem:[#allocation416_spill] sm:$0xff]  ;;  %v11586_v32 = vld [vmem:[#allocation233_spill] sm:$0xff]  ;;  %v11590_v3 = vld [vmem:[#allocation391_spill] sm:$0xff] }
 0x7f5   : > { %v3722_v58 = vadd.f32 %v3717_v49, %v3702_v39  ;;  %v2449_v15 = vadd.f32 %v2444_v7, %v2428_v2  ;;  %v2471_v17 = vadd.f32 %v11581_v11, %v2450_v54  ;;  %v3718_v38 = vsel %vm841_vm14, %v9173_v26, %v9266_v62  ;;  %v11583_v7 = vld [vmem:[#allocation442_spill] sm:$0xff]  ;;  %v11584_v62 = vld [vmem:[#allocation165_spill] sm:$0xff]  ;;  %v11585_v49 = vld [vmem:[#allocation343_spill] sm:$0xff] }
 0x7f6   : > { %4018 = vrot.lane.b32.xlu1 %v11578_v6, %s5136_s8  ;;  %v2281_v30 = vadd.f32 %v11580_v42, %v2260_v19  ;;  %v2487_v36 = vsel %vm763_vm12, %v11582_v34, %v11525_v18  ;;  %v3018_v35 = vsel %vm685_vm10, %v11576_v56, %v11548_v9  ;;  %v3703_v4 = vadd.f32 %v8824_v21, %v3683_v29  ;;  %v11592_v31 = vld [vmem:[#allocation446_spill] sm:$0xff] }
 0x7f7   : > { %v3784_v63 = vadd.f32 %v11367_v50, %v3764_v37  ;;  %v9380_v52 = vpop.permute.xlu1 %3860  ;;  %v9382_v2 = vpop.permute.xlu0 %3902  ;;  %v3022_v54 = vadd.f32 %v3017_v13, %v11583_v7  ;;  %v3124_v26 = vadd.f32 %v11273_v8, %v3104_v10  ;;  %v3287_v18 = vsel %vm685_vm10, %v11584_v62, %v8763_v41  ;;  %v11587_v50 = vld [vmem:[#allocation228_spill] sm:$0xff]  ;;  %v11589_v8 = vld [vmem:[#allocation150_spill] sm:$0xff]  ;;  %v11591_v10 = vld [vmem:[#allocation149_spill] sm:$0xff] }
 0x7f8   : > { %4502 = vrot.lane.b32.xlu0 %v11579_v25, %s5134_s17  ;;  %v3757_v9 = vsel %vm880_vm15, %v9296_v46, %v11585_v49  ;;  %v3394_v21 = vadd.f32 %v11586_v32, %v3374_v45  ;;  %v3723_v29 = vadd.f32 %v3718_v38, %v3703_v4  ;;  %v3742_v39 = vadd.f32 %v11587_v50, %v3722_v58  ;;  %v11588_v37 = vld [vmem:[#allocation76_spill] sm:$0xff]  ;;  %v11595_v4 = vld [vmem:[#allocation445_spill] sm:$0xff]  ;;  %v11598_v7 = vld [vmem:[#allocation470_spill] sm:$0xff]  ;;  %s5140_s17 = smov 123  }
 0x7f9   : > { %v2470_v1 = vadd.f32 %v11589_v8, %v2449_v15  ;;  %v2486_v24 = vsel %vm763_vm12, %v11590_v3, %v11582_v34  ;;  %v2492_v19 = vadd.f32 %v2487_v36, %v2471_v17  ;;  %v3144_v46 = vadd.f32 %v11591_v10, %v3124_v26  ;;  %v11593_v45 = vld [vmem:[#allocation324_spill] sm:$0xff]  ;;  %v11594_v15 = vld [vmem:[#allocation405_spill] sm:$0xff]  ;;  %v11599_v26 = vld [vmem:[#allocation455_spill] sm:$0xff] }
 0x7fa   : > { %3792 = vrot.lane.b32.xlu1 %v3784_v63, %s5137_s23  ;;  %v3288_v56 = vsel %vm685_vm10, %v8763_v41, %v11550_v28  ;;  %v3292_v13 = vadd.f32 %v3287_v18, %v11592_v31  ;;  %v3414_v58 = vadd.f32 %v11593_v45, %v3394_v21  ;;  %v3762_v6 = vadd.f32 %v3757_v9, %v3742_v39  ;;  %v11596_v17 = vld [vmem:[#allocation160_spill] sm:$0xff]  ;;  %v11597_v41 = vld [vmem:[#allocation179_spill] sm:$0xff]  ;;  %v11602_v32 = vld [vmem:[#allocation225_spill] sm:$0xff] }
 0x7fb   : > { %v9407_v25 = vpop.permute.xlu1 %3900  ;;  %v9409_v11 = vpop.permute.xlu0 %3938  ;;  %v2619_v38 = vadd.f32 %v11594_v15, %v2598_v20  ;;  %v3023_v34 = vadd.f32 %v3018_v35, %v11595_v4  ;;  %v3042_v36 = vadd.f32 %v11596_v17, %v3022_v54  ;;  %v3758_v63 = vsel %vm880_vm15, %v11585_v49, %v9323_v61  ;;  %v11600_v18 = vld [vmem:[#allocation340_spill] sm:$0xff]  ;;  %v11601_v35 = vld [vmem:[#allocation169_spill] sm:$0xff]  ;;  %v11603_v61 = vld [vmem:[#allocation447_spill] sm:$0xff] }
 0x7fc   : > { %4020 = vrot.lane.b32.xlu0 %v11588_v37, %s5136_s8  ;;  %v2302_v28 = vadd.f32 %v11597_v41, %v2281_v30  ;;  %v3057_v62 = vsel %vm724_vm11, %v11599_v26, %v11598_v7  ;;  %v3743_v9 = vadd.f32 %v11600_v18, %v3723_v29  ;;  %v2491_v20 = vadd.f32 %v2486_v24, %v2470_v1  ;;  %v11604_v30 = vld [vmem:[#allocation209_spill] sm:$0xff]  ;;  %v11606_v8 = vld [vmem:[#allocation307_spill] sm:$0xff]  ;;  %v11613_v26 = vld [vmem:[#allocation326_spill] sm:$0xff] }
 0x7fd   : > { %v2513_v54 = vadd.f32 %v11601_v35, %v2492_v19  ;;  %v3164_v21 = vadd.f32 %v11602_v32, %v3144_v46  ;;  %v3293_v49 = vadd.f32 %v3288_v56, %v11603_v61  ;;  %v3312_v50 = vadd.f32 %v11604_v30, %v3292_v13  ;;  %v11605_v39 = vld [vmem:[#allocation237_spill] sm:$0xff]  ;;  %v11610_v56 = vld [vmem:[#allocation182_spill] sm:$0xff] }
 0x7fe   : > { %1773 = vrot.lane.b32.xlu1 %v9222_v51, %s5137_s23  ;;  %v3434_v37 = vadd.f32 %v11605_v39, %v3414_v58  ;;  %v3782_v3 = vadd.f32 %v11606_v8, %v3762_v6  ;;  %v3763_v29 = vadd.f32 %v3758_v63, %v3743_v9  ;;  %v11608_v24 = vld [vmem:[#allocation181_spill] sm:$0xff]  ;;  %v3062_v46 = vadd.f32 %v3057_v62, %v3042_v36  ;;  %v11612_v63 = vld [vmem:[#allocation240_spill] sm:$0xff]  ;;  %v11617_v9 = vld [vmem:[#allocation410_spill] sm:$0xff] }
 0x7ff   : > { %v9432_v31 = vpop.permute.xlu1 %3940  ;;  %v9434_v51 = vpop.permute.xlu0 %3942  ;;  %v3043_v19 = vadd.f32 %v11608_v24, %v3023_v34  ;;  %v11609_v4 = vld [vmem:[#allocation217_spill] sm:$0xff]  ;;  %v3058_v58 = vsel %vm724_vm11, %v11598_v7, %v11564_v57  ;;  %v11615_v34 = vld [vmem:[#allocation404_spill] sm:$0xff]  ;;  %v2323_v35 = vadd.f32 %v11617_v9, %v2302_v28  ;;  %v11618_v32 = vld [vmem:[#allocation210_spill] sm:$0xff] }
 0x800   : > { %1775 = vrot.lane.b32.xlu0 %v9217_v14, %s5137_s23  ;;  %v11607_v14 = vld [vmem:[#allocation420_spill] sm:$0xff]  ;;  %v3327_v13 = vsel %vm724_vm11, %v11610_v56, %v11609_v4  ;;  %v11611_v6 = vld [vmem:[#allocation185_spill] sm:$0xff]  ;;  %v3454_v41 = vadd.f32 %v11612_v63, %v3434_v37  ;;  %v3313_v61 = vadd.f32 %v11618_v32, %v3293_v49  ;;  %v11619_v57 = vld [vmem:[#allocation154_spill] sm:$0xff] }
 0x801   : > { %v2529_v1 = vsel %vm802_vm13, %v11607_v14, %v11539_v48  ;;  %v3184_v17 = vadd.f32 %v11611_v6, %v3164_v21  ;;  %v11614_v48 = vld [vmem:[#allocation379_spill] sm:$0xff]  ;;  %v11616_v62 = vld [vmem:[#allocation184_spill] sm:$0xff]  ;;  %v2512_v7 = vadd.f32 %v11619_v57, %v2491_v20  ;;  %v3328_v21 = vsel %vm724_vm11, %v11609_v4, %v8712_v0  ;;  %v11622_v49 = vld [vmem:[#allocation309_spill] sm:$0xff] }
 0x802   : > { %3788 = vrot.lane.b32.xlu1 %v3782_v3, %s5137_s23  ;;  %v2274_v36 = vsel %vm841_vm14, %v11615_v34, %v11614_v48  ;;  %v2640_v18 = vadd.f32 %v11616_v62, %v2619_v38  ;;  %v3332_v30 = vadd.f32 %v3327_v13, %v3312_v50  ;;  %v11620_v39 = vld [vmem:[#allocation236_spill] sm:$0xff]  ;;  %v11621_v24 = vld [vmem:[#allocation395_spill] sm:$0xff]  ;;  %v2534_v28 = vadd.f32 %v2529_v1, %v2513_v54  ;;  %v11623_v20 = vld [vmem:[#allocation54_spill] sm:$0xff] }
 0x803   : > { %v3783_v37 = vadd.f32 %v11620_v39, %v3763_v29  ;;  %v9462_v8 = vpop.permute.xlu1 %4088  ;;  %v9464_v3 = vpop.permute.xlu0 %3978  ;;  %v2528_v38 = vsel %vm802_vm13, %v11621_v24, %v11607_v14  ;;  %v3063_v56 = vadd.f32 %v3058_v58, %v3043_v19  ;;  %v11624_v34 = vld [vmem:[#allocation81_spill] sm:$0xff]  ;;  %v11625_v0 = vld [vmem:[#allocation230_spill] sm:$0xff]  ;;  %v11627_v13 = vld [vmem:[#allocation235_spill] sm:$0xff]  ;;  %v2279_v32 = vadd.f32 %v2274_v36, %v9317_v23 }
 0x804   : > { %1771 = vrot.lane.b32.xlu0 %v11613_v26, %s5137_s23  ;;  %v3082_v26 = vadd.f32 %v11622_v49, %v3062_v46  ;;  %v3097_v62 = vsel %vm763_vm12, %v11624_v34, %v11623_v20  ;;  %v3204_v50 = vadd.f32 %v11625_v0, %v3184_v17  ;;  %v11626_v4 = vld [vmem:[#allocation241_spill] sm:$0xff]  ;;  %v2275_v54 = vsel %vm841_vm14, %v11614_v48, %v11580_v42  ;;  %v11628_v14 = vld [vmem:[#allocation183_spill] sm:$0xff]  ;;  %v11631_v39 = vld [vmem:[#allocation320_spill] sm:$0xff] }
 0x805   : > { %v3474_v29 = vadd.f32 %v11626_v4, %v3454_v41  ;;  %v2344_v1 = vadd.f32 %v11628_v14, %v2323_v35  ;;  %v3333_v19 = vadd.f32 %v3328_v21, %v3313_v61  ;;  %v3098_v46 = vsel %vm763_vm12, %v11623_v20, %v11575_v22  ;;  %v11629_v58 = vld [vmem:[#allocation295_spill] sm:$0xff]  ;;  %v11635_v34 = vld [vmem:[#allocation173_spill] sm:$0xff]  ;;  %v11637_v0 = vld [vmem:[#allocation246_spill] sm:$0xff] }
 0x806   : > { %1493 = vrot.lane.b32.xlu1 %v11627_v13, %s5127_s7  ;;  %v3224_v17 = vadd.f32 %v11629_v58, %v3204_v50  ;;  %v11630_v41 = vld [vmem:[#allocation211_spill] sm:$0xff]  ;;  %v2533_v36 = vadd.f32 %v2528_v38, %v2512_v7  ;;  %v3102_v49 = vadd.f32 %v3097_v62, %v3082_v26  ;;  %v2555_v22 = vadd.f32 %v11635_v34, %v2534_v28  ;;  %v11636_v20 = vld [vmem:[#allocation425_spill] sm:$0xff]  ;;  %v11638_v7 = vld [vmem:[#allocation20_spill] sm:$0xff] }
 0x807   : > { %v3352_v57 = vadd.f32 %v11630_v41, %v3332_v30  ;;  %v9489_v24 = vpop.permute.xlu1 %4092  ;;  %v9491_v23 = vpop.permute.xlu0 %4090  ;;  %v11632_v42 = vld [vmem:[#allocation187_spill] sm:$0xff]  ;;  %v2571_v30 = vsel %vm841_vm14, %v11636_v20, %v11567_v43  ;;  %v2654_v38 = vmul.f32 %v11638_v7, %v2640_v18  ;;  %v11639_v26 = vld [vmem:[#allocation100_spill] sm:$0xff]  ;;  %v11641_v28 = vld [vmem:[#allocation214_spill] sm:$0xff] }
 0x808   : > { %3790 = vrot.lane.b32.xlu0 %v3783_v37, %s5137_s23  ;;  %v3494_v37 = vadd.f32 %v11631_v39, %v3474_v29  ;;  %v3083_v48 = vadd.f32 %v11632_v42, %v3063_v56  ;;  %v11633_v35 = vld [vmem:[#allocation219_spill] sm:$0xff]  ;;  %v11640_v62 = vld [vmem:[#allocation120_spill] sm:$0xff]  ;;  %v3353_v4 = vadd.f32 %v11641_v28, %v3333_v19  ;;  %v11642_v29 = vld [vmem:[#allocation17_spill] sm:$0xff]  ;;  %v2280_v19 = vadd.f32 %v2275_v54, %v9355_v55  ;;  %s10165_s23 = scalar_lea.hbm %s10221_s5, %s4871_s9 }
 0x809   : > { %v11634_v61 = vld [vmem:[#allocation223_spill] sm:$0xff]  ;;  %v3137_v50 = vsel %vm802_vm13, %v11640_v62, %v11639_v26  ;;  %v2358_v13 = vmul.f32 %v11642_v29, %v2344_v1  ;;  %v11643_v43 = vld [vmem:[#allocation234_spill] sm:$0xff]  ;;  %v3368_v41 = vsel %vm763_vm12, %v11633_v35, %v8809_v27  ;;  %v11649_v54 = vld [vmem:[#allocation189_spill] sm:$0xff] }
 0x80a   : > { %v3367_v21 = vsel %vm763_vm12, %v11634_v61, %v11633_v35  ;;  %2070 = vrot.lane.b32.xlu1 %v9251_v16, %s5139_s10  ;;  %v3103_v56 = vadd.f32 %v3098_v46, %v3083_v48  ;;  %v3244_v14 = vadd.f32 %v11643_v43, %v3224_v17  ;;  %v11644_v61 = vld [vmem:[#allocation245_spill] sm:$0xff]  ;;  %v2027_v46 = vadd.f32 %v9230_v33, %v9225_v40  ;;  %v11645_v48 = vld [vmem:[#allocation156_spill] sm:$0xff]  ;;  %v11647_v62 = vld [vmem:[#allocation399_spill] sm:$0xff] }
 0x80b   : > { %v3372_v42 = vadd.f32 %v3367_v21, %v3352_v57  ;;  %v3514_v16 = vadd.f32 %v11644_v61, %v3494_v37  ;;  %v9516_v34 = vpop.permute.xlu1 %4358  ;;  %v9518_v18 = vpop.permute.xlu0 %4360  ;;  %v2554_v1 = vadd.f32 %v11645_v48, %v2533_v36  ;;  %v2570_v27 = vsel %vm841_vm14, %v11647_v62, %v11636_v20  ;;  %v11648_v40 = vld [vmem:[#allocation155_spill] sm:$0xff]  ;;  %v11650_v35 = vld [vmem:[#allocation381_spill] sm:$0xff]  ;;  %v11651_v21 = vld [vmem:[#allocation408_spill] sm:$0xff] }
 0x80c   : > { %1198 = vrot.lane.b32.xlu0 %v11637_v0, %s5138_s28  ;;  %v11646_v0 = vld [vmem:[#allocation166_spill] sm:$0xff]  ;;  %v2576_v57 = vadd.f32 %v2571_v30, %v2555_v22  ;;  %v3138_v37 = vsel %vm802_vm13, %v11639_v26, %v11591_v10  ;;  %v2300_v33 = vadd.f32 %v11648_v40, %v2279_v32  ;;  %v3123_v36 = vadd.f32 %v11649_v54, %v3103_v56  ;;  %v11652_v20 = vld [vmem:[#allocation316_spill] sm:$0xff]  ;;  %v11654_v43 = vld [vmem:[#allocation11_spill] sm:$0xff] }
 0x80d   : > { %v3122_v17 = vadd.f32 %v11646_v0, %v3102_v49  ;;  %v3373_v49 = vadd.f32 %v3368_v41, %v3353_v4  ;;  %v2316_v22 = vsel %vm880_vm15, %v11651_v21, %v11650_v35  ;;  %v3392_v30 = vadd.f32 %v11652_v20, %v3372_v42  ;;  %v11653_v26 = vld [vmem:[#allocation14_spill] sm:$0xff]  ;;  %v11655_v4 = vld [vmem:[#allocation297_spill] sm:$0xff]  ;;  %v11656_v41 = vld [vmem:[#allocation232_spill] sm:$0xff] }
 0x80e   : > { %2662 = vrot.lane.b32.xlu1 %v2654_v38, %s5141_s15  ;;  %v3247_v38 = vmul.f32 %v3244_v14, %v11654_v43  ;;  %v2317_v32 = vsel %vm880_vm15, %v11650_v35, %v11617_v9  ;;  %v2575_v56 = vadd.f32 %v2570_v27, %v2554_v1  ;;  %v3407_v61 = vsel %vm802_vm13, %v11656_v41, %v11655_v4  ;;  %v11657_v48 = vld [vmem:[#allocation138_spill] sm:$0xff]  ;;  %v11658_v0 = vld [vmem:[#allocation177_spill] sm:$0xff]  ;;  %v11660_v40 = vld [vmem:[#allocation152_spill] sm:$0xff] }
 0x80f   : > { %v3142_v55 = vadd.f32 %v3137_v50, %v3122_v17  ;;  %v9539_v28 = vpop.permute.xlu1 %4362  ;;  %v9541_v10 = vpop.permute.xlu0 %4128  ;;  %v3143_v50 = vadd.f32 %v3138_v37, %v3123_v36  ;;  %v2301_v42 = vadd.f32 %v11657_v48, %v2280_v19  ;;  %v2597_v17 = vadd.f32 %v11658_v0, %v2576_v57  ;;  %v11659_v62 = vld [vmem:[#allocation101_spill] sm:$0xff]  ;;  %v11661_v9 = vld [vmem:[#allocation63_spill] sm:$0xff]  ;;  %v11662_v27 = vld [vmem:[#allocation170_spill] sm:$0xff] }
 0x810   : > { %2366 = vrot.lane.b32.xlu0 %v2358_v13, %s5140_s17  ;;  %v3517_v13 = vmul.f32 %v3514_v16, %v11653_v26  ;;  %v3177_v16 = vsel %vm841_vm14, %v11660_v40, %v11659_v62  ;;  %v2321_v14 = vadd.f32 %v2316_v22, %v2300_v33  ;;  %v2613_v1 = vsel %vm880_vm15, %v11661_v9, %v11594_v15  ;;  %v11663_v54 = vld [vmem:[#allocation319_spill] sm:$0xff]  ;;  %v11664_v22 = vld [vmem:[#allocation158_spill] sm:$0xff]  ;;  %v11673_v48 = vld [vmem:[#allocation137_spill] sm:$0xff] }
 0x811   : > { %v3162_v37 = vadd.f32 %v11662_v27, %v3142_v55  ;;  %v3393_v36 = vadd.f32 %v11663_v54, %v3373_v49  ;;  %v2322_v19 = vadd.f32 %v2317_v32, %v2301_v42  ;;  %v3178_v57 = vsel %vm841_vm14, %v11659_v62, %v11611_v6  ;;  %v11665_v55 = vld [vmem:[#allocation172_spill] sm:$0xff]  ;;  %v11666_v49 = vld [vmem:[#allocation239_spill] sm:$0xff]  ;;  %v11667_v43 = vld [vmem:[#allocation418_spill] sm:$0xff] }
 0x812   : > { %3255 = vrot.lane.b32.xlu1 %v3247_v38, %s5138_s28  ;;  %v3412_v35 = vadd.f32 %v3407_v61, %v3392_v30  ;;  %v3408_v21 = vsel %vm802_vm13, %v11655_v4, %v11593_v45  ;;  %v2596_v15 = vadd.f32 %v11664_v22, %v2575_v56  ;;  %v1484_v38 = vmul.f32 %v11667_v43, %v11666_v49  ;;  %v11668_v32 = vld [vmem:[#allocation403_spill] sm:$0xff]  ;;  %v11669_v41 = vld [vmem:[#allocation242_spill] sm:$0xff]  ;;  %v11671_v4 = vld [vmem:[#allocation244_spill] sm:$0xff] }
 0x813   : > { %v9569_v20 = vpop.permute.xlu1 %4130  ;;  %v9571_v33 = vpop.permute.xlu0 %4132  ;;  %v3182_v26 = vadd.f32 %v3177_v16, %v3162_v37  ;;  %v2612_v6 = vsel %vm880_vm15, %v11668_v32, %v11661_v9  ;;  %v2618_v30 = vadd.f32 %v2613_v1, %v2597_v17  ;;  %v11670_v45 = vld [vmem:[#allocation243_spill] sm:$0xff]  ;;  %v11672_v61 = vld [vmem:[#allocation13_spill] sm:$0xff]  ;;  %v3413_v40 = vadd.f32 %v3408_v21, %v3393_v36  ;;  %v11676_v9 = vld [vmem:[#allocation142_spill] sm:$0xff] }
 0x814   : > { %3525 = vrot.lane.b32.xlu0 %v3517_v13, %s5127_s7  ;;  %v3163_v13 = vadd.f32 %v11665_v55, %v3143_v50  ;;  %v1483_v56 = vmul.f32 %v11672_v61, %v11671_v4  ;;  %v2047_v50 = vadd.f32 %v11673_v48, %v9237_v53  ;;  %v11674_v42 = vld [vmem:[#allocation121_spill] sm:$0xff]  ;;  %v2343_v17 = vadd.f32 %v11676_v9, %v2322_v19  ;;  %v11677_v1 = vld [vmem:[#allocation126_spill] sm:$0xff]  ;;  %v11678_v37 = vld [vmem:[#allocation195_spill] sm:$0xff] }
 0x815   : > { %v2048_v0 = vadd.f32 %v11674_v42, %v2027_v46  ;;  %v11675_v16 = vld [vmem:[#allocation157_spill] sm:$0xff]  ;;  %v3217_v54 = vsel %vm880_vm15, %v11678_v37, %v11677_v1  ;;  %v11679_v22 = vld [vmem:[#allocation216_spill] sm:$0xff]  ;;  %v11681_v53 = vld [vmem:[#allocation238_spill] sm:$0xff] }
 0x816   : > { %1196 = vrot.lane.b32.xlu1 %v11670_v45, %s5138_s28  ;;  %v3183_v62 = vadd.f32 %v3178_v57, %v3163_v13  ;;  %v2342_v27 = vadd.f32 %v11675_v16, %v2321_v14  ;;  %v3432_v55 = vadd.f32 %v11679_v22, %v3412_v35  ;;  %v11680_v45 = vld [vmem:[#allocation191_spill] sm:$0xff]  ;;  %v4094_v14 = vsel %vm685_vm10, %v9462_v8, %v9491_v23  ;;  %v11683_v36 = vld [vmem:[#allocation313_spill] sm:$0xff]  ;;  %v11686_v13 = vld [vmem:[#allocation174_spill] sm:$0xff] }
 0x817   : > { %v4151_v49 = vpop.permute.xlu1 %4150  ;;  %v4149_v32 = vpop.permute.xlu0 %4148  ;;  %v3202_v4 = vadd.f32 %v11680_v45, %v3182_v26  ;;  %v11682_v48 = vld [vmem:[#allocation227_spill] sm:$0xff]  ;;  %v2639_v19 = vadd.f32 %v11683_v36, %v2618_v30  ;;  %v3218_v57 = vsel %vm880_vm15, %v11677_v1, %v11629_v58  ;;  %v3448_v35 = vsel %vm841_vm14, %v11681_v53, %v11612_v63  ;;  %v11688_v58 = vld [vmem:[#allocation74_spill] sm:$0xff]  ;;  %v11689_v63 = vld [vmem:[#allocation421_spill] sm:$0xff] }
 0x818   : > { %1194 = vrot.lane.b32.xlu0 %v11669_v41, %s5138_s28  ;;  %v2617_v41 = vadd.f32 %v2612_v6, %v2596_v15  ;;  %v3447_v46 = vsel %vm841_vm14, %v11682_v48, %v11681_v53  ;;  %v11684_v21 = vld [vmem:[#allocation279_spill] sm:$0xff]  ;;  %v11685_v15 = vld [vmem:[#allocation284_spill] sm:$0xff]  ;;  %v3203_v6 = vadd.f32 %v11686_v13, %v3183_v62  ;;  %v4099_v9 = vadd.f32 %v4094_v14, %v11688_v58  ;;  %v11692_v62 = vld [vmem:[#allocation18_spill] sm:$0xff] }
 0x819   : > { %v9614_v26 = vsel %vm685_vm10, %v11685_v15, %v11684_v21  ;;  %v3222_v8 = vadd.f32 %v3217_v54, %v3202_v4  ;;  %v11687_v30 = vld [vmem:[#allocation315_spill] sm:$0xff]  ;;  %v3452_v16 = vadd.f32 %v3447_v46, %v3432_v55  ;;  %v2061_v22 = vmul.f32 %v11689_v63, %v2048_v0  ;;  %v11695_v14 = vld [vmem:[#allocation193_spill] sm:$0xff] }
 0x81a   : > { %1489 = vrot.lane.b32.xlu1 %v1483_v56, %s5127_s7  ;;  %v3433_v42 = vadd.f32 %v11687_v30, %v3413_v40  ;;  %v11691_v56 = vld [vmem:[#allocation293_spill] sm:$0xff]  ;;  %v3223_v48 = vadd.f32 %v3218_v57, %v3203_v6  ;;  %v4095_v54 = vsel %vm685_vm10, %v9491_v23, %v9489_v24  ;;  %v2356_v4 = vmul.f32 %v11692_v62, %v2342_v27  ;;  %v11693_v40 = vld [vmem:[#allocation422_spill] sm:$0xff]  ;;  %v11694_v46 = vld [vmem:[#allocation423_spill] sm:$0xff] }
 0x81b   : > { %v4399_v1 = vpop.permute.xlu1 %4398  ;;  %v4153_v37 = vpop.permute.xlu0 %4152  ;;  %v2638_v53 = vadd.f32 %v11691_v56, %v2617_v41  ;;  %v2357_v55 = vmul.f32 %v11693_v40, %v2343_v17  ;;  %v2653_v0 = vmul.f32 %v11694_v46, %v2639_v19  ;;  %v11696_v15 = vld [vmem:[#allocation229_spill] sm:$0xff]  ;;  %v11697_v41 = vld [vmem:[#allocation231_spill] sm:$0xff]  ;;  %v4134_v23 = vsel %vm724_vm11, %v9541_v10, %v9569_v20 }
 0x81c   : > { %1491 = vrot.lane.b32.xlu0 %v1484_v38, %s5127_s7  ;;  %v11690_v38 = vld [vmem:[#allocation15_spill] sm:$0xff]  ;;  %v3453_v36 = vadd.f32 %v3448_v35, %v3433_v42  ;;  %v3487_v57 = vsel %vm880_vm15, %v11697_v41, %v11696_v15  ;;  %v11698_v35 = vld [vmem:[#allocation73_spill] sm:$0xff]  ;;  %v3488_v17 = vsel %vm880_vm15, %v11696_v15, %v11631_v39  ;;  %v4154_v41 = vsel %vm724_vm11, %v4149_v32, %v4151_v49 }
 0x81d   : > { %v2060_v45 = vmul.f32 %v11690_v38, %v2047_v50  ;;  %v3242_v50 = vadd.f32 %v11695_v14, %v3222_v8  ;;  %v4101_v13 = vadd.f32 %v9489_v24, %v11698_v35  ;;  %v11699_v27 = vld [vmem:[#allocation213_spill] sm:$0xff]  ;;  %v11700_v19 = vld [vmem:[#allocation75_spill] sm:$0xff]  ;;  %v11701_v8 = vld [vmem:[#allocation222_spill] sm:$0xff]  ;;  %v4135_v32 = vsel %vm724_vm11, %v9569_v20, %v9571_v33 }
 0x81e   : > { %v3472_v6 = vadd.f32 %v11699_v27, %v3452_v16  ;;  %v4100_v30 = vadd.f32 %v4095_v54, %v11700_v19  ;;  %v4119_v42 = vadd.f32 %v11701_v8, %v4099_v9  ;;  %v11703_v14 = vld [vmem:[#allocation218_spill] sm:$0xff]  ;;  %v11704_v35 = vld [vmem:[#allocation19_spill] sm:$0xff]  ;;  %v4364_v16 = vsel %vm685_vm10, %v9516_v34, %v9518_v18 }
 0x81f   : > { %2066 = vrot.lane.b32.xlu1 %v2060_v45, %s5139_s10  ;;  %v4403_v58 = vpop.permute.xlu1 %4402  ;;  %v11702_v45 = vld [vmem:[#allocation178_spill] sm:$0xff]  ;;  %v3473_v24 = vadd.f32 %v11703_v14, %v3453_v36  ;;  %v2652_v10 = vmul.f32 %v11704_v35, %v2638_v53  ;;  %v11706_v53 = vld [vmem:[#allocation12_spill] sm:$0xff]  ;;  %v11712_v14 = vld [vmem:[#allocation215_spill] sm:$0xff] }
 0x820   : > { %2068 = vrot.lane.b32.xlu0 %v2061_v22, %s5139_s10  ;;  %v4401_v22 = vpop.permute.xlu0 %4400  ;;  %v3243_v56 = vadd.f32 %v11702_v45, %v3223_v48  ;;  %v3492_v46 = vadd.f32 %v3487_v57, %v3472_v6  ;;  %v4139_v39 = vadd.f32 %v4134_v23, %v4119_v42  ;;  %v4365_v48 = vsel %vm685_vm10, %v9518_v18, %v9539_v28  ;;  %v11705_v36 = vld [vmem:[#allocation282_spill] sm:$0xff]  ;;  %v11707_v57 = vld [vmem:[#allocation80_spill] sm:$0xff]  ;;  %v11710_v42 = vld [vmem:[#allocation79_spill] sm:$0xff] }
 0x821   : > { %v3493_v9 = vadd.f32 %v3488_v17, %v3473_v24  ;;  %v4121_v54 = vadd.f32 %v11705_v36, %v4101_v13  ;;  %v3245_v15 = vmul.f32 %v3242_v50, %v11706_v53  ;;  %v4371_v34 = vadd.f32 %v9539_v28, %v11707_v57  ;;  %v11708_v23 = vld [vmem:[#allocation224_spill] sm:$0xff]  ;;  %v11709_v17 = vld [vmem:[#allocation78_spill] sm:$0xff] }
 0x822   : > { %v4159_v27 = vadd.f32 %v4154_v41, %v4139_v39  ;;  %v4369_v19 = vadd.f32 %v4364_v16, %v11709_v17  ;;  %v4155_v13 = vsel %vm724_vm11, %v4151_v49, %v4153_v37  ;;  %v4370_v20 = vadd.f32 %v4365_v48, %v11710_v42  ;;  %v11711_v28 = vld [vmem:[#allocation220_spill] sm:$0xff]  ;;  %v11713_v16 = vld [vmem:[#allocation417_spill] sm:$0xff] }
 0x823   : > { %2364 = vrot.lane.b32.xlu1 %v2357_v55, %s5140_s17  ;;  %v4171_v55 = vpop.permute.xlu1 %4170  ;;  %v4141_v18 = vadd.f32 %v9571_v33, %v4121_v54  ;;  %v3513_v24 = vadd.f32 %v11712_v14, %v3493_v9  ;;  %v3246_v39 = vmul.f32 %v3243_v56, %v11713_v16  ;;  %v3824_v33 = vsel %vm685_vm10, %v9235_v12, %v9349_v59  ;;  %v11714_v54 = vld [vmem:[#allocation321_spill] sm:$0xff]  ;;  %v11720_v42 = vld [vmem:[#allocation92_spill] sm:$0xff] }
 0x824   : > { %2362 = vrot.lane.b32.xlu0 %v2356_v4, %s5140_s17  ;;  %v4120_v4 = vadd.f32 %v11708_v23, %v4100_v30  ;;  %v4169_v6 = vpop.permute.xlu0 %4168  ;;  %v3512_v30 = vadd.f32 %v11711_v28, %v3492_v46  ;;  %v3825_v49 = vsel %vm685_vm10, %v9349_v59, %v9268_v44  ;;  %v4404_v46 = vsel %vm724_vm11, %v4399_v1, %v4401_v22  ;;  %v11715_v1 = vld [vmem:[#allocation71_spill] sm:$0xff] }
 0x825   : > { %v4174_v8 = vsel %vm763_vm12, %v4169_v6, %v4171_v55  ;;  %v4161_v41 = vadd.f32 %v4153_v37, %v4141_v18  ;;  %v4405_v9 = vsel %vm724_vm11, %v4401_v22, %v4403_v58  ;;  %v4390_v12 = vadd.f32 %v9614_v26, %v4370_v20  ;;  %v11716_v22 = vld [vmem:[#allocation72_spill] sm:$0xff]  ;;  %v11721_v20 = vld [vmem:[#allocation37_spill] sm:$0xff]  ;;  %v11722_v28 = vld [vmem:[#allocation67_spill] sm:$0xff] }
 0x826   : > { %v4140_v45 = vadd.f32 %v4135_v32, %v4120_v4  ;;  %v4179_v50 = vadd.f32 %v4174_v8, %v4159_v27  ;;  %v4389_v32 = vadd.f32 %v11714_v54, %v4369_v19  ;;  %v3515_v59 = vmul.f32 %v3512_v30, %v11672_v61  ;;  %v11718_v61 = vld [vmem:[#allocation259_spill] sm:$0xff] }
 0x827   : > { %2658 = vrot.lane.b32.xlu1 %v2652_v10, %s5141_s15  ;;  %v4419_v36 = vpop.permute.xlu1 %4418  ;;  %v3516_v57 = vmul.f32 %v3513_v24, %v11667_v43  ;;  %v3830_v23 = vadd.f32 %v3825_v49, %v11716_v22  ;;  %v4410_v27 = vadd.f32 %v4405_v9, %v4390_v12  ;;  %v11717_v43 = vld [vmem:[#allocation272_spill] sm:$0xff]  ;;  %v3831_v30 = vadd.f32 %v9268_v44, %v11722_v28  ;;  %v11725_v44 = vld [vmem:[#allocation38_spill] sm:$0xff] }
 0x828   : > { %2660 = vrot.lane.b32.xlu0 %v2653_v0, %s5141_s15  ;;  %v4160_v48 = vadd.f32 %v4155_v13, %v4140_v45  ;;  %v4391_v0 = vadd.f32 %v11684_v21, %v4371_v34  ;;  %v4173_v10 = vpop.permute.xlu0 %4172  ;;  %v3829_v34 = vadd.f32 %v3824_v33, %v11715_v1  ;;  %v4409_v4 = vadd.f32 %v4404_v46, %v4389_v32  ;;  %v11719_v13 = vld [vmem:[#allocation261_spill] sm:$0xff]  ;;  %v11724_v33 = vld [vmem:[#allocation59_spill] sm:$0xff]  ;;  %v11726_v12 = vld [vmem:[#allocation58_spill] sm:$0xff] }
 0x829   : > { %v4175_v37 = vsel %vm763_vm12, %v4171_v55, %v4173_v10  ;;  %v4181_v56 = vadd.f32 %v4173_v10, %v4161_v41  ;;  %v3845_v8 = vsel %vm685_vm10, %v11717_v43, %v11719_v13  ;;  %v4262_v45 = vmul.f32 %v11721_v20, %v11720_v42  ;;  %v11727_v1 = vld [vmem:[#allocation274_spill] sm:$0xff] }
 0x82a   : > { %v4180_v53 = vadd.f32 %v4175_v37, %v4160_v48  ;;  %v4411_v21 = vadd.f32 %v4403_v58, %v4391_v0  ;;  %v3844_v58 = vsel %vm685_vm10, %v11718_v61, %v11717_v43  ;;  %v3850_v24 = vadd.f32 %v3845_v8, %v3830_v23  ;;  %v11729_v23 = vld [vmem:[#allocation265_spill] sm:$0xff]  ;;  %v11732_v43 = vld [vmem:[#allocation40_spill] sm:$0xff] }
 0x82b   : > { %3251 = vrot.lane.b32.xlu1 %v3245_v15, %s5138_s28  ;;  %v4423_v55 = vpop.permute.xlu1 %4422  ;;  %v3849_v14 = vadd.f32 %v3844_v58, %v3829_v34  ;;  %v3864_v48 = vsel %vm724_vm11, %v9298_v47, %v9380_v52  ;;  %v3865_v0 = vsel %vm724_vm11, %v9380_v52, %v9325_v5  ;;  %v4263_v46 = vmul.f32 %v11725_v44, %v11720_v42  ;;  %v11728_v34 = vld [vmem:[#allocation263_spill] sm:$0xff] }
 0x82c   : > { %3253 = vrot.lane.b32.xlu0 %v3246_v39, %s5138_s28  ;;  %v4421_v6 = vpop.permute.xlu0 %4420  ;;  %v4431_v17 = vadd.f32 %v4423_v55, %v4411_v21  ;;  %v11723_v39 = vld [vmem:[#allocation304_spill] sm:$0xff]  ;;  %v3851_v9 = vadd.f32 %v11719_v13, %v3831_v30  ;;  %v3870_v54 = vadd.f32 %v3865_v0, %v3850_v24  ;;  %v3884_v22 = vsel %vm724_vm11, %v11728_v34, %v11727_v1  ;;  %s5046_s28 = scalar_lea.vmem %s10167_s14, 1024 }
 0x82d   : > { %v4424_v26 = vsel %vm724_vm11, %v4419_v36, %v4421_v6  ;;  %v4425_v19 = vsel %vm724_vm11, %v4421_v6, %v4423_v55  ;;  %v4014_v49 = vmul.f32 %v11724_v33, %v11723_v39  ;;  %v3869_v37 = vadd.f32 %v3864_v48, %v3849_v14  ;;  %v11731_v55 = vld [vmem:[#allocation39_spill] sm:$0xff]  ;;  %p5047_p12 = scmp.ne.s32.totalorder %s10167_s14, %s5046_s28 }
 0x82e   : > { %v4429_v18 = vadd.f32 %v4424_v26, %v4409_v4  ;;  %v4430_v15 = vadd.f32 %v4425_v19, %v4410_v27  ;;  %v3885_v4 = vsel %vm724_vm11, %v11727_v1, %v11729_v23  ;;  %v11730_v27 = vld [vmem:[#allocation341_spill] sm:$0xff]  ;;  %v3905_v58 = vsel %vm763_vm12, %v9407_v25, %v9382_v2  ;;  %v11735_v48 = vld [vmem:[#allocation267_spill] sm:$0xff] }
 0x82f   : > { %3523 = vrot.lane.b32.xlu1 %v3516_v57, %s5127_s7  ;;  %v4191_v41 = vpop.permute.xlu1 %4190  ;;  %v4512_v6 = vmul.f32 %v11731_v55, %v11730_v27  ;;  %v3889_v26 = vadd.f32 %v3884_v22, %v3869_v37  ;;  %v4513_v61 = vmul.f32 %v11732_v43, %v11730_v27  ;;  %p5048_p2 = pnand %p5047_p12, %p11836_p0 }
 0x830   : > { %3521 = vrot.lane.b32.xlu0 %v3515_v59, %s5127_s7  ;;  %v4189_v16 = vpop.permute.xlu0 %4188  ;;  %v4264_v59 = vmul.f32 %v11726_v12, %v11720_v42 }
 0x831   : > { %v4194_v36 = vsel %vm763_vm12, %v4189_v16, %v4191_v41  ;;  %v11733_v16 = vld [vmem:[#allocation66_spill] sm:$0xff]  ;;  %p5049_p7 = pneg %p5048_p2 }
 0x832   : > { %v4199_v10 = vadd.f32 %v4194_v36, %v4179_v50  ;;  %v3871_v50 = vadd.f32 %v9325_v5, %v3851_v9  ;;  %v3904_v5 = vsel %vm763_vm12, %v9351_v60, %v9407_v25  ;;  %v4514_v60 = vmul.f32 %v11724_v33, %v11730_v27  ;;  %v11736_v36 = vld [vmem:[#allocation269_spill] sm:$0xff] }
 0x833   : > { %4022 = vrot.lane.b32.xlu1 %v4014_v49, %s5136_s8  ;;  %v4439_v32 = vpop.permute.xlu1 %4438  ;;  %v3909_v24 = vadd.f32 %v3904_v5, %v3889_v26  ;;  %v4032_v39 = vmul.f32 %v11721_v20, %v11733_v16  ;;  %v11737_v26 = vld [vmem:[#allocation322_spill] sm:$0xff] }
 0x834   : > { %4268 = vrot.lane.b32.xlu0 %v4262_v45, %s5135_s13  ;;  %v4193_v47 = vpop.permute.xlu0 %4192  ;;  %v3891_v45 = vadd.f32 %v11729_v23, %v3871_v50 }
 0x835   : > { %v4195_v52 = vsel %vm763_vm12, %v4191_v41, %v4193_v47  ;;  %v4201_v21 = vadd.f32 %v4193_v47, %v4181_v56  ;;  %v3890_v56 = vadd.f32 %v3885_v4, %v3870_v54  ;;  %v4034_v47 = vmul.f32 %v11726_v12, %v11733_v16 }
 0x836   : > { %v4200_v57 = vadd.f32 %v4195_v52, %v4180_v53  ;;  %v3911_v14 = vadd.f32 %v9382_v2, %v3891_v45  ;;  %v3945_v52 = vsel %vm802_vm13, %v9432_v31, %v9434_v51 }
 0x837   : > { %4270 = vrot.lane.b32.xlu1 %v4263_v46, %s5135_s13  ;;  %v4443_v53 = vpop.permute.xlu1 %4442  ;;  %v3910_v25 = vadd.f32 %v3905_v58, %v3890_v56  ;;  %v4033_v46 = vmul.f32 %v11725_v44, %v11733_v16  ;;  %v11740_v58 = vld [vmem:[#allocation273_spill] sm:$0xff] }
 0x838   : > { %4272 = vrot.lane.b32.xlu0 %v4264_v59, %s5135_s13  ;;  %v4441_v19 = vpop.permute.xlu0 %4440  ;;  %v4451_v13 = vadd.f32 %v4443_v53, %v4431_v17  ;;  %v3931_v54 = vadd.f32 %v11736_v36, %v3911_v14  ;;  %v3944_v59 = vsel %vm802_vm13, %v9409_v11, %v9432_v31  ;;  %v4282_v11 = vmul.f32 %v11731_v55, %v11737_v26 }
 0x839   : > { %v4444_v8 = vsel %vm763_vm12, %v4439_v32, %v4441_v19  ;;  %v4445_v42 = vsel %vm763_vm12, %v4441_v19, %v4443_v53  ;;  %v4283_v31 = vmul.f32 %v11732_v43, %v11737_v26  ;;  %v11739_v19 = vld [vmem:[#allocation271_spill] sm:$0xff] }
 0x83a   : > { %v4449_v28 = vadd.f32 %v4444_v8, %v4429_v18  ;;  %v4450_v30 = vadd.f32 %v4445_v42, %v4430_v15  ;;  %v11734_v15 = vld [vmem:[#allocation276_spill] sm:$0xff]  ;;  %v3951_v22 = vadd.f32 %v9434_v51, %v3931_v54  ;;  %v11738_v51 = vld [vmem:[#allocation278_spill] sm:$0xff] }
 0x83b   : > { %4518 = vrot.lane.b32.xlu1 %v4512_v6, %s5135_s13  ;;  %v4211_v17 = vpop.permute.xlu1 %4210  ;;  %v3924_v0 = vsel %vm763_vm12, %v11735_v48, %v11734_v15  ;;  %v3925_v2 = vsel %vm763_vm12, %v11734_v15, %v11736_v36  ;;  %v3965_v8 = vsel %vm802_vm13, %v11738_v51, %v11740_v58 }
 0x83c   : > { %4520 = vrot.lane.b32.xlu0 %v4513_v61, %s5135_s13  ;;  %v4209_v41 = vpop.permute.xlu0 %4208  ;;  %v3929_v9 = vadd.f32 %v3924_v0, %v3909_v24  ;;  %v3930_v37 = vadd.f32 %v3925_v2, %v3910_v25  ;;  %v3964_v61 = vsel %vm802_vm13, %v11739_v19, %v11738_v51 }
 0x83d   : > { %v4214_v49 = vsel %vm802_vm13, %v4209_v41, %v4211_v17 }
 0x83e   : > { %v4219_v18 = vadd.f32 %v4214_v49, %v4199_v10  ;;  %v3949_v23 = vadd.f32 %v3944_v59, %v3929_v9  ;;  %v3950_v4 = vadd.f32 %v3945_v52, %v3930_v37  ;;  %v11742_v9 = vld [vmem:[#allocation95_spill] sm:$0xff] }
 0x83f   : > { %4522 = vrot.lane.b32.xlu1 %v4514_v60, %s5135_s13  ;;  %v4459_v10 = vpop.permute.xlu1 %4458  ;;  %v4302_v37 = vmul.f32 %v11721_v20, %v11742_v9  ;;  %v4303_v54 = vmul.f32 %v11725_v44, %v11742_v9  ;;  %v4304_v52 = vmul.f32 %v11726_v12, %v11742_v9 }
 0x840   : > { %4038 = vrot.lane.b32.xlu0 %v4032_v39, %s5136_s8  ;;  %v4213_v32 = vpop.permute.xlu0 %4212  ;;  %v3969_v45 = vadd.f32 %v3964_v61, %v3949_v23  ;;  %v3970_v60 = vadd.f32 %v3965_v8, %v3950_v4  ;;  %v11746_v61 = vld [vmem:[#allocation41_spill] sm:$0xff] }
 0x841   : > { %v4215_v50 = vsel %vm802_vm13, %v4211_v17, %v4213_v32  ;;  %v4221_v1 = vadd.f32 %v4213_v32, %v4201_v21  ;;  %v11747_v8 = vld [vmem:[#allocation221_spill] sm:$0xff] }
 0x842   : > { %v4220_v34 = vadd.f32 %v4215_v50, %v4200_v57  ;;  %v11743_v50 = vld [vmem:[#allocation346_spill] sm:$0xff] }
 0x843   : > { %4040 = vrot.lane.b32.xlu1 %v4033_v46, %s5136_s8  ;;  %v4463_v27 = vpop.permute.xlu1 %4462 }
 0x844   : > { %4042 = vrot.lane.b32.xlu0 %v4034_v47, %s5136_s8  ;;  %v4461_v6 = vpop.permute.xlu0 %4460  ;;  %v4471_v56 = vadd.f32 %v4463_v27, %v4451_v13  ;;  %v3971_v13 = vadd.f32 %v11740_v58, %v3951_v22  ;;  %v4552_v22 = vmul.f32 %v11731_v55, %v11743_v50 }
 0x845   : > { %v4464_v21 = vsel %vm763_vm12, %v4459_v10, %v4461_v6  ;;  %v4465_v57 = vsel %vm763_vm12, %v4461_v6, %v4463_v27 }
 0x846   : > { %v4469_v5 = vadd.f32 %v4464_v21, %v4449_v28  ;;  %v4470_v53 = vadd.f32 %v4465_v57, %v4450_v30  ;;  %v4284_v28 = vmul.f32 %v11724_v33, %v11737_v26  ;;  %v11741_v30 = vld [vmem:[#allocation117_spill] sm:$0xff] }
 0x847   : > { %4288 = vrot.lane.b32.xlu1 %v4282_v11, %s5136_s8  ;;  %v3983_v42 = vpop.permute.xlu1 %3982  ;;  %v4532_v24 = vmul.f32 %v11721_v20, %v11741_v30  ;;  %v4533_v48 = vmul.f32 %v11725_v44, %v11741_v30  ;;  %v4534_v0 = vmul.f32 %v11726_v12, %v11741_v30  ;;  %v4553_v11 = vmul.f32 %v11732_v43, %v11743_v50  ;;  %v11752_v30 = vld [vmem:[#allocation29_spill] sm:$0xff] }
 0x848   : > { %4290 = vrot.lane.b32.xlu0 %v4283_v31, %s5136_s8  ;;  %v3981_v14 = vpop.permute.xlu0 %3980  ;;  %v3991_v25 = vadd.f32 %v3983_v42, %v3971_v13  ;;  %v4554_v31 = vmul.f32 %v11724_v33, %v11743_v50  ;;  %v11745_v33 = vld [vmem:[#allocation226_spill] sm:$0xff]  ;;  %v664_v13 = vmul.f32 %v11746_v61, %v11747_v8  ;;  %v11756_v50 = vld [vmem:[#allocation33_spill] sm:$0xff] }
 0x849   : > { %v3984_v17 = vsel %vm841_vm14, %v9464_v3, %v3981_v14  ;;  %v3985_v41 = vsel %vm841_vm14, %v3981_v14, %v3983_v42  ;;  %v663_v58 = vmul.f32 %v11746_v61, %v11745_v33  ;;  %v11751_v14 = vld [vmem:[#allocation286_spill] sm:$0xff] }
 0x84a   : > { %v3989_v16 = vadd.f32 %v3984_v17, %v3969_v45  ;;  %v3990_v39 = vadd.f32 %v3985_v41, %v3970_v60  ;;  %v11749_v45 = vld [vmem:[#allocation42_spill] sm:$0xff] }
 0x84b   : > { %4292 = vrot.lane.b32.xlu1 %v4284_v28, %s5136_s8  ;;  %v4231_v49 = vpop.permute.xlu1 %4230  ;;  %v11763_v8 = vld [vmem:[#allocation34_spill] sm:$0xff] }
 0x84c   : > { %4538 = vrot.lane.b32.xlu0 %v4532_v24, %s5135_s13  ;;  %v4229_v15 = vpop.permute.xlu0 %4228  ;;  %v669_v24 = vmul.f32 %v11749_v45, %v11752_v30 }
 0x84d   : > { %v4234_v36 = vsel %vm802_vm13, %v4229_v15, %v4231_v49 }
 0x84e   : > { %v4239_v2 = vadd.f32 %v4234_v36, %v4219_v18  ;;  %v671_v36 = vadd.f32 %v669_v24, %v664_v13  ;;  %v11764_v13 = vld [vmem:[#allocation35_spill] sm:$0xff] }
 0x84f   : > { %4540 = vrot.lane.b32.xlu1 %v4533_v48, %s5135_s13  ;;  %v4479_v3 = vpop.permute.xlu1 %4478  ;;  %v11767_v24 = vld [vmem:[#allocation43_spill] sm:$0xff] }
 0x850   : > { %4542 = vrot.lane.b32.xlu0 %v4534_v0, %s5135_s13  ;;  %v4233_v46 = vpop.permute.xlu0 %4232 }
 0x851   : > { %v4235_v10 = vsel %vm802_vm13, %v4231_v49, %v4233_v46  ;;  %v4241_v32 = vadd.f32 %v4233_v46, %v4221_v1 }
 0x852   : > { %v4240_v47 = vadd.f32 %v4235_v10, %v4220_v34 }
 0x853   : > { %4308 = vrot.lane.b32.xlu1 %v4302_v37, %s5136_s8 }
 0x854   : > { %4310 = vrot.lane.b32.xlu0 %v4303_v54, %s5136_s8  ;;  %v4483_v18 = vpop.permute.xlu1 %4482 }
 0x855   : > { %v4491_v23 = vadd.f32 %v4483_v18, %v4471_v56 }
 0x856   : > { %v4481_v59 = vpop.permute.xlu0 %4480 }
 0x857   : > { %v4484_v4 = vsel %vm802_vm13, %v4479_v3, %v4481_v59  ;;  %v4485_v27 = vsel %vm802_vm13, %v4481_v59, %v4483_v18  ;;  %4312 = vrot.lane.b32.xlu1 %v4304_v52, %s5136_s8  ;;  %v11754_v18 = vld [vmem:[#allocation32_spill] sm:$0xff]  ;;  %v11755_v59 = vld [vmem:[#allocation31_spill] sm:$0xff] }
 0x858   : > { %v4489_v6 = vadd.f32 %v4484_v4, %v4469_v5  ;;  %v4490_v1 = vadd.f32 %v4485_v27, %v4470_v53  ;;  %4558 = vrot.lane.b32.xlu0 %v4552_v22, %s5136_s8  ;;  %v4001_v34 = vpop.permute.xlu1 %4000  ;;  %v11744_v5 = vld [vmem:[#allocation122_spill] sm:$0xff]  ;;  %v705_v52 = vsel %vm685_vm10, %v11755_v59, %v11754_v18  ;;  %v11759_v27 = vld [vmem:[#allocation292_spill] sm:$0xff] }
 0x859   : > { %v4572_v53 = vmul.f32 %v11721_v20, %v11744_v5  ;;  %v4573_v51 = vmul.f32 %v11725_v44, %v11744_v5  ;;  %v11748_v20 = vld [vmem:[#allocation30_spill] sm:$0xff]  ;;  %v11750_v44 = vld [vmem:[#allocation281_spill] sm:$0xff]  ;;  %v4574_v41 = vmul.f32 %v11726_v12, %v11744_v5 }
 0x85a   : > { %v3999_v26 = vpop.permute.xlu0 %3998  ;;  %v668_v60 = vmul.f32 %v11749_v45, %v11748_v20  ;;  %v686_v28 = vsel %vm685_vm10, %v11751_v14, %v11750_v44  ;;  %v11758_v22 = vld [vmem:[#allocation290_spill] sm:$0xff]  ;;  %v11762_v5 = vld [vmem:[#allocation409_spill] sm:$0xff]  ;;  %v744_v20 = vsel %vm724_vm11, %v11764_v13, %v11763_v8 }
 0x85b   : > { %v4004_v55 = vsel %vm841_vm14, %v3999_v26, %v4001_v34  ;;  %4560 = vrot.lane.b32.xlu1 %v4553_v11, %s5136_s8  ;;  %v11765_v45 = vld [vmem:[#allocation45_spill] sm:$0xff] }
 0x85c   : > { %v4009_v56 = vadd.f32 %v4004_v55, %v3989_v16  ;;  %4562 = vrot.lane.b32.xlu0 %v4554_v31, %s5136_s8  ;;  %v4249_v21 = vpop.permute.xlu1 %4248  ;;  %v11753_v16 = vld [vmem:[#allocation288_spill] sm:$0xff]  ;;  %v670_v0 = vadd.f32 %v668_v60, %v663_v58  ;;  %v11760_v55 = vld [vmem:[#allocation430_spill] sm:$0xff] }
 0x85e   : > { %v4003_v57 = vpop.permute.xlu0 %4002  ;;  %v690_v9 = vadd.f32 %v686_v28, %v670_v0 }
 0x85f   : > { %v4005_v43 = vsel %vm841_vm14, %v4001_v34, %v4003_v57  ;;  %v9835_v19 = vadd.f32 %v4003_v57, %v3991_v25  ;;  %4578 = vrot.lane.b32.xlu1 %v4572_v53, %s5136_s8  ;;  %v2786_v53 = vsel %vm685_vm10, %v11760_v55, %v11762_v5  ;;  %v11782_v5 = vld [vmem:[#allocation301_spill] sm:$0xff] }
 0x860   : > { %v9841_v42 = vadd.f32 %v4005_v43, %v3990_v39  ;;  %4580 = vrot.lane.b32.xlu0 %v4573_v51, %s5136_s8  ;;  %v4253_v25 = vpop.permute.xlu1 %4252  ;;  %v687_v39 = vsel %vm685_vm10, %v11750_v44, %v11753_v16  ;;  %v709_v26 = vadd.f32 %v705_v52, %v690_v9  ;;  %v11766_v44 = vld [vmem:[#allocation46_spill] sm:$0xff] }
 0x861   : > { %v9857_v49 = vadd.f32 %v4253_v25, %v4241_v32  ;;  %v691_v12 = vadd.f32 %v687_v39, %v671_v36  ;;  %v2790_v14 = vadd.f32 %v2786_v53, %v11766_v44  ;;  %v11771_v36 = vld [vmem:[#allocation197_spill] sm:$0xff]  ;;  %v11772_v9 = vld [vmem:[#allocation186_spill] sm:$0xff] }
 0x862   : > { %v4251_v17 = vpop.permute.xlu0 %4250 }
 0x863   : > { %v4254_v15 = vsel %vm841_vm14, %v4249_v21, %v4251_v17  ;;  %v4255_v48 = vsel %vm841_vm14, %v4251_v17, %v4253_v25  ;;  %4582 = vrot.lane.b32.xlu1 %v4574_v41, %s5136_s8  ;;  %v11761_v21 = vld [vmem:[#allocation407_spill] sm:$0xff]  ;;  %v11768_v25 = vld [vmem:[#allocation285_spill] sm:$0xff]  ;;  %v11769_v17 = vld [vmem:[#allocation294_spill] sm:$0xff] }
 0x864   : > { %v9861_v3 = vadd.f32 %v4254_v15, %v4239_v2  ;;  %v9863_v46 = vadd.f32 %v4255_v48, %v4240_v47  ;;  %v4501_v37 = vpop.permute.xlu1 %4500  ;;  %v706_v2 = vsel %vm685_vm10, %v11754_v18, %v11756_v50  ;;  %v11757_v47 = vld [vmem:[#allocation283_spill] sm:$0xff]  ;;  %v2785_v57 = vsel %vm685_vm10, %v11761_v21, %v11760_v55  ;;  %v11770_v41 = vld [vmem:[#allocation296_spill] sm:$0xff]  ;;  %v11781_v21 = vld [vmem:[#allocation298_spill] sm:$0xff] }
 0x865   : > { %v725_v4 = vsel %vm724_vm11, %v11758_v22, %v11757_v47  ;;  %v726_v34 = vsel %vm724_vm11, %v11757_v47, %v11759_v27  ;;  %v710_v11 = vadd.f32 %v706_v2, %v691_v12  ;;  %v2789_v60 = vadd.f32 %v2785_v57, %v11765_v45  ;;  %v11774_v47 = vld [vmem:[#allocation433_spill] sm:$0xff]  ;;  %v11775_v22 = vld [vmem:[#allocation411_spill] sm:$0xff]  ;;  %v11783_v45 = vld [vmem:[#allocation44_spill] sm:$0xff] }
 0x866   : > { %v4499_v54 = vpop.permute.xlu0 %4498  ;;  %v729_v33 = vadd.f32 %v725_v4, %v709_v26  ;;  %v765_v16 = vsel %vm763_vm12, %v11768_v25, %v11770_v41  ;;  %v2803_v12 = vsel %vm685_vm10, %v11772_v9, %v11771_v36  ;;  %v11776_v4 = vld [vmem:[#allocation413_spill] sm:$0xff]  ;;  %v11778_v26 = vld [vmem:[#allocation47_spill] sm:$0xff]  ;;  %v11791_v9 = vld [vmem:[#allocation306_spill] sm:$0xff] }
 0x867   : > { %v4504_v10 = vsel %vm802_vm13, %v4499_v54, %v4501_v37  ;;  %v730_v61 = vadd.f32 %v726_v34, %v710_v11  ;;  %v2807_v59 = vadd.f32 %v2803_v12, %v2789_v60  ;;  %v2822_v27 = vsel %vm724_vm11, %v11774_v47, %v11776_v4  ;;  %v11777_v34 = vld [vmem:[#allocation36_spill] sm:$0xff]  ;;  %v11780_v55 = vld [vmem:[#allocation287_spill] sm:$0xff] }
 0x868   : > { %v9867_v32 = vadd.f32 %v4504_v10, %v4489_v6  ;;  %v4019_v6 = vpop.permute.xlu1 %4018  ;;  %v748_v15 = vadd.f32 %v744_v20, %v729_v33  ;;  %v783_v11 = vsel %vm763_vm12, %v11778_v26, %v11777_v34  ;;  %v803_v57 = vsel %vm802_vm13, %v11781_v21, %v11780_v55  ;;  %v11784_v60 = vld [vmem:[#allocation51_spill] sm:$0xff] }
 0x869   : > { %v804_v53 = vsel %vm802_vm13, %v11780_v55, %v11782_v5  ;;  %v822_v44 = vsel %vm802_vm13, %v11784_v60, %v11783_v45  ;;  %v11795_v5 = vld [vmem:[#allocation48_spill] sm:$0xff] }
 0x86a   : > { %v4503_v31 = vpop.permute.xlu0 %4502 }
 0x86b   : > { %v4505_v51 = vsel %vm802_vm13, %v4501_v37, %v4503_v31  ;;  %v9888_v43 = vadd.f32 %v4503_v31, %v4491_v23  ;;  %v745_v23 = vsel %vm724_vm11, %v11763_v8, %v11767_v24  ;;  %v11773_v37 = vld [vmem:[#allocation188_spill] sm:$0xff] }
 0x86c   : > { %v9890_v58 = vadd.f32 %v4505_v51, %v4490_v1  ;;  %v3793_v28 = vpop.permute.xlu1 %3792  ;;  %v764_v1 = vsel %vm763_vm12, %v11769_v17, %v11768_v25  ;;  %v749_v48 = vadd.f32 %v745_v23, %v730_v61  ;;  %v2804_v54 = vsel %vm685_vm10, %v11771_v36, %v11773_v37  ;;  %v11785_v23 = vld [vmem:[#allocation53_spill] sm:$0xff]  ;;  %v11786_v17 = vld [vmem:[#allocation199_spill] sm:$0xff] }
 0x86d   : > { %v768_v10 = vadd.f32 %v764_v1, %v748_v15  ;;  %v2808_v52 = vadd.f32 %v2804_v54, %v2790_v14  ;;  %v823_v25 = vsel %vm802_vm13, %v11783_v45, %v11785_v23  ;;  %v11787_v1 = vld [vmem:[#allocation190_spill] sm:$0xff]  ;;  %v11789_v15 = vld [vmem:[#allocation289_spill] sm:$0xff]  ;;  %v11800_v45 = vld [vmem:[#allocation196_spill] sm:$0xff] }
 0x86e   : > { %v9897_v30 = vpop.permute.xlu0 %4020  ;;  %v769_v18 = vadd.f32 %v765_v16, %v749_v48  ;;  %v2839_v41 = vsel %vm724_vm11, %v11787_v1, %v11786_v17  ;;  %v11788_v16 = vld [vmem:[#allocation192_spill] sm:$0xff]  ;;  %v11790_v48 = vld [vmem:[#allocation303_spill] sm:$0xff]  ;;  %v843_v12 = vsel %vm841_vm14, %v11789_v15, %v11791_v9  ;;  %v11803_v23 = vld [vmem:[#allocation310_spill] sm:$0xff] }
 0x86f   : > { %v4024_v39 = vsel %vm880_vm15, %v4019_v6, %v9897_v30  ;;  %v11779_v6 = vld [vmem:[#allocation49_spill] sm:$0xff]  ;;  %v787_v51 = vadd.f32 %v783_v11, %v768_v10  ;;  %v2826_v8 = vadd.f32 %v2822_v27, %v2808_v52  ;;  %v842_v36 = vsel %vm841_vm14, %v11790_v48, %v11789_v15  ;;  %v11793_v52 = vld [vmem:[#allocation415_spill] sm:$0xff]  ;;  %v11804_v48 = vld [vmem:[#allocation444_spill] sm:$0xff] }
 0x870   : > { %v9910_v0 = vadd.f32 %v4024_v39, %v4009_v56  ;;  %v9918_v50 = vpop.permute.xlu1 %1773  ;;  %v2821_v56 = vsel %vm724_vm11, %v11775_v22, %v11774_v47  ;;  %v784_v31 = vsel %vm763_vm12, %v11777_v34, %v11779_v6  ;;  %v2840_v39 = vsel %vm724_vm11, %v11786_v17, %v11788_v16  ;;  %v11794_v22 = vld [vmem:[#allocation419_spill] sm:$0xff] }
 0x871   : > { %v788_v33 = vadd.f32 %v784_v31, %v769_v18  ;;  %v2825_v61 = vadd.f32 %v2821_v56, %v2807_v59  ;;  %v807_v14 = vadd.f32 %v803_v57, %v787_v51  ;;  %v2844_v54 = vadd.f32 %v2840_v39, %v2826_v8  ;;  %v11792_v59 = vld [vmem:[#allocation440_spill] sm:$0xff]  ;;  %v11798_v8 = vld [vmem:[#allocation201_spill] sm:$0xff] }
 0x872   : > { %v9920_v2 = vpop.permute.xlu0 %1775  ;;  %v2857_v47 = vsel %vm763_vm12, %v11793_v52, %v11792_v59  ;;  %v2858_v56 = vsel %vm763_vm12, %v11792_v59, %v11794_v22  ;;  %v2876_v60 = vsel %vm763_vm12, %v11798_v8, %v11800_v45 }
 0x873   : > { %v808_v24 = vadd.f32 %v804_v53, %v788_v33  ;;  %v2843_v37 = vadd.f32 %v2839_v41, %v2825_v61  ;;  %v826_v34 = vadd.f32 %v822_v44, %v807_v14  ;;  %v2862_v55 = vadd.f32 %v2858_v56, %v2844_v54  ;;  %v11796_v53 = vld [vmem:[#allocation55_spill] sm:$0xff]  ;;  %v11797_v33 = vld [vmem:[#allocation60_spill] sm:$0xff]  ;;  %v11807_v56 = vld [vmem:[#allocation50_spill] sm:$0xff] }
 0x874   : > { %v3789_v13 = vpop.permute.xlu1 %3788  ;;  %v861_v51 = vsel %vm841_vm14, %v11796_v53, %v11795_v5  ;;  %v862_v61 = vsel %vm841_vm14, %v11795_v5, %v11797_v33  ;;  %v11801_v44 = vld [vmem:[#allocation291_spill] sm:$0xff]  ;;  %v11802_v14 = vld [vmem:[#allocation308_spill] sm:$0xff]  ;;  %v11811_v53 = vld [vmem:[#allocation198_spill] sm:$0xff] }
 0x875   : > { %v827_v26 = vadd.f32 %v823_v25, %v808_v24  ;;  %v846_v11 = vadd.f32 %v842_v36, %v826_v34  ;;  %v2861_v31 = vadd.f32 %v2857_v47, %v2843_v37  ;;  %v881_v24 = vsel %vm880_vm15, %v11802_v14, %v11801_v44  ;;  %v11805_v36 = vld [vmem:[#allocation424_spill] sm:$0xff]  ;;  %v11810_v5 = vld [vmem:[#allocation203_spill] sm:$0xff] }
 0x876   : > { %v9940_v20 = vpop.permute.xlu0 %1771  ;;  %v882_v25 = vsel %vm880_vm15, %v11801_v44, %v11803_v23  ;;  %v2880_v16 = vadd.f32 %v2876_v60, %v2862_v55  ;;  %v2893_v9 = vsel %vm802_vm13, %v11805_v36, %v11804_v48  ;;  %v11808_v34 = vld [vmem:[#allocation64_spill] sm:$0xff]  ;;  %v11813_v60 = vld [vmem:[#allocation311_spill] sm:$0xff]  ;;  %v11814_v44 = vld [vmem:[#allocation429_spill] sm:$0xff] }
 0x877   : > { %v847_v6 = vadd.f32 %v843_v12, %v827_v26  ;;  %v865_v17 = vadd.f32 %v861_v51, %v846_v11  ;;  %v11806_v12 = vld [vmem:[#allocation62_spill] sm:$0xff]  ;;  %v900_v26 = vsel %vm880_vm15, %v11808_v34, %v11807_v56  ;;  %v11809_v11 = vld [vmem:[#allocation69_spill] sm:$0xff]  ;;  %v2911_v51 = vsel %vm802_vm13, %v11811_v53, %v11810_v5  ;;  %v11812_v33 = vld [vmem:[#allocation200_spill] sm:$0xff] }
 0x878   : > { %v1494_v10 = vpop.permute.xlu1 %1493  ;;  %v2894_v37 = vsel %vm802_vm13, %v11804_v48, %v11806_v12  ;;  %v2929_v14 = vsel %vm841_vm14, %v11814_v44, %v11813_v60  ;;  %v11816_v34 = vld [vmem:[#allocation205_spill] sm:$0xff] }
 0x879   : > { %v866_v1 = vadd.f32 %v862_v61, %v847_v6  ;;  %v885_v54 = vadd.f32 %v881_v24, %v865_v17  ;;  %v2898_v52 = vadd.f32 %v2894_v37, %v2880_v16  ;;  %v901_v6 = vsel %vm880_vm15, %v11807_v56, %v11809_v11  ;;  %v11815_v24 = vld [vmem:[#allocation68_spill] sm:$0xff]  ;;  %v5002_v16 = vld [vmem:[%s10220_s4] sm:$0x7f] }
 0x87a   : > { %v3791_v18 = vpop.permute.xlu0 %3790  ;;  %v2912_v61 = vsel %vm802_vm13, %v11810_v5, %v11812_v33  ;;  %v2930_v23 = vsel %vm841_vm14, %v11813_v60, %v11815_v24  ;;  %v11819_v33 = vld [vmem:[#allocation102_spill] sm:$0xff] }
 0x87b   : > { %v9967_v4 = vsel %vm1777_vm0, %v3789_v13, %v3791_v18  ;;  %v9970_v27 = vsel %vm1777_vm0, %v3791_v18, %v3793_v28  ;;  %v11799_v28 = vld [vmem:[#allocation194_spill] sm:$0xff]  ;;  %v886_v18 = vadd.f32 %v882_v25, %v866_v1  ;;  %v5001_v1 = vld [vmem:[%s10220_s4 + $0x8] sm:$0x7f] }
 0x87c   : > { %v9972_v21 = vpop.permute.xlu1 %2070  ;;  %v2875_v13 = vsel %vm763_vm12, %v11799_v28, %v11798_v8  ;;  %v2916_v28 = vadd.f32 %v2912_v61, %v2898_v52  ;;  %v11820_v61 = vld [vmem:[#allocation439_spill] sm:$0xff] }
 0x87d   : > { %v2879_v41 = vadd.f32 %v2875_v13, %v2861_v31  ;;  %v904_v31 = vadd.f32 %v900_v26, %v885_v54  ;;  %v905_v55 = vadd.f32 %v901_v6, %v886_v18  ;;  %v11817_v26 = vld [vmem:[#allocation202_spill] sm:$0xff]  ;;  %v11818_v6 = vld [vmem:[#allocation204_spill] sm:$0xff] }
 0x87e   : > { %v1199_v57 = vpop.permute.xlu0 %1198  ;;  %v2947_v11 = vsel %vm841_vm14, %v11817_v26, %v11816_v34 }
 0x87f   : > { %v2897_v59 = vadd.f32 %v2893_v9, %v2879_v41  ;;  %v907_v41 = vmul.f32 %v5001_v1, %v905_v55  ;;  %v906_v48 = vmul.f32 %v5002_v16, %v904_v31  ;;  %v2934_v9 = vadd.f32 %v2930_v23, %v2916_v28 }
 0x880   : > { %v9992_v39 = vpop.permute.xlu1 %2662  ;;  %v2948_v31 = vsel %vm841_vm14, %v11816_v34, %v11818_v6 }
 0x881   : > { %v2915_v8 = vadd.f32 %v2911_v51, %v2897_v59  ;;  %v2952_v5 = vadd.f32 %v2948_v31, %v2934_v9 }
 0x882   : > { %v2367_v15 = vpop.permute.xlu0 %2366 }
 0x883   : > { %v2933_v36 = vadd.f32 %v2929_v14, %v2915_v8  ;;  %v2965_v8 = vsel %vm880_vm15, %v11820_v61, %v11819_v33 }
 0x884   : > { %v10000_v47 = vpop.permute.xlu1 %3255 }
 0x885   : > { %v2951_v55 = vadd.f32 %v2947_v11, %v2933_v36 }
 0x886   : > { %v10002_v22 = vpop.permute.xlu0 %3525 }
 0x887   : > { %v2969_v23 = vadd.f32 %v2965_v8, %v2951_v55 }
 0x888   : > { %v1197_v13 = vpop.permute.xlu1 %1196 }
 0x889   : > { %v1202_v25 = vsel %vm1200_vm1, %v1197_v13, %v1199_v57 }
 0x88a   : > { %v1195_v45 = vpop.permute.xlu0 %1194  ;;  %v1206_v12 = vadd.f32 %v1202_v25, %v907_v41 }
 0x88b   : > { %v1201_v17 = vsel %vm1200_vm1, %v1195_v45, %v1197_v13  ;;  %v1779_v13 = vsel %vm1777_vm0, %v9918_v50, %v9920_v2  ;;  %v1778_v45 = vsel %vm1777_vm0, %v9940_v20, %v9918_v50  ;;  %v11822_v50 = vld [vmem:[#allocation207_spill] sm:$0xff]  ;;  %v11823_v20 = vld [vmem:[#allocation206_spill] sm:$0xff] }
 0x88c   : > { %v1205_v37 = vadd.f32 %v1201_v17, %v906_v48  ;;  %v1490_v54 = vpop.permute.xlu1 %1489 }
 0x88e   : > { %v1492_v18 = vpop.permute.xlu0 %1491 }
 0x88f   : > { %v1496_v57 = vsel %vm1495_vm2, %v1490_v54, %v1492_v18  ;;  %v1497_v59 = vsel %vm1495_vm2, %v1492_v18, %v1494_v10  ;;  %v11821_v10 = vld [vmem:[#allocation443_spill] sm:$0xff] }
 0x890   : > { %v1500_v52 = vadd.f32 %v1496_v57, %v1205_v37  ;;  %v1501_v56 = vadd.f32 %v1497_v59, %v1206_v12  ;;  %v2966_v28 = vsel %vm880_vm15, %v11819_v33, %v11821_v10  ;;  %v2983_v12 = vsel %vm880_vm15, %v11823_v20, %v11822_v50  ;;  %v11824_v37 = vld [vmem:[#allocation208_spill] sm:$0xff] }
 0x891   : > { %v2067_v53 = vpop.permute.xlu1 %2066  ;;  %v2970_v25 = vadd.f32 %v2966_v28, %v2952_v5  ;;  %v2984_v54 = vsel %vm880_vm15, %v11822_v50, %v11824_v37 }
 0x892   : > { %v2069_v51 = vpop.permute.xlu0 %2068  ;;  %v1782_v60 = vadd.f32 %v1778_v45, %v1500_v52  ;;  %v1783_v44 = vadd.f32 %v1779_v13, %v1501_v56 }
 0x893   : > { %v2073_v14 = vsel %vm2072_vm3, %v2067_v53, %v2069_v51  ;;  %v2074_v24 = vsel %vm2072_vm3, %v2069_v51, %v9972_v21  ;;  %v2987_v21 = vadd.f32 %v2983_v12, %v2969_v23  ;;  %v2988_v18 = vadd.f32 %v2984_v54, %v2970_v25 }
 0x894   : > { %v2077_v36 = vadd.f32 %v2073_v14, %v1782_v60  ;;  %v2078_v9 = vadd.f32 %v2074_v24, %v1783_v44 }
 0x895   : > { %v2365_v17 = vpop.permute.xlu1 %2364  ;;  %v2989_v5 = vmul.f32 %v5002_v16, %v2987_v21  ;;  %v2990_v53 = vmul.f32 %v5001_v1, %v2988_v18 }
 0x896   : > { %v2363_v41 = vpop.permute.xlu0 %2362  ;;  %v2370_v48 = vsel %vm2368_vm4, %v2365_v17, %v2367_v15 }
 0x897   : > { %v2369_v2 = vsel %vm2368_vm4, %v2363_v41, %v2365_v17  ;;  %v2374_v57 = vadd.f32 %v2370_v48, %v2078_v9 }
 0x898   : > { %v2373_v59 = vadd.f32 %v2369_v2, %v2077_v36 }
 0x899   : > { %v2659_v52 = vpop.permute.xlu1 %2658 }
 0x89a   : > { %v2661_v56 = vpop.permute.xlu0 %2660 }
 0x89b   : > { %v2665_v15 = vsel %vm2664_vm5, %v2659_v52, %v2661_v56  ;;  %v2666_v34 = vsel %vm2664_vm5, %v2661_v56, %v9992_v39 }
 0x89c   : > { %v2669_v26 = vadd.f32 %v2665_v15, %v2373_v59  ;;  %v2670_v11 = vadd.f32 %v2666_v34, %v2374_v57 }
 0x89d   : > { %v3252_v55 = vpop.permute.xlu1 %3251 }
 0x89e   : > { %v4854_v6 = vmul.f32 -1.442695, %v2669_v26  ;;  %v4855_v31 = vmul.f32 -1.442695, %v2670_v11  ;;  %v3254_v51 = vpop.permute.xlu0 %3253 }
 0x89f   : > { %v3257_v33 = vsel %vm1200_vm1, %v3252_v55, %v3254_v51  ;;  %v3258_v61 = vsel %vm1200_vm1, %v3254_v51, %v10000_v47 }
 0x8a0   : > { %4985 = vpow2.f32 %v4854_v6  ;;  %v3261_v8 = vadd.f32 %v3257_v33, %v2989_v5  ;;  %v3262_v10 = vadd.f32 %v3258_v61, %v2990_v53  ;;  %v11826_v5 = vld [vmem:[#allocation27_spill] sm:$0xff]  ;;  %v11828_v33 = vld [vmem:[#allocation28_spill] sm:$0xff] }
 0x8a1   : > { %4987 = vpow2.f32 %v4855_v31  ;;  %v3524_v28 = vpop.permute.xlu1 %3523 }
 0x8a2   : > { %v3522_v13 = vpop.permute.xlu0 %3521  ;;  %v3528_v39 = vsel %vm1495_vm2, %v3524_v28, %v10002_v22 }
 0x8a3   : > { %v3527_v45 = vsel %vm1495_vm2, %v3522_v13, %v3524_v28  ;;  %v3532_v60 = vadd.f32 %v3528_v39, %v3262_v10 }
 0x8a4   : > { %v3531_v16 = vadd.f32 %v3527_v45, %v3261_v8  ;;  %v11829_v8 = vld [vmem:[#allocation26_spill] sm:$0xff] }
 0x8a5   : > { %v4023_v1 = vpop.permute.xlu1 %4022  ;;  %v10081_v9 = vadd.f32 %v9970_v27, %v3532_v60 }
 0x8a6   : > { %v4269_v44 = vpop.permute.xlu0 %4268  ;;  %v4025_v14 = vsel %vm880_vm15, %v9897_v30, %v4023_v1  ;;  %v10078_v22 = vadd.f32 %v9967_v4, %v3531_v16  ;;  %v2683_v30 = vlaneseq  ;;  %v4031_v4 = vadd.f32 %v4023_v1, %v9835_v19 }
 0x8a7   : > { %v4030_v47 = vadd.f32 %v4025_v14, %v9841_v42 }
 0x8a8   : > { %v2684_v20 = vshrl.u32 %v2683_v30, 7 }
 0x8a9   : > { %v4271_v24 = vpop.permute.xlu1 %4270 }
 0x8aa   : > { %v4273_v23 = vpop.permute.xlu0 %4272  ;;  %v10089_v59 = vsub.s32 0, %v2684_v20  ;;  %v4274_v28 = vsel %vm841_vm14, %v4269_v44, %v4271_v24 }
 0x8ab   : > { %v4279_v60 = vadd.f32 %v4274_v28, %v9861_v3  ;;  %v4275_v16 = vsel %vm841_vm14, %v4271_v24, %v4273_v23 }
 0x8ad   : > { %v4986_v25 = vpop.eup %4985  ;;  %v10073_v48 = vpop.permute.xlu1 %4518 }
 0x8ae   : > { %v4988_v17 = vpop.eup %4987  ;;  %v2677_v41 = vadd.f32 1.0, %v4986_v25  ;;  %v10075_v2 = vpop.permute.xlu0 %4520 }
 0x8af   : > { %v2678_v36 = vadd.f32 1.0, %v4988_v17  ;;  %v4524_v24 = vsel %vm841_vm14, %v10073_v48, %v10075_v2 }
 0x8b0   : > { %4989 = vrcp.f32 %v2677_v41  ;;  %v4280_v41 = vadd.f32 %v4275_v16, %v9863_v46 }
 0x8b1   : > { %4991 = vrcp.f32 %v2678_v36  ;;  %v10083_v42 = vpop.permute.xlu1 %4522 }
 0x8b2   : > { %v4039_v50 = vpop.permute.xlu0 %4038  ;;  %v4525_v48 = vsel %vm841_vm14, %v10075_v2, %v10083_v42 }
 0x8b5   : > { %v4041_v12 = vpop.permute.xlu1 %4040 }
 0x8b6   : > { %v4043_v37 = vpop.permute.xlu0 %4042  ;;  %v4044_v54 = vsel %vm880_vm15, %v4039_v50, %v4041_v12 }
 0x8b7   : > { %v4045_v21 = vsel %vm880_vm15, %v4041_v12, %v4043_v37  ;;  %v4049_v18 = vadd.f32 %v4044_v54, %v9910_v0  ;;  %v4051_v52 = vadd.f32 %v4043_v37, %v4031_v4  ;;  %v11825_v0 = vld [vmem:[#allocation16_spill] sm:$0xff] }
 0x8b8   : > { %v4050_v57 = vadd.f32 %v4045_v21, %v4030_v47  ;;  %v4281_v47 = vadd.f32 %v4273_v23, %v9857_v49  ;;  %v4529_v21 = vadd.f32 %v4524_v24, %v9867_v32 }
 0x8b9   : > { %v4052_v27 = vmul.f32 %v4049_v18, %v11690_v38  ;;  %v4289_v15 = vpop.permute.xlu1 %4288  ;;  %v4054_v6 = vmul.f32 %v4051_v52, %v11825_v0 }
 0x8ba   : > { %v4053_v56 = vmul.f32 %v4050_v57, %v11689_v63  ;;  %v4291_v34 = vpop.permute.xlu0 %4290  ;;  %v11827_v63 = vld [vmem:[#allocation25_spill] sm:$0xff] }
 0x8bb   : > { %4058 = vrot.lane.b32.xlu0 %v4052_v27, %s5139_s10  ;;  %v4294_v45 = vsel %vm880_vm15, %v4289_v15, %v4291_v34 }
 0x8bc   : > { %4060 = vrot.lane.b32.xlu1 %v4053_v56, %s5139_s10  ;;  %v4299_v1 = vadd.f32 %v4294_v45, %v4279_v60 }
 0x8bd   : > { %v4990_v26 = vpop.eup %4989  ;;  %v4293_v31 = vpop.permute.xlu1 %4292 }
 0x8be   : > { %v4992_v11 = vpop.eup %4991  ;;  %v2686_v19 = vrot.slane %v4990_v26, %v10089_v59  ;;  %v4539_v55 = vpop.permute.xlu0 %4538  ;;  %v4295_v25 = vsel %vm880_vm15, %v4291_v34, %v4293_v31  ;;  %v4301_v30 = vadd.f32 %v4293_v31, %v4281_v47 }
 0x8bf   : > { %v2690_v38 = vrot.slane %v4992_v11, %v10089_v59  ;;  %4062 = vrot.lane.b32.xlu0 %v4054_v6, %s5139_s10  ;;  %v4300_v50 = vadd.f32 %v4295_v25, %v4280_v41  ;;  %s5142_s10 = smov [#allocation7]  }
 0x8c0   : > { %v2691_v53 = vmul.f32 %v2686_v19, %v11826_v5  ;;  %v2693_v51 = vmul.f32 %v2686_v19, %v11827_v63  ;;  %v11831_v5 = vld [vmem:[#allocation423_spill] sm:$0xff] }
 0x8c1   : > { %v2692_v61 = vmul.f32 %v2690_v38, %v11828_v33  ;;  %v2694_v10 = vmul.f32 %v2690_v38, %v11829_v8  ;;  %v4541_v13 = vpop.permute.xlu1 %4540 }
 0x8c2   : > { %2695 = vst [vmem:[%s10106_s25] sm:$0xff] %v2691_v53  ;;  %2697 = vst [vmem:[%s10106_s25 + $0x10] sm:$0xff] %v2693_v51  ;;  %v4543_v39 = vpop.permute.xlu0 %4542  ;;  %v4544_v54 = vsel %vm841_vm14, %v4539_v55, %v4541_v13 }
 0x8c3   : > { %2696 = vst [vmem:[%s10106_s25 + $0x8] sm:$0xff] %v2692_v61  ;;  %2698 = vst [vmem:[%s10106_s25 + $0x18] sm:$0xff] %v2694_v10  ;;  %v4549_v27 = vadd.f32 %v4544_v54, %v4529_v21  ;;  %v4545_v32 = vsel %vm841_vm14, %v4541_v13, %v4543_v39  ;;  %v11833_v54 = vld [vmem:[#allocation23_spill] sm:$0xff]  ;;  %v11834_v21 = vld [vmem:[#allocation22_spill] sm:$0xff] }
 0x8c5   : > { %v4309_v44 = vpop.permute.xlu1 %4308 }
 0x8c6   : > { %v4311_v14 = vpop.permute.xlu0 %4310 }
 0x8c7   : > { %v4314_v17 = vsel %vm880_vm15, %v4309_v44, %v4311_v14 }
 0x8c8   : > { %v4319_v36 = vadd.f32 %v4314_v17, %v4299_v1 }
 0x8c9   : > { %v4313_v12 = vpop.permute.xlu1 %4312 }
 0x8ca   : > { %v4322_v20 = vmul.f32 %v4319_v36, %v11692_v62  ;;  %v4559_v3 = vpop.permute.xlu0 %4558  ;;  %v4315_v37 = vsel %vm880_vm15, %v4311_v14, %v4313_v12  ;;  %v4321_v49 = vadd.f32 %v4313_v12, %v4301_v30 }
 0x8cb   : > { %v4320_v23 = vadd.f32 %v4315_v37, %v4300_v50 }
 0x8cc   : > { %4328 = vrot.lane.b32.xlu1 %v4322_v20, %s5140_s17  ;;  %v4324_v46 = vmul.f32 %v4321_v49, %v11642_v29  ;;  %v4531_v29 = vadd.f32 %v10083_v42, %v9888_v43  ;;  %v11832_v49 = vld [vmem:[#allocation21_spill] sm:$0xff] }
 0x8cd   : > { %v4323_v62 = vmul.f32 %v4320_v23, %v11693_v40  ;;  %v4561_v4 = vpop.permute.xlu1 %4560  ;;  %v4530_v40 = vadd.f32 %v4525_v48, %v9890_v58 }
 0x8ce   : > { %v4563_v18 = vpop.permute.xlu0 %4562  ;;  %v4564_v57 = vsel %vm880_vm15, %v4559_v3, %v4561_v4  ;;  %v4551_v34 = vadd.f32 %v4543_v39, %v4531_v29 }
 0x8cf   : > { %4330 = vrot.lane.b32.xlu0 %v4323_v62, %s5140_s17  ;;  %v4569_v52 = vadd.f32 %v4564_v57, %v4549_v27  ;;  %v4565_v2 = vsel %vm880_vm15, %v4561_v4, %v4563_v18  ;;  %v4550_v11 = vadd.f32 %v4545_v32, %v4530_v40  ;;  %v11835_v4 = vld [vmem:[#allocation24_spill] sm:$0xff] }
 0x8d0   : > { %4332 = vrot.lane.b32.xlu1 %v4324_v46, %s5140_s17  ;;  %v4571_v0 = vadd.f32 %v4563_v18, %v4551_v34  ;;  %s5050_s17 = sshll.u32 %s5142_s10, 4  ;;  %s5051_s17 = int_to_ptr.vmem [resolvable:$false] %s5050_s17 }
 0x8d1   : > { %v4579_v56 = vpop.permute.xlu1 %4578  ;;  %v4570_v6 = vadd.f32 %v4565_v2, %v4550_v11  ;;  %p5053_p8 = scmp.lt.s32.totalorder %s10167_s14, %s5051_s17 }
 0x8d2   : > { %v4581_v15 = vpop.permute.xlu0 %4580 }
 0x8d3   : > { %v4584_v26 = vsel %vm880_vm15, %v4579_v56, %v4581_v15 }
 0x8d4   : > { %v4589_v19 = vadd.f32 %v4584_v26, %v4569_v52 }
 0x8d5   : > { %v4583_v55 = vpop.permute.xlu1 %4582 }
 0x8d6   : > { %v4592_v31 = vmul.f32 %v4589_v19, %v11704_v35  ;;  %v4585_v43 = vsel %vm880_vm15, %v4581_v15, %v4583_v55  ;;  %v4591_v42 = vadd.f32 %v4583_v55, %v4571_v0 }
 0x8d7   : > { %v4590_v38 = vadd.f32 %v4585_v43, %v4570_v6 }
 0x8d8   : > { %4598 = vrot.lane.b32.xlu0 %v4592_v31, %s5141_s15  ;;  %v4594_v58 = vmul.f32 %v4591_v42, %v11638_v7 }
 0x8d9   : > { %v4593_v53 = vmul.f32 %v4590_v38, %v11831_v5 }
 0x8db   : > { %4600 = vrot.lane.b32.xlu1 %v4593_v53, %s5141_s15 }
 0x8dc   : > { %4602 = vrot.lane.b32.xlu0 %v4594_v58, %s5141_s15  ;;  %s5052_s15 = scalar_lea.vmem %s5051_s17, 2048 }
 0x8dd   : > { %p5054_p9 = scmp.lt.s32.totalorder %s5052_s15, %s5046_s28 }
 0x8df   : > { %p5055_p10 = por %p5054_p9, %p5053_p8 }
 0x8e1   : > { %p5056_p1 = pnand %p5055_p10, %p5049_p7 }
 0x92d   : > { %v4059_v63 = vpop.permute.xlu0 %4058 }
 0x92e   : > { %v4061_v51 = vpop.permute.xlu1 %4060 }
 0x92f   : > { %v4064_v10 = vsel %vm2072_vm3, %v4059_v63, %v4061_v51 }
 0x930   : > { %v4068_v45 = vadd.f32 %v4064_v10, %v10078_v22 }
 0x931   : > { %v4063_v33 = vpop.permute.xlu0 %4062 }
 0x932   : > { %v4065_v28 = vsel %vm2072_vm3, %v4061_v51, %v4063_v33 }
 0x933   : > { %v4069_v60 = vadd.f32 %v4065_v28, %v10081_v9 }
 0x93e   : > { %v4329_v61 = vpop.permute.xlu1 %4328 }
 0x941   : > { %v4331_v35 = vpop.permute.xlu0 %4330 }
 0x942   : > { %v4333_v8 = vpop.permute.xlu1 %4332  ;;  %v4334_v39 = vsel %vm2368_vm4, %v4329_v61, %v4331_v35 }
 0x943   : > { %v4335_v7 = vsel %vm2368_vm4, %v4331_v35, %v4333_v8  ;;  %v4338_v16 = vadd.f32 %v4334_v39, %v4068_v45 }
 0x944   : > { %v4339_v1 = vadd.f32 %v4335_v7, %v4069_v60 }
 0x94a   : > { %v4599_v13 = vpop.permute.xlu0 %4598 }
 0x94d   : > { %v4601_v44 = vpop.permute.xlu1 %4600 }
 0x94e   : > { %v4603_v14 = vpop.permute.xlu0 %4602  ;;  %v4604_v47 = vsel %vm2664_vm5, %v4599_v13, %v4601_v44 }
 0x94f   : > { %v4605_v25 = vsel %vm2664_vm5, %v4601_v44, %v4603_v14  ;;  %v4608_v17 = vadd.f32 %v4604_v47, %v4338_v16 }
 0x950   : > { %v4609_v41 = vadd.f32 %v4605_v25, %v4339_v1 }
 0x951   : > { %v4856_v36 = vmul.f32 -1.442695, %v4608_v17 }
 0x952   : > { %v4857_v30 = vmul.f32 -1.442695, %v4609_v41 }
 0x953   : > { %4993 = vpow2.f32 %v4856_v36 }
 0x954   : > { %4995 = vpow2.f32 %v4857_v30 }
 0x960   : > { %v4994_v50 = vpop.eup %4993 }
 0x961   : > { %v4996_v22 = vpop.eup %4995  ;;  %v4616_v20 = vadd.f32 1.0, %v4994_v50 }
 0x962   : > { %v4617_v9 = vadd.f32 1.0, %v4996_v22 }
 0x963   : > { %4997 = vrcp.f32 %v4616_v20 }
 0x964   : > { %4999 = vrcp.f32 %v4617_v9 }
 0x970   : > { %v4998_v12 = vpop.eup %4997 }
 0x971   : > { %v5000_v3 = vpop.eup %4999  ;;  %v4625_v24 = vrot.slane %v4998_v12, %v10089_v59 }
 0x972   : > { %v4629_v37 = vrot.slane %v5000_v3, %v10089_v59 }
 0x973   : > { %v4630_v23 = vmul.f32 %v4625_v24, %v11832_v49  ;;  %v4632_v46 = vmul.f32 %v4625_v24, %v11833_v54 }
 0x974   : > { %v4631_v62 = vmul.f32 %v4629_v37, %v11834_v21  ;;  %v4633_v18 = vmul.f32 %v4629_v37, %v11835_v4 }
 0x975   : > { %4858 = vst [vmem:[%s10106_s25 + $0x20] sm:$0xff] %v4630_v23  ;;  %4860 = vst [vmem:[%s10106_s25 + $0x30] sm:$0xff] %v4632_v46 }
 0x976   : > { %4859 = vst [vmem:[%s10106_s25 + $0x28] sm:$0xff] %v4631_v62  ;;  %4861 = vst [vmem:[%s10106_s25 + $0x38] sm:$0xff] %v4633_v18 }
 0x977   : > { %5059 = shalt.err (!%p5056_p1)
}
 0x978   : > { %s5060_s7 = scalar_lea.hbm %s10165_s23, 1024  ;;  %s5064_s16 = scalar_lea.hbm %s10221_s5, 2048 }
 0x979   : > { %p5061_p4 = scmp.ne.s32.totalorder %s10165_s23, %s5060_s7  ;;  %p5065_p6 = scmp.lt.s32.totalorder %s10165_s23, %s10221_s5 }
 0x97a   : > { %p5066_p13 = scmp.lt.s32.totalorder %s5064_s16, %s5060_s7 }
 0x97b   : > { %p5062_p11 = pnand %p5061_p4, %p11836_p0 }
 0x97c   : > { %p5067_p3 = por %p5066_p13, %p5065_p6 }
 0x97d   : > { %p5063_p5 = pneg %p5062_p11 }
 0x97f   : > { %p5068_p12 = pnand %p5067_p3, %p5063_p5 }
 0x981   : > { %5071 = shalt.err (!%p5068_p12)
}
 0x982   : > { %s5143_s9 = smov 256   ;;  %s5144_s12 = smov 16  }
 0x983   : > { %4896 = dma.vmem_to_hbm [thread:$0]  (%p11836_p0), %s10167_s14, 1024, %s10165_s23, %s4640_s22, %s5143_s9, %s5143_s9, %s5144_s12  }
 0x984 PF: > { %s4669_s26 = sand.u32 1, %s5102_s18   ;;  %p11837_p2 = scmp.ne.s32.totalorder %s10561_s6, 0 }
 0x985   : > { %p11838_p7 = scmp.ge.s32.totalorder %s5114_s21, 2  ;;  %s4670_s28 = scalar_lea.sflag [#allocation4], %s4669_s26 }
 0x987   : > { %p4907_p8 = pnand %p11838_p7, %p11837_p2 }
 0x989   : > { %p4908_p9 = pneg %p4907_p8 }
 0x98b   : > { %5097 = dma.done.wait (%p4908_p9), %s4670_s28, 1024  }
 0x98c   : > { %5099 = vsyncadd (%p4908_p9), %s4670_s28, 4294966272  ;;  %p19_p10 = scmp.ge.s32.totalorder %s5200_s24, 4   ;;  %s11839_s18 = smov %s5106_s19 }
 0x98d   : > { %s11840_s19 = smov %s5110_s20  ;;  %s11841_s20 = smov %s5212_s27 }
 0x98e   : > { %s11842_s21 = smov %s5200_s24  ;;  %21 = sbr.rel (!%p19_p10) target bundleno = 6 (0x6), region = 91 }
 0x993   :  { %4675 = vsyncpa [#allocation3], 1 }
 0x994   :  { %4677 = vsyncpa [#allocation3 + $0x1], 1 }
 0x995   :  { %4678 = vsyncpa [#allocation4], 1 }
 0x996   :  { %4680 = vsyncpa [#allocation4 + $0x1], 1 }
 0x997   :  { %4681 = vsyncpa [#allocation5], 1 }
 0x998   :  { %4683 = vsyncpa [#allocation5 + $0x1], 1 }

</bundles_post_ra>
